<compile_context>
chip_gen: v6e
topology: v6e:2x2x1
jax: 0.10.0
libtpu: 0.0.40
codegen_flags: <defaults>
</compile_context>

<pallas_src>
import functools

import numpy as np
import jax
import jax.numpy as jnp
from jax.experimental import pallas as pl
from jax.experimental.pallas import tpu as pltpu


# ----------------------------------------------------------------------------
# Glue: window-size adjustment, shift mask, relative position bias (plain JAX /
# numpy — setup / index computations, not the hot path).
# ----------------------------------------------------------------------------
def adjust_window_and_shift_sizes(patch_grid_hw, target_window_size_hw):
    patch_h, patch_w = patch_grid_hw
    targ_h, targ_w = target_window_size_hw
    win_h = min(targ_h, patch_h)
    win_w = min(targ_w, patch_w)
    if patch_h % win_h != 0:
        h_divisors = [d for d in range(win_h // 2, 2 * win_h) if patch_h % d == 0]
        win_h = min(h_divisors, key=lambda d: abs(patch_h - d))
    if patch_w % win_w != 0:
        w_divisors = [d for d in range(win_w // 2, 2 * win_w) if patch_w % d == 0]
        win_w = min(w_divisors, key=lambda d: abs(patch_w - d))
    targ_sh, targ_sw = win_h // 2, win_w // 2
    shift_h = 0 if patch_h <= win_h else targ_sh
    shift_w = 0 if patch_w <= win_w else targ_sw
    return (win_h, win_w), (shift_h, shift_w)


def make_shift_mask_np(patch_grid_hw, window_size_hw, shift_hw):
    """Returns (num_windows, win_area, win_area) mask of 0 / -100 entries."""
    H, W = patch_grid_hw
    wh, ww = window_size_hw
    sh, sw = shift_hw
    img = np.zeros((H, W), np.float32)
    cnt = 0
    h_slices = [slice(0, -wh), slice(-wh, -sh), slice(-sh, None)]
    w_slices = [slice(0, -ww), slice(-ww, -sw), slice(-sw, None)]
    for hs in h_slices:
        for ws_ in w_slices:
            img[hs, ws_] = cnt
            cnt += 1
    ny, nx = H // wh, W // ww
    mw = img.reshape(ny, wh, nx, ww).transpose(0, 2, 1, 3).reshape(-1, wh * ww)
    am = mw[:, None, :] - mw[:, :, None]          # [n, i, j] = mw[n, j] - mw[n, i]
    am = np.where(am != 0, -100.0, 0.0).astype(np.float32)
    return am


# TODO(synk): RelativePositionEncoding class definition was not provided; this
# implements the canonical SwinV2 continuous-position-bias MLP (log-spaced coords
# -> MLP -> 16*sigmoid), computed once outside the kernel.
def compute_relpos_bias(params, win_hw, num_heads, pretrained_window_hw=None):
    win_h, win_w = win_hw
    Nw = win_h * win_w
    rh = np.arange(-(win_h - 1), win_h, dtype=np.float32)
    rw = np.arange(-(win_w - 1), win_w, dtype=np.float32)
    table = np.stack(np.meshgrid(rh, rw, indexing="ij"), axis=-1)  # (2h-1, 2w-1, 2)
    if pretrained_window_hw is not None:
        den_h = max(pretrained_window_hw[0] - 1, 1)
        den_w = max(pretrained_window_hw[1] - 1, 1)
    else:
        den_h = max(win_h - 1, 1)
        den_w = max(win_w - 1, 1)
    table[..., 0] /= den_h
    table[..., 1] /= den_w
    table *= 8.0
    table = np.sign(table) * np.log2(np.abs(table) + 1.0) / np.log2(8.0)

    coords = np.stack(np.meshgrid(np.arange(win_h), np.arange(win_w), indexing="ij"))
    coords_flat = coords.reshape(2, -1)
    rel = (coords_flat[:, :, None] - coords_flat[:, None, :]).transpose(1, 2, 0)
    rel = rel.astype(np.int64)
    rel[..., 0] += win_h - 1
    rel[..., 1] += win_w - 1
    rel[..., 0] *= 2 * win_w - 1
    idx = rel.sum(-1).reshape(-1)

    t = jnp.asarray(table.reshape(-1, 2))
    h = jax.nn.relu(t @ params["cpb_w1"] + params["cpb_b1"])
    b = 16.0 * jax.nn.sigmoid(h @ params["cpb_w2"])               # (T, heads)
    bias = b[jnp.asarray(idx)].reshape(Nw, Nw, num_heads).transpose(2, 0, 1)
    return bias.astype(jnp.float32)                               # (heads, Nw, Nw)


def _vmem_limit_bytes():
    # Generation-aware scoped-VMEM budget: ~75% of physical, capped at 100 MiB
    # (v5e/v6e: 128 MiB physical -> 96 MiB; v7x: 64 MiB physical -> 48 MiB).
    try:
        cap = int(getattr(pltpu.get_tpu_info(), "vmem_capacity_bytes",
                          64 * 1024 * 1024))
    except Exception:
        cap = 64 * 1024 * 1024
    return min(cap * 3 // 4, 100 * 1024 * 1024)


def _choose_window_batch(num_windows, win_area, num_total_windows,
                         per_window_bytes, fixed_bytes, vmem_budget,
                         target_rows=512):
    """Pick how many windows (wb) to process per grid step.

    wb must divide num_windows (so the shift-mask block index is a plain modulo;
    it then also divides P = B*num_windows).  Grow wb until either the rows
    target is met or the VMEM budget is hit; keep >= 2 grid steps, and prefer an
    even grid so both v7x TensorCores stay busy (no effect on 1-TC v5e/v6e).
    """
    best, best_even = 1, None
    for d in range(1, num_windows + 1):
        if num_windows % d:
            continue
        grid = num_total_windows // d
        if d > 1 and grid < 2:
            break
        if d > 1 and fixed_bytes + d * per_window_bytes > vmem_budget:
            break
        best = d
        if grid % 2 == 0:
            best_even = d
        if d * win_area >= target_rows:
            break
    if best_even is not None and 2 * best_even >= best:
        return best_even
    return best


# ----------------------------------------------------------------------------
# Pallas kernel: a batch of `wb` windows of multi-head cosine attention + proj.
# ----------------------------------------------------------------------------
def _window_attn_kernel(*refs, num_heads, head_dim, wb, nw, has_mask):
    if has_mask:
        (x_ref, wqkv_ref, qb_ref, vb_ref, ls_ref, relb_ref, mask_ref,
         wproj_ref, bproj_ref, out_ref, qkv_s, heads_s) = refs
    else:
        (x_ref, wqkv_ref, qb_ref, vb_ref, ls_ref, relb_ref,
         wproj_ref, bproj_ref, out_ref, qkv_s, heads_s) = refs
        mask_ref = None

    C = num_heads * head_dim
    rows = wb * nw

    # x arrives in f32 and is cast to bf16 in-register (no separate HBM convert).
    # (wb, Nw, C) -> (rows, C): relayout-free merge since Nw % 8 == 0.
    x = x_ref[...].reshape(rows, C).astype(jnp.bfloat16)

    # One big QKV matmul on the MXU (bf16 x bf16 -> f32); park the wide result
    # in a bf16 VMEM scratch so it is not live in f32 vregs across the head loop.
    qkv_s[...] = jnp.dot(x, wqkv_ref[...],
                         preferred_element_type=jnp.float32).astype(jnp.bfloat16)

    qb = qb_ref[...]                         # (heads, hd)     f32
    vb = vb_ref[...]
    ls = ls_ref[...]                         # (heads, 1)      f32
    relb = relb_ref[...]                     # (heads, Nw, Nw) f32
    mask = mask_ref[...] if has_mask else None   # (wb, Nw, Nw) f32

    # NOTE: a Python loop is fine for the usual 2-8 Swin heads; switch to
    # lax.fori_loop(..., unroll=True) to bound live ranges for large head counts.
    for h in range(num_heads):
        s = h * head_dim
        qh = qkv_s[:, s:s + head_dim].astype(jnp.float32) + qb[h]
        kh = qkv_s[:, C + s:C + s + head_dim].astype(jnp.float32)
        vh = (qkv_s[:, 2 * C + s:2 * C + s + head_dim].astype(jnp.float32)
              + vb[h]).astype(jnp.bfloat16)

        # F.normalize(dim=-1): x * rsqrt(max(||x||^2, 1e-24)).  The (raw, un-clamped)
        # logit_scale is folded into the q normalization multiply so it costs nothing,
        # and qn/kn are cast to bf16 so QK^T is a native bf16 MXU matmul.
        q_scale = ls[h, 0] * jax.lax.rsqrt(
            jnp.maximum(jnp.sum(qh * qh, -1, keepdims=True), 1e-24))
        k_scale = jax.lax.rsqrt(
            jnp.maximum(jnp.sum(kh * kh, -1, keepdims=True), 1e-24))
        qn = (qh * q_scale).astype(jnp.bfloat16).reshape(wb, nw, head_dim)
        kn = (kh * k_scale).astype(jnp.bfloat16).reshape(wb, nw, head_dim)
        vh = vh.reshape(wb, nw, head_dim)

        # Per-window cosine attention, windows batched along dim 0 (f32 logits).
        # TODO(synk): for very small Nw on v6e/v7x a block-diagonal dense (rows x rows)
        # formulation could better fill the 256-wide MXU; not implemented here.
        attn = jnp.einsum("bnd,bmd->bnm", qn, kn,
                          preferred_element_type=jnp.float32)      # (wb, Nw, Nw)
        attn = attn + relb[h][None]
        if has_mask:
            attn = attn + mask

        attn = attn - jnp.max(attn, axis=-1, keepdims=True)
        p = jnp.exp(attn)
        p = p * pl.reciprocal(jnp.sum(p, axis=-1, keepdims=True), approx=True)

        head_out = jnp.einsum("bnm,bmd->bnd", p.astype(jnp.bfloat16), vh,
                              preferred_element_type=jnp.float32)  # (wb, Nw, hd)

        # Park the head output at its lane offset; the output projection then runs
        # as ONE (rows, C) x (C, C) matmul with full contraction depth (no per-head
        # K=head_dim matmuls, no per-head f32 (rows, C) add chain).
        heads_s[:, s:s + head_dim] = (
            head_out.reshape(rows, head_dim).astype(jnp.bfloat16))

    out = jnp.dot(heads_s[...], wproj_ref[...],
                  preferred_element_type=jnp.float32) + bproj_ref[...]
    out_ref[...] = out.reshape(wb, nw, C).astype(out_ref.dtype)


def _build_attention_call(P, Nw, C, num_heads, hd, wb, has_mask, n_mask_blocks,
                          single_buffer_invariants):
    rows = wb * Nw
    # Grid-invariant operands: request single buffering so large wqkv/wproj and the
    # rel-pos bias are not double-buffered in VMEM.
    inv = ({"pipeline_mode": pl.Buffered(1)} if single_buffer_invariants else {})

    in_specs = [
        pl.BlockSpec((wb, Nw, C), lambda g: (g, 0, 0)),                 # x (f32)
        pl.BlockSpec((C, 3 * C), lambda g: (0, 0), **inv),              # wqkv (bf16)
        pl.BlockSpec((num_heads, hd), lambda g: (0, 0), **inv),         # q_bias
        pl.BlockSpec((num_heads, hd), lambda g: (0, 0), **inv),         # v_bias
        pl.BlockSpec((num_heads, 1), lambda g: (0, 0), **inv),          # logit_scale
        pl.BlockSpec((num_heads, Nw, Nw), lambda g: (0, 0, 0), **inv),  # rel-pos bias
    ]
    if has_mask:
        in_specs.append(
            pl.BlockSpec((wb, Nw, Nw), lambda g: (g % n_mask_blocks, 0, 0)))  # shift mask
    in_specs += [
        pl.BlockSpec((C, C), lambda g: (0, 0), **inv),                  # wproj (bf16)
        pl.BlockSpec((1, C), lambda g: (0, 0), **inv),                  # bproj
    ]

    kernel = functools.partial(_window_attn_kernel, num_heads=num_heads,
                               head_dim=hd, wb=wb, nw=Nw, has_mask=has_mask)
    return pl.pallas_call(
        kernel,
        # bf16 writeback: ~1/3 less HBM traffic in the mem-bound (small C) regime.
        out_shape=jax.ShapeDtypeStruct((P, Nw, C), jnp.bfloat16),
        grid_spec=pltpu.PrefetchScalarGridSpec(
            num_scalar_prefetch=0,
            grid=(P // wb,),
            in_specs=in_specs,
            out_specs=pl.BlockSpec((wb, Nw, C), lambda g: (g, 0, 0)),
            scratch_shapes=[pltpu.VMEM((rows, 3 * C), jnp.bfloat16),    # qkv slab
                            pltpu.VMEM((rows, C), jnp.bfloat16)],       # head outputs
        ),
        compiler_params=pltpu.CompilerParams(
            dimension_semantics=("parallel",),
            vmem_limit_bytes=_vmem_limit_bytes(),
        ),
    )


def pallas_window_attention(x, rel_bias, shift_mask, num_windows, params, num_heads):
    P, Nw, C = x.shape
    hd = C // num_heads
    assert C == num_heads * hd
    assert P % num_windows == 0
    # TODO(synk): Nw not a multiple of 8 (e.g. 7x7 windows) needs sublane padding +
    # key masking before the kernel; asserted here instead of silently relayouting.
    assert Nw % 8 == 0, "window area must be a multiple of 8 sublanes"

    has_mask = shift_mask is not None

    # Weights to bf16 once (grid-invariant); x stays f32 and is cast in-kernel so
    # no un-fused HBM convert of the activations is introduced at the boundary.
    wqkv_bf = params["wqkv"].astype(jnp.bfloat16)
    wproj_bf = params["wproj"].astype(jnp.bfloat16)

    vmem_limit = _vmem_limit_bytes()
    # Per-window VMEM estimate: double-buffered x(f32)/out(bf16)/mask(f32) + scratches.
    per_window = Nw * C * (4 * 2 + 2 * 2 + 3 * 2 + 2) + (8 * Nw * Nw if has_mask else 0)
    # Fixed operands (counted double-buffered to stay safe even if Buffered(1) is ignored).
    fixed = 2 * (C * 3 * C * 2 + C * C * 2 + num_heads * Nw * Nw * 4) + 64 * 1024
    wb = _choose_window_batch(num_windows, Nw, P, per_window, fixed,
                              int(vmem_limit * 0.6))
    assert num_windows % wb == 0 and P % wb == 0, "window batch must divide nW and P"
    n_mask_blocks = num_windows // wb

    args = [x, wqkv_bf, params["q_bias"], params["v_bias"], params["logit_scale"],
            rel_bias]
    if has_mask:
        args.append(shift_mask.astype(jnp.float32))
    args += [wproj_bf, params["bproj"]]

    try:
        f = _build_attention_call(P, Nw, C, num_heads, hd, wb, has_mask,
                                  n_mask_blocks, single_buffer_invariants=True)
        return f(*args)
    except Exception:
        # Fallback: some jax versions reject pl.Buffered(1); identical kernel with
        # default (double-buffered) invariant operands.
        f = _build_attention_call(P, Nw, C, num_heads, hd, wb, has_mask,
                                  n_mask_blocks, single_buffer_invariants=False)
        return f(*args)


# Pure-JAX reference for the same per-window attention (used for verification).
def reference_window_attention(x, rel_bias, shift_mask, num_windows, params, num_heads):
    P, Nw, C = x.shape
    hd = C // num_heads
    HI = jax.lax.Precision.HIGHEST
    qkv = jnp.einsum("pnc,cd->pnd", x, params["wqkv"], precision=HI)
    qkv = qkv.reshape(P, Nw, 3, num_heads, hd).transpose(2, 0, 3, 1, 4)
    q, k, v = qkv[0], qkv[1], qkv[2]
    q = q + params["q_bias"][None, :, None, :]
    v = v + params["v_bias"][None, :, None, :]
    qn = q / jnp.maximum(jnp.linalg.norm(q, axis=-1, keepdims=True), 1e-12)
    kn = k / jnp.maximum(jnp.linalg.norm(k, axis=-1, keepdims=True), 1e-12)
    attn = jnp.einsum("phnd,phmd->phnm", qn, kn, precision=HI)
    attn = attn * params["logit_scale"].reshape(1, num_heads, 1, 1)
    attn = attn + rel_bias[None]
    if shift_mask is not None:
        B = P // num_windows
        attn = attn + jnp.tile(shift_mask, (B, 1, 1))[:, None, :, :]
    w = jax.nn.softmax(attn, axis=-1)
    out = jnp.einsum("phnm,phmd->phnd", w, v, precision=HI)
    out = out.transpose(0, 2, 1, 3).reshape(P, Nw, C)
    out = jnp.einsum("pnc,cd->pnd", out, params["wproj"], precision=HI) + params["bproj"]
    return out


# ----------------------------------------------------------------------------
# Full forward pass (matches WindowAttentionWithRelPos.forward semantics).
# ----------------------------------------------------------------------------
def window_attention_forward(tokens, patch_grid_hw, params, num_heads,
                             target_window_hw, is_shift_block, attn_fn):
    B, N, C = tokens.shape
    H, W = patch_grid_hw
    img = tokens.reshape(B, H, W, C)

    win_hw, shift_hw = adjust_window_and_shift_sizes((H, W), target_window_hw)
    win_h, win_w = win_hw
    shift_h, shift_w = shift_hw
    need_shift = is_shift_block and (shift_h > 0 or shift_w > 0)

    if need_shift:
        img = jnp.roll(img, shift=(-shift_h, -shift_w), axis=(1, 2))

    ny, nx = H // win_h, W // win_w
    nW = ny * nx
    Nw = win_h * win_w
    x = img.reshape(B, ny, win_h, nx, win_w, C).transpose(0, 1, 3, 2, 4, 5)
    x = x.reshape(B * nW, Nw, C)

    rel_bias = compute_relpos_bias(params, win_hw, num_heads)      # (heads, Nw, Nw)
    if need_shift:
        shift_mask = jnp.asarray(make_shift_mask_np((H, W), win_hw, shift_hw))  # (nW,Nw,Nw)
    else:
        shift_mask = None

    win_out = attn_fn(x, rel_bias, shift_mask, nW, params, num_heads)  # (P, Nw, C)

    out = win_out.reshape(B, ny, nx, win_h, win_w, C).transpose(0, 1, 3, 2, 4, 5)
    out = out.reshape(B, H, W, C)
    if need_shift:
        out = jnp.roll(out, shift=(shift_h, shift_w), axis=(1, 2))
    return out.reshape(B, N, C)


# ----------------------------------------------------------------------------
# Deterministic parameter init (synthetic; shapes follow the module __init__).
# ----------------------------------------------------------------------------
def init_params(key, C, num_heads, cpb_hidden=64, scale=0.1):
    hd = C // num_heads
    ks = jax.random.split(key, 7)
    return dict(
        wqkv=jax.random.normal(ks[0], (C, 3 * C), jnp.float32) * scale,       # qkv.weight.T
        q_bias=jax.random.normal(ks[1], (num_heads, hd), jnp.float32) * scale,
        v_bias=jax.random.normal(ks[2], (num_heads, hd), jnp.float32) * scale,
        logit_scale=jnp.log(10.0 * jnp.ones((num_heads, 1), jnp.float32)),
        wproj=jax.random.normal(ks[3], (C, C), jnp.float32) * scale,          # proj.weight.T
        bproj=jax.random.normal(ks[4], (1, C), jnp.float32) * scale,
        cpb_w1=jax.random.normal(ks[5], (2, cpb_hidden), jnp.float32) * scale,
        cpb_b1=jnp.zeros((cpb_hidden,), jnp.float32),
        cpb_w2=jax.random.normal(ks[6], (cpb_hidden, num_heads), jnp.float32) * scale,
    )


if __name__ == "__main__":
    key = jax.random.PRNGKey(0)
    B, H, W, C = 2, 8, 8, 128          # C=128 -> lane-dense (unmasked) output stores
    num_heads = 4
    target_window_hw = (4, 4)          # 8x8 grid -> window (4,4), shift (2,2), 4 windows/img
    N = H * W

    k_tok, k_par = jax.random.split(key)
    tokens = jax.random.normal(k_tok, (B, N, C), jnp.float32)
    params = init_params(k_par, C, num_heads)

    # Exercise both kernel variants: shifted (masked) and unshifted (mask-free).
    for is_shift in (True, False):
        out_pallas = window_attention_forward(
            tokens, (H, W), params, num_heads, target_window_hw,
            is_shift_block=is_shift, attn_fn=pallas_window_attention)
        out_ref = window_attention_forward(
            tokens, (H, W), params, num_heads, target_window_hw,
            is_shift_block=is_shift, attn_fn=reference_window_attention)

        out_pallas = jax.block_until_ready(out_pallas)
        assert out_pallas.shape == (B, N, C)
        # Tolerance accounts for bf16 MXU inputs (QKV/logits/PV/proj) and bf16
        # writeback vs. the f32 reference.
        np.testing.assert_allclose(
            np.asarray(out_pallas.astype(jnp.float32)),
            np.asarray(out_ref).astype(np.float32),
            rtol=5e-2, atol=5e-2)

    print("KERNEL_OK")
</pallas_src>

<mosaic_0001>
module attributes {stable_mosaic.version = 11 : i64} {
  func.func @_window_attn_kernel(%arg0: i32, %arg1: memref<4x16x128xf32, #tpu.memory_space<vmem>>, %arg2: memref<128x384xbf16, #tpu.memory_space<vmem>>, %arg3: memref<4x32xf32, #tpu.memory_space<vmem>>, %arg4: memref<4x32xf32, #tpu.memory_space<vmem>>, %arg5: memref<4x1xf32, #tpu.memory_space<vmem>>, %arg6: memref<4x16x16xf32, #tpu.memory_space<vmem>>, %arg7: memref<4x16x16xf32, #tpu.memory_space<vmem>>, %arg8: memref<128x128xbf16, #tpu.memory_space<vmem>>, %arg9: memref<1x128xf32, #tpu.memory_space<vmem>>, %arg10: memref<4x16x128xbf16, #tpu.memory_space<vmem>>, %arg11: memref<64x384xbf16, #tpu.memory_space<vmem>>, %arg12: memref<64x128xbf16, #tpu.memory_space<vmem>>) attributes {dimension_semantics = [#tpu.dimension_semantics<parallel>], iteration_bounds = array<i64: 2>, scalar_prefetch = 0 : i64, scratch_operands = 2 : i64, tpu.core_type = #tpu.core_type<tc>, window_params = [{transform_indices = @transform_0, window_bounds = array<i64: 4, 16, 128>}, {pipeline_mode = #tpu.pipeline_mode<synchronous>, transform_indices = @transform_1, window_bounds = array<i64: 128, 384>}, {pipeline_mode = #tpu.pipeline_mode<synchronous>, transform_indices = @transform_2, window_bounds = array<i64: 4, 32>}, {pipeline_mode = #tpu.pipeline_mode<synchronous>, transform_indices = @transform_3, window_bounds = array<i64: 4, 32>}, {pipeline_mode = #tpu.pipeline_mode<synchronous>, transform_indices = @transform_4, window_bounds = array<i64: 4, 1>}, {pipeline_mode = #tpu.pipeline_mode<synchronous>, transform_indices = @transform_5, window_bounds = array<i64: 4, 16, 16>}, {transform_indices = @transform_6, window_bounds = array<i64: 4, 16, 16>}, {pipeline_mode = #tpu.pipeline_mode<synchronous>, transform_indices = @transform_7, window_bounds = array<i64: 128, 128>}, {pipeline_mode = #tpu.pipeline_mode<synchronous>, transform_indices = @transform_8, window_bounds = array<i64: 1, 128>}, {transform_indices = @transform_9, window_bounds = array<i64: 4, 16, 128>}]} {
    %c0 = arith.constant 0 : index
    %c0_0 = arith.constant 0 : index
    %c0_1 = arith.constant 0 : index
    %0 = vector.load %arg1[%c0, %c0_0, %c0_1] : memref<4x16x128xf32, #tpu.memory_space<vmem>>, vector<4x16x128xf32>
    %1 = vector.shape_cast %0 : vector<4x16x128xf32> to vector<64x128xf32>
    %2 = arith.truncf %1 : vector<64x128xf32> to vector<64x128xbf16>
    %c0_2 = arith.constant 0 : index
    %c0_3 = arith.constant 0 : index
    %3 = vector.load %arg2[%c0_2, %c0_3] : memref<128x384xbf16, #tpu.memory_space<vmem>>, vector<128x384xbf16>
    %cst = arith.constant dense<0.000000e+00> : vector<64x384xf32>
    %4 = tpu.matmul %2, %3, %cst {dimension_numbers = #tpu.dot_dimension_numbers<[1], [0], [0], [1], [0, 0, 1, 1], [], []>} : vector<64x128xbf16>, vector<128x384xbf16>, vector<64x384xf32> -> vector<64x384xf32>
    %5 = arith.truncf %4 : vector<64x384xf32> to vector<64x384xbf16>
    %c0_4 = arith.constant 0 : index
    %c0_5 = arith.constant 0 : index
    %6 = vector.load %arg11[%c0_4, %c0_5] : memref<64x384xbf16, #tpu.memory_space<vmem>>, vector<64x384xbf16>
    tpu.vector_store %arg11[%c0_4, %c0_5], %5 {strides = array<i32>} : memref<64x384xbf16, #tpu.memory_space<vmem>>, vector<64x384xbf16>,
    %c0_6 = arith.constant 0 : index
    %c0_7 = arith.constant 0 : index
    %7 = vector.load %arg3[%c0_6, %c0_7] : memref<4x32xf32, #tpu.memory_space<vmem>>, vector<4x32xf32>
    %c0_8 = arith.constant 0 : index
    %c0_9 = arith.constant 0 : index
    %8 = vector.load %arg4[%c0_8, %c0_9] : memref<4x32xf32, #tpu.memory_space<vmem>>, vector<4x32xf32>
    %c0_10 = arith.constant 0 : index
    %c0_11 = arith.constant 0 : index
    %9 = vector.load %arg5[%c0_10, %c0_11] : memref<4x1xf32, #tpu.memory_space<vmem>>, vector<4x1xf32>
    %c0_12 = arith.constant 0 : index
    %c0_13 = arith.constant 0 : index
    %c0_14 = arith.constant 0 : index
    %10 = vector.load %arg6[%c0_12, %c0_13, %c0_14] : memref<4x16x16xf32, #tpu.memory_space<vmem>>, vector<4x16x16xf32>
    %c0_15 = arith.constant 0 : index
    %c0_16 = arith.constant 0 : index
    %c0_17 = arith.constant 0 : index
    %11 = vector.load %arg7[%c0_15, %c0_16, %c0_17] : memref<4x16x16xf32, #tpu.memory_space<vmem>>, vector<4x16x16xf32>
    %c0_18 = arith.constant 0 : index
    %c0_19 = arith.constant 0 : index
    %12 = vector.load %arg11[%c0_18, %c0_19] : memref<64x384xbf16, #tpu.memory_space<vmem>>, vector<64x32xbf16>
    %13 = arith.extf %12 : vector<64x32xbf16> to vector<64x32xf32>
    %14 = vector.extract_strided_slice %7 {offsets = [0, 0], sizes = [1, 32], strides = [1, 1]} : vector<4x32xf32> to vector<1x32xf32>
    %15 = vector.shape_cast %14 : vector<1x32xf32> to vector<32xf32>
    %16 = vector.shape_cast %15 : vector<32xf32> to vector<1x32xf32>
    %17 = vector.broadcast %16 : vector<1x32xf32> to vector<64x32xf32>
    %18 = arith.addf %13, %17 : vector<64x32xf32>
    %c0_20 = arith.constant 0 : index
    %c128 = arith.constant 128 : index
    %19 = vector.load %arg11[%c0_20, %c128] : memref<64x384xbf16, #tpu.memory_space<vmem>>, vector<64x32xbf16>
    %20 = arith.extf %19 : vector<64x32xbf16> to vector<64x32xf32>
    %c0_21 = arith.constant 0 : index
    %c256 = arith.constant 256 : index
    %21 = vector.load %arg11[%c0_21, %c256] : memref<64x384xbf16, #tpu.memory_space<vmem>>, vector<64x32xbf16>
    %22 = arith.extf %21 : vector<64x32xbf16> to vector<64x32xf32>
    %23 = vector.extract_strided_slice %8 {offsets = [0, 0], sizes = [1, 32], strides = [1, 1]} : vector<4x32xf32> to vector<1x32xf32>
    %24 = vector.shape_cast %23 : vector<1x32xf32> to vector<32xf32>
    %25 = vector.shape_cast %24 : vector<32xf32> to vector<1x32xf32>
    %26 = vector.broadcast %25 : vector<1x32xf32> to vector<64x32xf32>
    %27 = arith.addf %22, %26 : vector<64x32xf32>
    %28 = arith.truncf %27 : vector<64x32xf32> to vector<64x32xbf16>
    %29 = vector.extract_strided_slice %9 {offsets = [0, 0], sizes = [1, 1], strides = [1, 1]} : vector<4x1xf32> to vector<1x1xf32>
    %30 = vector.extract %29[0, 0] : f32 from vector<1x1xf32>
    %31 = arith.mulf %18, %18 : vector<64x32xf32>
    %cst_22 = arith.constant dense<0.000000e+00> : vector<64xf32>
    %32 = vector.multi_reduction <add>, %31, %cst_22 [1] : vector<64x32xf32> to vector<64xf32>
    %33 = vector.shape_cast %32 : vector<64xf32> to vector<64x1xf32>
    %cst_23 = arith.constant 1.000000e-24 : f32
    %34 = vector.broadcast %cst_23 : f32 to vector<64x1xf32>
    %35 = arith.maximumf %33, %34 : vector<64x1xf32>
    %36 = math.rsqrt %35 : vector<64x1xf32>
    %37 = vector.broadcast %30 : f32 to vector<64x1xf32>
    %38 = arith.mulf %37, %36 : vector<64x1xf32>
    %39 = arith.mulf %20, %20 : vector<64x32xf32>
    %cst_24 = arith.constant dense<0.000000e+00> : vector<64xf32>
    %40 = vector.multi_reduction <add>, %39, %cst_24 [1] : vector<64x32xf32> to vector<64xf32>
    %41 = vector.shape_cast %40 : vector<64xf32> to vector<64x1xf32>
    %cst_25 = arith.constant 1.000000e-24 : f32
    %42 = vector.broadcast %cst_25 : f32 to vector<64x1xf32>
    %43 = arith.maximumf %41, %42 : vector<64x1xf32>
    %44 = math.rsqrt %43 : vector<64x1xf32>
    %45 = vector.broadcast %38 : vector<64x1xf32> to vector<64x32xf32>
    %46 = arith.mulf %18, %45 : vector<64x32xf32>
    %47 = arith.truncf %46 : vector<64x32xf32> to vector<64x32xbf16>
    %48 = vector.shape_cast %47 : vector<64x32xbf16> to vector<4x16x32xbf16>
    %49 = vector.broadcast %44 : vector<64x1xf32> to vector<64x32xf32>
    %50 = arith.mulf %20, %49 : vector<64x32xf32>
    %51 = arith.truncf %50 : vector<64x32xf32> to vector<64x32xbf16>
    %52 = vector.shape_cast %51 : vector<64x32xbf16> to vector<4x16x32xbf16>
    %53 = vector.shape_cast %28 : vector<64x32xbf16> to vector<4x16x32xbf16>
    "tpu.trace_start"() <{level = 10 : i32, message = "bnd,bmd->bnm"}> : () -> ()
    %cst_26 = arith.constant dense<0.000000e+00> : vector<4x16x16xf32>
    %54 = tpu.matmul %48, %52, %cst_26 {dimension_numbers = #tpu.dot_dimension_numbers<[2], [2], [1], [1], [0, 0, 0, 1, 1, 1], [0], [0]>} : vector<4x16x32xbf16>, vector<4x16x32xbf16>, vector<4x16x16xf32> -> vector<4x16x16xf32>
    "tpu.trace_stop"() : () -> ()
    %55 = vector.extract_strided_slice %10 {offsets = [0, 0, 0], sizes = [1, 16, 16], strides = [1, 1, 1]} : vector<4x16x16xf32> to vector<1x16x16xf32>
    %56 = vector.shape_cast %55 : vector<1x16x16xf32> to vector<16x16xf32>
    %57 = vector.shape_cast %56 : vector<16x16xf32> to vector<1x16x16xf32>
    %58 = vector.broadcast %57 : vector<1x16x16xf32> to vector<4x16x16xf32>
    %59 = arith.addf %54, %58 : vector<4x16x16xf32>
    %60 = arith.addf %59, %11 : vector<4x16x16xf32>
    %cst_27 = arith.constant dense<0xFF800000> : vector<4x16xf32>
    %61 = vector.multi_reduction <maximumf>, %60, %cst_27 [2] : vector<4x16x16xf32> to vector<4x16xf32>
    %62 = vector.shape_cast %61 : vector<4x16xf32> to vector<4x16x1xf32>
    %63 = vector.broadcast %62 : vector<4x16x1xf32> to vector<4x16x16xf32>
    %64 = arith.subf %60, %63 : vector<4x16x16xf32>
    %65 = math.exp %64 : vector<4x16x16xf32>
    %cst_28 = arith.constant dense<0.000000e+00> : vector<4x16xf32>
    %66 = vector.multi_reduction <add>, %65, %cst_28 [2] : vector<4x16x16xf32> to vector<4x16xf32>
    %67 = vector.shape_cast %66 : vector<4x16xf32> to vector<4x16x1xf32>
    %68 = tpu.reciprocal %67 {approx = true} : vector<4x16x1xf32> -> vector<4x16x1xf32>
    %69 = vector.broadcast %68 : vector<4x16x1xf32> to vector<4x16x16xf32>
    %70 = arith.mulf %65, %69 : vector<4x16x16xf32>
    %71 = arith.truncf %70 : vector<4x16x16xf32> to vector<4x16x16xbf16>
    "tpu.trace_start"() <{level = 10 : i32, message = "bnm,bmd->bnd"}> : () -> ()
    %cst_29 = arith.constant dense<0.000000e+00> : vector<4x16x32xf32>
    %72 = tpu.matmul %71, %53, %cst_29 {dimension_numbers = #tpu.dot_dimension_numbers<[2], [1], [1], [2], [0, 0, 0, 1, 1, 2], [0], [0]>} : vector<4x16x16xbf16>, vector<4x16x32xbf16>, vector<4x16x32xf32> -> vector<4x16x32xf32>
    "tpu.trace_stop"() : () -> ()
    %73 = vector.shape_cast %72 : vector<4x16x32xf32> to vector<64x32xf32>
    %74 = arith.truncf %73 : vector<64x32xf32> to vector<64x32xbf16>
    %c0_30 = arith.constant 0 : index
    %c0_31 = arith.constant 0 : index
    %75 = vector.load %arg12[%c0_30, %c0_31] : memref<64x128xbf16, #tpu.memory_space<vmem>>, vector<64x32xbf16>
    tpu.vector_store %arg12[%c0_30, %c0_31], %74 {strides = array<i32>} : memref<64x128xbf16, #tpu.memory_space<vmem>>, vector<64x32xbf16>,
    %c0_32 = arith.constant 0 : index
    %c32 = arith.constant 32 : index
    %76 = vector.load %arg11[%c0_32, %c32] : memref<64x384xbf16, #tpu.memory_space<vmem>>, vector<64x32xbf16>
    %77 = arith.extf %76 : vector<64x32xbf16> to vector<64x32xf32>
    %78 = vector.extract_strided_slice %7 {offsets = [1, 0], sizes = [1, 32], strides = [1, 1]} : vector<4x32xf32> to vector<1x32xf32>
    %79 = vector.shape_cast %78 : vector<1x32xf32> to vector<32xf32>
    %80 = vector.shape_cast %79 : vector<32xf32> to vector<1x32xf32>
    %81 = vector.broadcast %80 : vector<1x32xf32> to vector<64x32xf32>
    %82 = arith.addf %77, %81 : vector<64x32xf32>
    %c0_33 = arith.constant 0 : index
    %c160 = arith.constant 160 : index
    %83 = vector.load %arg11[%c0_33, %c160] : memref<64x384xbf16, #tpu.memory_space<vmem>>, vector<64x32xbf16>
    %84 = arith.extf %83 : vector<64x32xbf16> to vector<64x32xf32>
    %c0_34 = arith.constant 0 : index
    %c288 = arith.constant 288 : index
    %85 = vector.load %arg11[%c0_34, %c288] : memref<64x384xbf16, #tpu.memory_space<vmem>>, vector<64x32xbf16>
    %86 = arith.extf %85 : vector<64x32xbf16> to vector<64x32xf32>
    %87 = vector.extract_strided_slice %8 {offsets = [1, 0], sizes = [1, 32], strides = [1, 1]} : vector<4x32xf32> to vector<1x32xf32>
    %88 = vector.shape_cast %87 : vector<1x32xf32> to vector<32xf32>
    %89 = vector.shape_cast %88 : vector<32xf32> to vector<1x32xf32>
    %90 = vector.broadcast %89 : vector<1x32xf32> to vector<64x32xf32>
    %91 = arith.addf %86, %90 : vector<64x32xf32>
    %92 = arith.truncf %91 : vector<64x32xf32> to vector<64x32xbf16>
    %93 = vector.extract_strided_slice %9 {offsets = [1, 0], sizes = [1, 1], strides = [1, 1]} : vector<4x1xf32> to vector<1x1xf32>
    %94 = vector.extract %93[0, 0] : f32 from vector<1x1xf32>
    %95 = arith.mulf %82, %82 : vector<64x32xf32>
    %cst_35 = arith.constant dense<0.000000e+00> : vector<64xf32>
    %96 = vector.multi_reduction <add>, %95, %cst_35 [1] : vector<64x32xf32> to vector<64xf32>
    %97 = vector.shape_cast %96 : vector<64xf32> to vector<64x1xf32>
    %cst_36 = arith.constant 1.000000e-24 : f32
    %98 = vector.broadcast %cst_36 : f32 to vector<64x1xf32>
    %99 = arith.maximumf %97, %98 : vector<64x1xf32>
    %100 = math.rsqrt %99 : vector<64x1xf32>
    %101 = vector.broadcast %94 : f32 to vector<64x1xf32>
    %102 = arith.mulf %101, %100 : vector<64x1xf32>
    %103 = arith.mulf %84, %84 : vector<64x32xf32>
    %cst_37 = arith.constant dense<0.000000e+00> : vector<64xf32>
    %104 = vector.multi_reduction <add>, %103, %cst_37 [1] : vector<64x32xf32> to vector<64xf32>
    %105 = vector.shape_cast %104 : vector<64xf32> to vector<64x1xf32>
    %cst_38 = arith.constant 1.000000e-24 : f32
    %106 = vector.broadcast %cst_38 : f32 to vector<64x1xf32>
    %107 = arith.maximumf %105, %106 : vector<64x1xf32>
    %108 = math.rsqrt %107 : vector<64x1xf32>
    %109 = vector.broadcast %102 : vector<64x1xf32> to vector<64x32xf32>
    %110 = arith.mulf %82, %109 : vector<64x32xf32>
    %111 = arith.truncf %110 : vector<64x32xf32> to vector<64x32xbf16>
    %112 = vector.shape_cast %111 : vector<64x32xbf16> to vector<4x16x32xbf16>
    %113 = vector.broadcast %108 : vector<64x1xf32> to vector<64x32xf32>
    %114 = arith.mulf %84, %113 : vector<64x32xf32>
    %115 = arith.truncf %114 : vector<64x32xf32> to vector<64x32xbf16>
    %116 = vector.shape_cast %115 : vector<64x32xbf16> to vector<4x16x32xbf16>
    %117 = vector.shape_cast %92 : vector<64x32xbf16> to vector<4x16x32xbf16>
    "tpu.trace_start"() <{level = 10 : i32, message = "bnd,bmd->bnm"}> : () -> ()
    %cst_39 = arith.constant dense<0.000000e+00> : vector<4x16x16xf32>
    %118 = tpu.matmul %112, %116, %cst_39 {dimension_numbers = #tpu.dot_dimension_numbers<[2], [2], [1], [1], [0, 0, 0, 1, 1, 1], [0], [0]>} : vector<4x16x32xbf16>, vector<4x16x32xbf16>, vector<4x16x16xf32> -> vector<4x16x16xf32>
    "tpu.trace_stop"() : () -> ()
    %119 = vector.extract_strided_slice %10 {offsets = [1, 0, 0], sizes = [1, 16, 16], strides = [1, 1, 1]} : vector<4x16x16xf32> to vector<1x16x16xf32>
    %120 = vector.shape_cast %119 : vector<1x16x16xf32> to vector<16x16xf32>
    %121 = vector.shape_cast %120 : vector<16x16xf32> to vector<1x16x16xf32>
    %122 = vector.broadcast %121 : vector<1x16x16xf32> to vector<4x16x16xf32>
    %123 = arith.addf %118, %122 : vector<4x16x16xf32>
    %124 = arith.addf %123, %11 : vector<4x16x16xf32>
    %cst_40 = arith.constant dense<0xFF800000> : vector<4x16xf32>
    %125 = vector.multi_reduction <maximumf>, %124, %cst_40 [2] : vector<4x16x16xf32> to vector<4x16xf32>
    %126 = vector.shape_cast %125 : vector<4x16xf32> to vector<4x16x1xf32>
    %127 = vector.broadcast %126 : vector<4x16x1xf32> to vector<4x16x16xf32>
    %128 = arith.subf %124, %127 : vector<4x16x16xf32>
    %129 = math.exp %128 : vector<4x16x16xf32>
    %cst_41 = arith.constant dense<0.000000e+00> : vector<4x16xf32>
    %130 = vector.multi_reduction <add>, %129, %cst_41 [2] : vector<4x16x16xf32> to vector<4x16xf32>
    %131 = vector.shape_cast %130 : vector<4x16xf32> to vector<4x16x1xf32>
    %132 = tpu.reciprocal %131 {approx = true} : vector<4x16x1xf32> -> vector<4x16x1xf32>
    %133 = vector.broadcast %132 : vector<4x16x1xf32> to vector<4x16x16xf32>
    %134 = arith.mulf %129, %133 : vector<4x16x16xf32>
    %135 = arith.truncf %134 : vector<4x16x16xf32> to vector<4x16x16xbf16>
    "tpu.trace_start"() <{level = 10 : i32, message = "bnm,bmd->bnd"}> : () -> ()
    %cst_42 = arith.constant dense<0.000000e+00> : vector<4x16x32xf32>
    %136 = tpu.matmul %135, %117, %cst_42 {dimension_numbers = #tpu.dot_dimension_numbers<[2], [1], [1], [2], [0, 0, 0, 1, 1, 2], [0], [0]>} : vector<4x16x16xbf16>, vector<4x16x32xbf16>, vector<4x16x32xf32> -> vector<4x16x32xf32>
    "tpu.trace_stop"() : () -> ()
    %137 = vector.shape_cast %136 : vector<4x16x32xf32> to vector<64x32xf32>
    %138 = arith.truncf %137 : vector<64x32xf32> to vector<64x32xbf16>
    %c0_43 = arith.constant 0 : index
    %c32_44 = arith.constant 32 : index
    %139 = vector.load %arg12[%c0_43, %c32_44] : memref<64x128xbf16, #tpu.memory_space<vmem>>, vector<64x32xbf16>
    tpu.vector_store %arg12[%c0_43, %c32_44], %138 {strides = array<i32>} : memref<64x128xbf16, #tpu.memory_space<vmem>>, vector<64x32xbf16>,
    %c0_45 = arith.constant 0 : index
    %c64 = arith.constant 64 : index
    %140 = vector.load %arg11[%c0_45, %c64] : memref<64x384xbf16, #tpu.memory_space<vmem>>, vector<64x32xbf16>
    %141 = arith.extf %140 : vector<64x32xbf16> to vector<64x32xf32>
    %142 = vector.extract_strided_slice %7 {offsets = [2, 0], sizes = [1, 32], strides = [1, 1]} : vector<4x32xf32> to vector<1x32xf32>
    %143 = vector.shape_cast %142 : vector<1x32xf32> to vector<32xf32>
    %144 = vector.shape_cast %143 : vector<32xf32> to vector<1x32xf32>
    %145 = vector.broadcast %144 : vector<1x32xf32> to vector<64x32xf32>
    %146 = arith.addf %141, %145 : vector<64x32xf32>
    %c0_46 = arith.constant 0 : index
    %c192 = arith.constant 192 : index
    %147 = vector.load %arg11[%c0_46, %c192] : memref<64x384xbf16, #tpu.memory_space<vmem>>, vector<64x32xbf16>
    %148 = arith.extf %147 : vector<64x32xbf16> to vector<64x32xf32>
    %c0_47 = arith.constant 0 : index
    %c320 = arith.constant 320 : index
    %149 = vector.load %arg11[%c0_47, %c320] : memref<64x384xbf16, #tpu.memory_space<vmem>>, vector<64x32xbf16>
    %150 = arith.extf %149 : vector<64x32xbf16> to vector<64x32xf32>
    %151 = vector.extract_strided_slice %8 {offsets = [2, 0], sizes = [1, 32], strides = [1, 1]} : vector<4x32xf32> to vector<1x32xf32>
    %152 = vector.shape_cast %151 : vector<1x32xf32> to vector<32xf32>
    %153 = vector.shape_cast %152 : vector<32xf32> to vector<1x32xf32>
    %154 = vector.broadcast %153 : vector<1x32xf32> to vector<64x32xf32>
    %155 = arith.addf %150, %154 : vector<64x32xf32>
    %156 = arith.truncf %155 : vector<64x32xf32> to vector<64x32xbf16>
    %157 = vector.extract_strided_slice %9 {offsets = [2, 0], sizes = [1, 1], strides = [1, 1]} : vector<4x1xf32> to vector<1x1xf32>
    %158 = vector.extract %157[0, 0] : f32 from vector<1x1xf32>
    %159 = arith.mulf %146, %146 : vector<64x32xf32>
    %cst_48 = arith.constant dense<0.000000e+00> : vector<64xf32>
    %160 = vector.multi_reduction <add>, %159, %cst_48 [1] : vector<64x32xf32> to vector<64xf32>
    %161 = vector.shape_cast %160 : vector<64xf32> to vector<64x1xf32>
    %cst_49 = arith.constant 1.000000e-24 : f32
    %162 = vector.broadcast %cst_49 : f32 to vector<64x1xf32>
    %163 = arith.maximumf %161, %162 : vector<64x1xf32>
    %164 = math.rsqrt %163 : vector<64x1xf32>
    %165 = vector.broadcast %158 : f32 to vector<64x1xf32>
    %166 = arith.mulf %165, %164 : vector<64x1xf32>
    %167 = arith.mulf %148, %148 : vector<64x32xf32>
    %cst_50 = arith.constant dense<0.000000e+00> : vector<64xf32>
    %168 = vector.multi_reduction <add>, %167, %cst_50 [1] : vector<64x32xf32> to vector<64xf32>
    %169 = vector.shape_cast %168 : vector<64xf32> to vector<64x1xf32>
    %cst_51 = arith.constant 1.000000e-24 : f32
    %170 = vector.broadcast %cst_51 : f32 to vector<64x1xf32>
    %171 = arith.maximumf %169, %170 : vector<64x1xf32>
    %172 = math.rsqrt %171 : vector<64x1xf32>
    %173 = vector.broadcast %166 : vector<64x1xf32> to vector<64x32xf32>
    %174 = arith.mulf %146, %173 : vector<64x32xf32>
    %175 = arith.truncf %174 : vector<64x32xf32> to vector<64x32xbf16>
    %176 = vector.shape_cast %175 : vector<64x32xbf16> to vector<4x16x32xbf16>
    %177 = vector.broadcast %172 : vector<64x1xf32> to vector<64x32xf32>
    %178 = arith.mulf %148, %177 : vector<64x32xf32>
    %179 = arith.truncf %178 : vector<64x32xf32> to vector<64x32xbf16>
    %180 = vector.shape_cast %179 : vector<64x32xbf16> to vector<4x16x32xbf16>
    %181 = vector.shape_cast %156 : vector<64x32xbf16> to vector<4x16x32xbf16>
    "tpu.trace_start"() <{level = 10 : i32, message = "bnd,bmd->bnm"}> : () -> ()
    %cst_52 = arith.constant dense<0.000000e+00> : vector<4x16x16xf32>
    %182 = tpu.matmul %176, %180, %cst_52 {dimension_numbers = #tpu.dot_dimension_numbers<[2], [2], [1], [1], [0, 0, 0, 1, 1, 1], [0], [0]>} : vector<4x16x32xbf16>, vector<4x16x32xbf16>, vector<4x16x16xf32> -> vector<4x16x16xf32>
    "tpu.trace_stop"() : () -> ()
    %183 = vector.extract_strided_slice %10 {offsets = [2, 0, 0], sizes = [1, 16, 16], strides = [1, 1, 1]} : vector<4x16x16xf32> to vector<1x16x16xf32>
    %184 = vector.shape_cast %183 : vector<1x16x16xf32> to vector<16x16xf32>
    %185 = vector.shape_cast %184 : vector<16x16xf32> to vector<1x16x16xf32>
    %186 = vector.broadcast %185 : vector<1x16x16xf32> to vector<4x16x16xf32>
    %187 = arith.addf %182, %186 : vector<4x16x16xf32>
    %188 = arith.addf %187, %11 : vector<4x16x16xf32>
    %cst_53 = arith.constant dense<0xFF800000> : vector<4x16xf32>
    %189 = vector.multi_reduction <maximumf>, %188, %cst_53 [2] : vector<4x16x16xf32> to vector<4x16xf32>
    %190 = vector.shape_cast %189 : vector<4x16xf32> to vector<4x16x1xf32>
    %191 = vector.broadcast %190 : vector<4x16x1xf32> to vector<4x16x16xf32>
    %192 = arith.subf %188, %191 : vector<4x16x16xf32>
    %193 = math.exp %192 : vector<4x16x16xf32>
    %cst_54 = arith.constant dense<0.000000e+00> : vector<4x16xf32>
    %194 = vector.multi_reduction <add>, %193, %cst_54 [2] : vector<4x16x16xf32> to vector<4x16xf32>
    %195 = vector.shape_cast %194 : vector<4x16xf32> to vector<4x16x1xf32>
    %196 = tpu.reciprocal %195 {approx = true} : vector<4x16x1xf32> -> vector<4x16x1xf32>
    %197 = vector.broadcast %196 : vector<4x16x1xf32> to vector<4x16x16xf32>
    %198 = arith.mulf %193, %197 : vector<4x16x16xf32>
    %199 = arith.truncf %198 : vector<4x16x16xf32> to vector<4x16x16xbf16>
    "tpu.trace_start"() <{level = 10 : i32, message = "bnm,bmd->bnd"}> : () -> ()
    %cst_55 = arith.constant dense<0.000000e+00> : vector<4x16x32xf32>
    %200 = tpu.matmul %199, %181, %cst_55 {dimension_numbers = #tpu.dot_dimension_numbers<[2], [1], [1], [2], [0, 0, 0, 1, 1, 2], [0], [0]>} : vector<4x16x16xbf16>, vector<4x16x32xbf16>, vector<4x16x32xf32> -> vector<4x16x32xf32>
    "tpu.trace_stop"() : () -> ()
    %201 = vector.shape_cast %200 : vector<4x16x32xf32> to vector<64x32xf32>
    %202 = arith.truncf %201 : vector<64x32xf32> to vector<64x32xbf16>
    %c0_56 = arith.constant 0 : index
    %c64_57 = arith.constant 64 : index
    %203 = vector.load %arg12[%c0_56, %c64_57] : memref<64x128xbf16, #tpu.memory_space<vmem>>, vector<64x32xbf16>
    tpu.vector_store %arg12[%c0_56, %c64_57], %202 {strides = array<i32>} : memref<64x128xbf16, #tpu.memory_space<vmem>>, vector<64x32xbf16>,
    %c0_58 = arith.constant 0 : index
    %c96 = arith.constant 96 : index
    %204 = vector.load %arg11[%c0_58, %c96] : memref<64x384xbf16, #tpu.memory_space<vmem>>, vector<64x32xbf16>
    %205 = arith.extf %204 : vector<64x32xbf16> to vector<64x32xf32>
    %206 = vector.extract_strided_slice %7 {offsets = [3, 0], sizes = [1, 32], strides = [1, 1]} : vector<4x32xf32> to vector<1x32xf32>
    %207 = vector.shape_cast %206 : vector<1x32xf32> to vector<32xf32>
    %208 = vector.shape_cast %207 : vector<32xf32> to vector<1x32xf32>
    %209 = vector.broadcast %208 : vector<1x32xf32> to vector<64x32xf32>
    %210 = arith.addf %205, %209 : vector<64x32xf32>
    %c0_59 = arith.constant 0 : index
    %c224 = arith.constant 224 : index
    %211 = vector.load %arg11[%c0_59, %c224] : memref<64x384xbf16, #tpu.memory_space<vmem>>, vector<64x32xbf16>
    %212 = arith.extf %211 : vector<64x32xbf16> to vector<64x32xf32>
    %c0_60 = arith.constant 0 : index
    %c352 = arith.constant 352 : index
    %213 = vector.load %arg11[%c0_60, %c352] : memref<64x384xbf16, #tpu.memory_space<vmem>>, vector<64x32xbf16>
    %214 = arith.extf %213 : vector<64x32xbf16> to vector<64x32xf32>
    %215 = vector.extract_strided_slice %8 {offsets = [3, 0], sizes = [1, 32], strides = [1, 1]} : vector<4x32xf32> to vector<1x32xf32>
    %216 = vector.shape_cast %215 : vector<1x32xf32> to vector<32xf32>
    %217 = vector.shape_cast %216 : vector<32xf32> to vector<1x32xf32>
    %218 = vector.broadcast %217 : vector<1x32xf32> to vector<64x32xf32>
    %219 = arith.addf %214, %218 : vector<64x32xf32>
    %220 = arith.truncf %219 : vector<64x32xf32> to vector<64x32xbf16>
    %221 = vector.extract_strided_slice %9 {offsets = [3, 0], sizes = [1, 1], strides = [1, 1]} : vector<4x1xf32> to vector<1x1xf32>
    %222 = vector.extract %221[0, 0] : f32 from vector<1x1xf32>
    %223 = arith.mulf %210, %210 : vector<64x32xf32>
    %cst_61 = arith.constant dense<0.000000e+00> : vector<64xf32>
    %224 = vector.multi_reduction <add>, %223, %cst_61 [1] : vector<64x32xf32> to vector<64xf32>
    %225 = vector.shape_cast %224 : vector<64xf32> to vector<64x1xf32>
    %cst_62 = arith.constant 1.000000e-24 : f32
    %226 = vector.broadcast %cst_62 : f32 to vector<64x1xf32>
    %227 = arith.maximumf %225, %226 : vector<64x1xf32>
    %228 = math.rsqrt %227 : vector<64x1xf32>
    %229 = vector.broadcast %222 : f32 to vector<64x1xf32>
    %230 = arith.mulf %229, %228 : vector<64x1xf32>
    %231 = arith.mulf %212, %212 : vector<64x32xf32>
    %cst_63 = arith.constant dense<0.000000e+00> : vector<64xf32>
    %232 = vector.multi_reduction <add>, %231, %cst_63 [1] : vector<64x32xf32> to vector<64xf32>
    %233 = vector.shape_cast %232 : vector<64xf32> to vector<64x1xf32>
    %cst_64 = arith.constant 1.000000e-24 : f32
    %234 = vector.broadcast %cst_64 : f32 to vector<64x1xf32>
    %235 = arith.maximumf %233, %234 : vector<64x1xf32>
    %236 = math.rsqrt %235 : vector<64x1xf32>
    %237 = vector.broadcast %230 : vector<64x1xf32> to vector<64x32xf32>
    %238 = arith.mulf %210, %237 : vector<64x32xf32>
    %239 = arith.truncf %238 : vector<64x32xf32> to vector<64x32xbf16>
    %240 = vector.shape_cast %239 : vector<64x32xbf16> to vector<4x16x32xbf16>
    %241 = vector.broadcast %236 : vector<64x1xf32> to vector<64x32xf32>
    %242 = arith.mulf %212, %241 : vector<64x32xf32>
    %243 = arith.truncf %242 : vector<64x32xf32> to vector<64x32xbf16>
    %244 = vector.shape_cast %243 : vector<64x32xbf16> to vector<4x16x32xbf16>
    %245 = vector.shape_cast %220 : vector<64x32xbf16> to vector<4x16x32xbf16>
    "tpu.trace_start"() <{level = 10 : i32, message = "bnd,bmd->bnm"}> : () -> ()
    %cst_65 = arith.constant dense<0.000000e+00> : vector<4x16x16xf32>
    %246 = tpu.matmul %240, %244, %cst_65 {dimension_numbers = #tpu.dot_dimension_numbers<[2], [2], [1], [1], [0, 0, 0, 1, 1, 1], [0], [0]>} : vector<4x16x32xbf16>, vector<4x16x32xbf16>, vector<4x16x16xf32> -> vector<4x16x16xf32>
    "tpu.trace_stop"() : () -> ()
    %247 = vector.extract_strided_slice %10 {offsets = [3, 0, 0], sizes = [1, 16, 16], strides = [1, 1, 1]} : vector<4x16x16xf32> to vector<1x16x16xf32>
    %248 = vector.shape_cast %247 : vector<1x16x16xf32> to vector<16x16xf32>
    %249 = vector.shape_cast %248 : vector<16x16xf32> to vector<1x16x16xf32>
    %250 = vector.broadcast %249 : vector<1x16x16xf32> to vector<4x16x16xf32>
    %251 = arith.addf %246, %250 : vector<4x16x16xf32>
    %252 = arith.addf %251, %11 : vector<4x16x16xf32>
    %cst_66 = arith.constant dense<0xFF800000> : vector<4x16xf32>
    %253 = vector.multi_reduction <maximumf>, %252, %cst_66 [2] : vector<4x16x16xf32> to vector<4x16xf32>
    %254 = vector.shape_cast %253 : vector<4x16xf32> to vector<4x16x1xf32>
    %255 = vector.broadcast %254 : vector<4x16x1xf32> to vector<4x16x16xf32>
    %256 = arith.subf %252, %255 : vector<4x16x16xf32>
    %257 = math.exp %256 : vector<4x16x16xf32>
    %cst_67 = arith.constant dense<0.000000e+00> : vector<4x16xf32>
    %258 = vector.multi_reduction <add>, %257, %cst_67 [2] : vector<4x16x16xf32> to vector<4x16xf32>
    %259 = vector.shape_cast %258 : vector<4x16xf32> to vector<4x16x1xf32>
    %260 = tpu.reciprocal %259 {approx = true} : vector<4x16x1xf32> -> vector<4x16x1xf32>
    %261 = vector.broadcast %260 : vector<4x16x1xf32> to vector<4x16x16xf32>
    %262 = arith.mulf %257, %261 : vector<4x16x16xf32>
    %263 = arith.truncf %262 : vector<4x16x16xf32> to vector<4x16x16xbf16>
    "tpu.trace_start"() <{level = 10 : i32, message = "bnm,bmd->bnd"}> : () -> ()
    %cst_68 = arith.constant dense<0.000000e+00> : vector<4x16x32xf32>
    %264 = tpu.matmul %263, %245, %cst_68 {dimension_numbers = #tpu.dot_dimension_numbers<[2], [1], [1], [2], [0, 0, 0, 1, 1, 2], [0], [0]>} : vector<4x16x16xbf16>, vector<4x16x32xbf16>, vector<4x16x32xf32> -> vector<4x16x32xf32>
    "tpu.trace_stop"() : () -> ()
    %265 = vector.shape_cast %264 : vector<4x16x32xf32> to vector<64x32xf32>
    %266 = arith.truncf %265 : vector<64x32xf32> to vector<64x32xbf16>
    %c0_69 = arith.constant 0 : index
    %c96_70 = arith.constant 96 : index
    %267 = vector.load %arg12[%c0_69, %c96_70] : memref<64x128xbf16, #tpu.memory_space<vmem>>, vector<64x32xbf16>
    tpu.vector_store %arg12[%c0_69, %c96_70], %266 {strides = array<i32>} : memref<64x128xbf16, #tpu.memory_space<vmem>>, vector<64x32xbf16>,
    %c0_71 = arith.constant 0 : index
    %c0_72 = arith.constant 0 : index
    %268 = vector.load %arg12[%c0_71, %c0_72] : memref<64x128xbf16, #tpu.memory_space<vmem>>, vector<64x128xbf16>
    %c0_73 = arith.constant 0 : index
    %c0_74 = arith.constant 0 : index
    %269 = vector.load %arg8[%c0_73, %c0_74] : memref<128x128xbf16, #tpu.memory_space<vmem>>, vector<128x128xbf16>
    %cst_75 = arith.constant dense<0.000000e+00> : vector<64x128xf32>
    %270 = tpu.matmul %268, %269, %cst_75 {dimension_numbers = #tpu.dot_dimension_numbers<[1], [0], [0], [1], [0, 0, 1, 1], [], []>} : vector<64x128xbf16>, vector<128x128xbf16>, vector<64x128xf32> -> vector<64x128xf32>
    %c0_76 = arith.constant 0 : index
    %c0_77 = arith.constant 0 : index
    %271 = vector.load %arg9[%c0_76, %c0_77] : memref<1x128xf32, #tpu.memory_space<vmem>>, vector<1x128xf32>
    %272 = vector.broadcast %271 : vector<1x128xf32> to vector<64x128xf32>
    %273 = arith.addf %270, %272 : vector<64x128xf32>
    %274 = vector.shape_cast %273 : vector<64x128xf32> to vector<4x16x128xf32>
    %275 = arith.truncf %274 : vector<4x16x128xf32> to vector<4x16x128xbf16>
    %c0_78 = arith.constant 0 : index
    %c0_79 = arith.constant 0 : index
    %c0_80 = arith.constant 0 : index
    %276 = vector.load %arg10[%c0_78, %c0_79, %c0_80] : memref<4x16x128xbf16, #tpu.memory_space<vmem>>, vector<4x16x128xbf16>
    tpu.vector_store %arg10[%c0_78, %c0_79, %c0_80], %275 {strides = array<i32>} : memref<4x16x128xbf16, #tpu.memory_space<vmem>>, vector<4x16x128xbf16>,
    return
  }
  func.func @transform_0(%arg0: i32) -> (i32, i32, i32) {
    %c0_i32 = arith.constant 0 : i32
    %c0_i32_0 = arith.constant 0 : i32
    %c0_i32_1 = arith.constant 0 : i32
    return %arg0, %c0_i32, %c0_i32_0 : i32, i32, i32
  }
  func.func @transform_1(%arg0: i32) -> (i32, i32) {
    %c0_i32 = arith.constant 0 : i32
    %c0_i32_0 = arith.constant 0 : i32
    %c0_i32_1 = arith.constant 0 : i32
    return %c0_i32, %c0_i32_0 : i32, i32
  }
  func.func @transform_2(%arg0: i32) -> (i32, i32) {
    %c0_i32 = arith.constant 0 : i32
    %c0_i32_0 = arith.constant 0 : i32
    %c0_i32_1 = arith.constant 0 : i32
    return %c0_i32, %c0_i32_0 : i32, i32
  }
  func.func @transform_3(%arg0: i32) -> (i32, i32) {
    %c0_i32 = arith.constant 0 : i32
    %c0_i32_0 = arith.constant 0 : i32
    %c0_i32_1 = arith.constant 0 : i32
    return %c0_i32, %c0_i32_0 : i32, i32
  }
  func.func @transform_4(%arg0: i32) -> (i32, i32) {
    %c0_i32 = arith.constant 0 : i32
    %c0_i32_0 = arith.constant 0 : i32
    %c0_i32_1 = arith.constant 0 : i32
    return %c0_i32, %c0_i32_0 : i32, i32
  }
  func.func @transform_5(%arg0: i32) -> (i32, i32, i32) {
    %c0_i32 = arith.constant 0 : i32
    %c0_i32_0 = arith.constant 0 : i32
    %c0_i32_1 = arith.constant 0 : i32
    %c0_i32_2 = arith.constant 0 : i32
    return %c0_i32, %c0_i32_0, %c0_i32_1 : i32, i32, i32
  }
  func.func @transform_6(%arg0: i32) -> (i32, i32, i32) {
    %c1_i32 = arith.constant 1 : i32
    %c0_i32 = arith.constant 0 : i32
    %0 = arith.cmpi eq, %c1_i32, %c0_i32 : i32
    %c1_i32_0 = arith.constant 1 : i32
    %1 = arith.select %0, %c1_i32_0, %c1_i32 : i32
    %2 = arith.remsi %arg0, %1 : i32
    %c0_i32_1 = arith.constant 0 : i32
    %3 = arith.cmpi ne, %2, %c0_i32_1 : i32
    %c0_i32_2 = arith.constant 0 : i32
    %4 = arith.cmpi slt, %2, %c0_i32_2 : i32
    %c0_i32_3 = arith.constant 0 : i32
    %5 = arith.cmpi slt, %1, %c0_i32_3 : i32
    %6 = arith.xori %4, %5 : i1
    %7 = arith.andi %6, %3 : i1
    %8 = arith.addi %2, %1 : i32
    %9 = arith.select %7, %8, %2 : i32
    %c0_i32_4 = arith.constant 0 : i32
    %c0_i32_5 = arith.constant 0 : i32
    %c0_i32_6 = arith.constant 0 : i32
    return %9, %c0_i32_4, %c0_i32_5 : i32, i32, i32
  }
  func.func @transform_7(%arg0: i32) -> (i32, i32) {
    %c0_i32 = arith.constant 0 : i32
    %c0_i32_0 = arith.constant 0 : i32
    %c0_i32_1 = arith.constant 0 : i32
    return %c0_i32, %c0_i32_0 : i32, i32
  }
  func.func @transform_8(%arg0: i32) -> (i32, i32) {
    %c0_i32 = arith.constant 0 : i32
    %c0_i32_0 = arith.constant 0 : i32
    %c0_i32_1 = arith.constant 0 : i32
    return %c0_i32, %c0_i32_0 : i32, i32
  }
  func.func @transform_9(%arg0: i32) -> (i32, i32, i32) {
    %c0_i32 = arith.constant 0 : i32
    %c0_i32_0 = arith.constant 0 : i32
    %c0_i32_1 = arith.constant 0 : i32
    return %arg0, %c0_i32, %c0_i32_0 : i32, i32, i32
  }
}

module attributes {stable_mosaic.version = 11 : i64} {
  func.func @_window_attn_kernel(%arg0: i32, %arg1: memref<4x16x128xf32, #tpu.memory_space<vmem>>, %arg2: memref<128x384xbf16, #tpu.memory_space<vmem>>, %arg3: memref<4x32xf32, #tpu.memory_space<vmem>>, %arg4: memref<4x32xf32, #tpu.memory_space<vmem>>, %arg5: memref<4x1xf32, #tpu.memory_space<vmem>>, %arg6: memref<4x16x16xf32, #tpu.memory_space<vmem>>, %arg7: memref<4x16x16xf32, #tpu.memory_space<vmem>>, %arg8: memref<128x128xbf16, #tpu.memory_space<vmem>>, %arg9: memref<1x128xf32, #tpu.memory_space<vmem>>, %arg10: memref<4x16x128xbf16, #tpu.memory_space<vmem>>, %arg11: memref<64x384xbf16, #tpu.memory_space<vmem>>, %arg12: memref<64x128xbf16, #tpu.memory_space<vmem>>) attributes {dimension_semantics = [#tpu.dimension_semantics<parallel>], iteration_bounds = array<i64: 2>, scalar_prefetch = 0 : i64, scratch_operands = 2 : i64, tpu.core_type = #tpu.core_type<tc>, window_params = [{transform_indices = @transform_0, window_bounds = array<i64: 4, 16, 128>}, {pipeline_mode = #tpu.pipeline_mode<synchronous>, transform_indices = @transform_1, window_bounds = array<i64: 128, 384>}, {pipeline_mode = #tpu.pipeline_mode<synchronous>, transform_indices = @transform_2, window_bounds = array<i64: 4, 32>}, {pipeline_mode = #tpu.pipeline_mode<synchronous>, transform_indices = @transform_3, window_bounds = array<i64: 4, 32>}, {pipeline_mode = #tpu.pipeline_mode<synchronous>, transform_indices = @transform_4, window_bounds = array<i64: 4, 1>}, {pipeline_mode = #tpu.pipeline_mode<synchronous>, transform_indices = @transform_5, window_bounds = array<i64: 4, 16, 16>}, {transform_indices = @transform_6, window_bounds = array<i64: 4, 16, 16>}, {pipeline_mode = #tpu.pipeline_mode<synchronous>, transform_indices = @transform_7, window_bounds = array<i64: 128, 128>}, {pipeline_mode = #tpu.pipeline_mode<synchronous>, transform_indices = @transform_8, window_bounds = array<i64: 1, 128>}, {transform_indices = @transform_9, window_bounds = array<i64: 4, 16, 128>}]} {
    %c0 = arith.constant 0 : index
    %c0_0 = arith.constant 0 : index
    %c0_1 = arith.constant 0 : index
    %0 = vector.load %arg1[%c0, %c0_0, %c0_1] : memref<4x16x128xf32, #tpu.memory_space<vmem>>, vector<4x16x128xf32>
    %1 = vector.shape_cast %0 : vector<4x16x128xf32> to vector<64x128xf32>
    %2 = arith.truncf %1 : vector<64x128xf32> to vector<64x128xbf16>
    %c0_2 = arith.constant 0 : index
    %c0_3 = arith.constant 0 : index
    %3 = vector.load %arg2[%c0_2, %c0_3] : memref<128x384xbf16, #tpu.memory_space<vmem>>, vector<128x384xbf16>
    %cst = arith.constant dense<0.000000e+00> : vector<64x384xf32>
    %4 = tpu.matmul %2, %3, %cst {dimension_numbers = #tpu.dot_dimension_numbers<[1], [0], [0], [1], [0, 0, 1, 1], [], []>} : vector<64x128xbf16>, vector<128x384xbf16>, vector<64x384xf32> -> vector<64x384xf32>
    %5 = arith.truncf %4 : vector<64x384xf32> to vector<64x384xbf16>
    %c0_4 = arith.constant 0 : index
    %c0_5 = arith.constant 0 : index
    %6 = vector.load %arg11[%c0_4, %c0_5] : memref<64x384xbf16, #tpu.memory_space<vmem>>, vector<64x384xbf16>
    tpu.vector_store %arg11[%c0_4, %c0_5], %5 {strides = array<i32>} : memref<64x384xbf16, #tpu.memory_space<vmem>>, vector<64x384xbf16>,
    %c0_6 = arith.constant 0 : index
    %c0_7 = arith.constant 0 : index
    %7 = vector.load %arg3[%c0_6, %c0_7] : memref<4x32xf32, #tpu.memory_space<vmem>>, vector<4x32xf32>
    %c0_8 = arith.constant 0 : index
    %c0_9 = arith.constant 0 : index
    %8 = vector.load %arg4[%c0_8, %c0_9] : memref<4x32xf32, #tpu.memory_space<vmem>>, vector<4x32xf32>
    %c0_10 = arith.constant 0 : index
    %c0_11 = arith.constant 0 : index
    %9 = vector.load %arg5[%c0_10, %c0_11] : memref<4x1xf32, #tpu.memory_space<vmem>>, vector<4x1xf32>
    %c0_12 = arith.constant 0 : index
    %c0_13 = arith.constant 0 : index
    %c0_14 = arith.constant 0 : index
    %10 = vector.load %arg6[%c0_12, %c0_13, %c0_14] : memref<4x16x16xf32, #tpu.memory_space<vmem>>, vector<4x16x16xf32>
    %c0_15 = arith.constant 0 : index
    %c0_16 = arith.constant 0 : index
    %c0_17 = arith.constant 0 : index
    %11 = vector.load %arg7[%c0_15, %c0_16, %c0_17] : memref<4x16x16xf32, #tpu.memory_space<vmem>>, vector<4x16x16xf32>
    %c0_18 = arith.constant 0 : index
    %c0_19 = arith.constant 0 : index
    %12 = vector.load %arg11[%c0_18, %c0_19] : memref<64x384xbf16, #tpu.memory_space<vmem>>, vector<64x32xbf16>
    %13 = arith.extf %12 : vector<64x32xbf16> to vector<64x32xf32>
    %14 = vector.extract_strided_slice %7 {offsets = [0, 0], sizes = [1, 32], strides = [1, 1]} : vector<4x32xf32> to vector<1x32xf32>
    %15 = vector.shape_cast %14 : vector<1x32xf32> to vector<32xf32>
    %16 = vector.shape_cast %15 : vector<32xf32> to vector<1x32xf32>
    %17 = vector.broadcast %16 : vector<1x32xf32> to vector<64x32xf32>
    %18 = arith.addf %13, %17 : vector<64x32xf32>
    %c0_20 = arith.constant 0 : index
    %c128 = arith.constant 128 : index
    %19 = vector.load %arg11[%c0_20, %c128] : memref<64x384xbf16, #tpu.memory_space<vmem>>, vector<64x32xbf16>
    %20 = arith.extf %19 : vector<64x32xbf16> to vector<64x32xf32>
    %c0_21 = arith.constant 0 : index
    %c256 = arith.constant 256 : index
    %21 = vector.load %arg11[%c0_21, %c256] : memref<64x384xbf16, #tpu.memory_space<vmem>>, vector<64x32xbf16>
    %22 = arith.extf %21 : vector<64x32xbf16> to vector<64x32xf32>
    %23 = vector.extract_strided_slice %8 {offsets = [0, 0], sizes = [1, 32], strides = [1, 1]} : vector<4x32xf32> to vector<1x32xf32>
    %24 = vector.shape_cast %23 : vector<1x32xf32> to vector<32xf32>
    %25 = vector.shape_cast %24 : vector<32xf32> to vector<1x32xf32>
    %26 = vector.broadcast %25 : vector<1x32xf32> to vector<64x32xf32>
    %27 = arith.addf %22, %26 : vector<64x32xf32>
    %28 = arith.truncf %27 : vector<64x32xf32> to vector<64x32xbf16>
    %29 = vector.extract_strided_slice %9 {offsets = [0, 0], sizes = [1, 1], strides = [1, 1]} : vector<4x1xf32> to vector<1x1xf32>
    %30 = vector.extract %29[0, 0] : f32 from vector<1x1xf32>
    %31 = arith.mulf %18, %18 : vector<64x32xf32>
    %cst_22 = arith.constant dense<0.000000e+00> : vector<64xf32>
    %32 = vector.multi_reduction <add>, %31, %cst_22 [1] : vector<64x32xf32> to vector<64xf32>
    %33 = vector.shape_cast %32 : vector<64xf32> to vector<64x1xf32>
    %cst_23 = arith.constant 1.000000e-24 : f32
    %34 = vector.broadcast %cst_23 : f32 to vector<64x1xf32>
    %35 = arith.maximumf %33, %34 : vector<64x1xf32>
    %36 = math.rsqrt %35 : vector<64x1xf32>
    %37 = vector.broadcast %30 : f32 to vector<64x1xf32>
    %38 = arith.mulf %37, %36 : vector<64x1xf32>
    %39 = arith.mulf %20, %20 : vector<64x32xf32>
    %cst_24 = arith.constant dense<0.000000e+00> : vector<64xf32>
    %40 = vector.multi_reduction <add>, %39, %cst_24 [1] : vector<64x32xf32> to vector<64xf32>
    %41 = vector.shape_cast %40 : vector<64xf32> to vector<64x1xf32>
    %cst_25 = arith.constant 1.000000e-24 : f32
    %42 = vector.broadcast %cst_25 : f32 to vector<64x1xf32>
    %43 = arith.maximumf %41, %42 : vector<64x1xf32>
    %44 = math.rsqrt %43 : vector<64x1xf32>
    %45 = vector.broadcast %38 : vector<64x1xf32> to vector<64x32xf32>
    %46 = arith.mulf %18, %45 : vector<64x32xf32>
    %47 = arith.truncf %46 : vector<64x32xf32> to vector<64x32xbf16>
    %48 = vector.shape_cast %47 : vector<64x32xbf16> to vector<4x16x32xbf16>
    %49 = vector.broadcast %44 : vector<64x1xf32> to vector<64x32xf32>
    %50 = arith.mulf %20, %49 : vector<64x32xf32>
    %51 = arith.truncf %50 : vector<64x32xf32> to vector<64x32xbf16>
    %52 = vector.shape_cast %51 : vector<64x32xbf16> to vector<4x16x32xbf16>
    %53 = vector.shape_cast %28 : vector<64x32xbf16> to vector<4x16x32xbf16>
    "tpu.trace_start"() <{level = 10 : i32, message = "bnd,bmd->bnm"}> : () -> ()
    %cst_26 = arith.constant dense<0.000000e+00> : vector<4x16x16xf32>
    %54 = tpu.matmul %48, %52, %cst_26 {dimension_numbers = #tpu.dot_dimension_numbers<[2], [2], [1], [1], [0, 0, 0, 1, 1, 1], [0], [0]>} : vector<4x16x32xbf16>, vector<4x16x32xbf16>, vector<4x16x16xf32> -> vector<4x16x16xf32>
    "tpu.trace_stop"() : () -> ()
    %55 = vector.extract_strided_slice %10 {offsets = [0, 0, 0], sizes = [1, 16, 16], strides = [1, 1, 1]} : vector<4x16x16xf32> to vector<1x16x16xf32>
    %56 = vector.shape_cast %55 : vector<1x16x16xf32> to vector<16x16xf32>
    %57 = vector.shape_cast %56 : vector<16x16xf32> to vector<1x16x16xf32>
    %58 = vector.broadcast %57 : vector<1x16x16xf32> to vector<4x16x16xf32>
    %59 = arith.addf %54, %58 : vector<4x16x16xf32>
    %60 = arith.addf %59, %11 : vector<4x16x16xf32>
    %cst_27 = arith.constant dense<0xFF800000> : vector<4x16xf32>
    %61 = vector.multi_reduction <maximumf>, %60, %cst_27 [2] : vector<4x16x16xf32> to vector<4x16xf32>
    %62 = vector.shape_cast %61 : vector<4x16xf32> to vector<4x16x1xf32>
    %63 = vector.broadcast %62 : vector<4x16x1xf32> to vector<4x16x16xf32>
    %64 = arith.subf %60, %63 : vector<4x16x16xf32>
    %65 = math.exp %64 : vector<4x16x16xf32>
    %cst_28 = arith.constant dense<0.000000e+00> : vector<4x16xf32>
    %66 = vector.multi_reduction <add>, %65, %cst_28 [2] : vector<4x16x16xf32> to vector<4x16xf32>
    %67 = vector.shape_cast %66 : vector<4x16xf32> to vector<4x16x1xf32>
    %68 = tpu.reciprocal %67 {approx = true} : vector<4x16x1xf32> -> vector<4x16x1xf32>
    %69 = vector.broadcast %68 : vector<4x16x1xf32> to vector<4x16x16xf32>
    %70 = arith.mulf %65, %69 : vector<4x16x16xf32>
    %71 = arith.truncf %70 : vector<4x16x16xf32> to vector<4x16x16xbf16>
    "tpu.trace_start"() <{level = 10 : i32, message = "bnm,bmd->bnd"}> : () -> ()
    %cst_29 = arith.constant dense<0.000000e+00> : vector<4x16x32xf32>
    %72 = tpu.matmul %71, %53, %cst_29 {dimension_numbers = #tpu.dot_dimension_numbers<[2], [1], [1], [2], [0, 0, 0, 1, 1, 2], [0], [0]>} : vector<4x16x16xbf16>, vector<4x16x32xbf16>, vector<4x16x32xf32> -> vector<4x16x32xf32>
    "tpu.trace_stop"() : () -> ()
    %73 = vector.shape_cast %72 : vector<4x16x32xf32> to vector<64x32xf32>
    %74 = arith.truncf %73 : vector<64x32xf32> to vector<64x32xbf16>
    %c0_30 = arith.constant 0 : index
    %c0_31 = arith.constant 0 : index
    %75 = vector.load %arg12[%c0_30, %c0_31] : memref<64x128xbf16, #tpu.memory_space<vmem>>, vector<64x32xbf16>
    tpu.vector_store %arg12[%c0_30, %c0_31], %74 {strides = array<i32>} : memref<64x128xbf16, #tpu.memory_space<vmem>>, vector<64x32xbf16>,
    %c0_32 = arith.constant 0 : index
    %c32 = arith.constant 32 : index
    %76 = vector.load %arg11[%c0_32, %c32] : memref<64x384xbf16, #tpu.memory_space<vmem>>, vector<64x32xbf16>
    %77 = arith.extf %76 : vector<64x32xbf16> to vector<64x32xf32>
    %78 = vector.extract_strided_slice %7 {offsets = [1, 0], sizes = [1, 32], strides = [1, 1]} : vector<4x32xf32> to vector<1x32xf32>
    %79 = vector.shape_cast %78 : vector<1x32xf32> to vector<32xf32>
    %80 = vector.shape_cast %79 : vector<32xf32> to vector<1x32xf32>
    %81 = vector.broadcast %80 : vector<1x32xf32> to vector<64x32xf32>
    %82 = arith.addf %77, %81 : vector<64x32xf32>
    %c0_33 = arith.constant 0 : index
    %c160 = arith.constant 160 : index
    %83 = vector.load %arg11[%c0_33, %c160] : memref<64x384xbf16, #tpu.memory_space<vmem>>, vector<64x32xbf16>
    %84 = arith.extf %83 : vector<64x32xbf16> to vector<64x32xf32>
    %c0_34 = arith.constant 0 : index
    %c288 = arith.constant 288 : index
    %85 = vector.load %arg11[%c0_34, %c288] : memref<64x384xbf16, #tpu.memory_space<vmem>>, vector<64x32xbf16>
    %86 = arith.extf %85 : vector<64x32xbf16> to vector<64x32xf32>
    %87 = vector.extract_strided_slice %8 {offsets = [1, 0], sizes = [1, 32], strides = [1, 1]} : vector<4x32xf32> to vector<1x32xf32>
    %88 = vector.shape_cast %87 : vector<1x32xf32> to vector<32xf32>
    %89 = vector.shape_cast %88 : vector<32xf32> to vector<1x32xf32>
    %90 = vector.broadcast %89 : vector<1x32xf32> to vector<64x32xf32>
    %91 = arith.addf %86, %90 : vector<64x32xf32>
    %92 = arith.truncf %91 : vector<64x32xf32> to vector<64x32xbf16>
    %93 = vector.extract_strided_slice %9 {offsets = [1, 0], sizes = [1, 1], strides = [1, 1]} : vector<4x1xf32> to vector<1x1xf32>
    %94 = vector.extract %93[0, 0] : f32 from vector<1x1xf32>
    %95 = arith.mulf %82, %82 : vector<64x32xf32>
    %cst_35 = arith.constant dense<0.000000e+00> : vector<64xf32>
    %96 = vector.multi_reduction <add>, %95, %cst_35 [1] : vector<64x32xf32> to vector<64xf32>
    %97 = vector.shape_cast %96 : vector<64xf32> to vector<64x1xf32>
    %cst_36 = arith.constant 1.000000e-24 : f32
    %98 = vector.broadcast %cst_36 : f32 to vector<64x1xf32>
    %99 = arith.maximumf %97, %98 : vector<64x1xf32>
    %100 = math.rsqrt %99 : vector<64x1xf32>
    %101 = vector.broadcast %94 : f32 to vector<64x1xf32>
    %102 = arith.mulf %101, %100 : vector<64x1xf32>
    %103 = arith.mulf %84, %84 : vector<64x32xf32>
    %cst_37 = arith.constant dense<0.000000e+00> : vector<64xf32>
    %104 = vector.multi_reduction <add>, %103, %cst_37 [1] : vector<64x32xf32> to vector<64xf32>
    %105 = vector.shape_cast %104 : vector<64xf32> to vector<64x1xf32>
    %cst_38 = arith.constant 1.000000e-24 : f32
    %106 = vector.broadcast %cst_38 : f32 to vector<64x1xf32>
    %107 = arith.maximumf %105, %106 : vector<64x1xf32>
    %108 = math.rsqrt %107 : vector<64x1xf32>
    %109 = vector.broadcast %102 : vector<64x1xf32> to vector<64x32xf32>
    %110 = arith.mulf %82, %109 : vector<64x32xf32>
    %111 = arith.truncf %110 : vector<64x32xf32> to vector<64x32xbf16>
    %112 = vector.shape_cast %111 : vector<64x32xbf16> to vector<4x16x32xbf16>
    %113 = vector.broadcast %108 : vector<64x1xf32> to vector<64x32xf32>
    %114 = arith.mulf %84, %113 : vector<64x32xf32>
    %115 = arith.truncf %114 : vector<64x32xf32> to vector<64x32xbf16>
    %116 = vector.shape_cast %115 : vector<64x32xbf16> to vector<4x16x32xbf16>
    %117 = vector.shape_cast %92 : vector<64x32xbf16> to vector<4x16x32xbf16>
    "tpu.trace_start"() <{level = 10 : i32, message = "bnd,bmd->bnm"}> : () -> ()
    %cst_39 = arith.constant dense<0.000000e+00> : vector<4x16x16xf32>
    %118 = tpu.matmul %112, %116, %cst_39 {dimension_numbers = #tpu.dot_dimension_numbers<[2], [2], [1], [1], [0, 0, 0, 1, 1, 1], [0], [0]>} : vector<4x16x32xbf16>, vector<4x16x32xbf16>, vector<4x16x16xf32> -> vector<4x16x16xf32>
    "tpu.trace_stop"() : () -> ()
    %119 = vector.extract_strided_slice %10 {offsets = [1, 0, 0], sizes = [1, 16, 16], strides = [1, 1, 1]} : vector<4x16x16xf32> to vector<1x16x16xf32>
    %120 = vector.shape_cast %119 : vector<1x16x16xf32> to vector<16x16xf32>
    %121 = vector.shape_cast %120 : vector<16x16xf32> to vector<1x16x16xf32>
    %122 = vector.broadcast %121 : vector<1x16x16xf32> to vector<4x16x16xf32>
    %123 = arith.addf %118, %122 : vector<4x16x16xf32>
    %124 = arith.addf %123, %11 : vector<4x16x16xf32>
    %cst_40 = arith.constant dense<0xFF800000> : vector<4x16xf32>
    %125 = vector.multi_reduction <maximumf>, %124, %cst_40 [2] : vector<4x16x16xf32> to vector<4x16xf32>
    %126 = vector.shape_cast %125 : vector<4x16xf32> to vector<4x16x1xf32>
    %127 = vector.broadcast %126 : vector<4x16x1xf32> to vector<4x16x16xf32>
    %128 = arith.subf %124, %127 : vector<4x16x16xf32>
    %129 = math.exp %128 : vector<4x16x16xf32>
    %cst_41 = arith.constant dense<0.000000e+00> : vector<4x16xf32>
    %130 = vector.multi_reduction <add>, %129, %cst_41 [2] : vector<4x16x16xf32> to vector<4x16xf32>
    %131 = vector.shape_cast %130 : vector<4x16xf32> to vector<4x16x1xf32>
    %132 = tpu.reciprocal %131 {approx = true} : vector<4x16x1xf32> -> vector<4x16x1xf32>
    %133 = vector.broadcast %132 : vector<4x16x1xf32> to vector<4x16x16xf32>
    %134 = arith.mulf %129, %133 : vector<4x16x16xf32>
    %135 = arith.truncf %134 : vector<4x16x16xf32> to vector<4x16x16xbf16>
    "tpu.trace_start"() <{level = 10 : i32, message = "bnm,bmd->bnd"}> : () -> ()
    %cst_42 = arith.constant dense<0.000000e+00> : vector<4x16x32xf32>
    %136 = tpu.matmul %135, %117, %cst_42 {dimension_numbers = #tpu.dot_dimension_numbers<[2], [1], [1], [2], [0, 0, 0, 1, 1, 2], [0], [0]>} : vector<4x16x16xbf16>, vector<4x16x32xbf16>, vector<4x16x32xf32> -> vector<4x16x32xf32>
    "tpu.trace_stop"() : () -> ()
    %137 = vector.shape_cast %136 : vector<4x16x32xf32> to vector<64x32xf32>
    %138 = arith.truncf %137 : vector<64x32xf32> to vector<64x32xbf16>
    %c0_43 = arith.constant 0 : index
    %c32_44 = arith.constant 32 : index
    %139 = vector.load %arg12[%c0_43, %c32_44] : memref<64x128xbf16, #tpu.memory_space<vmem>>, vector<64x32xbf16>
    tpu.vector_store %arg12[%c0_43, %c32_44], %138 {strides = array<i32>} : memref<64x128xbf16, #tpu.memory_space<vmem>>, vector<64x32xbf16>,
    %c0_45 = arith.constant 0 : index
    %c64 = arith.constant 64 : index
    %140 = vector.load %arg11[%c0_45, %c64] : memref<64x384xbf16, #tpu.memory_space<vmem>>, vector<64x32xbf16>
    %141 = arith.extf %140 : vector<64x32xbf16> to vector<64x32xf32>
    %142 = vector.extract_strided_slice %7 {offsets = [2, 0], sizes = [1, 32], strides = [1, 1]} : vector<4x32xf32> to vector<1x32xf32>
    %143 = vector.shape_cast %142 : vector<1x32xf32> to vector<32xf32>
    %144 = vector.shape_cast %143 : vector<32xf32> to vector<1x32xf32>
    %145 = vector.broadcast %144 : vector<1x32xf32> to vector<64x32xf32>
    %146 = arith.addf %141, %145 : vector<64x32xf32>
    %c0_46 = arith.constant 0 : index
    %c192 = arith.constant 192 : index
    %147 = vector.load %arg11[%c0_46, %c192] : memref<64x384xbf16, #tpu.memory_space<vmem>>, vector<64x32xbf16>
    %148 = arith.extf %147 : vector<64x32xbf16> to vector<64x32xf32>
    %c0_47 = arith.constant 0 : index
    %c320 = arith.constant 320 : index
    %149 = vector.load %arg11[%c0_47, %c320] : memref<64x384xbf16, #tpu.memory_space<vmem>>, vector<64x32xbf16>
    %150 = arith.extf %149 : vector<64x32xbf16> to vector<64x32xf32>
    %151 = vector.extract_strided_slice %8 {offsets = [2, 0], sizes = [1, 32], strides = [1, 1]} : vector<4x32xf32> to vector<1x32xf32>
    %152 = vector.shape_cast %151 : vector<1x32xf32> to vector<32xf32>
    %153 = vector.shape_cast %152 : vector<32xf32> to vector<1x32xf32>
    %154 = vector.broadcast %153 : vector<1x32xf32> to vector<64x32xf32>
    %155 = arith.addf %150, %154 : vector<64x32xf32>
    %156 = arith.truncf %155 : vector<64x32xf32> to vector<64x32xbf16>
    %157 = vector.extract_strided_slice %9 {offsets = [2, 0], sizes = [1, 1], strides = [1, 1]} : vector<4x1xf32> to vector<1x1xf32>
    %158 = vector.extract %157[0, 0] : f32 from vector<1x1xf32>
    %159 = arith.mulf %146, %146 : vector<64x32xf32>
    %cst_48 = arith.constant dense<0.000000e+00> : vector<64xf32>
    %160 = vector.multi_reduction <add>, %159, %cst_48 [1] : vector<64x32xf32> to vector<64xf32>
    %161 = vector.shape_cast %160 : vector<64xf32> to vector<64x1xf32>
    %cst_49 = arith.constant 1.000000e-24 : f32
    %162 = vector.broadcast %cst_49 : f32 to vector<64x1xf32>
    %163 = arith.maximumf %161, %162 : vector<64x1xf32>
    %164 = math.rsqrt %163 : vector<64x1xf32>
    %165 = vector.broadcast %158 : f32 to vector<64x1xf32>
    %166 = arith.mulf %165, %164 : vector<64x1xf32>
    %167 = arith.mulf %148, %148 : vector<64x32xf32>
    %cst_50 = arith.constant dense<0.000000e+00> : vector<64xf32>
    %168 = vector.multi_reduction <add>, %167, %cst_50 [1] : vector<64x32xf32> to vector<64xf32>
    %169 = vector.shape_cast %168 : vector<64xf32> to vector<64x1xf32>
    %cst_51 = arith.constant 1.000000e-24 : f32
    %170 = vector.broadcast %cst_51 : f32 to vector<64x1xf32>
    %171 = arith.maximumf %169, %170 : vector<64x1xf32>
    %172 = math.rsqrt %171 : vector<64x1xf32>
    %173 = vector.broadcast %166 : vector<64x1xf32> to vector<64x32xf32>
    %174 = arith.mulf %146, %173 : vector<64x32xf32>
    %175 = arith.truncf %174 : vector<64x32xf32> to vector<64x32xbf16>
    %176 = vector.shape_cast %175 : vector<64x32xbf16> to vector<4x16x32xbf16>
    %177 = vector.broadcast %172 : vector<64x1xf32> to vector<64x32xf32>
    %178 = arith.mulf %148, %177 : vector<64x32xf32>
    %179 = arith.truncf %178 : vector<64x32xf32> to vector<64x32xbf16>
    %180 = vector.shape_cast %179 : vector<64x32xbf16> to vector<4x16x32xbf16>
    %181 = vector.shape_cast %156 : vector<64x32xbf16> to vector<4x16x32xbf16>
    "tpu.trace_start"() <{level = 10 : i32, message = "bnd,bmd->bnm"}> : () -> ()
    %cst_52 = arith.constant dense<0.000000e+00> : vector<4x16x16xf32>
    %182 = tpu.matmul %176, %180, %cst_52 {dimension_numbers = #tpu.dot_dimension_numbers<[2], [2], [1], [1], [0, 0, 0, 1, 1, 1], [0], [0]>} : vector<4x16x32xbf16>, vector<4x16x32xbf16>, vector<4x16x16xf32> -> vector<4x16x16xf32>
    "tpu.trace_stop"() : () -> ()
    %183 = vector.extract_strided_slice %10 {offsets = [2, 0, 0], sizes = [1, 16, 16], strides = [1, 1, 1]} : vector<4x16x16xf32> to vector<1x16x16xf32>
    %184 = vector.shape_cast %183 : vector<1x16x16xf32> to vector<16x16xf32>
    %185 = vector.shape_cast %184 : vector<16x16xf32> to vector<1x16x16xf32>
    %186 = vector.broadcast %185 : vector<1x16x16xf32> to vector<4x16x16xf32>
    %187 = arith.addf %182, %186 : vector<4x16x16xf32>
    %188 = arith.addf %187, %11 : vector<4x16x16xf32>
    %cst_53 = arith.constant dense<0xFF800000> : vector<4x16xf32>
    %189 = vector.multi_reduction <maximumf>, %188, %cst_53 [2] : vector<4x16x16xf32> to vector<4x16xf32>
    %190 = vector.shape_cast %189 : vector<4x16xf32> to vector<4x16x1xf32>
    %191 = vector.broadcast %190 : vector<4x16x1xf32> to vector<4x16x16xf32>
    %192 = arith.subf %188, %191 : vector<4x16x16xf32>
    %193 = math.exp %192 : vector<4x16x16xf32>
    %cst_54 = arith.constant dense<0.000000e+00> : vector<4x16xf32>
    %194 = vector.multi_reduction <add>, %193, %cst_54 [2] : vector<4x16x16xf32> to vector<4x16xf32>
    %195 = vector.shape_cast %194 : vector<4x16xf32> to vector<4x16x1xf32>
    %196 = tpu.reciprocal %195 {approx = true} : vector<4x16x1xf32> -> vector<4x16x1xf32>
    %197 = vector.broadcast %196 : vector<4x16x1xf32> to vector<4x16x16xf32>
    %198 = arith.mulf %193, %197 : vector<4x16x16xf32>
    %199 = arith.truncf %198 : vector<4x16x16xf32> to vector<4x16x16xbf16>
    "tpu.trace_start"() <{level = 10 : i32, message = "bnm,bmd->bnd"}> : () -> ()
    %cst_55 = arith.constant dense<0.000000e+00> : vector<4x16x32xf32>
    %200 = tpu.matmul %199, %181, %cst_55 {dimension_numbers = #tpu.dot_dimension_numbers<[2], [1], [1], [2], [0, 0, 0, 1, 1, 2], [0], [0]>} : vector<4x16x16xbf16>, vector<4x16x32xbf16>, vector<4x16x32xf32> -> vector<4x16x32xf32>
    "tpu.trace_stop"() : () -> ()
    %201 = vector.shape_cast %200 : vector<4x16x32xf32> to vector<64x32xf32>
    %202 = arith.truncf %201 : vector<64x32xf32> to vector<64x32xbf16>
    %c0_56 = arith.constant 0 : index
    %c64_57 = arith.constant 64 : index
    %203 = vector.load %arg12[%c0_56, %c64_57] : memref<64x128xbf16, #tpu.memory_space<vmem>>, vector<64x32xbf16>
    tpu.vector_store %arg12[%c0_56, %c64_57], %202 {strides = array<i32>} : memref<64x128xbf16, #tpu.memory_space<vmem>>, vector<64x32xbf16>,
    %c0_58 = arith.constant 0 : index
    %c96 = arith.constant 96 : index
    %204 = vector.load %arg11[%c0_58, %c96] : memref<64x384xbf16, #tpu.memory_space<vmem>>, vector<64x32xbf16>
    %205 = arith.extf %204 : vector<64x32xbf16> to vector<64x32xf32>
    %206 = vector.extract_strided_slice %7 {offsets = [3, 0], sizes = [1, 32], strides = [1, 1]} : vector<4x32xf32> to vector<1x32xf32>
    %207 = vector.shape_cast %206 : vector<1x32xf32> to vector<32xf32>
    %208 = vector.shape_cast %207 : vector<32xf32> to vector<1x32xf32>
    %209 = vector.broadcast %208 : vector<1x32xf32> to vector<64x32xf32>
    %210 = arith.addf %205, %209 : vector<64x32xf32>
    %c0_59 = arith.constant 0 : index
    %c224 = arith.constant 224 : index
    %211 = vector.load %arg11[%c0_59, %c224] : memref<64x384xbf16, #tpu.memory_space<vmem>>, vector<64x32xbf16>
    %212 = arith.extf %211 : vector<64x32xbf16> to vector<64x32xf32>
    %c0_60 = arith.constant 0 : index
    %c352 = arith.constant 352 : index
    %213 = vector.load %arg11[%c0_60, %c352] : memref<64x384xbf16, #tpu.memory_space<vmem>>, vector<64x32xbf16>
    %214 = arith.extf %213 : vector<64x32xbf16> to vector<64x32xf32>
    %215 = vector.extract_strided_slice %8 {offsets = [3, 0], sizes = [1, 32], strides = [1, 1]} : vector<4x32xf32> to vector<1x32xf32>
    %216 = vector.shape_cast %215 : vector<1x32xf32> to vector<32xf32>
    %217 = vector.shape_cast %216 : vector<32xf32> to vector<1x32xf32>
    %218 = vector.broadcast %217 : vector<1x32xf32> to vector<64x32xf32>
    %219 = arith.addf %214, %218 : vector<64x32xf32>
    %220 = arith.truncf %219 : vector<64x32xf32> to vector<64x32xbf16>
    %221 = vector.extract_strided_slice %9 {offsets = [3, 0], sizes = [1, 1], strides = [1, 1]} : vector<4x1xf32> to vector<1x1xf32>
    %222 = vector.extract %221[0, 0] : f32 from vector<1x1xf32>
    %223 = arith.mulf %210, %210 : vector<64x32xf32>
    %cst_61 = arith.constant dense<0.000000e+00> : vector<64xf32>
    %224 = vector.multi_reduction <add>, %223, %cst_61 [1] : vector<64x32xf32> to vector<64xf32>
    %225 = vector.shape_cast %224 : vector<64xf32> to vector<64x1xf32>
    %cst_62 = arith.constant 1.000000e-24 : f32
    %226 = vector.broadcast %cst_62 : f32 to vector<64x1xf32>
    %227 = arith.maximumf %225, %226 : vector<64x1xf32>
    %228 = math.rsqrt %227 : vector<64x1xf32>
    %229 = vector.broadcast %222 : f32 to vector<64x1xf32>
    %230 = arith.mulf %229, %228 : vector<64x1xf32>
    %231 = arith.mulf %212, %212 : vector<64x32xf32>
    %cst_63 = arith.constant dense<0.000000e+00> : vector<64xf32>
    %232 = vector.multi_reduction <add>, %231, %cst_63 [1] : vector<64x32xf32> to vector<64xf32>
    %233 = vector.shape_cast %232 : vector<64xf32> to vector<64x1xf32>
    %cst_64 = arith.constant 1.000000e-24 : f32
    %234 = vector.broadcast %cst_64 : f32 to vector<64x1xf32>
    %235 = arith.maximumf %233, %234 : vector<64x1xf32>
    %236 = math.rsqrt %235 : vector<64x1xf32>
    %237 = vector.broadcast %230 : vector<64x1xf32> to vector<64x32xf32>
    %238 = arith.mulf %210, %237 : vector<64x32xf32>
    %239 = arith.truncf %238 : vector<64x32xf32> to vector<64x32xbf16>
    %240 = vector.shape_cast %239 : vector<64x32xbf16> to vector<4x16x32xbf16>
    %241 = vector.broadcast %236 : vector<64x1xf32> to vector<64x32xf32>
    %242 = arith.mulf %212, %241 : vector<64x32xf32>
    %243 = arith.truncf %242 : vector<64x32xf32> to vector<64x32xbf16>
    %244 = vector.shape_cast %243 : vector<64x32xbf16> to vector<4x16x32xbf16>
    %245 = vector.shape_cast %220 : vector<64x32xbf16> to vector<4x16x32xbf16>
    "tpu.trace_start"() <{level = 10 : i32, message = "bnd,bmd->bnm"}> : () -> ()
    %cst_65 = arith.constant dense<0.000000e+00> : vector<4x16x16xf32>
    %246 = tpu.matmul %240, %244, %cst_65 {dimension_numbers = #tpu.dot_dimension_numbers<[2], [2], [1], [1], [0, 0, 0, 1, 1, 1], [0], [0]>} : vector<4x16x32xbf16>, vector<4x16x32xbf16>, vector<4x16x16xf32> -> vector<4x16x16xf32>
    "tpu.trace_stop"() : () -> ()
    %247 = vector.extract_strided_slice %10 {offsets = [3, 0, 0], sizes = [1, 16, 16], strides = [1, 1, 1]} : vector<4x16x16xf32> to vector<1x16x16xf32>
    %248 = vector.shape_cast %247 : vector<1x16x16xf32> to vector<16x16xf32>
    %249 = vector.shape_cast %248 : vector<16x16xf32> to vector<1x16x16xf32>
    %250 = vector.broadcast %249 : vector<1x16x16xf32> to vector<4x16x16xf32>
    %251 = arith.addf %246, %250 : vector<4x16x16xf32>
    %252 = arith.addf %251, %11 : vector<4x16x16xf32>
    %cst_66 = arith.constant dense<0xFF800000> : vector<4x16xf32>
    %253 = vector.multi_reduction <maximumf>, %252, %cst_66 [2] : vector<4x16x16xf32> to vector<4x16xf32>
    %254 = vector.shape_cast %253 : vector<4x16xf32> to vector<4x16x1xf32>
    %255 = vector.broadcast %254 : vector<4x16x1xf32> to vector<4x16x16xf32>
    %256 = arith.subf %252, %255 : vector<4x16x16xf32>
    %257 = math.exp %256 : vector<4x16x16xf32>
    %cst_67 = arith.constant dense<0.000000e+00> : vector<4x16xf32>
    %258 = vector.multi_reduction <add>, %257, %cst_67 [2] : vector<4x16x16xf32> to vector<4x16xf32>
    %259 = vector.shape_cast %258 : vector<4x16xf32> to vector<4x16x1xf32>
    %260 = tpu.reciprocal %259 {approx = true} : vector<4x16x1xf32> -> vector<4x16x1xf32>
    %261 = vector.broadcast %260 : vector<4x16x1xf32> to vector<4x16x16xf32>
    %262 = arith.mulf %257, %261 : vector<4x16x16xf32>
    %263 = arith.truncf %262 : vector<4x16x16xf32> to vector<4x16x16xbf16>
    "tpu.trace_start"() <{level = 10 : i32, message = "bnm,bmd->bnd"}> : () -> ()
    %cst_68 = arith.constant dense<0.000000e+00> : vector<4x16x32xf32>
    %264 = tpu.matmul %263, %245, %cst_68 {dimension_numbers = #tpu.dot_dimension_numbers<[2], [1], [1], [2], [0, 0, 0, 1, 1, 2], [0], [0]>} : vector<4x16x16xbf16>, vector<4x16x32xbf16>, vector<4x16x32xf32> -> vector<4x16x32xf32>
    "tpu.trace_stop"() : () -> ()
    %265 = vector.shape_cast %264 : vector<4x16x32xf32> to vector<64x32xf32>
    %266 = arith.truncf %265 : vector<64x32xf32> to vector<64x32xbf16>
    %c0_69 = arith.constant 0 : index
    %c96_70 = arith.constant 96 : index
    %267 = vector.load %arg12[%c0_69, %c96_70] : memref<64x128xbf16, #tpu.memory_space<vmem>>, vector<64x32xbf16>
    tpu.vector_store %arg12[%c0_69, %c96_70], %266 {strides = array<i32>} : memref<64x128xbf16, #tpu.memory_space<vmem>>, vector<64x32xbf16>,
    %c0_71 = arith.constant 0 : index
    %c0_72 = arith.constant 0 : index
    %268 = vector.load %arg12[%c0_71, %c0_72] : memref<64x128xbf16, #tpu.memory_space<vmem>>, vector<64x128xbf16>
    %c0_73 = arith.constant 0 : index
    %c0_74 = arith.constant 0 : index
    %269 = vector.load %arg8[%c0_73, %c0_74] : memref<128x128xbf16, #tpu.memory_space<vmem>>, vector<128x128xbf16>
    %cst_75 = arith.constant dense<0.000000e+00> : vector<64x128xf32>
    %270 = tpu.matmul %268, %269, %cst_75 {dimension_numbers = #tpu.dot_dimension_numbers<[1], [0], [0], [1], [0, 0, 1, 1], [], []>} : vector<64x128xbf16>, vector<128x128xbf16>, vector<64x128xf32> -> vector<64x128xf32>
    %c0_76 = arith.constant 0 : index
    %c0_77 = arith.constant 0 : index
    %271 = vector.load %arg9[%c0_76, %c0_77] : memref<1x128xf32, #tpu.memory_space<vmem>>, vector<1x128xf32>
    %272 = vector.broadcast %271 : vector<1x128xf32> to vector<64x128xf32>
    %273 = arith.addf %270, %272 : vector<64x128xf32>
    %274 = vector.shape_cast %273 : vector<64x128xf32> to vector<4x16x128xf32>
    %275 = arith.truncf %274 : vector<4x16x128xf32> to vector<4x16x128xbf16>
    %c0_78 = arith.constant 0 : index
    %c0_79 = arith.constant 0 : index
    %c0_80 = arith.constant 0 : index
    %276 = vector.load %arg10[%c0_78, %c0_79, %c0_80] : memref<4x16x128xbf16, #tpu.memory_space<vmem>>, vector<4x16x128xbf16>
    tpu.vector_store %arg10[%c0_78, %c0_79, %c0_80], %275 {strides = array<i32>} : memref<4x16x128xbf16, #tpu.memory_space<vmem>>, vector<4x16x128xbf16>,
    return
  }
  func.func @transform_0(%arg0: i32) -> (i32, i32, i32) {
    %c0_i32 = arith.constant 0 : i32
    %c0_i32_0 = arith.constant 0 : i32
    %c0_i32_1 = arith.constant 0 : i32
    return %arg0, %c0_i32, %c0_i32_0 : i32, i32, i32
  }
  func.func @transform_1(%arg0: i32) -> (i32, i32) {
    %c0_i32 = arith.constant 0 : i32
    %c0_i32_0 = arith.constant 0 : i32
    %c0_i32_1 = arith.constant 0 : i32
    return %c0_i32, %c0_i32_0 : i32, i32
  }
  func.func @transform_2(%arg0: i32) -> (i32, i32) {
    %c0_i32 = arith.constant 0 : i32
    %c0_i32_0 = arith.constant 0 : i32
    %c0_i32_1 = arith.constant 0 : i32
    return %c0_i32, %c0_i32_0 : i32, i32
  }
  func.func @transform_3(%arg0: i32) -> (i32, i32) {
    %c0_i32 = arith.constant 0 : i32
    %c0_i32_0 = arith.constant 0 : i32
    %c0_i32_1 = arith.constant 0 : i32
    return %c0_i32, %c0_i32_0 : i32, i32
  }
  func.func @transform_4(%arg0: i32) -> (i32, i32) {
    %c0_i32 = arith.constant 0 : i32
    %c0_i32_0 = arith.constant 0 : i32
    %c0_i32_1 = arith.constant 0 : i32
    return %c0_i32, %c0_i32_0 : i32, i32
  }
  func.func @transform_5(%arg0: i32) -> (i32, i32, i32) {
    %c0_i32 = arith.constant 0 : i32
    %c0_i32_0 = arith.constant 0 : i32
    %c0_i32_1 = arith.constant 0 : i32
    %c0_i32_2 = arith.constant 0 : i32
    return %c0_i32, %c0_i32_0, %c0_i32_1 : i32, i32, i32
  }
  func.func @transform_6(%arg0: i32) -> (i32, i32, i32) {
    %c1_i32 = arith.constant 1 : i32
    %c0_i32 = arith.constant 0 : i32
    %0 = arith.cmpi eq, %c1_i32, %c0_i32 : i32
    %c1_i32_0 = arith.constant 1 : i32
    %1 = arith.select %0, %c1_i32_0, %c1_i32 : i32
    %2 = arith.remsi %arg0, %1 : i32
    %c0_i32_1 = arith.constant 0 : i32
    %3 = arith.cmpi ne, %2, %c0_i32_1 : i32
    %c0_i32_2 = arith.constant 0 : i32
    %4 = arith.cmpi slt, %2, %c0_i32_2 : i32
    %c0_i32_3 = arith.constant 0 : i32
    %5 = arith.cmpi slt, %1, %c0_i32_3 : i32
    %6 = arith.xori %4, %5 : i1
    %7 = arith.andi %6, %3 : i1
    %8 = arith.addi %2, %1 : i32
    %9 = arith.select %7, %8, %2 : i32
    %c0_i32_4 = arith.constant 0 : i32
    %c0_i32_5 = arith.constant 0 : i32
    %c0_i32_6 = arith.constant 0 : i32
    return %9, %c0_i32_4, %c0_i32_5 : i32, i32, i32
  }
  func.func @transform_7(%arg0: i32) -> (i32, i32) {
    %c0_i32 = arith.constant 0 : i32
    %c0_i32_0 = arith.constant 0 : i32
    %c0_i32_1 = arith.constant 0 : i32
    return %c0_i32, %c0_i32_0 : i32, i32
  }
  func.func @transform_8(%arg0: i32) -> (i32, i32) {
    %c0_i32 = arith.constant 0 : i32
    %c0_i32_0 = arith.constant 0 : i32
    %c0_i32_1 = arith.constant 0 : i32
    return %c0_i32, %c0_i32_0 : i32, i32
  }
  func.func @transform_9(%arg0: i32) -> (i32, i32, i32) {
    %c0_i32 = arith.constant 0 : i32
    %c0_i32_0 = arith.constant 0 : i32
    %c0_i32_1 = arith.constant 0 : i32
    return %arg0, %c0_i32, %c0_i32_0 : i32, i32, i32
  }
}

</mosaic_0001>

<bundles_post_ra>
// kernel: tpu_custom_call.1
= control target key start
LH: loop header
LB: loop body
LE: loop exit
PB: predicated region body
PF: predicated region fallthrough
CT: control target
= control target key end

     0   :  { %s7408_s0 = inlined_call_operand.hbm [shape: f32[8,16,128], index: 0, kind: input, shape index: {}]   ;;  %s7409_s1 = inlined_call_operand.hbm [shape: bf16[128,384], index: 1, kind: input, shape index: {}]   ;;  %s7410_s2 = inlined_call_operand.vmem [shape: f32[4,32], index: 2, kind: input, shape index: {}]   ;;  %s7411_s3 = inlined_call_operand.vmem [shape: f32[4,32], index: 3, kind: input, shape index: {}]   ;;  %s7412_s4 = inlined_call_operand.vmem [shape: f32[4,1], index: 4, kind: input, shape index: {}]   ;;  %s7413_s5 = inlined_call_operand.hbm [shape: f32[4,16,16], index: 5, kind: input, shape index: {}]   ;;  %s7414_s6 = inlined_call_operand.hbm [shape: f32[4,16,16], index: 6, kind: input, shape index: {}]   ;;  %s7415_s7 = inlined_call_operand.hbm [shape: bf16[128,128], index: 7, kind: input, shape index: {}]   ;;  %s7416_s8 = inlined_call_operand.vmem [shape: f32[1,128], index: 8, kind: input, shape index: {}]   ;;  %s7417_s9 = inlined_call_operand.hbm [shape: bf16[8,16,128], index: 9, kind: output, shape index: {}]  }
   0x1   :  { %7441 = sst [smem:[#allocation33_spill]] %s7409_s1 }
   0x2   :  { %7442 = sst [smem:[#allocation34_spill]] %s7413_s5 }
   0x3   :  { %7443 = sst [smem:[#allocation35_spill]] %s7414_s6 }
   0x4   :  { %14 = vsyncpa [#allocation5], 0 }
   0x5   :  { %16 = vsyncpa [#allocation5 + $0x1], 0 }
   0x6   :  { %17 = vsyncpa [#allocation8], 0 }
   0x7   :  { %18 = vsyncpa [#allocation11], 0 }
   0x8   :  { %19 = vsyncpa [#allocation6], 0 }
   0x9   :  { %21 = vsyncpa [#allocation6 + $0x1], 0  ;;  %s5661_s30 = smov 0   ;;  %s5663_s10 = smov 0  }
   0xa   :  { %s5665_s11 = smov 0   ;;  %s5667_s12 = smov 0  }
   0xb LB: > { %s5682_s13 = sadd.s32 4294967295, %s5590_s12   ;;  %s4405_s14 = sadd.s32 4294967294, %s5590_s12   ;;  %s5590_s12 = sphi %s5667_s12, %s7513_s12   ;;  %s5586_s11 = sphi %s5665_s11, %s7512_s11   ;;  %s5582_s10 = sphi %s5663_s10, %s7511_s10   ;;  %s5578_s30 = sphi %s5661_s30, %s7510_s30  }
   0xc   : > { %p47_p0 = scmp.ne.s32.totalorder %s5582_s10, %s5578_s30  ;;  %p7420_p1 = scmp.eq.s32.totalorder %s5682_s13, 0 }
   0xd   : > { %p245_p3 = scmp.eq.s32.totalorder %s4405_s14, 1  ;;  %p4406_p5 = scmp.ge.s32.totalorder %s5590_s12, 1 }
   0xe   : > { %p5691_p4 = por %p7420_p1, %p47_p0  ;;  %p252_p7 = scmp.lt.s32.totalorder %s5590_s12, 3 }
   0xf   : > { %p5696_p6 = por %p245_p3, %p47_p0  ;;  %s5592_s18 = smov [#allocation7]  }
  0x10   : > { %s7444_s15 = scalar_select %p5691_p4, 1, 0 }
  0x11   : > { %s7445_s16 = scalar_select %p5696_p6, 1, 0 }
  0x12   : > { %p5701_p8 = pnand %p4406_p5, %p252_p7  ;;  %s264_s19 = sshll.u32 %s5592_s18, 4  ;;  %s265_s19 = int_to_ptr.vmem [resolvable:$true] %s264_s19 }
  0x13   : > { %s5593_s21 = smov [#allocation10]   ;;  %s5397_s23 = scalar_lea.vmem %s265_s19, 3072 }
  0x14   : > { %s7446_s17 = scalar_select %p5701_p8, 1, 0 }
  0x15   : > { %p4993_p9 = pneg %p5701_p8  ;;  %s299_s22 = sshll.u32 %s5593_s21, 4  ;;  %s300_s22 = int_to_ptr.vmem [resolvable:$true] %s299_s22 }
  0x16   : > { %p5398_p13 = scmp.ne.s32.totalorder %s265_s19, %s5397_s23  ;;  %p5405_p5 = scmp.lt.s32.totalorder %s265_s19, %s265_s19 }
  0x17   : > { %p5710_p11 = pnand %p4993_p9, %p7420_p1  ;;  %p5406_p7 = scmp.lt.s32.totalorder %s5397_s23, %s5397_s23 }
  0x19   : > { %p5388_p12 = pneg %p5710_p11  ;;  %p5407_p10 = por %p5406_p7, %p5405_p5 }
  0x1b   : > { %p5400_p0 = pnand %p5398_p13, %p5388_p12 }
  0x1d   : > { %p5401_p3 = pneg %p5400_p0 }
  0x1f   : > { %p5408_p2 = pnand %p5407_p10, %p5401_p3 }
  0x21   : > { %5411 = shalt.err (!%p5408_p2)
}
  0x22   : > { %s5594_s24 = smov 192   ;;  %s5595_s25 = smov 12  }
  0x23   : > { %s7448_s1 = sld [smem:[#allocation33_spill]]  ;;  %s5596_s28 = smov [#allocation9]  }
  0x24   : > { %s286_s29 = sshll.u32 %s5596_s28, 4  ;;  %s5423_s14 = scalar_lea.vmem %s300_s22, 1024  ;;  %s287_s29 = int_to_ptr.vmem [resolvable:$true] %s286_s29 }
  0x25   : > { %p5424_p9 = scmp.ne.s32.totalorder %s300_s22, %s5423_s14  ;;  %p5431_p10 = scmp.lt.s32.totalorder %s300_s22, %s300_s22 }
  0x26   : > { %p5432_p2 = scmp.lt.s32.totalorder %s5423_s14, %s5423_s14 }
  0x27   : > { %p5426_p13 = pnand %p5424_p9, %p5388_p12 }
  0x28   : > { %p5433_p3 = por %p5432_p2, %p5431_p10 }
  0x29   : > { %4996 = dma.hbm_to_vmem [thread:$0]  (!%p5710_p11), %s7448_s1, 3072, %s265_s19, [#allocation8], %s5594_s24, %s5594_s24, %s5595_s25  }
  0x2a   : > { %p5427_p0 = pneg %p5426_p13 }
  0x2c   : > { %p5434_p5 = pnand %p5433_p3, %p5427_p0 }
  0x2e   : > { %5437 = shalt.err (!%p5434_p5)
}
  0x2f   : > { %s7418_s18 = smov 128   ;;  %s7419_s21 = smov 8  }
  0x30   : > { %s7449_s6 = sld [smem:[#allocation35_spill]]  ;;  %s5449_s24 = scalar_lea.vmem %s287_s29, 1024 }
  0x31   : > { %p5450_p7 = scmp.ne.s32.totalorder %s287_s29, %s5449_s24  ;;  %p5457_p0 = scmp.lt.s32.totalorder %s287_s29, %s287_s29 }
  0x32   : > { %p5458_p10 = scmp.lt.s32.totalorder %s5449_s24, %s5449_s24 }
  0x33   : > { %p5452_p9 = pnand %p5450_p7, %p5388_p12 }
  0x34   : > { %p5459_p2 = por %p5458_p10, %p5457_p0 }
  0x35   : > { %p5453_p13 = pneg %p5452_p9 }
  0x36   : > { %5002 = dma.hbm_to_vmem [thread:$0]  (!%p5710_p11), %s7449_s6, 1024, %s300_s22, [#allocation11], %s7418_s18, %s7418_s18, %s7419_s21  }
  0x37   : > { %p5460_p3 = pnand %p5459_p2, %p5453_p13 }
  0x39   : > { %5463 = shalt.err (!%p5460_p3)
}
  0x3a   : > { %s7450_s5 = sld [smem:[#allocation34_spill]]  ;;  %s5599_s22 = smov [#allocation12]  }
  0x3b   : > { %s312_s27 = sshll.u32 %s5599_s22, 4  ;;  %s313_s27 = int_to_ptr.vmem [resolvable:$true] %s312_s27 }
  0x3c   : > { %s5475_s28 = scalar_lea.vmem %s313_s27, 1024  ;;  %p5483_p13 = scmp.lt.s32.totalorder %s313_s27, %s313_s27 }
  0x3d   : > { %p5476_p5 = scmp.ne.s32.totalorder %s313_s27, %s5475_s28  ;;  %p5484_p0 = scmp.lt.s32.totalorder %s5475_s28, %s5475_s28 }
  0x3f   : > { %p5478_p7 = pnand %p5476_p5, %p5388_p12  ;;  %p5485_p10 = por %p5484_p0, %p5483_p13 }
  0x40   : > { %4999 = dma.hbm_to_vmem [thread:$0]  (!%p5710_p11), %s7450_s5, 1024, %s287_s29, [#allocation8], %s7418_s18, %s7418_s18, %s7419_s21  }
  0x41   : > { %p5479_p9 = pneg %p5478_p7 }
  0x43   : > { %p5486_p2 = pnand %p5485_p10, %p5479_p9 }
  0x45   : > { %5489 = shalt.err (!%p5486_p2)
}
  0x46   : > { %s5600_s14 = smov 64   ;;  %s5601_s29 = smov 4  }
  0x47   : > { %5005 = dma.hbm_to_vmem [thread:$0]  (!%p5710_p11), %s7415_s7, 1024, %s313_s27, [#allocation11], %s5600_s14, %s5600_s14, %s5601_s29  }
  0x48   : > { %s5755_s24 = sadd.s32 1, %s5590_s12   ;;  %s34_s26 = sadd.s32 1, %s5586_s11 }
  0x49   : > { %s31_s25 = ssub.s32 %s5590_s12, %s5755_s24  ;;  %p41_p3 = scmp.ne.s32.totalorder %s5586_s11, %s5582_s10 }
  0x4a   : > { %p32_p12 = scmp.eq.s32.totalorder %s31_s25, 0  ;;  %p42_p5 = scmp.eq.s32.totalorder %s5590_s12, 0 }
  0x4b   : > { %p7451_p9 = scmp.eq.s32.totalorder %s5682_s13, 1  ;;  %p5018_p0 = scmp.lt.s32.totalorder %s5590_s12, 2 }
  0x4c   : > { %s5764_s22 = scalar_select %p32_p12, %s5586_s11, %s34_s26  }
  0x4d   : > { %p43_p7 = por %p42_p5, %p41_p3  ;;  %p5768_p13 = por %p7451_p9, %p41_p3 }
  0x4e   : > { %s329_s20 = sand.u32 1, %s5586_s11   ;;  %s4555_s27 = sshll.u32 %s5590_s12, 10 }
  0x4f   : > { %s7452_s28 = scalar_select %p5768_p13, 1, 0 }
  0x50   : > { %s4412_s19 = sshll.u32 %s329_s20, 6  ;;  %s5778_s23 = scalar_lea.hbm %s7408_s0, %s4555_s27 }
  0x51   : > { %s333_s25 = scalar_lea.vmem [#allocation4], %s4412_s19  ;;  %p5782_p11 = pnand %p5018_p0, %p43_p7 }
  0x52   : > { %s341_s26 = sshll.u32 %s333_s25, 4  ;;  %s5786_s21 = scalar_lea.sflag [#allocation5], %s329_s20  ;;  %s5780_s26 = int_to_ptr.vmem [resolvable:$true] %s341_s26 }
  0x53   : > { %s5490_s1 = scalar_lea.hbm %s5778_s23, 1024  ;;  %p5492_p2 = pneg %p5782_p11 }
  0x54   : > { %p5491_p10 = scmp.ne.s32.totalorder %s5778_s23, %s5490_s1  ;;  %s5495_s19 = scalar_lea.hbm %s7408_s0, 2048 }
  0x55   : > { %p5496_p5 = scmp.lt.s32.totalorder %s5778_s23, %s7408_s0  ;;  %p5497_p7 = scmp.lt.s32.totalorder %s5495_s19, %s5490_s1 }
  0x56   : > { %p5493_p12 = pnand %p5492_p2, %p5491_p10 }
  0x57   : > { %p5498_p9 = por %p5497_p7, %p5496_p5 }
  0x58   : > { %p5494_p3 = pneg %p5493_p12 }
  0x5a   : > { %p5499_p0 = pnand %p5498_p9, %p5494_p3 }
  0x5c   : > { %5502 = shalt.err (!%p5499_p0)
}
  0x5d   : > { %s5503_s20 = scalar_lea.vmem %s5780_s26, 1024  ;;  %s5602_s5 = smov [#allocation4]  }
  0x5e   : > { %p5504_p1 = scmp.ne.s32.totalorder %s5780_s26, %s5503_s20  ;;  %s5508_s6 = sshll.u32 %s5602_s5, 4  ;;  %s5509_s6 = int_to_ptr.vmem [resolvable:$false] %s5508_s6 }
  0x5f   : > { %s5510_s27 = scalar_lea.vmem %s5509_s6, 2048  ;;  %p5511_p12 = scmp.lt.s32.totalorder %s5780_s26, %s5509_s6 }
  0x60   : > { %p5506_p6 = pnand %p5504_p1, %p5492_p2  ;;  %p5512_p13 = scmp.lt.s32.totalorder %s5510_s27, %s5503_s20 }
  0x62   : > { %p5507_p10 = pneg %p5506_p6  ;;  %p5513_p4 = por %p5512_p13, %p5511_p12 }
  0x64   : > { %p5514_p8 = pnand %p5513_p4, %p5507_p10 }
  0x66   : > { %5517 = shalt.err (!%p5514_p8)
}
  0x67   : > { %s7454_s1 = smov 8   ;;  %s7455_s14 = smov 128  }
  0x68   : > { %5009 = dma.hbm_to_vmem [thread:$0]  (!%p5782_p11), %s5778_s23, 1024, %s5780_s26, %s5786_s21, %s7455_s14, %s7455_s14, %s7454_s1  }
  0x69   : > { %p7456_p1 = scmp.ne.s32.totalorder %s7446_s17, 0 }
  0x6b   : > { %353 = sbr.rel (%p7456_p1) target bundleno = 3719 (0xe87), region = 56 }
  0x70   : > { %s5813_s5 = sand.u32 1, %s5582_s10   ;;  %p7457_p4 = scmp.ne.s32.totalorder %s7444_s15, 0 }
  0x71   : > { %s4417_s6 = sshll.u32 %s5813_s5, 6  ;;  %s356_s19 = scalar_lea.sflag [#allocation5], %s5813_s5 }
  0x72   : > { %s5817_s29 = scalar_lea.vmem [#allocation4], %s4417_s6 }
  0x73   : > { %5561 = dma.done.wait (%p7457_p4), %s356_s19, 1024  }
  0x74   : > { %5563 = vsyncadd (%p7457_p4), %s356_s19, 4294966272  ;;  %p7458_p6 = scmp.eq.s32.totalorder %s5682_s13, 0 }
  0x76   : > { %5565 = dma.done.wait (%p7458_p6), [#allocation8], 4096   ;;  %p7459_p8 = pmov %p7458_p6 }
  0x77   : > { %p7460_p13 = pmov %p7458_p6 }
  0x78   : > { %5567 = vsyncadd (%p7459_p8), [#allocation8], 4294963200 }
  0x79   : > { %5569 = dma.done.wait (%p7460_p13), [#allocation11], 2048   ;;  %p7461_p11 = pmov %p7458_p6 }
  0x7a   : > { %v5603_v0 = vmov 0   ;;  %v5073_v1 = vld [vmem:[#allocation7 + $0xac] ss:$12 sps:$4 sm:$0xff]   ;;  %v5075_v2 = vld [vmem:[#allocation7 + $0xa8] ss:$12 sps:$4 sm:$0xff]   ;;  %v413_v8 = vld [vmem:[%s5817_s29] sm:$0xff]  ;;  %v854_v38 = vlaneseq }
  0x7b   : > { %5571 = vsyncadd (%p7461_p11), [#allocation11], 4294965248  ;;  %617 = vmatprep.mubr.bf16.mxu1 %v5603_v0  ;;  %585 = vmatprep.subr.bf16.mxu1 %v5073_v1  ;;  %v5076_v3 = vld [vmem:[#allocation7 + $0x94] ss:$12 sps:$4 sm:$0xff]   ;;  %v5078_v4 = vld [vmem:[#allocation7 + $0x90] ss:$12 sps:$4 sm:$0xff]  }
  0x7c   : > { %586 = vmatpush1.bf16.msra.mxu1 %v5075_v2  ;;  %v5079_v5 = vld [vmem:[#allocation7 + $0x7c] ss:$12 sps:$4 sm:$0xff]   ;;  %v5081_v6 = vld [vmem:[#allocation7 + $0x78] ss:$12 sps:$4 sm:$0xff]   ;;  %v5084_v9 = vld [vmem:[#allocation7 + $0x60] ss:$12 sps:$4 sm:$0xff]  }
  0x7d   : > { %587 = vmatprep.subr.bf16.mxu1 %v5076_v3  ;;  %v5082_v7 = vld [vmem:[#allocation7 + $0x64] ss:$12 sps:$4 sm:$0xff]   ;;  %v414_v10 = vld [vmem:[%s5817_s29 + $0x8] sm:$0xff]  ;;  %v5088_v16 = vld [vmem:[#allocation7 + $0x34] ss:$12 sps:$4 sm:$0xff]   ;;  %v5849_v42 = vshrl.u32 %v854_v38, 7 }
  0x7e   : > { %v5085_v11 = vld [vmem:[#allocation7 + $0x4c] ss:$12 sps:$4 sm:$0xff]   ;;  %v421_v12 = vpack.c.bf16 %v414_v10, %v413_v8  ;;  %v5087_v13 = vld [vmem:[#allocation7 + $0x48] ss:$12 sps:$4 sm:$0xff]   ;;  %v5097_v14 = vld [vmem:[#allocation7 + $0xb0] ss:$12 sps:$4 sm:$0xff]  }
  0x7f   : > { %v5098_v15 = vld [vmem:[#allocation7 + $0x98] ss:$12 sps:$4 sm:$0xff]   ;;  %4725 = vmatprep.subr.bf16.mxu0 %v5097_v14  ;;  %v5099_v17 = vld [vmem:[#allocation7 + $0x80] ss:$12 sps:$4 sm:$0xff]   ;;  %v5090_v18 = vld [vmem:[#allocation7 + $0x30] ss:$12 sps:$4 sm:$0xff]  }
  0x80   : > { %588 = vmatpush1.bf16.msra.mxu1 %v5078_v4  ;;  %4741 = vmatprep.mubr.bf16.mxu0 %v421_v12  ;;  %v5091_v19 = vld [vmem:[#allocation7 + $0x1c] ss:$12 sps:$4 sm:$0xff]   ;;  %v5093_v20 = vld [vmem:[#allocation7 + $0x18] ss:$12 sps:$4 sm:$0xff]   ;;  %v5096_v24 = vld [vmem:[#allocation7] ss:$12 sps:$4 sm:$0xff]  }
  0x81   : > { %589 = vmatprep.subr.bf16.mxu1 %v5079_v5  ;;  %4726 = vmatpush3.bf16.msra.mxu0 %v5097_v14  ;;  %v5100_v21 = vld [vmem:[#allocation7 + $0x68] ss:$12 sps:$4 sm:$0xff]   ;;  %v5094_v22 = vld [vmem:[#allocation7 + $0x4] ss:$12 sps:$4 sm:$0xff]   ;;  %v5103_v26 = vld [vmem:[#allocation7 + $0x20] ss:$12 sps:$4 sm:$0xff]  }
  0x82   : > { %4727 = vmatprep.subr.bf16.mxu0 %v5098_v15  ;;  %v5101_v23 = vld [vmem:[#allocation7 + $0x50] ss:$12 sps:$4 sm:$0xff]   ;;  %v5102_v25 = vld [vmem:[#allocation7 + $0x38] ss:$12 sps:$4 sm:$0xff]   ;;  %v5104_v29 = vld [vmem:[#allocation7 + $0x8] ss:$12 sps:$4 sm:$0xff]  }
  0x83   : > { %v415_v27 = vld [vmem:[%s5817_s29 + $0x10] sm:$0xff]  ;;  %v416_v28 = vld [vmem:[%s5817_s29 + $0x18] sm:$0xff]  ;;  %v417_v31 = vld [vmem:[%s5817_s29 + $0x20] sm:$0xff]  ;;  %7462 = vst [vmem:[#allocation18_spill] sm:$0xff] %v5849_v42  ;;  %v856_v46 = vsub.s32 0, %v5849_v42  ;;  %vm923_vm0 = vcmask 261120  }
  0x84   : > { %590 = vmatpush1.bf16.msra.mxu1 %v5081_v6  ;;  %v422_v30 = vpack.c.bf16 %v416_v28, %v415_v27  ;;  %v418_v32 = vld [vmem:[%s5817_s29 + $0x28] sm:$0xff]  ;;  %v419_v34 = vld [vmem:[%s5817_s29 + $0x30] sm:$0xff]  ;;  %v420_v35 = vld [vmem:[%s5817_s29 + $0x38] sm:$0xff]  ;;  %vm5605_vm1 = vmmov 0   ;;  %s5606_s23 = smov 96   ;;  %s5607_s26 = smov 32  }
  0x85   : > { %591 = vmatprep.subr.bf16.mxu1 %v5082_v7  ;;  %4728 = vmatpush3.bf16.msra.mxu0 %v5098_v15  ;;  %v423_v33 = vpack.c.bf16 %v418_v32, %v417_v31  ;;  %v424_v36 = vpack.c.bf16 %v420_v35, %v419_v34  ;;  %v5846_v37 = vld [vmem:[%s7412_s4] sm:$0xf]  ;;  %vm1241_vm2 = vcmask 130048   ;;  %s5608_s14 = smov 64   ;;  %vm1542_vm3 = vcmask 257024   ;;  %s4613_s29 = sshll.u32 %s5682_s13, 9 }
  0x86   : > { %4729 = vmatprep.subr.bf16.mxu0 %v5099_v17  ;;  %4965 = vpush %v5846_v37  ;;  %v5855_v48 = vld [vmem:[%s7410_s2] sm:$0xf]  ;;  %vm2382_vm4 = vcmask 519424   ;;  %vm3222_vm5 = vcmask 781824   ;;  %vm4062_vm6 = vcmask 1044224   ;;  %s7363_s18 = scalar_lea.hbm %s7417_s9, %s4613_s29  ;;  %p7507_p3 = scmp.ne.s32.totalorder %s7452_s28, 0 }
  0x87   : > { %v5860_v51 = vrot.slane %v5855_v48, %v856_v46  ;;  %s5609_s13 = smov [#allocation13]  }
  0x88   : > { %592 = vmatpush1.bf16.msra.mxu1 %v5084_v9  ;;  %s5522_s20 = sshll.u32 %s5609_s13, 4  ;;  %s5523_s20 = int_to_ptr.vmem [resolvable:$false] %s5522_s20 }
  0x89   : > { %593 = vmatprep.subr.bf16.mxu1 %v5085_v11  ;;  %4730 = vmatpush3.bf16.msra.mxu0 %v5099_v17  ;;  %s5524_s27 = scalar_lea.vmem %s5523_s20, 1024 }
  0x8a   : > { %4731 = vmatprep.subr.bf16.mxu0 %v5100_v21 }
  0x8c   : > { %594 = vmatpush1.bf16.msra.mxu1 %v5087_v13 }
  0x8d   : > { %595 = vmatprep.subr.bf16.mxu1 %v5088_v16  ;;  %4732 = vmatpush3.bf16.msra.mxu0 %v5100_v21 }
  0x8e   : > { %4733 = vmatprep.subr.bf16.mxu0 %v5101_v23 }
  0x90   : > { %596 = vmatpush1.bf16.msra.mxu1 %v5090_v18 }
  0x91   : > { %597 = vmatprep.subr.bf16.mxu1 %v5091_v19  ;;  %4734 = vmatpush3.bf16.msra.mxu0 %v5101_v23 }
  0x92   : > { %4735 = vmatprep.subr.bf16.mxu0 %v5102_v25 }
  0x94   : > { %598 = vmatpush1.bf16.msra.mxu1 %v5093_v20 }
  0x95   : > { %599 = vmatprep.subr.bf16.mxu1 %v5094_v22  ;;  %4736 = vmatpush3.bf16.msra.mxu0 %v5102_v25 }
  0x96   : > { %4737 = vmatprep.subr.bf16.mxu0 %v5103_v26 }
  0x98   : > { %600 = vmatpush1.bf16.msra.mxu1 %v5096_v24 }
  0x99   : > { %4738 = vmatpush3.bf16.msra.mxu0 %v5103_v26 }
  0x9a   : > { %4739 = vmatprep.subr.bf16.mxu0 %v5104_v29 }
  0x9b   : > { %618 = vmatmul.mubr.bf16.vlgmr.msra.gmra.mxu1 %v421_v12 }
  0x9c   : > { %627 = vmatprep.mubr.bf16.mxu1 %v5603_v0 }
  0x9d   : > { %4740 = vmatpush3.bf16.msra.mxu0 %v5104_v29 }
  0xa0   : > { %4742 = vmatmul.mubr.bf16.vlgmr.msra.gmra.mxu0 %v422_v30 }
  0xa1   : > { %4745 = vmatprep.mubr.bf16.mxu0 %v423_v33 }
  0xa3   : > { %628 = vmatmul.mubr.bf16.gmra.mxu1 %v422_v30 }
  0xa4   : > { %637 = vmatprep.mubr.bf16.mxu1 %v5603_v0 }
  0xa8   : > { %4746 = vmatmul.mubr.bf16.gmra.mxu0 %v424_v36 }
  0xab   : > { %638 = vmatmul.mubr.bf16.gmra.mxu1 %v423_v33 }
  0xac   : > { %647 = vmatprep.mubr.bf16.mxu1 %v5603_v0 }
  0xb3   : > { %648 = vmatmul.mubr.bf16.gmra.mxu1 %v424_v36 }
  0xb7   : > { %s4966_s25 = spop %4965 }
 0x15b   : > { %v619_v39 = vpop.f32.mrf.mxu1 }
 0x15d   : > { %v621_v40 = vpop.f32.mrf.mxu1 }
 0x15e   : > { %v4556_v41 = vpack.c.bf16 %v621_v40, %v619_v39 }
 0x15f   : > { %v623_v43 = vpop.f32.mrf.mxu1 }
 0x160   : > { %803 = vst [vmem:[#allocation2] sm:$0xff] %v4556_v41  ;;  %v4743_v57 = vpop.f32.mrf.mxu0 }
 0x161   : > { %v625_v44 = vpop.f32.mrf.mxu1  ;;  %v4561_v61 = vpack.c.bf16 %v4743_v57, %v4743_v57 }
 0x162   : > { %v4558_v45 = vpack.c.bf16 %v625_v44, %v623_v43  ;;  %v692_v0 = vpop.f32.mrf.mxu0 }
 0x163   : > { %v629_v47 = vpop.f32.mrf.mxu1  ;;  %808 = vst [vmem:[#allocation2 + $0x20] sm:$0xf] %v4561_v61  ;;  %v4557_v13 = vpack.c.bf16 %v692_v0, %v692_v0 }
 0x164   : > { %805 = vst [vmem:[#allocation2 + $0xc] sm:$0xff] %v4558_v45  ;;  %v4744_v6 = vpop.f32.mrf.mxu0 }
 0x165   : > { %v631_v49 = vpop.f32.mrf.mxu1  ;;  %v4563_v14 = vpack.c.bf16 %v4744_v6, %v4744_v6  ;;  %804 = vst [vmem:[#allocation2 + $0x8] sm:$0xf] %v4557_v13 }
 0x166   : > { %v4560_v50 = vpack.c.bf16 %v631_v49, %v629_v47  ;;  %v695_v15 = vpop.f32.mrf.mxu0 }
 0x167   : > { %v633_v52 = vpop.f32.mrf.mxu1  ;;  %v866_v53 = vld [vmem:[#allocation2] sm:$0xff]   ;;  %810 = vst [vmem:[#allocation2 + $0x2c] sm:$0xf] %v4563_v14  ;;  %v4559_v21 = vpack.c.bf16 %v695_v15, %v695_v15 }
 0x168   : > { %807 = vst [vmem:[#allocation2 + $0x18] sm:$0xff] %v4560_v50  ;;  %v5862_v54 = vunpack.c.h.bf16 %v866_v53  ;;  %v846_v55 = vunpack.c.l.bf16 %v866_v53  ;;  %v4747_v22 = vpop.f32.mrf.mxu0 }
 0x169   : > { %v635_v56 = vpop.f32.mrf.mxu1  ;;  %806 = vst [vmem:[#allocation2 + $0x14] sm:$0xf] %v4559_v21  ;;  %v4569_v29 = vpack.c.bf16 %v4747_v22, %v4747_v22 }
 0x16a   : > { %v4562_v58 = vpack.c.bf16 %v635_v56, %v633_v52  ;;  %v973_v59 = vmul.f32 %v5862_v54, %v5862_v54  ;;  %v5867_v60 = vadd.f32 %v5860_v51, %v846_v55  ;;  %v708_v30 = vpop.f32.mrf.mxu0 }
 0x16b   : > { %v639_v62 = vpop.f32.mrf.mxu1  ;;  %v867_v63 = vld [vmem:[#allocation2 + $0xc] sm:$0xff]   ;;  %816 = vst [vmem:[#allocation2 + $0x50] sm:$0xf] %v4569_v29  ;;  %v4565_v44 = vpack.c.bf16 %v708_v30, %v708_v30  ;;  %v7425_v30 = vmov 0.0  }
 0x16c   : > { %809 = vst [vmem:[#allocation2 + $0x24] sm:$0xff] %v4562_v58  ;;  %v981_v1 = vsel %vm923_vm0, %v973_v59, 0.0  ;;  %v915_v2 = vmul.f32 %v5867_v60, %v5867_v60  ;;  %v5872_v3 = vunpack.c.h.bf16 %v867_v63  ;;  %v847_v4 = vunpack.c.l.bf16 %v867_v63  ;;  %v4748_v36 = vpop.f32.mrf.mxu0  ;;  %4749 = vmatprep.subr.bf16.mxu1 %v7425_v30  ;;  %4761 = vmatprep.subr.bf16.mxu0 %v7425_v30 }
 0x16d   : > { %982 = vadd.xlane.f32.xlu0 %v981_v1  ;;  %v641_v5 = vpop.f32.mrf.mxu1  ;;  %v4571_v45 = vpack.c.bf16 %v4748_v36, %v4748_v36  ;;  %812 = vst [vmem:[#allocation2 + $0x38] sm:$0xf] %v4565_v44  ;;  %4751 = vmatprep.mubr.msk.bf16.mxu1 %vm5605_vm1, %v7425_v30 }
 0x16e   : > { %v4564_v7 = vpack.c.bf16 %v641_v5, %v639_v62  ;;  %v924_v8 = vsel %vm923_vm0, %v915_v2, 0.0  ;;  %v974_v9 = vmul.f32 %v5872_v3, %v5872_v3  ;;  %v5878_v10 = vadd.f32 %v5860_v51, %v847_v4  ;;  %v711_v47 = vpop.f32.mrf.mxu0  ;;  %4763 = vmatprep.mubr.msk.bf16.mxu0 %vm5605_vm1, %v7425_v30 }
 0x16f   : > { %925 = vadd.xlane.f32.xlu1 %v924_v8  ;;  %v643_v11 = vpop.f32.mrf.mxu1  ;;  %v868_v12 = vld [vmem:[#allocation2 + $0x18] sm:$0xff]   ;;  %818 = vst [vmem:[#allocation2 + $0x5c] sm:$0xf] %v4571_v45  ;;  %v4567_v56 = vpack.c.bf16 %v711_v47, %v711_v47 }
 0x170   : > { %811 = vst [vmem:[#allocation2 + $0x30] sm:$0xff] %v4564_v7  ;;  %v984_v16 = vsel %vm923_vm0, %v974_v9, 0.0  ;;  %v916_v17 = vmul.f32 %v5878_v10, %v5878_v10  ;;  %v5883_v18 = vunpack.c.h.bf16 %v868_v12  ;;  %v848_v19 = vunpack.c.l.bf16 %v868_v12 }
 0x171   : > { %985 = vadd.xlane.f32.xlu0 %v984_v16  ;;  %v645_v20 = vpop.f32.mrf.mxu1  ;;  %814 = vst [vmem:[#allocation2 + $0x44] sm:$0xf] %v4567_v56 }
 0x172   : > { %v4566_v23 = vpack.c.bf16 %v645_v20, %v643_v11  ;;  %v927_v24 = vsel %vm923_vm0, %v916_v17, 0.0  ;;  %v975_v25 = vmul.f32 %v5883_v18, %v5883_v18  ;;  %v5889_v26 = vadd.f32 %v5860_v51, %v848_v19 }
 0x173   : > { %928 = vadd.xlane.f32.xlu1 %v927_v24  ;;  %v649_v27 = vpop.f32.mrf.mxu1  ;;  %v869_v28 = vld [vmem:[#allocation2 + $0x24] sm:$0xff]  }
 0x174   : > { %813 = vst [vmem:[#allocation2 + $0x3c] sm:$0xff] %v4566_v23  ;;  %v987_v31 = vsel %vm923_vm0, %v975_v25, 0.0  ;;  %v917_v32 = vmul.f32 %v5889_v26, %v5889_v26  ;;  %v5894_v33 = vunpack.c.h.bf16 %v869_v28  ;;  %v849_v34 = vunpack.c.l.bf16 %v869_v28 }
 0x175   : > { %988 = vadd.xlane.f32.xlu0 %v987_v31  ;;  %v651_v35 = vpop.f32.mrf.mxu1  ;;  %v1569_v31 = vsub.s32 1, %v5849_v42 }
 0x176   : > { %v4568_v38 = vpack.c.bf16 %v651_v35, %v649_v27  ;;  %v976_v39 = vmul.f32 %v5894_v33, %v5894_v33  ;;  %v5899_v40 = vadd.f32 %v5860_v51, %v849_v34  ;;  %v930_v49 = vsel %vm923_vm0, %v917_v32, 0.0  ;;  %v1586_v34 = vld [vmem:[#allocation2 + $0x1c] ss:$12 sps:$4 sm:$0xff]  }
 0x177   : > { %v653_v41 = vpop.f32.mrf.mxu1  ;;  %v870_v43 = vld [vmem:[#allocation2 + $0x30] sm:$0xff]   ;;  %v1570_v35 = vrot.slane %v5855_v48, %v1569_v31 }
 0x178   : > { %815 = vst [vmem:[#allocation2 + $0x48] sm:$0xff] %v4568_v38  ;;  %v990_v50 = vsel %vm923_vm0, %v976_v39, 0.0  ;;  %v918_v52 = vmul.f32 %v5899_v40, %v5899_v40  ;;  %v5905_v53 = vunpack.c.h.bf16 %v870_v43  ;;  %v850_v61 = vunpack.c.l.bf16 %v870_v43 }
 0x179   : > { %931 = vadd.xlane.f32.xlu0 %v930_v49  ;;  %991 = vadd.xlane.f32.xlu1 %v990_v50  ;;  %v655_v55 = vpop.f32.mrf.mxu1  ;;  %v5966_v39 = vunpack.c.h.bf16 %v1586_v34 }
 0x17a   : > { %v4570_v57 = vpack.c.bf16 %v655_v55, %v653_v41  ;;  %v977_v58 = vmul.f32 %v5905_v53, %v5905_v53  ;;  %v933_v62 = vsel %vm923_vm0, %v918_v52, 0.0  ;;  %v5916_v4 = vadd.f32 %v5860_v51, %v850_v61 }
 0x17b   : > { %v871_v59 = vld [vmem:[#allocation2 + $0x3c] sm:$0xff]   ;;  %v5972_v41 = vunpack.c.l.bf16 %v1586_v34  ;;  %v1729_v43 = vmul.f32 %v5966_v39, %v5966_v39 }
 0x17c   : > { %817 = vst [vmem:[#allocation2 + $0x54] sm:$0xff] %v4570_v57  ;;  %v993_v63 = vsel %vm923_vm0, %v977_v58, 0.0  ;;  %v5911_v0 = vunpack.c.h.bf16 %v871_v59  ;;  %v851_v5 = vunpack.c.l.bf16 %v871_v59  ;;  %v919_v11 = vmul.f32 %v5916_v4, %v5916_v4 }
 0x17d   : > { %934 = vadd.xlane.f32.xlu1 %v933_v62  ;;  %994 = vadd.xlane.f32.xlu0 %v993_v63  ;;  %v1728_v44 = vmul.f32 %v5972_v41, %v5972_v41 }
 0x17e   : > { %v978_v1 = vmul.f32 %v5911_v0, %v5911_v0  ;;  %v5926_v13 = vadd.f32 %v5860_v51, %v851_v5  ;;  %v936_v20 = vsel %vm923_vm0, %v919_v11, 0.0 }
 0x17f   : > { %v872_v2 = vld [vmem:[#allocation2 + $0x48] sm:$0xff]  }
 0x180   : > { %v996_v6 = vsel %vm923_vm0, %v978_v1, 0.0  ;;  %v5919_v7 = vunpack.c.h.bf16 %v872_v2  ;;  %v852_v8 = vunpack.c.l.bf16 %v872_v2  ;;  %v920_v23 = vmul.f32 %v5926_v13, %v5926_v13 }
 0x181   : > { %997 = vadd.xlane.f32.xlu1 %v996_v6 }
 0x182   : > { %v979_v9 = vmul.f32 %v5919_v7, %v5919_v7  ;;  %v5932_v16 = vadd.f32 %v5860_v51, %v852_v8  ;;  %v939_v27 = vsel %vm923_vm0, %v920_v23, 0.0 }
 0x183   : > { %v873_v12 = vld [vmem:[#allocation2 + $0x54] sm:$0xff]  }
 0x184   : > { %v999_v14 = vsel %vm923_vm0, %v979_v9, 0.0  ;;  %v5929_v15 = vunpack.c.h.bf16 %v873_v12  ;;  %v853_v17 = vunpack.c.l.bf16 %v873_v12  ;;  %v921_v22 = vmul.f32 %v5932_v16, %v5932_v16 }
 0x185   : > { %1000 = vadd.xlane.f32.xlu0 %v999_v14 }
 0x186   : > { %v980_v19 = vmul.f32 %v5929_v15, %v5929_v15  ;;  %v5943_v24 = vadd.f32 %v5860_v51, %v853_v17  ;;  %v942_v25 = vsel %vm923_vm0, %v921_v22, 0.0  ;;  %v1583_v51 = vld [vmem:[#allocation2 + $0x4] ss:$12 sps:$4 sm:$0xff]   ;;  %v5983_v22 = vstv %s4966_s25 }
 0x187   : > { %v5953_v32 = vunpack.c.l.bf16 %v1583_v51  ;;  %v5960_v38 = vunpack.c.h.bf16 %v1583_v51 }
 0x188   : > { %v1002_v21 = vsel %vm923_vm0, %v980_v19, 0.0  ;;  %v922_v28 = vmul.f32 %v5943_v24, %v5943_v24 }
 0x189   : > { %937 = vadd.xlane.f32.xlu0 %v936_v20  ;;  %1003 = vadd.xlane.f32.xlu1 %v1002_v21  ;;  %v1726_v36 = vmul.f32 %v5953_v32, %v5953_v32  ;;  %v1727_v48 = vmul.f32 %v5960_v38, %v5960_v38 }
 0x18a   : > { %v945_v29 = vsel %vm923_vm0, %v922_v28, 0.0 }
 0x18d   : > { %943 = vadd.xlane.f32.xlu0 %v942_v25  ;;  %940 = vadd.xlane.f32.xlu1 %v939_v27 }
 0x191   : > { %946 = vadd.xlane.f32.xlu1 %v945_v29 }
 0x1a2   : > { %1742 = vrot.lane.b32.xlu1 %v1726_v36, %s5606_s23 }
 0x1a3   : > { %1572 = vrot.lane.b32.xlu0 %v1570_v35, %s5607_s26 }
 0x1a6   : > { %1744 = vrot.lane.b32.xlu1 %v1727_v48, %s5606_s23 }
 0x1a7   : > { %1748 = vrot.lane.b32.xlu0 %v1729_v43, %s5606_s23 }
 0x1aa   : > { %1746 = vrot.lane.b32.xlu1 %v1728_v44, %s5606_s23 }
 0x1f6   : > { %v983_v45 = vpop.xlane.xlu0 %982 }
 0x1f7   : > { %v1005_v47 = vmax.f32 %v983_v45, 1e-24 }
 0x1f8   : > { %v926_v49 = vpop.xlane.xlu1 %925 }
 0x1f9   : > { %v948_v50 = vmax.f32 %v926_v49, 1e-24  ;;  %5117 = vrsqrt.f32 %v1005_v47 }
 0x1fa   : > { %v986_v52 = vpop.xlane.xlu0 %985 }
 0x1fb   : > { %v1006_v55 = vmax.f32 %v986_v52, 1e-24 }
 0x1fc   : > { %v929_v56 = vpop.xlane.xlu1 %928 }
 0x1fd   : > { %5119 = vrsqrt.f32 %v1006_v55  ;;  %v949_v57 = vmax.f32 %v929_v56, 1e-24 }
 0x1fe   : > { %5121 = vrsqrt.f32 %v948_v50  ;;  %v989_v58 = vpop.xlane.xlu0 %988 }
 0x1ff   : > { %5123 = vrsqrt.f32 %v949_v57  ;;  %v1007_v59 = vmax.f32 %v989_v58, 1e-24  ;;  %v1552_v57 = vld [vmem:[#allocation2] ss:$12 sps:$4 sm:$0xff]  }
 0x201   : > { %5125 = vrsqrt.f32 %v1007_v59 }
 0x202   : > { %v932_v61 = vpop.xlane.xlu0 %931  ;;  %v992_v62 = vpop.xlane.xlu1 %991 }
 0x203   : > { %v1008_v63 = vmax.f32 %v992_v62, 1e-24  ;;  %v950_v1 = vmax.f32 %v932_v61, 1e-24  ;;  %v1554_v61 = vld [vmem:[#allocation2 + $0x18] ss:$12 sps:$4 sm:$0xff]  }
 0x205   : > { %5127 = vrsqrt.f32 %v1008_v63  ;;  %v1560_v63 = vunpack.c.h.bf16 %v1552_v57 }
 0x206   : > { %v935_v2 = vpop.xlane.xlu1 %934  ;;  %v995_v5 = vpop.xlane.xlu0 %994  ;;  %5129 = vrsqrt.f32 %v950_v1  ;;  %v1559_v1 = vunpack.c.l.bf16 %v1552_v57 }
 0x207   : > { %v951_v6 = vmax.f32 %v935_v2, 1e-24  ;;  %v5118_v8 = vpop.eup %5117  ;;  %v1009_v9 = vmax.f32 %v995_v5, 1e-24 }
 0x208   : > { %v1033_v19 = vmul.f32 %v5118_v8, %v5862_v54 }
 0x209   : > { %5131 = vrsqrt.f32 %v951_v6 }
 0x20a   : > { %v5120_v11 = vpop.eup %5119  ;;  %v998_v12 = vpop.xlane.xlu1 %997  ;;  %5133 = vrsqrt.f32 %v1009_v9  ;;  %v1562_v9 = vunpack.c.h.bf16 %v1554_v61 }
 0x20b   : > { %v5122_v14 = vpop.eup %5121  ;;  %v1010_v17 = vmax.f32 %v998_v12, 1e-24  ;;  %v1034_v20 = vmul.f32 %v5120_v11, %v5872_v3 }
 0x20c   : > { %v5124_v21 = vpop.eup %5123  ;;  %v965_v28 = vmul.f32 %v5122_v14, %v5983_v22 }
 0x20d   : > { %v966_v23 = vmul.f32 %v5124_v21, %v5983_v22  ;;  %5135 = vrsqrt.f32 %v1010_v17  ;;  %v1041_v25 = vpack.c.bf16 %v1034_v20, %v1033_v19  ;;  %v1561_v17 = vunpack.c.l.bf16 %v1554_v61 }
 0x20e   : > { %v1001_v27 = vpop.xlane.xlu0 %1000  ;;  %v5126_v34 = vpop.eup %5125  ;;  %v1021_v48 = vmul.f32 %v965_v28, %v5867_v60 }
 0x20f   : > { %v1049_v29 = vsel %vm923_vm0, %v1041_v25, 0  ;;  %v1011_v51 = vmax.f32 %v1001_v27, 1e-24  ;;  %v1022_v54 = vmul.f32 %v966_v23, %v5878_v10  ;;  %v1035_v45 = vmul.f32 %v5126_v34, %v5883_v18 }
 0x210   : > { %4750 = vmatpush3.bf16.xpose.msra.mxu1 %v1049_v29 }
 0x211   : > { %4755 = vmatprep.subr.bf16.mxu1 %v7425_v30  ;;  %5137 = vrsqrt.f32 %v1011_v51  ;;  %v1029_v50 = vpack.c.bf16 %v1022_v54, %v1021_v48  ;;  %v1587_v51 = vld [vmem:[#allocation2 + $0x30] sm:$0xff]  }
 0x212   : > { %v938_v3 = vpop.xlane.xlu0 %937  ;;  %v1004_v35 = vpop.xlane.xlu1 %1003  ;;  %v1590_v48 = vld [vmem:[#allocation2 + $0x54] sm:$0xff]  }
 0x213   : > { %v5128_v36 = vpop.eup %5127  ;;  %v952_v43 = vmax.f32 %v938_v3, 1e-24  ;;  %v1012_v44 = vmax.f32 %v1004_v35, 1e-24  ;;  %v6032_v35 = vunpack.c.h.bf16 %v1587_v51 }
 0x214   : > { %v1036_v47 = vmul.f32 %v5128_v36, %v5894_v33  ;;  %v5130_v49 = vpop.eup %5129 }
 0x215   : > { %5139 = vrsqrt.f32 %v952_v43  ;;  %v967_v33 = vmul.f32 %v5130_v49, %v5983_v22  ;;  %v1589_v43 = vld [vmem:[#allocation2 + $0x48] sm:$0xff]  }
 0x216   : > { %v5132_v52 = vpop.eup %5131  ;;  %5141 = vrsqrt.f32 %v1012_v44  ;;  %v944_v10 = vpop.xlane.xlu0 %943  ;;  %v1042_v56 = vpack.c.bf16 %v1036_v47, %v1035_v45 }
 0x217   : > { %v941_v55 = vpop.xlane.xlu1 %940  ;;  %v954_v58 = vmax.f32 %v944_v10, 1e-24  ;;  %4752 = vmatmul.mubr.msk.bf16.vlgmr.msra.gmra.mxu1 %vm923_vm0, %v1029_v50  ;;  %v968_v60 = vmul.f32 %v5132_v52, %v5983_v22  ;;  %v5134_v62 = vpop.eup %5133  ;;  %v1023_v19 = vmul.f32 %v967_v33, %v5889_v26  ;;  %v1588_v26 = vld [vmem:[#allocation2 + $0x3c] sm:$0xff]   ;;  %v1730_v50 = vmul.f32 %v6032_v35, %v6032_v35 }
 0x218   : > { %v953_v59 = vmax.f32 %v941_v55, 1e-24  ;;  %v1096_v18 = vsel %vm923_vm0, %v1042_v56, 0  ;;  %4757 = vmatprep.mubr.msk.bf16.mxu1 %vm5605_vm1, %v7425_v30  ;;  %v1037_v20 = vmul.f32 %v5134_v62, %v5905_v53  ;;  %v6030_v3 = vunpack.c.h.bf16 %v1588_v26 }
 0x219   : > { %5143 = vrsqrt.f32 %v954_v58  ;;  %4756 = vmatpush3.bf16.xpose.msra.mxu1 %v1096_v18  ;;  %v1024_v8 = vmul.f32 %v968_v60, %v5899_v40  ;;  %v6045_v52 = vunpack.c.h.bf16 %v1590_v48  ;;  %v6047_v10 = vunpack.c.h.bf16 %v1589_v43 }
 0x21a   : > { %v5136_v2 = vpop.eup %5135  ;;  %5145 = vrsqrt.f32 %v953_v59  ;;  %v5999_v5 = vpop.permute.xlu0 %1572  ;;  %4767 = vmatprep.subr.bf16.mxu1 %v7425_v30  ;;  %v1731_v49 = vmul.f32 %v6030_v3, %v6030_v3  ;;  %v1564_v58 = vunpack.c.l.bf16 %v1588_v26  ;;  %v1563_v59 = vunpack.c.l.bf16 %v1587_v51 }
 0x21b   : > { %v947_v6 = vpop.xlane.xlu1 %946  ;;  %v6004_v12 = vadd.f32 %v5999_v5, %v1560_v63  ;;  %v6007_v14 = vadd.f32 %v5999_v5, %v1559_v1  ;;  %v1038_v21 = vmul.f32 %v5136_v2, %v5911_v0  ;;  %v6013_v23 = vadd.f32 %v5999_v5, %v1562_v9 }
 0x21c   : > { %v955_v11 = vmax.f32 %v947_v6, 1e-24  ;;  %v6020_v27 = vadd.f32 %v5999_v5, %v1561_v17  ;;  %v1030_v28 = vpack.c.bf16 %v1024_v8, %v1023_v19  ;;  %v6055_v61 = vadd.f32 %v5999_v5, %v1564_v58  ;;  %v6115_v58 = vld [vmem:[#allocation10 + $0x8] sm:$0xff] }
 0x21d   : > { %v1638_v40 = vmul.f32 %v6004_v12, %v6004_v12  ;;  %v1637_v25 = vmul.f32 %v6007_v14, %v6007_v14  ;;  %v1043_v29 = vpack.c.bf16 %v1038_v21, %v1037_v20  ;;  %v1640_v34 = vmul.f32 %v6013_v23, %v6013_v23 }
 0x21e   : > { %5147 = vrsqrt.f32 %v955_v11  ;;  %v5138_v0 = vpop.eup %5137  ;;  %v1639_v54 = vmul.f32 %v6020_v27, %v6020_v27  ;;  %v6058_v18 = vadd.f32 %v5999_v5, %v1563_v59  ;;  %v1733_v33 = vmul.f32 %v6045_v52, %v6045_v52 }
 0x21f   : > { %1655 = vrot.lane.b32.xlu0 %v1638_v40, %s5606_s23  ;;  %1653 = vrot.lane.b32.xlu1 %v1637_v25, %s5606_s23  ;;  %v1143_v53 = vsel %vm923_vm0, %v1043_v29, 0  ;;  %v1039_v45 = vmul.f32 %v5138_v0, %v5919_v7  ;;  %v1732_v62 = vmul.f32 %v6047_v10, %v6047_v10  ;;  %v1566_v9 = vunpack.c.l.bf16 %v1590_v48  ;;  %v884_v29 = vld [vmem:[#allocation2 + $0x20] ss:$12 sps:$4 sm:$0xff]  }
 0x220   : > { %4758 = vmatmul.mubr.msk.bf16.vlgmr.msra.gmra.mxu1 %vm923_vm0, %v1030_v28  ;;  %4762 = vmatpush3.bf16.xpose.msra.mxu0 %v1143_v53  ;;  %v1565_v11 = vunpack.c.l.bf16 %v1589_v43  ;;  %v1642_v19 = vmul.f32 %v6055_v61, %v6055_v61  ;;  %v1641_v20 = vmul.f32 %v6058_v18, %v6058_v18  ;;  %v882_v28 = vld [vmem:[#allocation2 + $0x8] ss:$12 sps:$4 sm:$0xff]   ;;  %v892_v53 = vunpack.c.l.bf16 %v884_v29 }
 0x221   : > { %4769 = vmatprep.mubr.msk.bf16.mxu1 %vm5605_vm1, %v7425_v30  ;;  %4773 = vmatprep.subr.bf16.mxu0 %v7425_v30  ;;  %v6078_v21 = vadd.f32 %v5999_v5, %v1566_v9  ;;  %v890_v26 = vunpack.c.l.bf16 %v882_v28  ;;  %v891_v51 = vunpack.c.h.bf16 %v882_v28  ;;  %v893_v0 = vunpack.c.h.bf16 %v884_v29  ;;  %v6129_v9 = vld [vmem:[#allocation10 + $0x18] sm:$0xff] }
 0x222   : > { %v5140_v36 = vpop.eup %5139  ;;  %v6081_v40 = vadd.f32 %v5999_v5, %v1565_v11  ;;  %v820_v5 = vld [vmem:[%s7411_s3] sm:$0xf] }
 0x223   : > { %v5142_v44 = vpop.eup %5141  ;;  %1659 = vrot.lane.b32.xlu0 %v1640_v34, %s5606_s23  ;;  %1657 = vrot.lane.b32.xlu1 %v1639_v54, %s5606_s23  ;;  %v969_v56 = vmul.f32 %v5140_v36, %v5983_v22  ;;  %v6102_v25 = vrot.slane %v820_v5, %v856_v46  ;;  %v822_v46 = vld [vmem:[#allocation9] sm:$0xff] }
 0x224   : > { %v1040_v47 = vmul.f32 %v5142_v44, %v5929_v15  ;;  %v6139_v5 = vld [vmem:[#allocation10 + $0x20] sm:$0xff] }
 0x225   : > { %v1025_v2 = vmul.f32 %v969_v56, %v5916_v4  ;;  %v902_v34 = vadd.f32 %v6102_v25, %v890_v26  ;;  %v903_v54 = vadd.f32 %v6102_v25, %v891_v51  ;;  %v904_v36 = vadd.f32 %v6102_v25, %v892_v53  ;;  %v6144_v53 = vld [vmem:[#allocation10 + $0x30] sm:$0xff] }
 0x226   : > { %v5144_v55 = vpop.eup %5143  ;;  %v1044_v57 = vpack.c.bf16 %v1040_v47, %v1039_v45  ;;  %v905_v48 = vadd.f32 %v6102_v25, %v893_v0  ;;  %v6110_v47 = vld [vmem:[#allocation10] sm:$0xff] }
 0x227   : > { %v5146_v60 = vpop.eup %5145  ;;  %1752 = vrot.lane.b32.xlu0 %v1731_v49, %s5606_s23  ;;  %1750 = vrot.lane.b32.xlu1 %v1730_v50, %s5606_s23  ;;  %v971_v63 = vmul.f32 %v5144_v55, %v5983_v22  ;;  %v910_v43 = vpack.c.bf16 %v903_v54, %v902_v34  ;;  %v823_v55 = vld [vmem:[#allocation9 + $0x8] sm:$0xff] }
 0x228   : > { %v970_v7 = vmul.f32 %v5146_v60, %v5983_v22  ;;  %v1190_v15 = vsel %vm923_vm0, %v1044_v57, 0  ;;  %v911_v44 = vpack.c.bf16 %v905_v48, %v904_v36  ;;  %v6146_v36 = vld [vmem:[#allocation10 + $0x28] sm:$0xff] }
 0x229   : > { %4768 = vmatpush3.bf16.xpose.msra.mxu1 %v1190_v15  ;;  %v1027_v4 = vmul.f32 %v971_v63, %v5932_v16  ;;  %v1644_v16 = vmul.f32 %v6078_v21, %v6078_v21  ;;  %v6124_v63 = vld [vmem:[#allocation10 + $0x10] sm:$0xff] }
 0x22a   : > { %v1026_v6 = vmul.f32 %v970_v7, %v5926_v13  ;;  %4779 = vmatprep.subr.bf16.mxu1 %v7425_v30 }
 0x22b   : > { %v5148_v1 = vpop.eup %5147  ;;  %1756 = vrot.lane.b32.xlu0 %v1733_v33, %s5606_s23  ;;  %1754 = vrot.lane.b32.xlu1 %v1732_v62, %s5606_s23 }
 0x22c   : > { %v972_v8 = vmul.f32 %v5148_v1, %v5983_v22  ;;  %v1031_v17 = vpack.c.bf16 %v1026_v6, %v1025_v2 }
 0x22e   : > { %v1028_v13 = vmul.f32 %v972_v8, %v5943_v24  ;;  %4764 = vmatmul.mubr.msk.bf16.vlgmr.msra.gmra.mxu0 %vm923_vm0, %v1031_v17  ;;  %v1643_v24 = vmul.f32 %v6081_v40, %v6081_v40 }
 0x22f   : > { %1663 = vrot.lane.b32.xlu0 %v1642_v19, %s5606_s23  ;;  %1661 = vrot.lane.b32.xlu1 %v1641_v20, %s5606_s23  ;;  %v1743_v19 = vpop.permute.xlu1 %1742 }
 0x230   : > { %v1032_v22 = vpack.c.bf16 %v1028_v13, %v1027_v4  ;;  %4775 = vmatprep.mubr.msk.bf16.mxu0 %vm5605_vm1, %v7425_v30  ;;  %4774 = vmatpush3.bf16.msra.mxu0 %v910_v43 }
 0x231   : > { %4785 = vmatprep.subr.bf16.mxu0 %v7425_v30 }
 0x232   : > { %4770 = vmatmul.mubr.msk.bf16.vlgmr.msra.gmra.mxu1 %vm923_vm0, %v1032_v22  ;;  %v1635_v22 = vrot.slane %v5846_v37, 1 }
 0x233   : > { %4781 = vmatprep.mubr.msk.bf16.mxu1 %vm5605_vm1, %v7425_v30  ;;  %1667 = vrot.lane.b32.xlu0 %v1644_v16, %s5606_s23  ;;  %v1745_v16 = vpop.permute.xlu1 %1744 }
 0x234   : > { %1665 = vrot.lane.b32.xlu1 %v1643_v24, %s5606_s23  ;;  %4780 = vmatpush3.bf16.msra.mxu1 %v911_v44  ;;  %4967 = vpush %v1635_v22 }
 0x235   : > { %4791 = vmatprep.subr.bf16.mxu1 %v7425_v30 }
 0x237   : > { %v1747_v0 = vpop.permute.xlu1 %1746 }
 0x265   : > { %s4968_s1 = spop %4967 }
 0x2d7   : > { %v1085_v45 = vpop.f32.mrf.mxu1 }
 0x2d8   : > { %v1086_v49 = vadd.f32 %v1085_v45, %v822_v46 }
 0x2d9   : > { %v4753_v50 = vpop.f32.mrf.mxu1 }
 0x2da   : > { %v6113_v56 = vadd.f32 %v1086_v49, %v6110_v47 }
 0x2db   : > { %v1088_v57 = vpop.f32.mrf.mxu1 }
 0x2dc   : > { %v1089_v59 = vadd.f32 %v1088_v57, %v823_v55  ;;  %v1242_v60 = vsel %vm1241_vm2, %v6113_v56, -inf  ;;  %v837_v57 = vld [vmem:[#allocation10 + $0x38] sm:$0xff] }
 0x2dd   : > { %v4754_v7 = vpop.f32.mrf.mxu1  ;;  %1243 = vmax.xlane.f32.xlu1 %v1242_v60  ;;  %v1654_v60 = vpop.permute.xlu1 %1653 }
 0x2de   : > { %v6120_v15 = vadd.f32 %v1089_v59, %v6115_v58  ;;  %v1749_v59 = vpop.permute.xlu0 %1748 }
 0x2e0   : > { %v1132_v33 = vpop.f32.mrf.mxu1  ;;  %v1245_v62 = vsel %vm1241_vm2, %v6120_v15, -inf }
 0x2e1   : > { %v1133_v1 = vadd.f32 %v1132_v33, %v822_v46  ;;  %1246 = vmax.xlane.f32.xlu0 %v1245_v62 }
 0x2e2   : > { %v4759_v2 = vpop.f32.mrf.mxu1 }
 0x2e3   : > { %v6127_v6 = vadd.f32 %v1133_v1, %v6124_v63  ;;  %v1656_v2 = vpop.permute.xlu0 %1655 }
 0x2e4   : > { %v1135_v8 = vpop.f32.mrf.mxu1 }
 0x2e5   : > { %v1136_v11 = vadd.f32 %v1135_v8, %v823_v55  ;;  %v1248_v17 = vsel %vm1241_vm2, %v6127_v6, -inf }
 0x2e6   : > { %v4760_v20 = vpop.f32.mrf.mxu1  ;;  %1249 = vmax.xlane.f32.xlu0 %v1248_v17  ;;  %v1658_v17 = vpop.permute.xlu1 %1657 }
 0x2e7   : > { %v6134_v4 = vadd.f32 %v1136_v11, %v6129_v9  ;;  %v1766_v11 = vsel %vm923_vm0, %v1743_v19, 0.0  ;;  %v1772_v20 = vsel %vm923_vm0, %v1747_v0, 0.0  ;;  %v1680_v19 = vsel %vm923_vm0, %v1656_v2, 0.0 }
 0x2e9   : > { %v1251_v13 = vsel %vm1241_vm2, %v6134_v4, -inf }
 0x2ea   : > { %1252 = vmax.xlane.f32.xlu0 %v1251_v13  ;;  %v1660_v13 = vpop.permute.xlu0 %1659  ;;  %v1751_v22 = vpop.permute.xlu1 %1750 }
 0x2eb   : > { %v1778_v0 = vsel %vm923_vm0, %v1751_v22, 0.0 }
 0x2ee   : > { %v1179_v24 = vpop.f32.mrf.mxu0 }
 0x2ef   : > { %v1180_v28 = vadd.f32 %v1179_v24, %v822_v46  ;;  %v1775_v24 = vsel %vm923_vm0, %v1749_v59, 0.0 }
 0x2f0   : > { %v4765_v29 = vpop.f32.mrf.mxu0 }
 0x2f1   : > { %v6142_v51 = vadd.f32 %v1180_v28, %v6139_v5  ;;  %v1677_v28 = vsel %vm923_vm0, %v1654_v60, 0.0  ;;  %v1753_v29 = vpop.permute.xlu0 %1752 }
 0x2f2   : > { %v1226_v26 = vpop.f32.mrf.mxu1  ;;  %v1182_v34 = vpop.f32.mrf.mxu0 }
 0x2f3   : > { %v1227_v54 = vadd.f32 %v1226_v26, %v822_v46  ;;  %v1183_v48 = vadd.f32 %v1182_v34, %v823_v55  ;;  %v1254_v37 = vsel %vm1241_vm2, %v6142_v51, -inf  ;;  %v1683_v26 = vsel %vm923_vm0, %v1658_v17, 0.0  ;;  %v1755_v34 = vpop.permute.xlu1 %1754 }
 0x2f4   : > { %v4771_v43 = vpop.f32.mrf.mxu1  ;;  %v4766_v44 = vpop.f32.mrf.mxu0  ;;  %1255 = vmax.xlane.f32.xlu1 %v1254_v37  ;;  %v1781_v37 = vsel %vm923_vm0, %v1753_v29, 0.0 }
 0x2f5   : > { %v6151_v45 = vadd.f32 %v1227_v54, %v6144_v53  ;;  %v6154_v50 = vadd.f32 %v1183_v48, %v6146_v36  ;;  %v1757_v54 = vpop.permute.xlu0 %1756  ;;  %v1784_v43 = vsel %vm923_vm0, %v1755_v34, 0.0 }
 0x2f6   : > { %v1229_v49 = vpop.f32.mrf.mxu1 }
 0x2f7   : > { %v1230_v46 = vadd.f32 %v1229_v49, %v823_v55  ;;  %v1260_v7 = vsel %vm1241_vm2, %v6151_v45, -inf  ;;  %v1257_v33 = vsel %vm1241_vm2, %v6154_v50, -inf  ;;  %v1769_v55 = vsel %vm923_vm0, %v1745_v16, 0.0  ;;  %v1662_v48 = vpop.permute.xlu1 %1661 }
 0x2f8   : > { %v4772_v62 = vpop.f32.mrf.mxu1  ;;  %1258 = vmax.xlane.f32.xlu0 %v1257_v33  ;;  %1261 = vmax.xlane.f32.xlu1 %v1260_v7  ;;  %v1686_v16 = vsel %vm923_vm0, %v1660_v13, 0.0  ;;  %v1787_v49 = vsel %vm923_vm0, %v1757_v54, 0.0 }
 0x2f9   : > { %v6160_v1 = vadd.f32 %v1230_v46, %v837_v57  ;;  %v1664_v44 = vpop.permute.xlu0 %1663  ;;  %v1689_v57 = vsel %vm923_vm0, %v1662_v48, 0.0 }
 0x2fa   : > { %v1692_v60 = vsel %vm923_vm0, %v1664_v44, 0.0 }
 0x2fb   : > { %v1263_v8 = vsel %vm1241_vm2, %v6160_v1, -inf  ;;  %v1666_v59 = vpop.permute.xlu1 %1665 }
 0x2fc   : > { %1264 = vmax.xlane.f32.xlu0 %v1263_v8  ;;  %1767 = vadd.xlane.f32.xlu1 %v1766_v11  ;;  %v1695_v46 = vsel %vm923_vm0, %v1666_v59, 0.0 }
 0x2fd   : > { %v1668_v7 = vpop.permute.xlu0 %1667 }
 0x2fe   : > { %v1698_v33 = vsel %vm923_vm0, %v1668_v7, 0.0 }
 0x300   : > { %1770 = vadd.xlane.f32.xlu0 %v1769_v55  ;;  %1773 = vadd.xlane.f32.xlu1 %v1772_v20 }
 0x304   : > { %1776 = vadd.xlane.f32.xlu0 %v1775_v24  ;;  %1678 = vadd.xlane.f32.xlu1 %v1677_v28 }
 0x308   : > { %1681 = vadd.xlane.f32.xlu0 %v1680_v19  ;;  %1684 = vadd.xlane.f32.xlu1 %v1683_v26 }
 0x30c   : > { %1687 = vadd.xlane.f32.xlu0 %v1686_v16  ;;  %1779 = vadd.xlane.f32.xlu1 %v1778_v0 }
 0x310   : > { %1782 = vadd.xlane.f32.xlu0 %v1781_v37  ;;  %1785 = vadd.xlane.f32.xlu1 %v1784_v43 }
 0x314   : > { %1788 = vadd.xlane.f32.xlu0 %v1787_v49  ;;  %1690 = vadd.xlane.f32.xlu1 %v1689_v57 }
 0x318   : > { %1693 = vadd.xlane.f32.xlu0 %v1692_v60  ;;  %1696 = vadd.xlane.f32.xlu1 %v1695_v46 }
 0x31c   : > { %1699 = vadd.xlane.f32.xlu0 %v1698_v33 }
 0x366   : > { %v6184_v13 = vpop.xlane.xlu1 %1243 }
 0x36a   : > { %v1247_v62 = vpop.xlane.xlu0 %1246 }
 0x36b   : > { %v1267_v2 = vsub.f32 %v6120_v15, %v1247_v62 }
 0x36d   : > { %v1276_v8 = vmul.f32 1.442695, %v1267_v2 }
 0x36f   : > { %5149 = vpow2.f32 %v1276_v8  ;;  %v6181_v11 = vpop.xlane.xlu0 %1249 }
 0x373   : > { %v1253_v17 = vpop.xlane.xlu0 %1252 }
 0x374   : > { %v1269_v55 = vsub.f32 %v6134_v4, %v1253_v17 }
 0x376   : > { %v1280_v20 = vmul.f32 1.442695, %v1269_v55 }
 0x378   : > { %5151 = vpow2.f32 %v1280_v20 }
 0x37c   : > { %v6186_v22 = vpop.eup %5149 }
 0x37d   : > { %v6188_v24 = vpop.xlane.xlu1 %1255  ;;  %v1293_v28 = vsel %vm1241_vm2, %v6186_v22, 0.0 }
 0x37e   : > { %1294 = vadd.xlane.f32.xlu0 %v1293_v28 }
 0x381   : > { %v1259_v15 = vpop.xlane.xlu0 %1258  ;;  %v6192_v29 = vpop.xlane.xlu1 %1261 }
 0x382   : > { %v1271_v19 = vsub.f32 %v6154_v50, %v1259_v15 }
 0x384   : > { %v1284_v26 = vmul.f32 1.442695, %v1271_v19 }
 0x385   : > { %v6195_v34 = vpop.eup %5151  ;;  %v1265_v4 = vpop.xlane.xlu0 %1264 }
 0x386   : > { %v1768_v16 = vpop.xlane.xlu1 %1767  ;;  %5153 = vpow2.f32 %v1284_v26  ;;  %v1273_v0 = vsub.f32 %v6160_v1, %v1265_v4  ;;  %v1299_v48 = vsel %vm1241_vm2, %v6195_v34, 0.0 }
 0x387   : > { %v1790_v54 = vmax.f32 %v1768_v16, 1e-24  ;;  %1300 = vadd.xlane.f32.xlu0 %v1299_v48 }
 0x388   : > { %v1288_v37 = vmul.f32 1.442695, %v1273_v0 }
 0x389   : > { %5155 = vrsqrt.f32 %v1790_v54  ;;  %v1771_v43 = vpop.xlane.xlu0 %1770 }
 0x38a   : > { %v1774_v44 = vpop.xlane.xlu1 %1773  ;;  %5157 = vpow2.f32 %v1288_v37  ;;  %v1791_v49 = vmax.f32 %v1771_v43, 1e-24 }
 0x38b   : > { %v1792_v17 = vmax.f32 %v1774_v44, 1e-24 }
 0x38c   : > { %5159 = vrsqrt.f32 %v1791_v49 }
 0x38d   : > { %v1777_v50 = vpop.xlane.xlu0 %1776 }
 0x38e   : > { %v6200_v57 = vpop.xlane.xlu1 %1678  ;;  %v1793_v7 = vmax.f32 %v1777_v50, 1e-24 }
 0x390   : > { %5161 = vrsqrt.f32 %v1793_v7 }
 0x391   : > { %v6202_v59 = vpop.xlane.xlu0 %1681  ;;  %5163 = vrsqrt.f32 %v1792_v17 }
 0x392   : > { %v6204_v60 = vpop.xlane.xlu1 %1684 }
 0x393   : > { %v6206_v1 = vpop.eup %5153 }
 0x394   : > { %v1305_v46 = vsel %vm1241_vm2, %v6206_v1, 0.0 }
 0x395   : > { %1306 = vadd.xlane.f32.xlu0 %v1305_v46  ;;  %v6210_v33 = vpop.xlane.xlu0 %1687 }
 0x396   : > { %v6212_v62 = vpop.xlane.xlu1 %1779  ;;  %v5156_v2 = vpop.eup %5155 }
 0x397   : > { %v6214_v8 = vpop.eup %5157  ;;  %v1818_v26 = vmul.f32 %v5156_v2, %v5953_v32 }
 0x398   : > { %v1311_v55 = vsel %vm1241_vm2, %v6214_v8, 0.0 }
 0x399   : > { %v5160_v20 = vpop.eup %5159  ;;  %1312 = vadd.xlane.f32.xlu0 %v1311_v55  ;;  %v6218_v28 = vpop.xlane.xlu0 %1782 }
 0x39a   : > { %v1786_v15 = vpop.xlane.xlu1 %1785  ;;  %v1819_v4 = vmul.f32 %v5160_v20, %v5960_v38  ;;  %v1266_v38 = vsub.f32 %v6113_v56, %v6184_v13  ;;  %v6238_v13 = vstv %s4968_s1  ;;  %s4422_s1 = sshll.u32 %s5813_s5, 5 }
 0x39b   : > { %v1796_v19 = vmax.f32 %v1786_v15, 1e-24  ;;  %v1268_v15 = vsub.f32 %v6127_v6, %v6181_v11  ;;  %s409_s6 = scalar_lea.vmem [#allocation13], %s4422_s1 }
 0x39c   : > { %v1826_v16 = vpack.c.bf16 %v1819_v4, %v1818_v26  ;;  %v1274_v20 = vmul.f32 1.442695, %v1266_v38  ;;  %s4294_s19 = sshll.u32 %s409_s6, 4  ;;  %s7358_s19 = int_to_ptr.vmem [resolvable:$true] %s4294_s19 }
 0x39d   : > { %v1789_v0 = vpop.xlane.xlu0 %1788  ;;  %5165 = vrsqrt.f32 %v1796_v19  ;;  %v5162_v50 = vpop.eup %5161  ;;  %v1278_v56 = vmul.f32 1.442695, %v1268_v15  ;;  %p5525_p9 = scmp.lt.s32.totalorder %s7358_s19, %s5523_s20 }
 0x39e   : > { %v6222_v54 = vpop.xlane.xlu1 %1690  ;;  %v1797_v48 = vmax.f32 %v1789_v0, 1e-24  ;;  %1834 = vrot.lane.b32.xlu1 %v1826_v16, %s5606_s23  ;;  %v5164_v46 = vpop.eup %5163  ;;  %v1821_v7 = vmul.f32 %v5162_v50, %v5966_v39  ;;  %v1270_v39 = vsub.f32 %v6142_v51, %v6188_v24  ;;  %v6252_v50 = vld [vmem:[#allocation2 + $0x18] sm:$0xff]  }
 0x39f   : > { %v1820_v17 = vmul.f32 %v5164_v46, %v5972_v41 }
 0x3a0   : > { %5167 = vrsqrt.f32 %v1797_v48  ;;  %v6245_v48 = vld [vmem:[#allocation2] sm:$0xff]  }
 0x3a1   : > { %v6225_v37 = vpop.xlane.xlu0 %1693  ;;  %v1827_v19 = vpack.c.bf16 %v1821_v7, %v1820_v17  ;;  %v1701_v7 = vmax.f32 %v6200_v57, 1e-24  ;;  %v1703_v57 = vmax.f32 %v6204_v60, 1e-24 }
 0x3a2   : > { %v1697_v43 = vpop.xlane.xlu1 %1696 }
 0x3a3   : > { %v1707_v44 = vmax.f32 %v1697_v43, 1e-24 }
 0x3a5   : > { %5169 = vrsqrt.f32 %v1707_v44  ;;  %v1700_v49 = vpop.xlane.xlu0 %1699 }
 0x3a6   : > { %v1708_v32 = vmax.f32 %v1700_v49, 1e-24  ;;  %v6250_v49 = vunpack.c.h.bf16 %v6245_v48 }
 0x3a8   : > { %5171 = vrsqrt.f32 %v1708_v32 }
 0x3a9   : > { %5173 = vpow2.f32 %v1274_v20 }
 0x3aa   : > { %v5166_v2 = vpop.eup %5165  ;;  %5175 = vpow2.f32 %v1278_v56 }
 0x3ab   : > { %v1824_v26 = vmul.f32 %v5166_v2, %v6047_v10  ;;  %v1282_v10 = vmul.f32 1.442695, %v1270_v39 }
 0x3ad   : > { %v5168_v55 = vpop.eup %5167  ;;  %5177 = vpow2.f32 %v1282_v10 }
 0x3ae   : > { %v1825_v4 = vmul.f32 %v5168_v55, %v6045_v52  ;;  %v1272_v52 = vsub.f32 %v6151_v45, %v6192_v29  ;;  %v2566_v29 = vmul.f32 %v6250_v49, %v6250_v49  ;;  %v1795_v55 = vmax.f32 %v6218_v28, 1e-24 }
 0x3af   : > { %1887 = vrot.lane.b32.xlu0 %v1827_v19, %s5606_s23  ;;  %v1794_v19 = vmax.f32 %v6212_v62, 1e-24 }
 0x3b0   : > { %v1829_v16 = vpack.c.bf16 %v1825_v4, %v1824_v26  ;;  %v1286_v24 = vmul.f32 1.442695, %v1272_v52  ;;  %v1706_v26 = vmax.f32 %v6225_v37, 1e-24 }
 0x3b2   : > { %v5170_v41 = vpop.eup %5169  ;;  %5179 = vpow2.f32 %v1286_v24 }
 0x3b3   : > { %1993 = vrot.lane.b32.xlu0 %v1829_v16, %s5606_s23  ;;  %v1724_v6 = vmul.f32 %v5170_v41, %v6238_v13 }
 0x3b5   : > { %v5172_v11 = vpop.eup %5171  ;;  %v1812_v43 = vmul.f32 %v1724_v6, %v6081_v40  ;;  %v6260_v40 = vunpack.c.h.bf16 %v6252_v50 }
 0x3b6   : > { %v1725_v0 = vmul.f32 %v5172_v11, %v6238_v13  ;;  %v6255_v45 = vpop.eup %5173 }
 0x3b7   : > { %v1290_v32 = vsel %vm1241_vm2, %v6255_v45, 0.0  ;;  %v6266_v46 = vpop.eup %5175  ;;  %v2568_v38 = vmul.f32 %v6260_v40, %v6260_v40 }
 0x3b8   : > { %v1813_v51 = vmul.f32 %v1725_v0, %v6078_v21  ;;  %v1702_v21 = vmax.f32 %v6202_v59, 1e-24  ;;  %v1296_v2 = vsel %vm1241_vm2, %v6266_v46, 0.0  ;;  %v1704_v59 = vmax.f32 %v6210_v33, 1e-24 }
 0x3b9   : > { %v1705_v33 = vmax.f32 %v6222_v54, 1e-24 }
 0x3ba   : > { %v1817_v44 = vpack.c.bf16 %v1813_v51, %v1812_v43  ;;  %5181 = vrsqrt.f32 %v1702_v21  ;;  %v6274_v17 = vpop.eup %5177 }
 0x3bb   : > { %5183 = vrsqrt.f32 %v1701_v7  ;;  %v1302_v20 = vsel %vm1241_vm2, %v6274_v17, 0.0 }
 0x3bc   : > { %1990 = vrot.lane.b32.xlu0 %v1817_v44, %s5606_s23  ;;  %5185 = vrsqrt.f32 %v1704_v59 }
 0x3bd   : > { %5187 = vrsqrt.f32 %v1795_v55 }
 0x3be   : > { %5189 = vrsqrt.f32 %v1703_v57 }
 0x3bf   : > { %v6280_v15 = vpop.eup %5179  ;;  %5191 = vrsqrt.f32 %v1794_v19 }
 0x3c0   : > { %2582 = vrot.lane.b32.xlu0 %v2566_v29, %s5608_s14  ;;  %v1308_v4 = vsel %vm1241_vm2, %v6280_v15, 0.0  ;;  %5193 = vrsqrt.f32 %v1706_v26 }
 0x3c1   : > { %5195 = vrsqrt.f32 %v1705_v33 }
 0x3c2   : > { %1291 = vadd.xlane.f32.xlu1 %v1290_v32 }
 0x3c4   : > { %2586 = vrot.lane.b32.xlu0 %v2568_v38, %s5608_s14  ;;  %v7424_v38 = vsub.s32 2, %v5849_v42 }
 0x3c6   : > { %1297 = vadd.xlane.f32.xlu1 %v1296_v2  ;;  %v6306_v2 = vld [vmem:[#allocation2 + $0xc] sm:$0xff]  }
 0x3c7   : > { %v5182_v28 = vpop.eup %5181 }
 0x3c8   : > { %v5184_v16 = vpop.eup %5183  ;;  %v1719_v60 = vmul.f32 %v5182_v28, %v6238_v13  ;;  %v6332_v28 = vld [vmem:[#allocation2 + $0x44] sm:$0xff]  }
 0x3c9   : > { %v1718_v62 = vmul.f32 %v5184_v16, %v6238_v13  ;;  %v5186_v56 = vpop.eup %5185 }
 0x3ca   : > { %1303 = vadd.xlane.f32.xlu1 %v1302_v20  ;;  %v1807_v39 = vmul.f32 %v1719_v60, %v6004_v12  ;;  %v5188_v37 = vpop.eup %5187  ;;  %v1721_v54 = vmul.f32 %v5186_v56, %v6238_v13  ;;  %v895_v56 = vunpack.c.l.bf16 %v6332_v28 }
 0x3cb   : > { %v5190_v41 = vpop.eup %5189  ;;  %v1806_v6 = vmul.f32 %v1718_v62, %v6007_v14  ;;  %v1823_v52 = vmul.f32 %v5188_v37, %v6030_v3  ;;  %v6334_v62 = vld [vmem:[#allocation2 + $0x38] sm:$0xff]  }
 0x3cc   : > { %v5192_v11 = vpop.eup %5191  ;;  %v1720_v51 = vmul.f32 %v5190_v41, %v6238_v13  ;;  %v1809_v12 = vmul.f32 %v1721_v54, %v6013_v23  ;;  %v6312_v23 = vld [vmem:[%s7410_s2] sm:$0xf]  ;;  %v6339_v37 = vld [vmem:[#allocation2 + $0x58] sm:$0xff]  }
 0x3cd   : > { %v1814_v10 = vpack.c.bf16 %v1807_v39, %v1806_v6  ;;  %v5194_v0 = vpop.eup %5193  ;;  %v1822_v43 = vmul.f32 %v5192_v11, %v6032_v35  ;;  %v6337_v39 = vld [vmem:[#allocation2 + $0x50] sm:$0xff]   ;;  %v894_v11 = vunpack.c.l.bf16 %v6334_v62 }
 0x3ce   : > { %1309 = vadd.xlane.f32.xlu1 %v1308_v4  ;;  %v5196_v24 = vpop.eup %5195  ;;  %v1723_v29 = vmul.f32 %v5194_v0, %v6238_v13  ;;  %v1808_v14 = vmul.f32 %v1720_v51, %v6020_v27  ;;  %v2410_v27 = vrot.slane %v6312_v23, %v7424_v38  ;;  %v896_v54 = vunpack.c.l.bf16 %v6337_v39  ;;  %v6587_v38 = vld [vmem:[#allocation2 + $0x44] sm:$0xff]  }
 0x3cf   : > { %v1828_v44 = vpack.c.bf16 %v1823_v52, %v1822_v43  ;;  %v1722_v3 = vmul.f32 %v5196_v24, %v6238_v13  ;;  %v907_v52 = vadd.f32 %v6102_v25, %v895_v56  ;;  %v897_v0 = vunpack.c.h.bf16 %v6339_v37 }
 0x3d0   : > { %v1815_v21 = vpack.c.bf16 %v1809_v12, %v1808_v14  ;;  %v1811_v32 = vmul.f32 %v1723_v29, %v6055_v61  ;;  %v6318_v61 = vunpack.c.h.bf16 %v6306_v2  ;;  %v906_v12 = vadd.f32 %v6102_v25, %v894_v11 }
 0x3d1   : > { %v1810_v35 = vmul.f32 %v1722_v3, %v6058_v18  ;;  %v6320_v18 = vld [vmem:[#allocation2 + $0x24] sm:$0xff]  }
 0x3d2   : > { %v2567_v13 = vmul.f32 %v6318_v61, %v6318_v61  ;;  %v6326_v59 = vunpack.c.h.bf16 %v6320_v18  ;;  %v912_v3 = vpack.c.bf16 %v907_v52, %v906_v12  ;;  %v2402_v11 = vunpack.c.l.bf16 %v6320_v18 }
 0x3d3   : > { %v1816_v7 = vpack.c.bf16 %v1811_v32, %v1810_v35  ;;  %v909_v32 = vadd.f32 %v6102_v25, %v897_v0 }
 0x3d4   : > { %v2569_v55 = vmul.f32 %v6326_v59, %v6326_v59 }
 0x3df   : > { %1831 = vrot.lane.b32.xlu1 %v1814_v10, %s5606_s23 }
 0x3e3   : > { %1940 = vrot.lane.b32.xlu1 %v1828_v44, %s5606_s23 }
 0x3e7   : > { %1884 = vrot.lane.b32.xlu1 %v1815_v21, %s5606_s23  ;;  %v908_v21 = vadd.f32 %v6102_v25, %v896_v54 }
 0x3eb   : > { %1937 = vrot.lane.b32.xlu1 %v1816_v7, %s5606_s23 }
 0x3ef   : > { %2412 = vrot.lane.b32.xlu1 %v2410_v27, %s5608_s14 }
 0x3f3   : > { %2584 = vrot.lane.b32.xlu1 %v2567_v13, %s5608_s14 }
 0x3f7   : > { %2588 = vrot.lane.b32.xlu1 %v2569_v55, %s5608_s14  ;;  %v913_v55 = vpack.c.bf16 %v909_v32, %v908_v21  ;;  %v6418_v21 = vunpack.c.l.bf16 %v6339_v37 }
 0x3f9   : > { %7463 = vst [vmem:[#allocation19_spill] sm:$0xff] %v6418_v21 }
 0x407   : > { %v1295_v20 = vpop.xlane.xlu0 %1294 }
 0x408   : > { %5197 = vrcp.f32 %v1295_v20 }
 0x410   : > { %v1835_v57 = vpop.permute.xlu1 %1834  ;;  %v1301_v19 = vpop.xlane.xlu0 %1300 }
 0x415   : > { %v5198_v41 = vpop.eup %5197 }
 0x416   : > { %v1323_v51 = vmul.f32 %v5198_v41, %v6186_v22  ;;  %v2399_v41 = vunpack.c.l.bf16 %v6245_v48 }
 0x41e   : > { %v1307_v4 = vpop.xlane.xlu0 %1306 }
 0x422   : > { %v1313_v16 = vpop.xlane.xlu0 %1312 }
 0x44b   : > { %v1292_v26 = vpop.xlane.xlu1 %1291 }
 0x44c   : > { %5199 = vrcp.f32 %v1292_v26 }
 0x44d   : > { %5201 = vrcp.f32 %v1301_v19 }
 0x44f   : > { %v1298_v33 = vpop.xlane.xlu1 %1297 }
 0x450   : > { %5203 = vrcp.f32 %v1298_v33 }
 0x451   : > { %5205 = vrcp.f32 %v1307_v4  ;;  %v1840_v4 = vsel %vm923_vm0, %v1835_v57, 0  ;;  %v2400_v57 = vunpack.c.l.bf16 %v6306_v2 }
 0x453   : > { %v1304_v60 = vpop.xlane.xlu1 %1303 }
 0x454   : > { %5207 = vrcp.f32 %v1304_v60 }
 0x455   : > { %5209 = vrcp.f32 %v1313_v16  ;;  %v1888_v16 = vpop.permute.xlu0 %1887 }
 0x456   : > { %v1893_v56 = vsel %vm923_vm0, %v1888_v16, 0 }
 0x457   : > { %v1310_v6 = vpop.xlane.xlu1 %1309 }
 0x458   : > { %5211 = vrcp.f32 %v1310_v6 }
 0x459   : > { %v5200_v10 = vpop.eup %5199 }
 0x45a   : > { %v1322_v43 = vmul.f32 %v5200_v10, %v6255_v45  ;;  %v5202_v24 = vpop.eup %5201  ;;  %v2401_v10 = vunpack.c.l.bf16 %v6252_v50  ;;  %v2428_v50 = vld [vmem:[#allocation2 + $0x40] ss:$12 sps:$4 sm:$0xff]  }
 0x45b   : > { %v1832_v44 = vpop.permute.xlu1 %1831  ;;  %v1325_v7 = vmul.f32 %v5202_v24, %v6195_v34  ;;  %v6420_v32 = vunpack.c.h.bf16 %v2428_v50 }
 0x45c   : > { %v1330_v29 = vpack.c.bf16 %v1323_v51, %v1322_v43  ;;  %v2427_v43 = vld [vmem:[#allocation2 + $0x30] sm:$0xff]   ;;  %v1994_v51 = vpop.permute.xlu0 %1993 }
 0x45d   : > { %v5204_v14 = vpop.eup %5203  ;;  %v6396_v18 = vunpack.c.h.bf16 %v2427_v43  ;;  %v1999_v24 = vsel %vm923_vm0, %v1994_v51, 0  ;;  %7464 = vst [vmem:[#allocation20_spill] sm:$0xff] %v6420_v32  ;;  %v2572_v37 = vmul.f32 %v6420_v32, %v6420_v32  ;;  %v3264_v32 = vld [vmem:[#allocation2 + $0x10] ss:$24 sps:$4 sm:$0xff]  }
 0x45e   : > { %4776 = vmatmul.mubr.msk.bf16.vlgmr.msra.gmra.mxu0 %vm1241_vm2, %v1330_v29  ;;  %v1324_v35 = vmul.f32 %v5204_v14, %v6266_v46  ;;  %v5206_v45 = vpop.eup %5205  ;;  %v6405_v29 = vunpack.c.l.bf16 %v2428_v50 }
 0x45f   : > { %4786 = vmatpush3.bf16.msra.mxu0 %v912_v3  ;;  %v1941_v22 = vpop.permute.xlu1 %1940  ;;  %4787 = vmatprep.mubr.msk.bf16.mxu0 %vm5605_vm1, %v7425_v30  ;;  %v1327_v20 = vmul.f32 %v5206_v45, %v6206_v1  ;;  %v2570_v3 = vmul.f32 %v6396_v18, %v6396_v18 }
 0x460   : > { %v1331_v27 = vpack.c.bf16 %v1325_v7, %v1324_v35  ;;  %4797 = vmatprep.subr.bf16.mxu0 %v7425_v30  ;;  %v1946_v52 = vsel %vm923_vm0, %v1941_v22, 0  ;;  %v2571_v14 = vmul.f32 %v6405_v29, %v6405_v29  ;;  %v2404_v35 = vunpack.c.h.bf16 %v6334_v62  ;;  %v1991_v45 = vpop.permute.xlu0 %1990 }
 0x461   : > { %v5208_v13 = vpop.eup %5207  ;;  %v2403_v7 = vunpack.c.l.bf16 %v2427_v43  ;;  %v2573_v22 = vmul.f32 %v6418_v21, %v6418_v21  ;;  %v2406_v62 = vunpack.c.h.bf16 %v6337_v39 }
 0x462   : > { %4782 = vmatmul.mubr.msk.bf16.vlgmr.msra.gmra.mxu1 %vm1241_vm2, %v1331_v27  ;;  %v1326_v25 = vmul.f32 %v5208_v13, %v6274_v17  ;;  %v5210_v46 = vpop.eup %5209 }
 0x463   : > { %4792 = vmatpush3.bf16.msra.mxu1 %v913_v55  ;;  %v1885_v34 = vpop.permute.xlu1 %1884  ;;  %4793 = vmatprep.mubr.msk.bf16.mxu1 %vm5605_vm1, %v7425_v30  ;;  %v1329_v17 = vmul.f32 %v5210_v46, %v6214_v8  ;;  %v2405_v55 = vunpack.c.h.bf16 %v6332_v28 }
 0x464   : > { %v1332_v19 = vpack.c.bf16 %v1327_v20, %v1326_v25  ;;  %4803 = vmatprep.subr.bf16.mxu1 %v7425_v30  ;;  %v2583_v39 = vpop.permute.xlu0 %2582 }
 0x465   : > { %v5212_v26 = vpop.eup %5211 }
 0x466   : > { %4788 = vmatmul.mubr.msk.bf16.vlgmr.msra.gmra.mxu0 %vm1241_vm2, %v1332_v19  ;;  %v1328_v33 = vmul.f32 %v5212_v26, %v6280_v15 }
 0x467   : > { %4798 = vmatpush3.bf16.xpose.msra.mxu0 %v1840_v4  ;;  %v1938_v1 = vpop.permute.xlu1 %1937  ;;  %4799 = vmatprep.mubr.msk.bf16.mxu0 %vm5605_vm1, %v7425_v30  ;;  %v2606_v4 = vsel %vm923_vm0, %v2583_v39, 0.0 }
 0x468   : > { %v1333_v60 = vpack.c.bf16 %v1329_v17, %v1328_v33  ;;  %4809 = vmatprep.subr.bf16.mxu0 %v7425_v30  ;;  %v2587_v33 = vpop.permute.xlu0 %2586 }
 0x469   : > { %v2612_v17 = vsel %vm923_vm0, %v2587_v33, 0.0 }
 0x46a   : > { %4794 = vmatmul.mubr.msk.bf16.vlgmr.msra.gmra.mxu1 %vm1241_vm2, %v1333_v60 }
 0x46b   : > { %4804 = vmatpush3.bf16.xpose.msra.mxu1 %v1893_v56  ;;  %v2413_v15 = vpop.permute.xlu1 %2412  ;;  %4805 = vmatprep.mubr.msk.bf16.mxu1 %vm5605_vm1, %v7425_v30  ;;  %v6465_v56 = vld [vmem:[%s7412_s4] sm:$0xf] }
 0x46c   : > { %v6375_v8 = vadd.f32 %v2413_v15, %v2400_v57  ;;  %v6377_v6 = vadd.f32 %v2413_v15, %v2399_v41  ;;  %4815 = vmatprep.subr.bf16.mxu1 %v7425_v30  ;;  %v6388_v54 = vadd.f32 %v2413_v15, %v2402_v11  ;;  %v6390_v0 = vadd.f32 %v2413_v15, %v2401_v10 }
 0x46d   : > { %v6432_v27 = vadd.f32 %v2413_v15, %v2404_v35  ;;  %v6434_v13 = vadd.f32 %v2413_v15, %v2403_v7  ;;  %v6446_v46 = vadd.f32 %v2413_v15, %v2406_v62  ;;  %7467 = vst [vmem:[#allocation23_spill] sm:$0xff] %v6465_v56  ;;  %v2475_v57 = vrot.slane %v6465_v56, 2 }
 0x46e   : > { %4800 = vmatmul.mubr.msk.bf16.vlgmr.msra.gmra.mxu0 %vm923_vm0, %v1832_v44  ;;  %v2478_v48 = vmul.f32 %v6375_v8, %v6375_v8  ;;  %v2477_v2 = vmul.f32 %v6377_v6, %v6377_v6  ;;  %v2480_v44 = vmul.f32 %v6388_v54, %v6388_v54  ;;  %v2479_v12 = vmul.f32 %v6390_v0, %v6390_v0 }
 0x46f   : > { %4810 = vmatpush3.bf16.xpose.msra.mxu0 %v1946_v52  ;;  %4811 = vmatprep.mubr.msk.bf16.mxu0 %vm5605_vm1, %v7425_v30  ;;  %v2482_v25 = vmul.f32 %v6432_v27, %v6432_v27  ;;  %v2481_v20 = vmul.f32 %v6434_v13, %v6434_v13  ;;  %7465 = vst [vmem:[#allocation21_spill] sm:$0xff] %v6446_v46  ;;  %v2585_v26 = vpop.permute.xlu1 %2584  ;;  %4969 = vpush %v2475_v57 }
 0x470   : > { %2495 = vrot.lane.b32.xlu1 %v2478_v48, %s5608_s14  ;;  %2493 = vrot.lane.b32.xlu0 %v2477_v2, %s5608_s14  ;;  %v2484_v19 = vmul.f32 %v6446_v46, %v6446_v46  ;;  %v2609_v16 = vsel %vm923_vm0, %v2585_v26, 0.0 }
 0x471   : > { %4821 = vmatprep.subr.bf16.mxu0 %v7425_v30 }
 0x472   : > { %4806 = vmatmul.mubr.msk.bf16.vlgmr.msra.gmra.mxu1 %vm923_vm0, %v1885_v34  ;;  %v6448_v34 = vadd.f32 %v2413_v15, %v2405_v55 }
 0x473   : > { %4816 = vmatpush3.bf16.xpose.msra.mxu1 %v1999_v24  ;;  %4817 = vmatprep.mubr.msk.bf16.mxu1 %vm5605_vm1, %v7425_v30 }
 0x474   : > { %2499 = vrot.lane.b32.xlu1 %v2480_v44, %s5608_s14  ;;  %2497 = vrot.lane.b32.xlu0 %v2479_v12, %s5608_s14  ;;  %7466 = vst [vmem:[#allocation22_spill] sm:$0xff] %v6448_v34  ;;  %v2483_v28 = vmul.f32 %v6448_v34, %v6448_v34  ;;  %v6595_v34 = vld [vmem:[#allocation2 + $0x58] sm:$0xff]  }
 0x475   : > { %4827 = vmatprep.subr.bf16.mxu1 %v7425_v30 }
 0x476   : > { %4812 = vmatmul.mubr.msk.bf16.vlgmr.msra.gmra.mxu0 %vm923_vm0, %v1938_v1  ;;  %v2589_v1 = vpop.permute.xlu1 %2588 }
 0x477   : > { %4823 = vmatprep.mubr.msk.bf16.mxu0 %vm5605_vm1, %v7425_v30  ;;  %v2615_v60 = vsel %vm923_vm0, %v2589_v1, 0.0  ;;  %v825_v1 = vld [vmem:[#allocation9 + $0x18] sm:$0xff] }
 0x478   : > { %2592 = vrot.lane.b32.xlu1 %v2571_v14, %s5608_s14  ;;  %2590 = vrot.lane.b32.xlu0 %v2570_v3, %s5608_s14 }
 0x47a   : > { %4818 = vmatmul.mubr.msk.bf16.vlgmr.msra.gmra.mxu1 %vm923_vm0, %v1991_v45 }
 0x47b   : > { %4829 = vmatprep.mubr.msk.bf16.mxu1 %vm5605_vm1, %v7425_v30 }
 0x47c   : > { %2596 = vrot.lane.b32.xlu1 %v2573_v22, %s5608_s14  ;;  %2594 = vrot.lane.b32.xlu0 %v2572_v37, %s5608_s14 }
 0x480   : > { %2503 = vrot.lane.b32.xlu1 %v2482_v25, %s5608_s14  ;;  %2501 = vrot.lane.b32.xlu0 %v2481_v20, %s5608_s14 }
 0x484   : > { %2507 = vrot.lane.b32.xlu1 %v2484_v19, %s5608_s14  ;;  %2505 = vrot.lane.b32.xlu0 %v2483_v28, %s5608_s14  ;;  %v824_v28 = vld [vmem:[#allocation9 + $0x10] sm:$0xff] }
 0x4a0   : > { %s4970_s21 = spop %4969 }
 0x4a3   : > { %2607 = vadd.xlane.f32.xlu0 %v2606_v4 }
 0x4a7   : > { %2613 = vadd.xlane.f32.xlu0 %v2612_v17 }
 0x4a8   : > { %2610 = vadd.xlane.f32.xlu1 %v2609_v16 }
 0x4ac   : > { %2616 = vadd.xlane.f32.xlu1 %v2615_v60 }
 0x4e2   : > { %v2494_v41 = vpop.permute.xlu0 %2493  ;;  %v2496_v15 = vpop.permute.xlu1 %2495 }
 0x4e3   : > { %v2517_v11 = vsel %vm923_vm0, %v2494_v41, 0.0  ;;  %v2520_v10 = vsel %vm923_vm0, %v2496_v15, 0.0 }
 0x4e4   : > { %2518 = vadd.xlane.f32.xlu0 %v2517_v11  ;;  %2521 = vadd.xlane.f32.xlu1 %v2520_v10 }
 0x4e6   : > { %v2500_v15 = vpop.permute.xlu1 %2499 }
 0x51e   : > { %v1371_v52 = vpop.f32.mrf.mxu0 }
 0x51f   : > { %v4572_v48 = vpack.c.bf16 %v1371_v52, %v1371_v52 }
 0x520   : > { %v4777_v2 = vpop.f32.mrf.mxu0 }
 0x521   : > { %1543 = vst.msk [vmem:[#allocation3] sm:$0xf] %vm1542_vm3, %v4572_v48 }
 0x522   : > { %v1374_v43 = vpop.f32.mrf.mxu0  ;;  %v1415_v51 = vpop.f32.mrf.mxu1 }
 0x523   : > { %v4573_v50 = vpack.c.bf16 %v1374_v43, %v1374_v43  ;;  %v4574_v24 = vpack.c.bf16 %v1415_v51, %v1415_v51 }
 0x524   : > { %v4778_v44 = vpop.f32.mrf.mxu0  ;;  %v4783_v12 = vpop.f32.mrf.mxu1 }
 0x525   : > { %1544 = vst.msk [vmem:[#allocation3 + $0x4] sm:$0xf] %vm1542_vm3, %v4573_v50  ;;  %1545 = vst.msk [vmem:[#allocation3 + $0x8] sm:$0xf] %vm1542_vm3, %v4574_v24 }
 0x526   : > { %v1418_v14 = vpop.f32.mrf.mxu1  ;;  %v1459_v3 = vpop.f32.mrf.mxu0 }
 0x527   : > { %v4575_v35 = vpack.c.bf16 %v1418_v14, %v1418_v14  ;;  %v4576_v7 = vpack.c.bf16 %v1459_v3, %v1459_v3 }
 0x528   : > { %v4784_v45 = vpop.f32.mrf.mxu1  ;;  %v4789_v22 = vpop.f32.mrf.mxu0 }
 0x529   : > { %1546 = vst.msk [vmem:[#allocation3 + $0xc] sm:$0xf] %vm1542_vm3, %v4575_v35  ;;  %1547 = vst.msk [vmem:[#allocation3 + $0x10] sm:$0xf] %vm1542_vm3, %v4576_v7  ;;  %v2593_v7 = vpop.permute.xlu1 %2592  ;;  %v2498_v22 = vpop.permute.xlu0 %2497 }
 0x52a   : > { %v1462_v37 = vpop.f32.mrf.mxu0  ;;  %v1503_v62 = vpop.f32.mrf.mxu1 }
 0x52b   : > { %v4577_v55 = vpack.c.bf16 %v1462_v37, %v1462_v37  ;;  %v4578_v25 = vpack.c.bf16 %v1503_v62, %v1503_v62 }
 0x52c   : > { %v4790_v20 = vpop.f32.mrf.mxu0  ;;  %v4795_v19 = vpop.f32.mrf.mxu1 }
 0x52d   : > { %1548 = vst.msk [vmem:[#allocation3 + $0x14] sm:$0xf] %vm1542_vm3, %v4577_v55  ;;  %1549 = vst.msk [vmem:[#allocation3 + $0x18] sm:$0xf] %vm1542_vm3, %v4578_v25  ;;  %v2526_v25 = vsel %vm923_vm0, %v2500_v15, 0.0  ;;  %v2621_v15 = vsel %vm923_vm0, %v2593_v7, 0.0 }
 0x52e   : > { %v1506_v39 = vpop.f32.mrf.mxu1  ;;  %v1876_v26 = vpop.f32.mrf.mxu0 }
 0x52f   : > { %v4579_v4 = vpack.c.bf16 %v1506_v39, %v1506_v39  ;;  %v1877_v33 = vadd.f32 %v1876_v26, %v824_v28 }
 0x530   : > { %v4796_v17 = vpop.f32.mrf.mxu1  ;;  %v4801_v16 = vpop.f32.mrf.mxu0 }
 0x531   : > { %1550 = vst.msk [vmem:[#allocation3 + $0x1c] sm:$0xf] %vm1542_vm3, %v4579_v4  ;;  %v6479_v60 = vadd.f32 %v1877_v33, %v6110_v47  ;;  %v2597_v17 = vpop.permute.xlu1 %2596 }
 0x532   : > { %v1879_v57 = vpop.f32.mrf.mxu0  ;;  %v1929_v41 = vpop.f32.mrf.mxu1 }
 0x533   : > { %v1880_v11 = vadd.f32 %v1879_v57, %v825_v1  ;;  %v1930_v10 = vadd.f32 %v1929_v41, %v824_v28  ;;  %v2050_v52 = vsel %vm1241_vm2, %v6479_v60, -inf  ;;  %v2591_v57 = vpop.permute.xlu0 %2590 }
 0x534   : > { %v4802_v48 = vpop.f32.mrf.mxu0  ;;  %v4807_v2 = vpop.f32.mrf.mxu1  ;;  %2051 = vmax.xlane.f32.xlu0 %v2050_v52  ;;  %v2618_v52 = vsel %vm923_vm0, %v2591_v57, 0.0 }
 0x535   : > { %v6484_v43 = vadd.f32 %v1880_v11, %v6115_v58  ;;  %v6487_v51 = vadd.f32 %v1930_v10, %v6124_v63  ;;  %v2627_v11 = vsel %vm923_vm0, %v2597_v17, 0.0 }
 0x536   : > { %v1932_v50 = vpop.f32.mrf.mxu1  ;;  %v1982_v47 = vpop.f32.mrf.mxu0 }
 0x537   : > { %v1933_v24 = vadd.f32 %v1932_v50, %v825_v1  ;;  %v1983_v44 = vadd.f32 %v1982_v47, %v824_v28  ;;  %v2056_v12 = vsel %vm1241_vm2, %v6487_v51, -inf  ;;  %v2053_v14 = vsel %vm1241_vm2, %v6484_v43, -inf  ;;  %v2595_v10 = vpop.permute.xlu0 %2594 }
 0x538   : > { %v4808_v3 = vpop.f32.mrf.mxu1  ;;  %v4813_v35 = vpop.f32.mrf.mxu0  ;;  %2057 = vmax.xlane.f32.xlu0 %v2056_v12  ;;  %2054 = vmax.xlane.f32.xlu1 %v2053_v14  ;;  %v2624_v50 = vsel %vm923_vm0, %v2595_v10, 0.0  ;;  %v6525_v14 = vld [vmem:[%s7411_s3] sm:$0xf] }
 0x539   : > { %v6494_v58 = vadd.f32 %v1983_v44, %v6139_v5  ;;  %v6497_v37 = vadd.f32 %v1933_v24, %v6129_v9  ;;  %7468 = vst [vmem:[#allocation24_spill] sm:$0xff] %v6525_v14  ;;  %v1618_v3 = vrot.slane %v6525_v14, %v1569_v31 }
 0x53a   : > { %v1985_v63 = vpop.f32.mrf.mxu0  ;;  %v2035_v45 = vpop.f32.mrf.mxu1 }
 0x53b   : > { %v1986_v62 = vadd.f32 %v1985_v63, %v825_v1  ;;  %v2062_v55 = vsel %vm1241_vm2, %v6494_v58, -inf  ;;  %v2036_v26 = vadd.f32 %v2035_v45, %v824_v28  ;;  %v2059_v9 = vsel %vm1241_vm2, %v6497_v37, -inf  ;;  %v2504_v28 = vpop.permute.xlu1 %2503 }
 0x53c   : > { %v4814_v20 = vpop.f32.mrf.mxu0  ;;  %v4819_v19 = vpop.f32.mrf.mxu1  ;;  %2063 = vmax.xlane.f32.xlu0 %v2062_v55  ;;  %2527 = vadd.xlane.f32.xlu1 %v2526_v25  ;;  %v2532_v48 = vsel %vm923_vm0, %v2504_v28, 0.0 }
 0x53d   : > { %v6503_v39 = vadd.f32 %v1986_v62, %v6146_v36  ;;  %v2048_v41 = vadd.f32 %v2036_v26, %v6144_v53  ;;  %v2523_v36 = vsel %vm923_vm0, %v2498_v22, 0.0  ;;  %v2502_v53 = vpop.permute.xlu0 %2501 }
 0x53e   : > { %v2038_v5 = vpop.f32.mrf.mxu1  ;;  %v2529_v24 = vsel %vm923_vm0, %v2502_v53, 0.0 }
 0x53f   : > { %v6505_v4 = vadd.f32 %v2038_v5, %v825_v1  ;;  %v2065_v33 = vsel %vm1241_vm2, %v6503_v39, -inf  ;;  %v2068_v1 = vsel %vm1241_vm2, %v2048_v41, -inf  ;;  %v2508_v2 = vpop.permute.xlu1 %2507 }
 0x540   : > { %v4820_v16 = vpop.f32.mrf.mxu1  ;;  %2060 = vmax.xlane.f32.xlu0 %v2059_v9  ;;  %2066 = vmax.xlane.f32.xlu1 %v2065_v33  ;;  %v2538_v47 = vsel %vm923_vm0, %v2508_v2, 0.0  ;;  %v6571_v2 = vld [vmem:[#allocation2 + $0x14] sm:$0xff]  }
 0x541   : > { %v2506_v44 = vpop.permute.xlu0 %2505 }
 0x542   : > { %v2535_v12 = vsel %vm923_vm0, %v2506_v44, 0.0 }
 0x543   : > { %v6533_v7 = vpop.xlane.xlu1 %2610 }
 0x544   : > { %2524 = vadd.xlane.f32.xlu0 %v2523_v36  ;;  %2622 = vadd.xlane.f32.xlu1 %v2621_v15 }
 0x545   : > { %v6531_v35 = vpop.xlane.xlu0 %2607 }
 0x547   : > { %v6539_v22 = vpop.xlane.xlu1 %2616 }
 0x548   : > { %2069 = vmax.xlane.f32.xlu0 %v2068_v1  ;;  %2628 = vadd.xlane.f32.xlu1 %v2627_v11 }
 0x549   : > { %v6535_v63 = vpop.xlane.xlu0 %2613 }
 0x54c   : > { %2619 = vadd.xlane.f32.xlu0 %v2618_v52  ;;  %2533 = vadd.xlane.f32.xlu1 %v2532_v48  ;;  %v6569_v48 = vld [vmem:[#allocation2 + $0x8] sm:$0xff]  }
 0x54d   : > { %v1607_v44 = vunpack.c.l.bf16 %v6569_v48 }
 0x550   : > { %2625 = vadd.xlane.f32.xlu0 %v2624_v50  ;;  %2539 = vadd.xlane.f32.xlu1 %v2538_v47  ;;  %v6575_v50 = vld [vmem:[#allocation2 + $0x20] sm:$0xff]   ;;  %v6577_v47 = vld [vmem:[#allocation2 + $0x2c] sm:$0xff]  }
 0x554   : > { %2530 = vadd.xlane.f32.xlu0 %v2529_v24 }
 0x558   : > { %2536 = vadd.xlane.f32.xlu0 %v2535_v12  ;;  %v1608_v12 = vunpack.c.l.bf16 %v6571_v2 }
 0x56d   : > { %v6537_v45 = vpop.xlane.xlu0 %2518  ;;  %v6543_v55 = vpop.xlane.xlu1 %2521 }
 0x56e   : > { %1620 = vrot.lane.b32.xlu0 %v1618_v3, %s5607_s26 }
 0x5bd   : > { %v6541_v62 = vpop.xlane.xlu0 %2051 }
 0x5c1   : > { %v6545_v25 = vpop.xlane.xlu0 %2057  ;;  %v6547_v20 = vpop.xlane.xlu1 %2054 }
 0x5c5   : > { %v6549_v31 = vpop.xlane.xlu0 %2063  ;;  %v6551_v19 = vpop.xlane.xlu1 %2527 }
 0x5c9   : > { %v6553_v5 = vpop.xlane.xlu0 %2060  ;;  %v6557_v9 = vpop.xlane.xlu1 %2066 }
 0x5cd   : > { %v6555_v26 = vpop.xlane.xlu0 %2524  ;;  %v6559_v16 = vpop.xlane.xlu1 %2622 }
 0x5d1   : > { %v2070_v33 = vpop.xlane.xlu0 %2069  ;;  %v6565_v28 = vpop.xlane.xlu1 %2628 }
 0x5d2   : > { %v2080_v17 = vsub.f32 %v2048_v41, %v2070_v33 }
 0x5d4   : > { %v2094_v57 = vmul.f32 1.442695, %v2080_v17 }
 0x5d5   : > { %v6561_v36 = vpop.xlane.xlu0 %2619  ;;  %v2534_v11 = vpop.xlane.xlu1 %2533 }
 0x5d6   : > { %5213 = vpow2.f32 %v2094_v57  ;;  %v2546_v53 = vmax.f32 %v2534_v11, 1e-24  ;;  %v1609_v57 = vunpack.c.l.bf16 %v6575_v50  ;;  %v6585_v11 = vld [vmem:[#allocation2 + $0x38] sm:$0xff]  }
 0x5d9   : > { %v6563_v15 = vpop.xlane.xlu0 %2625 }
 0x5dd   : > { %v2531_v1 = vpop.xlane.xlu0 %2530 }
 0x5de   : > { %v2545_v10 = vmax.f32 %v2531_v1, 1e-24  ;;  %v1610_v1 = vunpack.c.l.bf16 %v6577_v47 }
 0x5e0   : > { %5215 = vrsqrt.f32 %v2545_v10  ;;  %v1611_v10 = vunpack.c.l.bf16 %v6585_v11 }
 0x5e1   : > { %v6567_v52 = vpop.xlane.xlu0 %2536  ;;  %5217 = vrsqrt.f32 %v2546_v53  ;;  %v6593_v53 = vld [vmem:[#allocation2 + $0x50] sm:$0xff]  }
 0x5e3   : > { %v6573_v41 = vpop.eup %5213 }
 0x5e4   : > { %7469 = vst [vmem:[#allocation25_spill] sm:$0xff] %v6573_v41  ;;  %v2116_v24 = vsel %vm1241_vm2, %v6573_v41, 0.0 }
 0x5e5   : > { %2117 = vadd.xlane.f32.xlu0 %v2116_v24  ;;  %v1621_v3 = vpop.permute.xlu0 %1620  ;;  %v1612_v24 = vunpack.c.l.bf16 %v6587_v38 }
 0x5e6   : > { %v1623_v33 = vadd.f32 %v1621_v3, %v1607_v44  ;;  %v1624_v17 = vadd.f32 %v1621_v3, %v1608_v12  ;;  %v1625_v14 = vadd.f32 %v1621_v3, %v1609_v57  ;;  %v1626_v41 = vadd.f32 %v1621_v3, %v1610_v1 }
 0x5e7   : > { %v1627_v12 = vadd.f32 %v1621_v3, %v1611_v10  ;;  %v1628_v56 = vadd.f32 %v1621_v3, %v1612_v24  ;;  %v6600_v1 = vstv %s4970_s21  ;;  %s4280_s21 = scalar_lea.sflag [#allocation6], %s5813_s5 }
 0x5e8   : > { %v1631_v30 = vpack.c.bf16 %v1624_v17, %v1623_v33  ;;  %v1632_v44 = vpack.c.bf16 %v1626_v41, %v1625_v14  ;;  %v1614_v17 = vunpack.c.h.bf16 %v6595_v34 }
 0x5e9   : > { %v1633_v46 = vpack.c.bf16 %v1628_v56, %v1627_v12  ;;  %v7434_v12 = vsub.s32 3, %v5849_v42 }
 0x5ea   : > { %2143 = vrot.lane.b32.xlu1 %v1631_v30, %s5606_s23  ;;  %v1613_v30 = vunpack.c.l.bf16 %v6593_v53  ;;  %v1630_v41 = vadd.f32 %v1621_v3, %v1614_v17 }
 0x5ec   : > { %v1629_v14 = vadd.f32 %v1621_v3, %v1613_v30  ;;  %v3250_v3 = vrot.slane %v6312_v23, %v7434_v12  ;;  %v6614_v30 = vunpack.c.l.bf16 %v3264_v32  ;;  %v2076_v23 = vsub.f32 %v6487_v51, %v6545_v25 }
 0x5ed   : > { %v5216_v33 = vpop.eup %5215  ;;  %v2077_v51 = vsub.f32 %v6497_v37, %v6553_v5 }
 0x5ee   : > { %2191 = vrot.lane.b32.xlu1 %v1632_v44, %s5606_s23  ;;  %v5218_v57 = vpop.eup %5217  ;;  %v2562_v10 = vmul.f32 %v5216_v33, %v6600_v1  ;;  %v1634_v24 = vpack.c.bf16 %v1630_v41, %v1629_v14  ;;  %v2074_v33 = vsub.f32 %v6479_v60, %v6541_v62  ;;  %v3407_v17 = vmul.f32 %v6614_v30, %v6614_v30 }
 0x5ef   : > { %v2563_v56 = vmul.f32 %v5218_v57, %v6600_v1  ;;  %v6621_v57 = vunpack.c.h.bf16 %v3264_v32  ;;  %v2086_v62 = vmul.f32 1.442695, %v2076_v23  ;;  %v2088_v25 = vmul.f32 1.442695, %v2077_v51 }
 0x5f0   : > { %v2650_v44 = vmul.f32 %v2562_v10, %v6434_v13  ;;  %v2082_v13 = vmul.f32 1.442695, %v2074_v33  ;;  %v2079_v41 = vsub.f32 %v6503_v39, %v6557_v9  ;;  %v2633_v33 = vmax.f32 %v6539_v22, 1e-24 }
 0x5f1   : > { %v3409_v60 = vmul.f32 %v6621_v57, %v6621_v57  ;;  %v2635_v22 = vmax.f32 %v6559_v16, 1e-24 }
 0x5f2   : > { %2239 = vrot.lane.b32.xlu1 %v1633_v46, %s5606_s23  ;;  %v2651_v46 = vmul.f32 %v2563_v56, %v6432_v27  ;;  %v2075_v27 = vsub.f32 %v6484_v43, %v6547_v20  ;;  %5219 = vpow2.f32 %v2082_v13  ;;  %v2078_v43 = vsub.f32 %v6494_v58, %v6549_v31  ;;  %v6631_v20 = vld [vmem:[#allocation10 + $0x38] sm:$0xff] }
 0x5f3   : > { %v6635_v32 = vadd.f32 %v6631_v20, %v6505_v4  ;;  %v2092_v31 = vmul.f32 1.442695, %v2079_v41  ;;  %v2541_v13 = vmax.f32 %v6537_v45, 1e-24  ;;  %v2634_v45 = vmax.f32 %v6561_v36, 1e-24 }
 0x5f4   : > { %v2656_v21 = vpack.c.bf16 %v2651_v46, %v2650_v44  ;;  %v2090_v14 = vmul.f32 1.442695, %v2078_v43 }
 0x5f5   : > { %v2071_v10 = vsel %vm1241_vm2, %v6635_v32, -inf }
 0x5fb   : > { %2287 = vrot.lane.b32.xlu0 %v1634_v24, %s5606_s23  ;;  %v2631_v24 = vmax.f32 %v6533_v7, 1e-24  ;;  %v2632_v7 = vmax.f32 %v6535_v63, 1e-24 }
 0x5ff   : > { %2777 = vrot.lane.b32.xlu0 %v2656_v21, %s5608_s14  ;;  %v2084_v21 = vmul.f32 1.442695, %v2075_v27  ;;  %v6643_v58 = vpop.eup %5219  ;;  %v2542_v27 = vmax.f32 %v6543_v55, 1e-24 }
 0x600   : > { %v2098_v4 = vsel %vm1241_vm2, %v6643_v58, 0.0 }
 0x601   : > { %5221 = vpow2.f32 %v2084_v21 }
 0x602   : > { %5223 = vpow2.f32 %v2086_v62 }
 0x603   : > { %3252 = vrot.lane.b32.xlu0 %v3250_v3, %s5606_s23  ;;  %5225 = vpow2.f32 %v2090_v14  ;;  %v2630_v3 = vmax.f32 %v6531_v35, 1e-24 }
 0x604   : > { %5227 = vpow2.f32 %v2088_v25 }
 0x605   : > { %5229 = vpow2.f32 %v2092_v31 }
 0x606   : > { %5231 = vrsqrt.f32 %v2631_v24 }
 0x607   : > { %3424 = vrot.lane.b32.xlu0 %v3407_v17, %s5607_s26  ;;  %5233 = vrsqrt.f32 %v2630_v3 }
 0x608   : > { %5235 = vrsqrt.f32 %v2633_v33 }
 0x609   : > { %5237 = vrsqrt.f32 %v2541_v13 }
 0x60a   : > { %5239 = vrsqrt.f32 %v2542_v27 }
 0x60b   : > { %3428 = vrot.lane.b32.xlu0 %v3409_v60, %s5607_s26  ;;  %5241 = vrsqrt.f32 %v2632_v7  ;;  %v3243_v7 = vunpack.c.h.bf16 %v6577_v47 }
 0x60c   : > { %5243 = vrsqrt.f32 %v2634_v45 }
 0x60d   : > { %5245 = vrsqrt.f32 %v2635_v22  ;;  %v3242_v22 = vunpack.c.h.bf16 %v6575_v50 }
 0x60e   : > { %v6647_v56 = vpop.eup %5221 }
 0x60f   : > { %v2101_v37 = vsel %vm1241_vm2, %v6647_v56, 0.0  ;;  %v6651_v5 = vpop.eup %5223 }
 0x610   : > { %v2104_v39 = vsel %vm1241_vm2, %v6651_v5, 0.0  ;;  %v6655_v9 = vpop.eup %5225 }
 0x611   : > { %v2110_v44 = vsel %vm1241_vm2, %v6655_v9, 0.0  ;;  %v6660_v46 = vpop.eup %5227 }
 0x612   : > { %v2107_v17 = vsel %vm1241_vm2, %v6660_v46, 0.0  ;;  %v6668_v23 = vpop.eup %5229 }
 0x613   : > { %v2113_v35 = vsel %vm1241_vm2, %v6668_v23, 0.0  ;;  %v5232_v55 = vpop.eup %5231 }
 0x614   : > { %v5234_v21 = vpop.eup %5233  ;;  %v2659_v63 = vmul.f32 %v5232_v55, %v6318_v61 }
 0x615   : > { %v5236_v60 = vpop.eup %5235  ;;  %v2658_v14 = vmul.f32 %v5234_v21, %v6250_v49 }
 0x616   : > { %2072 = vmax.xlane.f32.xlu1 %v2071_v10  ;;  %v5238_v62 = vpop.eup %5237  ;;  %v2661_v41 = vmul.f32 %v5236_v60, %v6326_v59 }
 0x617   : > { %v5240_v43 = vpop.eup %5239  ;;  %v2666_v25 = vpack.c.bf16 %v2659_v63, %v2658_v14  ;;  %v2558_v10 = vmul.f32 %v5238_v62, %v6600_v1  ;;  %v6735_v63 = vunpack.c.l.bf16 %v6595_v34 }
 0x618   : > { %v5242_v51 = vpop.eup %5241  ;;  %v2559_v36 = vmul.f32 %v5240_v43, %v6600_v1  ;;  %v3244_v43 = vunpack.c.h.bf16 %v6585_v11 }
 0x619   : > { %v2660_v16 = vmul.f32 %v5242_v51, %v6260_v40  ;;  %v6689_v40 = vpop.xlane.xlu1 %2539  ;;  %v3413_v14 = vmul.f32 %v6735_v63, %v6735_v63 }
 0x61a   : > { %2099 = vadd.xlane.f32.xlu1 %v2098_v4  ;;  %v2646_v4 = vmul.f32 %v2558_v10, %v6377_v6  ;;  %v2647_v61 = vmul.f32 %v2559_v36, %v6375_v8  ;;  %v7470_v6 = vmov 0.0  }
 0x61b   : > { %v2667_v31 = vpack.c.bf16 %v2661_v41, %v2660_v16 }
 0x61e   : > { %2102 = vadd.xlane.f32.xlu1 %v2101_v37  ;;  %v5244_v37 = vpop.eup %5243 }
 0x61f   : > { %v5246_v49 = vpop.eup %5245  ;;  %v2662_v59 = vmul.f32 %v5244_v37, %v6396_v18 }
 0x620   : > { %v2663_v24 = vmul.f32 %v5246_v49, %v6405_v29  ;;  %v3240_v29 = vunpack.c.h.bf16 %v6569_v48  ;;  %v2637_v49 = vmax.f32 %v6565_v28, 1e-24 }
 0x622   : > { %2105 = vadd.xlane.f32.xlu1 %v2104_v39  ;;  %v2654_v39 = vpack.c.bf16 %v2647_v61, %v2646_v4  ;;  %v2544_v61 = vmax.f32 %v6551_v19, 1e-24 }
 0x626   : > { %2111 = vadd.xlane.f32.xlu1 %v2110_v44  ;;  %v2668_v44 = vpack.c.bf16 %v2663_v24, %v2662_v59  ;;  %v2636_v59 = vmax.f32 %v6563_v15, 1e-24  ;;  %v2547_v24 = vmax.f32 %v6567_v52, 1e-24 }
 0x62a   : > { %2108 = vadd.xlane.f32.xlu1 %v2107_v17  ;;  %v3241_v17 = vunpack.c.h.bf16 %v6571_v2 }
 0x62e   : > { %2114 = vadd.xlane.f32.xlu1 %v2113_v35  ;;  %v3245_v35 = vunpack.c.h.bf16 %v6587_v38  ;;  %v6723_v38 = vld [vmem:[#allocation2 + $0x1c] ss:$36 sps:$4 sm:$0xff]  }
 0x62f   : > { %v6729_v60 = vunpack.c.h.bf16 %v6723_v38 }
 0x631   : > { %v3411_v62 = vmul.f32 %v6729_v60, %v6729_v60 }
 0x63f   : > { %2674 = vrot.lane.b32.xlu1 %v2666_v25, %s5608_s14  ;;  %v3246_v25 = vunpack.c.h.bf16 %v6593_v53  ;;  %v2543_v53 = vmax.f32 %v6555_v26, 1e-24 }
 0x643   : > { %2727 = vrot.lane.b32.xlu1 %v2667_v31, %s5608_s14 }
 0x647   : > { %2671 = vrot.lane.b32.xlu1 %v2654_v39, %s5608_s14 }
 0x64b   : > { %2780 = vrot.lane.b32.xlu1 %v2668_v44, %s5608_s14 }
 0x65c   : > { %v2144_v3 = vpop.permute.xlu1 %2143 }
 0x65d   : > { %4822 = vmatpush3.bf16.msra.mxu0 %v2144_v3 }
 0x65e   : > { %4833 = vmatprep.subr.bf16.mxu0 %v7470_v6 }
 0x660   : > { %v2192_v8 = vpop.permute.xlu1 %2191 }
 0x661   : > { %4828 = vmatpush3.bf16.msra.mxu1 %v2192_v8 }
 0x662   : > { %4839 = vmatprep.subr.bf16.mxu1 %v7470_v6 }
 0x664   : > { %v2240_v10 = vpop.permute.xlu1 %2239 }
 0x66e   : > { %v6693_v33 = vpop.xlane.xlu0 %2117 }
 0x672   : > { %v6695_v18 = vpop.permute.xlu0 %2287 }
 0x676   : > { %v6697_v13 = vpop.permute.xlu0 %2777 }
 0x67a   : > { %v6700_v27 = vpop.permute.xlu0 %3252 }
 0x67b   : > { %v6706_v45 = vadd.f32 %v6700_v27, %v3240_v29  ;;  %v6710_v55 = vadd.f32 %v6700_v27, %v3241_v17  ;;  %v6713_v21 = vadd.f32 %v6700_v27, %v3243_v7  ;;  %v6716_v48 = vadd.f32 %v6700_v27, %v3245_v35 }
 0x67c   : > { %v6721_v47 = vadd.f32 %v6700_v27, %v3242_v22  ;;  %v6742_v51 = vadd.f32 %v6700_v27, %v3244_v43  ;;  %v6749_v34 = vadd.f32 %v6700_v27, %v3246_v25 }
 0x67d   : > { %v3318_v2 = vmul.f32 %v6706_v45, %v6706_v45 }
 0x67e   : > { %v3320_v50 = vmul.f32 %v6721_v47, %v6721_v47  ;;  %v3322_v41 = vmul.f32 %v6742_v51, %v6742_v51  ;;  %v3324_v11 = vmul.f32 %v6749_v34, %v6749_v34 }
 0x67f   : > { %3335 = vrot.lane.b32.xlu0 %v3318_v2, %s5607_s26 }
 0x683   : > { %3339 = vrot.lane.b32.xlu0 %v3320_v50, %s5607_s26 }
 0x687   : > { %3432 = vrot.lane.b32.xlu0 %v3411_v62, %s5607_s26 }
 0x68b   : > { %3436 = vrot.lane.b32.xlu0 %v3413_v14, %s5607_s26 }
 0x68f   : > { %3343 = vrot.lane.b32.xlu0 %v3322_v41, %s5607_s26 }
 0x693   : > { %3347 = vrot.lane.b32.xlu0 %v3324_v11, %s5607_s26 }
 0x69f   : > { %v2073_v36 = vpop.xlane.xlu1 %2072 }
 0x6a0   : > { %v2081_v16 = vsub.f32 %v6635_v32, %v2073_v36  ;;  %v2548_v32 = vmax.f32 %v6689_v40, 1e-24 }
 0x6a2   : > { %v2096_v31 = vmul.f32 1.442695, %v2081_v16  ;;  %v7471_v16 = vld [vmem:[#allocation20_spill] sm:$0xff] }
 0x6a3   : > { %v2100_v4 = vpop.xlane.xlu1 %2099 }
 0x6a4   : > { %5247 = vpow2.f32 %v2096_v31 }
 0x6a5   : > { %5249 = vrcp.f32 %v2100_v4 }
 0x6a7   : > { %v2103_v37 = vpop.xlane.xlu1 %2102 }
 0x6a8   : > { %5251 = vrcp.f32 %v2103_v37  ;;  %v7472_v37 = vld [vmem:[#allocation19_spill] sm:$0xff] }
 0x6a9   : > { %5253 = vrsqrt.f32 %v2543_v53 }
 0x6aa   : > { %5255 = vrsqrt.f32 %v2544_v61 }
 0x6ab   : > { %v2106_v39 = vpop.xlane.xlu1 %2105  ;;  %5257 = vrsqrt.f32 %v2637_v49 }
 0x6ac   : > { %5259 = vrsqrt.f32 %v2636_v59 }
 0x6ad   : > { %5261 = vrsqrt.f32 %v2547_v24  ;;  %v7473_v24 = vld [vmem:[#allocation22_spill] sm:$0xff] }
 0x6ae   : > { %5263 = vrcp.f32 %v2106_v39 }
 0x6af   : > { %v2112_v44 = vpop.xlane.xlu1 %2111  ;;  %5265 = vrsqrt.f32 %v2548_v32 }
 0x6b1   : > { %v6762_v26 = vpop.eup %5247 }
 0x6b2   : > { %v2119_v19 = vsel %vm1241_vm2, %v6762_v26, 0.0  ;;  %v5250_v3 = vpop.eup %5249 }
 0x6b3   : > { %2120 = vadd.xlane.f32.xlu1 %v2119_v19  ;;  %v2109_v28 = vpop.xlane.xlu1 %2108  ;;  %v2130_v52 = vmul.f32 %v5250_v3, %v6643_v58 }
 0x6b4   : > { %5267 = vrcp.f32 %v2109_v28 }
 0x6b5   : > { %v5252_v15 = vpop.eup %5251  ;;  %5269 = vrcp.f32 %v2112_v44  ;;  %v3263_v44 = vld [vmem:[#allocation2] sm:$0xff]  }
 0x6b6   : > { %v5254_v8 = vpop.eup %5253  ;;  %v2131_v40 = vmul.f32 %v5252_v15, %v6647_v56  ;;  %v6797_v15 = vunpack.c.h.bf16 %v3263_v44 }
 0x6b7   : > { %v2115_v29 = vpop.xlane.xlu1 %2114  ;;  %v5256_v17 = vpop.eup %5255  ;;  %v2560_v35 = vmul.f32 %v5254_v8, %v6600_v1  ;;  %v6806_v8 = vunpack.c.l.bf16 %v6723_v38 }
 0x6b8   : > { %5271 = vrcp.f32 %v2115_v29  ;;  %v2138_v7 = vpack.c.bf16 %v2131_v40, %v2130_v52  ;;  %v2561_v22 = vmul.f32 %v5256_v17, %v6600_v1  ;;  %v5258_v2 = vpop.eup %5257  ;;  %v3239_v40 = vunpack.c.l.bf16 %v3263_v44 }
 0x6b9   : > { %v5260_v58 = vpop.eup %5259  ;;  %v2648_v56 = vmul.f32 %v2560_v35, %v6390_v0  ;;  %v2665_v49 = vmul.f32 %v5258_v2, %v7472_v37  ;;  %v3408_v17 = vmul.f32 %v6806_v8, %v6806_v8  ;;  %v3267_v35 = vld [vmem:[#allocation2 + $0x34] ss:$24 sps:$4 sm:$0xff]   ;;  %5273 = vrcp.f32 %v6693_v33 }
 0x6ba   : > { %4824 = vmatmul.mubr.msk.bf16.vlgmr.msra.gmra.mxu0 %vm1241_vm2, %v2138_v7  ;;  %v5262_v62 = vpop.eup %5261  ;;  %v2649_v14 = vmul.f32 %v2561_v22, %v6388_v54  ;;  %v2664_v31 = vmul.f32 %v5260_v58, %v7471_v16  ;;  %v6814_v7 = vadd.f32 %v6700_v27, %v3239_v40  ;;  %v3319_v27 = vmul.f32 %v6710_v55, %v6710_v55 }
 0x6bb   : > { %4834 = vmatpush3.bf16.msra.mxu0 %v2240_v10  ;;  %4835 = vmatprep.mubr.msk.bf16.mxu0 %vm5605_vm1, %v7470_v6  ;;  %v2675_v50 = vpop.permute.xlu1 %2674  ;;  %v5264_v43 = vpop.eup %5263  ;;  %v2564_v4 = vmul.f32 %v5262_v62, %v6600_v1  ;;  %v6827_v22 = vunpack.c.l.bf16 %v3267_v35  ;;  %v6834_v58 = vunpack.c.h.bf16 %v3267_v35  ;;  %v7475_v62 = vld [vmem:[#allocation23_spill] sm:$0xff] }
 0x6bc   : > { %4845 = vmatprep.subr.bf16.mxu0 %v7470_v6  ;;  %v5266_v25 = vpop.eup %5265  ;;  %v2655_v11 = vpack.c.bf16 %v2649_v14, %v2648_v56  ;;  %v2132_v10 = vmul.f32 %v5264_v43, %v6651_v5  ;;  %v2669_v5 = vpack.c.bf16 %v2665_v49, %v2664_v31  ;;  %v3317_v38 = vmul.f32 %v6814_v7, %v6814_v7  ;;  %v3425_v14 = vpop.permute.xlu0 %3424 }
 0x6bd   : > { %v2565_v54 = vmul.f32 %v5266_v25, %v6600_v1  ;;  %v2652_v32 = vmul.f32 %v2564_v4, %v7473_v24  ;;  %v7474_v1 = vld [vmem:[#allocation21_spill] sm:$0xff]  ;;  %v3410_v2 = vmul.f32 %v6827_v22, %v6827_v22  ;;  %v3323_v56 = vmul.f32 %v6716_v48, %v6716_v48 }
 0x6be   : > { %v3315_v43 = vrot.slane %v7475_v62, 3 }
 0x6bf   : > { %v6780_v61 = vpop.permute.xlu1 %2727  ;;  %v2653_v3 = vmul.f32 %v2565_v54, %v7474_v1 }
 0x6c0   : > { %4971 = vpush %v3315_v43  ;;  %v3429_v25 = vpop.permute.xlu0 %3428  ;;  %v2733_v44 = vsel %vm923_vm0, %v6780_v61, 0 }
 0x6c1   : > { %v5268_v41 = vpop.eup %5267 }
 0x6c2   : > { %v2133_v36 = vmul.f32 %v5268_v41, %v6660_v46  ;;  %v5270_v53 = vpop.eup %5269  ;;  %v3449_v41 = vsel %vm923_vm0, %v3425_v14, 0.0  ;;  %v6884_v14 = vld [vmem:[#allocation9 + $0x28] sm:$0xff] }
 0x6c3   : > { %v2134_v46 = vmul.f32 %v5270_v53, %v6655_v9  ;;  %v2672_v28 = vpop.permute.xlu1 %2671  ;;  %v2680_v9 = vsel %vm923_vm0, %v2675_v50, 0  ;;  %v3321_v50 = vmul.f32 %v6713_v21, %v6713_v21 }
 0x6c4   : > { %2724 = vrot.lane.b32.xlu1 %v2655_v11, %s5608_s14  ;;  %v2139_v0 = vpack.c.bf16 %v2133_v36, %v2132_v10  ;;  %v3455_v10 = vsel %vm923_vm0, %v3429_v25, 0.0  ;;  %v6886_v25 = vld [vmem:[#allocation10] sm:$0xff] }
 0x6c5   : > { %v5272_v39 = vpop.eup %5271 }
 0x6c6   : > { %4830 = vmatmul.mubr.msk.bf16.vlgmr.msra.gmra.mxu1 %vm1241_vm2, %v2139_v0  ;;  %v2135_v59 = vmul.f32 %v5272_v39, %v6668_v23  ;;  %v2657_v23 = vpack.c.bf16 %v2653_v3, %v2652_v32  ;;  %v5274_v37 = vpop.eup %5273  ;;  %v7476_v39 = vld [vmem:[#allocation25_spill] sm:$0xff] }
 0x6c7   : > { %4840 = vmatpush3.bf16.msra.mxu1 %v6695_v18  ;;  %4841 = vmatprep.mubr.msk.bf16.mxu1 %vm5605_vm1, %v7470_v6  ;;  %v3406_v18 = vmul.f32 %v6797_v15, %v6797_v15  ;;  %v2781_v52 = vpop.permute.xlu1 %2780 }
 0x6c8   : > { %2833 = vrot.lane.b32.xlu1 %v2669_v5, %s5608_s14  ;;  %v2140_v19 = vpack.c.bf16 %v2135_v59, %v2134_v46  ;;  %4851 = vmatprep.subr.bf16.mxu1 %v7470_v6  ;;  %v2786_v29 = vsel %vm923_vm0, %v2781_v52, 0  ;;  %v2136_v5 = vmul.f32 %v5274_v37, %v7476_v39 }
 0x6ca   : > { %4836 = vmatmul.mubr.msk.bf16.vlgmr.msra.gmra.mxu0 %vm1241_vm2, %v2140_v19 }
 0x6cb   : > { %4846 = vmatpush3.bf16.xpose.msra.mxu0 %v2680_v9  ;;  %4847 = vmatprep.mubr.msk.bf16.mxu0 %vm5605_vm1, %v7470_v6 }
 0x6cc   : > { %2830 = vrot.lane.b32.xlu1 %v2657_v23, %s5608_s14  ;;  %4857 = vmatprep.subr.bf16.mxu0 %v7470_v6 }
 0x6d0   : > { %3422 = vrot.lane.b32.xlu1 %v3406_v18, %s5607_s26 }
 0x6d2   : > { %4848 = vmatmul.mubr.msk.bf16.vlgmr.msra.gmra.mxu0 %vm923_vm0, %v2672_v28 }
 0x6d3   : > { %4858 = vmatpush3.bf16.xpose.msra.mxu0 %v2786_v29  ;;  %4859 = vmatprep.mubr.msk.bf16.mxu0 %vm5605_vm1, %v7470_v6 }
 0x6d4   : > { %3426 = vrot.lane.b32.xlu1 %v3408_v17, %s5607_s26  ;;  %4869 = vmatprep.subr.bf16.mxu0 %v7470_v6 }
 0x6d8   : > { %3333 = vrot.lane.b32.xlu1 %v3317_v38, %s5607_s26 }
 0x6da   : > { %4860 = vmatmul.mubr.msk.bf16.vlgmr.msra.gmra.mxu0 %vm923_vm0, %v6697_v13  ;;  %v3412_v13 = vmul.f32 %v6834_v58, %v6834_v58 }
 0x6db   : > { %4871 = vmatprep.mubr.msk.bf16.mxu0 %vm5605_vm1, %v7470_v6 }
 0x6dc   : > { %3337 = vrot.lane.b32.xlu1 %v3319_v27, %s5607_s26 }
 0x6e0   : > { %3430 = vrot.lane.b32.xlu1 %v3410_v2, %s5607_s26 }
 0x6e4   : > { %3434 = vrot.lane.b32.xlu1 %v3412_v13, %s5607_s26 }
 0x6e8   : > { %3341 = vrot.lane.b32.xlu1 %v3321_v50, %s5607_s26  ;;  %v826_v50 = vld [vmem:[#allocation9 + $0x20] sm:$0xff] }
 0x6ec   : > { %3345 = vrot.lane.b32.xlu1 %v3323_v56, %s5607_s26 }
 0x6f1   : > { %v3336_v11 = vpop.permute.xlu0 %3335  ;;  %s4972_s25 = spop %4971 }
 0x6f2   : > { %v3360_v36 = vsel %vm923_vm0, %v3336_v11, 0.0 }
 0x6f5   : > { %v3340_v16 = vpop.permute.xlu0 %3339 }
 0x6f6   : > { %v3366_v31 = vsel %vm923_vm0, %v3340_v16, 0.0 }
 0x710   : > { %3450 = vadd.xlane.f32.xlu1 %v3449_v41 }
 0x714   : > { %3456 = vadd.xlane.f32.xlu1 %v3455_v10 }
 0x718   : > { %3361 = vadd.xlane.f32.xlu1 %v3360_v36 }
 0x71c   : > { %3367 = vadd.xlane.f32.xlu1 %v3366_v31  ;;  %v6894_v31 = vld [vmem:[#allocation10 + $0x8] sm:$0xff] }
 0x73c   : > { %v2121_v4 = vpop.xlane.xlu1 %2120 }
 0x73d   : > { %5275 = vrcp.f32 %v2121_v4 }
 0x740   : > { %v2725_v53 = vpop.permute.xlu1 %2724 }
 0x744   : > { %v2834_v0 = vpop.permute.xlu1 %2833 }
 0x745   : > { %v2839_v3 = vsel %vm923_vm0, %v2834_v0, 0 }
 0x748   : > { %v2831_v49 = vpop.permute.xlu1 %2830 }
 0x74a   : > { %v5276_v54 = vpop.eup %5275 }
 0x74b   : > { %v2137_v46 = vmul.f32 %v5276_v54, %v6762_v26 }
 0x74c   : > { %v3423_v59 = vpop.permute.xlu1 %3422 }
 0x74d   : > { %v3446_v24 = vsel %vm923_vm0, %v3423_v59, 0.0  ;;  %v2141_v32 = vpack.c.bf16 %v2137_v46, %v2136_v5 }
 0x74e   : > { %3447 = vadd.xlane.f32.xlu0 %v3446_v24 }
 0x74f   : > { %4842 = vmatmul.mubr.msk.bf16.vlgmr.msra.gmra.mxu1 %vm1241_vm2, %v2141_v32 }
 0x750   : > { %4852 = vmatpush3.bf16.xpose.msra.mxu1 %v2733_v44  ;;  %v3427_v33 = vpop.permute.xlu1 %3426  ;;  %4853 = vmatprep.mubr.msk.bf16.mxu1 %vm5605_vm1, %v7470_v6 }
 0x751   : > { %v3452_v19 = vsel %vm923_vm0, %v3427_v33, 0.0  ;;  %4863 = vmatprep.subr.bf16.mxu1 %v7470_v6 }
 0x752   : > { %3453 = vadd.xlane.f32.xlu0 %v3452_v19  ;;  %v6905_v19 = vld [vmem:[#allocation10 + $0x10] sm:$0xff] }
 0x753   : > { %7485 = vst [vmem:[#allocation28_spill] sm:$0xff] %v6905_v19 }
 0x754   : > { %v3334_v26 = vpop.permute.xlu1 %3333 }
 0x755   : > { %v3357_v1 = vsel %vm923_vm0, %v3334_v26, 0.0 }
 0x756   : > { %3358 = vadd.xlane.f32.xlu0 %v3357_v1 }
 0x757   : > { %4854 = vmatmul.mubr.msk.bf16.vlgmr.msra.gmra.mxu1 %vm923_vm0, %v2725_v53 }
 0x758   : > { %4864 = vmatpush3.bf16.xpose.msra.mxu1 %v2839_v3  ;;  %v3338_v61 = vpop.permute.xlu1 %3337  ;;  %4865 = vmatprep.mubr.msk.bf16.mxu1 %vm5605_vm1, %v7470_v6  ;;  %v6910_v3 = vld [vmem:[#allocation10 + $0x20] sm:$0xff] }
 0x759   : > { %v3363_v28 = vsel %vm923_vm0, %v3338_v61, 0.0  ;;  %4875 = vmatprep.subr.bf16.mxu1 %v7470_v6  ;;  %7486 = vst [vmem:[#allocation29_spill] sm:$0xff] %v6910_v3 }
 0x75a   : > { %3364 = vadd.xlane.f32.xlu0 %v3363_v28 }
 0x75f   : > { %4866 = vmatmul.mubr.msk.bf16.vlgmr.msra.gmra.mxu1 %vm923_vm0, %v2831_v49 }
 0x760   : > { %4877 = vmatprep.mubr.msk.bf16.mxu1 %vm5605_vm1, %v7470_v6 }
 0x77a   : > { %v6872_v9 = vpop.f32.mrf.mxu0 }
 0x77b   : > { %7477 = vst [vmem:[#allocation20_spill] sm:$0xff] %v6872_v9 }
 0x77c   : > { %v4825_v23 = vpop.f32.mrf.mxu0 }
 0x77e   : > { %v6874_v18 = vpop.f32.mrf.mxu0 }
 0x77f   : > { %7478 = vst [vmem:[#allocation19_spill] sm:$0xff] %v6874_v18 }
 0x780   : > { %v4826_v52 = vpop.f32.mrf.mxu0 }
 0x786   : > { %v6876_v40 = vpop.f32.mrf.mxu1 }
 0x787   : > { %7479 = vst [vmem:[#allocation22_spill] sm:$0xff] %v6876_v40 }
 0x788   : > { %v4831_v29 = vpop.f32.mrf.mxu1 }
 0x78a   : > { %v6878_v17 = vpop.f32.mrf.mxu1  ;;  %v6880_v38 = vpop.f32.mrf.mxu0 }
 0x78b   : > { %7480 = vst [vmem:[#allocation21_spill] sm:$0xff] %v6878_v17  ;;  %7481 = vst [vmem:[#allocation23_spill] sm:$0xff] %v6880_v38 }
 0x78c   : > { %v4832_v35 = vpop.f32.mrf.mxu1  ;;  %v4837_v27 = vpop.f32.mrf.mxu0 }
 0x78d   : > { %v3433_v35 = vpop.permute.xlu0 %3432  ;;  %v6919_v27 = vld [vmem:[#allocation10 + $0x18] sm:$0xff] }
 0x78e   : > { %v6882_v2 = vpop.f32.mrf.mxu0  ;;  %7487 = vst [vmem:[#allocation30_spill] sm:$0xff] %v6919_v27 }
 0x78f   : > { %7482 = vst [vmem:[#allocation25_spill] sm:$0xff] %v6882_v2  ;;  %v2439_v2 = vld [vmem:[#allocation2 + $0x8] ss:$12 sps:$4 sm:$0xff]  }
 0x790   : > { %v4838_v13 = vpop.f32.mrf.mxu0 }
 0x792   : > { %v2716_v56 = vpop.f32.mrf.mxu0 }
 0x793   : > { %v2717_v62 = vadd.f32 %v2716_v56, %v826_v50  ;;  %v3431_v56 = vpop.permute.xlu1 %3430 }
 0x794   : > { %v4849_v43 = vpop.f32.mrf.mxu0 }
 0x795   : > { %v6889_v41 = vadd.f32 %v6886_v25, %v2717_v62  ;;  %v6924_v43 = vld [vmem:[#allocation10 + $0x28] sm:$0xff] }
 0x796   : > { %v2719_v11 = vpop.f32.mrf.mxu0  ;;  %7488 = vst [vmem:[#allocation31_spill] sm:$0xff] %v6924_v43 }
 0x797   : > { %v2720_v10 = vadd.f32 %v2719_v11, %v6884_v14  ;;  %v2890_v36 = vsel %vm1241_vm2, %v6889_v41, -inf }
 0x798   : > { %2891 = vmax.xlane.f32.xlu1 %v2890_v36  ;;  %v4850_v16 = vpop.f32.mrf.mxu0 }
 0x799   : > { %v6897_v4 = vadd.f32 %v6894_v31, %v2720_v10 }
 0x79a   : > { %v2822_v53 = vpop.f32.mrf.mxu0 }
 0x79b   : > { %v2893_v0 = vsel %vm1241_vm2, %v6897_v4, -inf  ;;  %v2823_v32 = vadd.f32 %v2822_v53, %v826_v50 }
 0x79c   : > { %v4861_v37 = vpop.f32.mrf.mxu0  ;;  %2894 = vmax.xlane.f32.xlu0 %v2893_v0  ;;  %v6931_v0 = vld [vmem:[#allocation10 + $0x30] sm:$0xff] }
 0x79d   : > { %v6913_v61 = vadd.f32 %v6910_v3, %v2823_v32  ;;  %7489 = vst [vmem:[#allocation32_spill] sm:$0xff] %v6931_v0  ;;  %v3461_v32 = vsel %vm923_vm0, %v3433_v35, 0.0 }
 0x79e   : > { %v2825_v49 = vpop.f32.mrf.mxu0 }
 0x79f   : > { %v2826_v28 = vadd.f32 %v2825_v49, %v6884_v14  ;;  %v2902_v16 = vsel %vm1241_vm2, %v6913_v61, -inf }
 0x7a0   : > { %v4862_v54 = vpop.f32.mrf.mxu0 }
 0x7a1   : > { %v2887_v11 = vadd.f32 %v6924_v43, %v2826_v28  ;;  %v3437_v54 = vpop.permute.xlu0 %3436 }
 0x7a2   : > { %v3467_v28 = vsel %vm923_vm0, %v3437_v54, 0.0 }
 0x80f   : > { %v6901_v39 = vpop.f32.mrf.mxu1 }
 0x810   : > { %7483 = vst [vmem:[#allocation26_spill] sm:$0xff] %v6901_v39 }
 0x811   : > { %v4843_v5 = vpop.f32.mrf.mxu1 }
 0x812   : > { %v2905_v5 = vsel %vm1241_vm2, %v2887_v11, -inf }
 0x813   : > { %v6903_v46 = vpop.f32.mrf.mxu1 }
 0x814   : > { %7484 = vst [vmem:[#allocation27_spill] sm:$0xff] %v6903_v46 }
 0x815   : > { %v4844_v59 = vpop.f32.mrf.mxu1 }
 0x816   : > { %v3435_v59 = vpop.permute.xlu1 %3434 }
 0x817   : > { %v2769_v24 = vpop.f32.mrf.mxu1 }
 0x818   : > { %v2770_v44 = vadd.f32 %v2769_v24, %v826_v50 }
 0x819   : > { %v4855_v33 = vpop.f32.mrf.mxu1 }
 0x81a   : > { %v6908_v26 = vadd.f32 %v6905_v19, %v2770_v44  ;;  %v3458_v44 = vsel %vm923_vm0, %v3431_v56, 0.0  ;;  %v3344_v33 = vpop.permute.xlu0 %3343 }
 0x81b   : > { %v2772_v1 = vpop.f32.mrf.mxu1 }
 0x81c   : > { %v2773_v23 = vadd.f32 %v2772_v1, %v6884_v14  ;;  %v2896_v52 = vsel %vm1241_vm2, %v6908_v26, -inf  ;;  %v3342_v1 = vpop.permute.xlu1 %3341 }
 0x81d   : > { %v4856_v29 = vpop.f32.mrf.mxu1  ;;  %2897 = vmax.xlane.f32.xlu0 %v2896_v52  ;;  %v3372_v52 = vsel %vm923_vm0, %v3344_v33, 0.0 }
 0x81e   : > { %v6922_v13 = vadd.f32 %v6919_v27, %v2773_v23  ;;  %v3464_v23 = vsel %vm923_vm0, %v3435_v59, 0.0  ;;  %v3369_v29 = vsel %vm923_vm0, %v3342_v1, 0.0 }
 0x81f   : > { %v2875_v62 = vpop.f32.mrf.mxu1 }
 0x820   : > { %v2876_v10 = vadd.f32 %v2875_v62, %v826_v50  ;;  %v2899_v36 = vsel %vm1241_vm2, %v6922_v13, -inf  ;;  %v3348_v62 = vpop.permute.xlu0 %3347 }
 0x821   : > { %2900 = vmax.xlane.f32.xlu1 %v2899_v36  ;;  %v4867_v53 = vpop.f32.mrf.mxu1  ;;  %2903 = vmax.xlane.f32.xlu0 %v2902_v16  ;;  %v3378_v35 = vsel %vm923_vm0, %v3348_v62, 0.0  ;;  %v7490_v36 = vsub.s32 2, %v5849_v42  ;;  %v7491_v16 = vld [vmem:[#allocation24_spill] sm:$0xff] }
 0x822   : > { %v6934_v37 = vadd.f32 %v6931_v0, %v2876_v10  ;;  %v3346_v10 = vpop.permute.xlu1 %3345 }
 0x823   : > { %v6936_v49 = vpop.f32.mrf.mxu1  ;;  %v3375_v56 = vsel %vm923_vm0, %v3346_v10, 0.0  ;;  %v2458_v53 = vrot.slane %v7491_v16, %v7490_v36 }
 0x824   : > { %v2908_v50 = vsel %vm1241_vm2, %v6934_v37, -inf  ;;  %v6953_v54 = vpop.xlane.xlu0 %3447 }
 0x825   : > { %2906 = vmax.xlane.f32.xlu1 %v2905_v5  ;;  %v4868_v24 = vpop.f32.mrf.mxu1  ;;  %2909 = vmax.xlane.f32.xlu0 %v2908_v50 }
 0x826   : > { %v6955_v5 = vpop.xlane.xlu1 %3450 }
 0x828   : > { %v6957_v50 = vpop.xlane.xlu0 %3453 }
 0x829   : > { %3462 = vadd.xlane.f32.xlu1 %v3461_v32  ;;  %3459 = vadd.xlane.f32.xlu0 %v3458_v44 }
 0x82a   : > { %v6959_v59 = vpop.xlane.xlu1 %3456 }
 0x82c   : > { %v6961_v24 = vpop.xlane.xlu0 %3358 }
 0x82d   : > { %3468 = vadd.xlane.f32.xlu1 %v3467_v28  ;;  %3465 = vadd.xlane.f32.xlu0 %v3464_v23 }
 0x82e   : > { %v6963_v32 = vpop.xlane.xlu1 %3361 }
 0x830   : > { %v6965_v44 = vpop.xlane.xlu0 %3364 }
 0x831   : > { %3373 = vadd.xlane.f32.xlu1 %v3372_v52  ;;  %3370 = vadd.xlane.f32.xlu0 %v3369_v29 }
 0x832   : > { %v6967_v33 = vpop.xlane.xlu1 %3367 }
 0x834   : > { %v6969_v1 = vpop.xlane.xlu0 %2894 }
 0x835   : > { %3379 = vadd.xlane.f32.xlu1 %v3378_v35  ;;  %3376 = vadd.xlane.f32.xlu0 %v3375_v56 }
 0x836   : > { %v6971_v28 = vpop.xlane.xlu1 %2891 }
 0x84b   : > { %2460 = vrot.lane.b32.xlu0 %v2458_v53, %s5608_s14 }
 0x8a6   : > { %v6973_v23 = vpop.xlane.xlu0 %2897 }
 0x8aa   : > { %v6975_v52 = vpop.xlane.xlu0 %2903  ;;  %v6977_v29 = vpop.xlane.xlu1 %2900 }
 0x8ae   : > { %v6979_v62 = vpop.xlane.xlu0 %2909  ;;  %v2907_v10 = vpop.xlane.xlu1 %2906 }
 0x8af   : > { %v2919_v35 = vsub.f32 %v2887_v11, %v2907_v10  ;;  %v2441_v11 = vld [vmem:[#allocation2 + $0x20] ss:$12 sps:$4 sm:$0xff]  }
 0x8b1   : > { %v2932_v56 = vmul.f32 1.442695, %v2919_v35 }
 0x8b2   : > { %v3460_v36 = vpop.xlane.xlu0 %3459  ;;  %v3463_v16 = vpop.xlane.xlu1 %3462 }
 0x8b3   : > { %v3474_v53 = vmax.f32 %v3460_v36, 1e-24  ;;  %v3475_v12 = vmax.f32 %v3463_v16, 1e-24  ;;  %5277 = vpow2.f32 %v2932_v56  ;;  %v2447_v36 = vunpack.c.l.bf16 %v2439_v2 }
 0x8b4   : > { %v2448_v56 = vunpack.c.h.bf16 %v2439_v2 }
 0x8b5   : > { %5279 = vrsqrt.f32 %v3474_v53 }
 0x8b6   : > { %5281 = vrsqrt.f32 %v3475_v12  ;;  %v3466_v39 = vpop.xlane.xlu0 %3465  ;;  %v3469_v38 = vpop.xlane.xlu1 %3468 }
 0x8b7   : > { %v3476_v42 = vmax.f32 %v3466_v39, 1e-24  ;;  %v3477_v10 = vmax.f32 %v3469_v38, 1e-24 }
 0x8ba   : > { %v3371_v17 = vpop.xlane.xlu0 %3370  ;;  %v3374_v40 = vpop.xlane.xlu1 %3373 }
 0x8bb   : > { %v3385_v18 = vmax.f32 %v3371_v17, 1e-24  ;;  %v3386_v9 = vmax.f32 %v3374_v40, 1e-24  ;;  %v2449_v17 = vunpack.c.l.bf16 %v2441_v11  ;;  %v2450_v40 = vunpack.c.h.bf16 %v2441_v11 }
 0x8bd   : > { %5283 = vrsqrt.f32 %v3385_v18 }
 0x8be   : > { %5285 = vrsqrt.f32 %v3386_v9  ;;  %v3377_v46 = vpop.xlane.xlu0 %3376  ;;  %v3380_v35 = vpop.xlane.xlu1 %3379 }
 0x8bf   : > { %v3387_v12 = vmax.f32 %v3377_v46, 1e-24  ;;  %5287 = vrsqrt.f32 %v3476_v42  ;;  %v3388_v9 = vmax.f32 %v3380_v35, 1e-24  ;;  %v2445_v35 = vld [vmem:[#allocation2 + $0x50] ss:$12 sps:$4 sm:$0xff]  }
 0x8c0   : > { %v6981_v0 = vpop.eup %5277  ;;  %5289 = vrsqrt.f32 %v3477_v10  ;;  %v6994_v10 = vstv %s4972_s25  ;;  %s5518_s25 = scalar_lea.vmem %s7358_s19, 512 }
 0x8c1   : > { %v2953_v43 = vsel %vm1241_vm2, %v6981_v0, 0.0  ;;  %5291 = vrsqrt.f32 %v3387_v12  ;;  %p5519_p2 = scmp.ne.s32.totalorder %s7358_s19, %s5518_s25  ;;  %p5526_p0 = scmp.lt.s32.totalorder %s5524_s27, %s5518_s25 }
 0x8c2   : > { %v5280_v16 = vpop.eup %5279  ;;  %v2461_v53 = vpop.permute.xlu0 %2460  ;;  %2954 = vadd.xlane.f32.xlu0 %v2953_v43  ;;  %5293 = vrsqrt.f32 %v3388_v9 }
 0x8c3   : > { %v5282_v18 = vpop.eup %5281  ;;  %v2463_v39 = vadd.f32 %v2461_v53, %v2447_v36  ;;  %v2464_v27 = vadd.f32 %v2461_v53, %v2448_v56  ;;  %v2465_v38 = vadd.f32 %v2461_v53, %v2449_v17  ;;  %v2466_v19 = vadd.f32 %v2461_v53, %v2450_v40  ;;  %p5520_p5 = pnand %p5519_p2, %p7507_p3  ;;  %p5527_p10 = por %p5526_p0, %p5525_p9 }
 0x8c4   : > { %v6986_v2 = vmul.f32 %v5280_v16, %v6827_v22  ;;  %v6989_v46 = vmul.f32 %v5282_v18, %v6729_v60  ;;  %v2453_v16 = vunpack.c.l.bf16 %v2445_v35 }
 0x8c5   : > { %v2471_v3 = vpack.c.bf16 %v2464_v27, %v2463_v39  ;;  %v2472_v43 = vpack.c.bf16 %v2466_v19, %v2465_v38  ;;  %v2454_v19 = vunpack.c.h.bf16 %v2445_v35  ;;  %p5521_p7 = pneg %p5520_p5 }
 0x8c6   : > { %v3508_v42 = vpack.c.bf16 %v6989_v46, %v6986_v2  ;;  %v2469_v40 = vadd.f32 %v2461_v53, %v2453_v16  ;;  %v2443_v16 = vld [vmem:[#allocation2 + $0x38] ss:$12 sps:$4 sm:$0xff]  }
 0x8c7   : > { %2983 = vrot.lane.b32.xlu1 %v2471_v3, %s5608_s14  ;;  %v2470_v18 = vadd.f32 %v2461_v53, %v2454_v19  ;;  %v2451_v19 = vunpack.c.l.bf16 %v2443_v16  ;;  %p5528_p12 = pnand %p5527_p10, %p5521_p7 }
 0x8c9   : > { %v2474_v38 = vpack.c.bf16 %v2470_v18, %v2469_v40  ;;  %v2914_v18 = vsub.f32 %v6889_v41, %v6971_v28 }
 0x8ca   : > { %v5284_v11 = vpop.eup %5283 }
 0x8cb   : > { %v5286_v27 = vpop.eup %5285  ;;  %3031 = vrot.lane.b32.xlu1 %v2472_v43, %s5608_s14  ;;  %v3402_v22 = vmul.f32 %v5284_v11, %v6994_v10 }
 0x8cc   : > { %v3403_v60 = vmul.f32 %v5286_v27, %v6994_v10  ;;  %v5288_v56 = vpop.eup %5287 }
 0x8cd   : > { %v7000_v36 = vmul.f32 %v3402_v22, %v6713_v21  ;;  %v5290_v17 = vpop.eup %5289  ;;  %v3504_v43 = vmul.f32 %v5288_v56, %v6834_v58  ;;  %v2879_v58 = vadd.f32 %v6936_v49, %v6884_v14  ;;  %v2916_v49 = vsub.f32 %v6908_v26, %v6973_v23 }
 0x8ce   : > { %v7003_v3 = vmul.f32 %v3403_v60, %v6742_v51  ;;  %v5292_v9 = vpop.eup %5291  ;;  %v3505_v21 = vmul.f32 %v5290_v17, %v6735_v63  ;;  %v2467_v17 = vadd.f32 %v2461_v53, %v2451_v19  ;;  %v3470_v23 = vmax.f32 %v6953_v54, 1e-24 }
 0x8cf   : > { %v5294_v39 = vpop.eup %5293  ;;  %v3404_v11 = vmul.f32 %v5292_v9, %v6994_v10  ;;  %v7019_v63 = vadd.f32 %v6631_v20, %v2879_v58  ;;  %v2922_v9 = vmul.f32 1.442695, %v2914_v18  ;;  %v2915_v20 = vsub.f32 %v6897_v4, %v6969_v1 }
 0x8d0   : > { %v3496_v12 = vpack.c.bf16 %v7003_v3, %v7000_v36  ;;  %v3405_v51 = vmul.f32 %v5294_v39, %v6994_v10  ;;  %v3509_v27 = vpack.c.bf16 %v3505_v21, %v3504_v43  ;;  %v2926_v39 = vmul.f32 1.442695, %v2916_v49 }
 0x8d1   : > { %v3492_v22 = vmul.f32 %v3404_v11, %v6716_v48  ;;  %v2911_v56 = vsel %vm1241_vm2, %v7019_v63, -inf  ;;  %v2452_v48 = vunpack.c.h.bf16 %v2443_v16  ;;  %5295 = vpow2.f32 %v2922_v9 }
 0x8d2   : > { %v3493_v60 = vmul.f32 %v3405_v51, %v6749_v34  ;;  %v2924_v14 = vmul.f32 1.442695, %v2915_v20  ;;  %v2917_v43 = vsub.f32 %v6922_v13, %v6977_v29  ;;  %v3471_v29 = vmax.f32 %v6955_v5, 1e-24 }
 0x8d3   : > { %v2468_v34 = vadd.f32 %v2461_v53, %v2452_v48  ;;  %v2918_v53 = vsub.f32 %v6913_v61, %v6975_v52  ;;  %v3472_v21 = vmax.f32 %v6957_v50, 1e-24  ;;  %v3381_v11 = vmax.f32 %v6961_v24, 1e-24 }
 0x8d4   : > { %v3497_v35 = vpack.c.bf16 %v3493_v60, %v3492_v22  ;;  %5297 = vpow2.f32 %v2924_v14  ;;  %v2928_v41 = vmul.f32 1.442695, %v2917_v43  ;;  %v3473_v54 = vmax.f32 %v6959_v59, 1e-24 }
 0x8d5   : > { %v2473_v40 = vpack.c.bf16 %v2468_v34, %v2467_v17  ;;  %5299 = vpow2.f32 %v2926_v39  ;;  %v3382_v22 = vmax.f32 %v6963_v32, 1e-24 }
 0x8d8   : > { %3127 = vrot.lane.b32.xlu0 %v2474_v38, %s5608_s14  ;;  %v2930_v38 = vmul.f32 1.442695, %v2918_v53 }
 0x8da   : > { %5301 = vpow2.f32 %v2930_v38  ;;  %v3384_v38 = vmax.f32 %v6967_v33, 1e-24 }
 0x8db   : > { %5303 = vpow2.f32 %v2928_v41 }
 0x8dc   : > { %3673 = vrot.lane.b32.xlu0 %v3509_v27, %s5607_s26  ;;  %5305 = vrsqrt.f32 %v3470_v23 }
 0x8dd   : > { %5307 = vrsqrt.f32 %v3471_v29 }
 0x8de   : > { %v7034_v28 = vpop.eup %5295  ;;  %5309 = vrsqrt.f32 %v3472_v21 }
 0x8df   : > { %v2938_v4 = vsel %vm1241_vm2, %v7034_v28, 0.0  ;;  %5311 = vrsqrt.f32 %v3381_v11 }
 0x8e0   : > { %3670 = vrot.lane.b32.xlu0 %v3497_v35, %s5607_s26  ;;  %5313 = vrsqrt.f32 %v3473_v54 }
 0x8e1   : > { %v7038_v1 = vpop.eup %5297  ;;  %5315 = vrsqrt.f32 %v3382_v22 }
 0x8e2   : > { %v2941_v26 = vsel %vm1241_vm2, %v7038_v1, 0.0  ;;  %v7042_v61 = vpop.eup %5299 }
 0x8e3   : > { %v2944_v13 = vsel %vm1241_vm2, %v7042_v61, 0.0 }
 0x8e7   : > { %v7047_v52 = vpop.eup %5301 }
 0x8e8   : > { %v2950_v51 = vsel %vm1241_vm2, %v7047_v52, 0.0  ;;  %v7054_v27 = vpop.eup %5303 }
 0x8e9   : > { %v2947_v5 = vsel %vm1241_vm2, %v7054_v27, 0.0  ;;  %v5306_v24 = vpop.eup %5305 }
 0x8ea   : > { %v5308_v35 = vpop.eup %5307  ;;  %v3498_v58 = vmul.f32 %v5306_v24, %v6797_v15 }
 0x8eb   : > { %v5310_v59 = vpop.eup %5309  ;;  %v3499_v16 = vmul.f32 %v5308_v35, %v6614_v30 }
 0x8ec   : > { %v5312_v32 = vpop.eup %5311  ;;  %v3500_v17 = vmul.f32 %v5310_v59, %v6806_v8  ;;  %v2920_v8 = vsub.f32 %v6934_v37, %v6979_v62 }
 0x8ed   : > { %v3506_v48 = vpack.c.bf16 %v3499_v16, %v3498_v58  ;;  %v3398_v34 = vmul.f32 %v5312_v32, %v6994_v10 }
 0x8ee   : > { %v2934_v14 = vmul.f32 1.442695, %v2920_v8 }
 0x8ef   : > { %2912 = vmax.xlane.f32.xlu1 %v2911_v56  ;;  %v5314_v56 = vpop.eup %5313  ;;  %v3486_v15 = vmul.f32 %v3398_v34, %v6814_v7 }
 0x8f0   : > { %v5316_v19 = vpop.eup %5315  ;;  %5317 = vpow2.f32 %v2934_v14 }
 0x8f1   : > { %v3399_v18 = vmul.f32 %v5316_v19, %v6994_v10 }
 0x8f3   : > { %v3487_v20 = vmul.f32 %v3399_v18, %v6706_v45  ;;  %v3383_v45 = vmax.f32 %v6965_v44, 1e-24 }
 0x8f5   : > { %v3494_v30 = vpack.c.bf16 %v3487_v20, %v3486_v15 }
 0x8fd   : > { %v7075_v49 = vpop.eup %5317 }
 0x900   : > { %3079 = vrot.lane.b32.xlu1 %v2473_v40, %s5608_s14  ;;  %v3501_v40 = vmul.f32 %v5314_v56, %v6621_v57  ;;  %v2956_v57 = vsel %vm1241_vm2, %v7075_v49, 0.0 }
 0x902   : > { %v3507_v9 = vpack.c.bf16 %v3501_v40, %v3500_v17 }
 0x924   : > { %2939 = vadd.xlane.f32.xlu1 %v2938_v4 }
 0x928   : > { %2942 = vadd.xlane.f32.xlu1 %v2941_v26 }
 0x92c   : > { %2945 = vadd.xlane.f32.xlu1 %v2944_v13 }
 0x930   : > { %2951 = vadd.xlane.f32.xlu1 %v2950_v51 }
 0x934   : > { %2948 = vadd.xlane.f32.xlu1 %v2947_v5 }
 0x939   : > { %v2984_v50 = vpop.permute.xlu1 %2983 }
 0x93a   : > { %4870 = vmatpush3.bf16.msra.mxu0 %v2984_v50 }
 0x93b   : > { %4881 = vmatprep.subr.bf16.mxu0 %v7470_v6 }
 0x93d   : > { %v3032_v60 = vpop.permute.xlu1 %3031 }
 0x93e   : > { %4876 = vmatpush3.bf16.msra.mxu1 %v3032_v60 }
 0x93f   : > { %4887 = vmatprep.subr.bf16.mxu1 %v7470_v6 }
 0x945   : > { %3514 = vrot.lane.b32.xlu1 %v3506_v48, %s5607_s26 }
 0x949   : > { %3567 = vrot.lane.b32.xlu1 %v3507_v9, %s5607_s26 }
 0x94d   : > { %3511 = vrot.lane.b32.xlu1 %v3494_v30, %s5607_s26 }
 0x971   : > { %2957 = vadd.xlane.f32.xlu1 %v2956_v57 }
 0x978   : > { %v2913_v39 = vpop.xlane.xlu1 %2912 }
 0x979   : > { %v2921_v7 = vsub.f32 %v7019_v63, %v2913_v39 }
 0x97b   : > { %v2936_v53 = vmul.f32 1.442695, %v2921_v7 }
 0x97c   : > { %v3080_v23 = vpop.permute.xlu1 %3079 }
 0x97d   : > { %5319 = vpow2.f32 %v2936_v53 }
 0x97e   : > { %5321 = vrsqrt.f32 %v3383_v45 }
 0x97f   : > { %5323 = vrsqrt.f32 %v3384_v38 }
 0x98a   : > { %v7082_v37 = vpop.eup %5319 }
 0x98b   : > { %v2959_v62 = vsel %vm1241_vm2, %v7082_v37, 0.0  ;;  %v5322_v43 = vpop.eup %5321 }
 0x98c   : > { %2960 = vadd.xlane.f32.xlu1 %v2959_v62  ;;  %v5324_v41 = vpop.eup %5323  ;;  %v3400_v4 = vmul.f32 %v5322_v43, %v6994_v10 }
 0x98d   : > { %v3401_v63 = vmul.f32 %v5324_v41, %v6994_v10 }
 0x98e   : > { %v3488_v26 = vmul.f32 %v3400_v4, %v6710_v55  ;;  %v2955_v55 = vpop.xlane.xlu0 %2954 }
 0x98f   : > { %v3489_v44 = vmul.f32 %v3401_v63, %v6721_v47 }
 0x991   : > { %v3495_v33 = vpack.c.bf16 %v3489_v44, %v3488_v26  ;;  %v829_v26 = vld [vmem:[#allocation9 + $0x38] sm:$0xff] }
 0x99d   : > { %3620 = vrot.lane.b32.xlu1 %v3508_v42, %s5607_s26 }
 0x9a1   : > { %3564 = vrot.lane.b32.xlu1 %v3495_v33, %s5607_s26 }
 0x9a5   : > { %3617 = vrot.lane.b32.xlu1 %v3496_v12, %s5607_s26 }
 0x9ad   : > { %v2940_v13 = vpop.xlane.xlu1 %2939 }
 0x9ae   : > { %5325 = vrcp.f32 %v2940_v13 }
 0x9b1   : > { %v2943_v10 = vpop.xlane.xlu1 %2942 }
 0x9b2   : > { %5327 = vrcp.f32 %v2943_v10 }
 0x9b3   : > { %5329 = vrcp.f32 %v2955_v55 }
 0x9b5   : > { %v2946_v29 = vpop.xlane.xlu1 %2945 }
 0x9b9   : > { %v2952_v2 = vpop.xlane.xlu1 %2951 }
 0x9ba   : > { %5331 = vrcp.f32 %v2952_v2 }
 0x9bb   : > { %5333 = vrcp.f32 %v2946_v29  ;;  %v5326_v47 = vpop.eup %5325 }
 0x9bc   : > { %v2970_v21 = vmul.f32 %v5326_v47, %v7034_v28 }
 0x9bd   : > { %v2949_v46 = vpop.xlane.xlu1 %2948 }
 0x9be   : > { %5335 = vrcp.f32 %v2949_v46 }
 0x9bf   : > { %v5328_v42 = vpop.eup %5327 }
 0x9c0   : > { %v2971_v36 = vmul.f32 %v5328_v42, %v7038_v1  ;;  %v5330_v12 = vpop.eup %5329 }
 0x9c1   : > { %v3515_v51 = vpop.permute.xlu1 %3514  ;;  %v2975_v22 = vmul.f32 %v5330_v12, %v6981_v0  ;;  %v3128_v0 = vpop.permute.xlu0 %3127 }
 0x9c2   : > { %v2978_v3 = vpack.c.bf16 %v2971_v36, %v2970_v21  ;;  %v3520_v1 = vsel %vm923_vm0, %v3515_v51, 0 }
 0x9c4   : > { %4872 = vmatmul.mubr.msk.bf16.vlgmr.msra.gmra.mxu0 %vm1241_vm2, %v2978_v3 }
 0x9c5   : > { %4882 = vmatpush3.bf16.msra.mxu0 %v3080_v23  ;;  %4883 = vmatprep.mubr.msk.bf16.mxu0 %vm5605_vm1, %v7470_v6  ;;  %v3568_v35 = vpop.permute.xlu1 %3567  ;;  %v3674_v9 = vpop.permute.xlu0 %3673 }
 0x9c6   : > { %4893 = vmatprep.subr.bf16.mxu0 %v7470_v6  ;;  %v3573_v18 = vsel %vm923_vm0, %v3568_v35, 0  ;;  %v3679_v15 = vsel %vm923_vm0, %v3674_v9, 0 }
 0x9c7   : > { %v5332_v11 = vpop.eup %5331 }
 0x9c8   : > { %v2974_v54 = vmul.f32 %v5332_v11, %v7047_v52  ;;  %v5334_v5 = vpop.eup %5333 }
 0x9c9   : > { %v2972_v24 = vmul.f32 %v5334_v5, %v7042_v61  ;;  %v3512_v61 = vpop.permute.xlu1 %3511  ;;  %v3671_v20 = vpop.permute.xlu0 %3670 }
 0x9ca   : > { %v2980_v28 = vpack.c.bf16 %v2975_v22, %v2974_v54 }
 0x9cb   : > { %v5336_v50 = vpop.eup %5335 }
 0x9cc   : > { %4884 = vmatmul.mubr.msk.bf16.vlgmr.msra.gmra.mxu0 %vm1241_vm2, %v2980_v28  ;;  %v2973_v60 = vmul.f32 %v5336_v50, %v7054_v27  ;;  %v7493_v28 = vld [vmem:[#allocation29_spill] sm:$0xff] }
 0x9cd   : > { %4894 = vmatpush3.bf16.xpose.msra.mxu0 %v3520_v1  ;;  %4895 = vmatprep.mubr.msk.bf16.mxu0 %vm5605_vm1, %v7470_v6 }
 0x9ce   : > { %v2979_v59 = vpack.c.bf16 %v2973_v60, %v2972_v24  ;;  %4905 = vmatprep.subr.bf16.mxu0 %v7470_v6 }
 0x9d0   : > { %4878 = vmatmul.mubr.msk.bf16.vlgmr.msra.gmra.mxu1 %vm1241_vm2, %v2979_v59  ;;  %v7494_v59 = vld [vmem:[#allocation30_spill] sm:$0xff] }
 0x9d1   : > { %4888 = vmatpush3.bf16.msra.mxu1 %v3128_v0  ;;  %4889 = vmatprep.mubr.msk.bf16.mxu1 %vm5605_vm1, %v7470_v6 }
 0x9d2   : > { %4899 = vmatprep.subr.bf16.mxu1 %v7470_v6 }
 0x9d4   : > { %4896 = vmatmul.mubr.msk.bf16.vlgmr.msra.gmra.mxu0 %vm923_vm0, %v3512_v61 }
 0x9d5   : > { %4907 = vmatprep.mubr.msk.bf16.mxu0 %vm5605_vm1, %v7470_v6 }
 0x9fa   : > { %v2958_v52 = vpop.xlane.xlu1 %2957 }
 0x9fb   : > { %5337 = vrcp.f32 %v2958_v52  ;;  %v7495_v52 = vld [vmem:[#allocation31_spill] sm:$0xff] }
 0xa08   : > { %v5338_v16 = vpop.eup %5337 }
 0xa09   : > { %v2976_v17 = vmul.f32 %v5338_v16, %v7075_v49 }
 0xa15   : > { %v2961_v27 = vpop.xlane.xlu1 %2960 }
 0xa16   : > { %5339 = vrcp.f32 %v2961_v27 }
 0xa19   : > { %v3621_v58 = vpop.permute.xlu1 %3620 }
 0xa1a   : > { %v3626_v32 = vsel %vm923_vm0, %v3621_v58, 0 }
 0xa1b   : > { %4906 = vmatpush3.bf16.xpose.msra.mxu0 %v3626_v32 }
 0xa1c   : > { %4917 = vmatprep.subr.bf16.mxu0 %v7470_v6 }
 0xa1d   : > { %v3565_v56 = vpop.permute.xlu1 %3564 }
 0xa21   : > { %v3618_v19 = vpop.permute.xlu1 %3617 }
 0xa22   : > { %4908 = vmatmul.mubr.msk.bf16.vlgmr.msra.gmra.mxu0 %vm923_vm0, %v3618_v19  ;;  %v7496_v19 = vld [vmem:[#allocation32_spill] sm:$0xff] }
 0xa23   : > { %v5340_v48 = vpop.eup %5339  ;;  %4919 = vmatprep.mubr.msk.bf16.mxu0 %vm5605_vm1, %v7470_v6 }
 0xa24   : > { %v2977_v34 = vmul.f32 %v5340_v48, %v7082_v37  ;;  %v828_v37 = vld [vmem:[#allocation9 + $0x30] sm:$0xff] }
 0xa26   : > { %v2981_v40 = vpack.c.bf16 %v2977_v34, %v2976_v17 }
 0xa28   : > { %4890 = vmatmul.mubr.msk.bf16.vlgmr.msra.gmra.mxu1 %vm1241_vm2, %v2981_v40 }
 0xa29   : > { %4900 = vmatpush3.bf16.xpose.msra.mxu1 %v3573_v18  ;;  %4901 = vmatprep.mubr.msk.bf16.mxu1 %vm5605_vm1, %v7470_v6 }
 0xa2a   : > { %4911 = vmatprep.subr.bf16.mxu1 %v7470_v6 }
 0xa30   : > { %4902 = vmatmul.mubr.msk.bf16.vlgmr.msra.gmra.mxu1 %vm923_vm0, %v3565_v56 }
 0xa31   : > { %4912 = vmatpush3.bf16.xpose.msra.mxu1 %v3679_v15  ;;  %4913 = vmatprep.mubr.msk.bf16.mxu1 %vm5605_vm1, %v7470_v6  ;;  %v5384_v15 = vld [vmem:[#allocation10 + $0x38] sm:$0xff] }
 0xa32   : > { %4923 = vmatprep.subr.bf16.mxu1 %v7470_v6 }
 0xa38   : > { %4914 = vmatmul.mubr.msk.bf16.vlgmr.msra.gmra.mxu1 %vm923_vm0, %v3671_v20 }
 0xa39   : > { %4925 = vmatprep.mubr.msk.bf16.mxu1 %vm5605_vm1, %v7470_v6 }
 0xa84   : > { %v7141_v30 = vpop.f32.mrf.mxu0 }
 0xa86   : > { %v4873_v8 = vpop.f32.mrf.mxu0 }
 0xa88   : > { %v7143_v14 = vpop.f32.mrf.mxu0 }
 0xa8a   : > { %v4874_v49 = vpop.f32.mrf.mxu0 }
 0xa8b   : > { %v5385_v49 = vld [vmem:[%s7411_s3] sm:$0xf] }
 0xa8c   : > { %v7145_v57 = vpop.f32.mrf.mxu0 }
 0xa8e   : > { %v4885_v39 = vpop.f32.mrf.mxu0 }
 0xa8f   : > { %v7497_v39 = vld [vmem:[#allocation18_spill] sm:$0xff] }
 0xa90   : > { %v7147_v7 = vpop.f32.mrf.mxu1  ;;  %v7149_v53 = vpop.f32.mrf.mxu0 }
 0xa92   : > { %v4879_v45 = vpop.f32.mrf.mxu1  ;;  %v4886_v38 = vpop.f32.mrf.mxu0 }
 0xa93   : > { %v7498_v45 = vsub.s32 3, %v7497_v39  ;;  %v7499_v39 = vld [vmem:[#allocation25_spill] sm:$0xff] }
 0xa94   : > { %v7151_v62 = vpop.f32.mrf.mxu1  ;;  %v3556_v43 = vpop.f32.mrf.mxu0 }
 0xa95   : > { %v3557_v41 = vadd.f32 %v3556_v43, %v828_v37  ;;  %v3298_v38 = vrot.slane %v5385_v49, %v7498_v45 }
 0xa96   : > { %v4880_v4 = vpop.f32.mrf.mxu1  ;;  %v4897_v63 = vpop.f32.mrf.mxu0 }
 0xa97   : > { %v7154_v44 = vadd.f32 %v6886_v25, %v3557_v41 }
 0xa98   : > { %v3559_v33 = vpop.f32.mrf.mxu0 }
 0xa99   : > { %v3560_v23 = vadd.f32 %v3559_v33, %v829_v26  ;;  %v3730_v13 = vsel %vm1241_vm2, %v7154_v44, -inf }
 0xa9a   : > { %3731 = vmax.xlane.f32.xlu1 %v3730_v13  ;;  %v4898_v10 = vpop.f32.mrf.mxu0 }
 0xa9b   : > { %v7159_v55 = vadd.f32 %v6894_v31, %v3560_v23  ;;  %v7492_v31 = vld [vmem:[#allocation28_spill] sm:$0xff]  ;;  %v3281_v10 = vld [vmem:[#allocation2 + $0x20] ss:$12 sps:$4 sm:$0xff]  }
 0xa9c   : > { %v3279_v23 = vld [vmem:[#allocation2 + $0x8] ss:$12 sps:$4 sm:$0xff]  }
 0xa9d   : > { %v3733_v29 = vsel %vm1241_vm2, %v7159_v55, -inf }
 0xa9e   : > { %3734 = vmax.xlane.f32.xlu0 %v3733_v29 }
 0xae2   : > { %v3662_v2 = vpop.f32.mrf.mxu0 }
 0xae3   : > { %v3663_v11 = vadd.f32 %v3662_v2, %v828_v37  ;;  %v3287_v2 = vunpack.c.l.bf16 %v3279_v23 }
 0xae4   : > { %v4909_v47 = vpop.f32.mrf.mxu0 }
 0xae5   : > { %v7171_v50 = vadd.f32 %v7493_v28, %v3663_v11  ;;  %v3288_v47 = vunpack.c.h.bf16 %v3279_v23 }
 0xae6   : > { %v3665_v46 = vpop.f32.mrf.mxu0 }
 0xae7   : > { %v3666_v1 = vadd.f32 %v3665_v46, %v829_v26  ;;  %v3742_v56 = vsel %vm1241_vm2, %v7171_v50, -inf }
 0xae8   : > { %v7163_v42 = vpop.f32.mrf.mxu1  ;;  %v4910_v25 = vpop.f32.mrf.mxu0 }
 0xae9   : > { %v3727_v27 = vadd.f32 %v7495_v52, %v3666_v1 }
 0xaea   : > { %v4891_v21 = vpop.f32.mrf.mxu1 }
 0xaeb   : > { %v3745_v18 = vsel %vm1241_vm2, %v3727_v27, -inf }
 0xaec   : > { %v7165_v36 = vpop.f32.mrf.mxu1 }
 0xaee   : > { %v4892_v3 = vpop.f32.mrf.mxu1 }
 0xaef   : > { %v3289_v3 = vunpack.c.l.bf16 %v3281_v10 }
 0xaf0   : > { %v3609_v12 = vpop.f32.mrf.mxu1 }
 0xaf1   : > { %v3610_v51 = vadd.f32 %v3609_v12, %v828_v37  ;;  %v3290_v12 = vunpack.c.h.bf16 %v3281_v10  ;;  %v3283_v10 = vld [vmem:[#allocation2 + $0x38] ss:$12 sps:$4 sm:$0xff]  }
 0xaf2   : > { %v4903_v54 = vpop.f32.mrf.mxu1 }
 0xaf3   : > { %v7168_v22 = vadd.f32 %v7492_v31, %v3610_v51 }
 0xaf4   : > { %v3612_v5 = vpop.f32.mrf.mxu1 }
 0xaf5   : > { %v3613_v24 = vadd.f32 %v3612_v5, %v829_v26  ;;  %v3736_v60 = vsel %vm1241_vm2, %v7168_v22, -inf }
 0xaf6   : > { %3737 = vmax.xlane.f32.xlu0 %v3736_v60  ;;  %v4904_v35 = vpop.f32.mrf.mxu1 }
 0xaf7   : > { %v7176_v0 = vadd.f32 %v7494_v59, %v3613_v24 }
 0xaf8   : > { %v3715_v61 = vpop.f32.mrf.mxu1 }
 0xaf9   : > { %v3716_v58 = vadd.f32 %v3715_v61, %v828_v37  ;;  %v3739_v32 = vsel %vm1241_vm2, %v7176_v0, -inf  ;;  %v3285_v61 = vld [vmem:[#allocation2 + $0x50] ss:$12 sps:$4 sm:$0xff]  }
 0xafa   : > { %3740 = vmax.xlane.f32.xlu1 %v3739_v32  ;;  %v4915_v16 = vpop.f32.mrf.mxu1  ;;  %3743 = vmax.xlane.f32.xlu0 %v3742_v56  ;;  %v3293_v52 = vunpack.c.l.bf16 %v3285_v61 }
 0xafb   : > { %v7184_v48 = vadd.f32 %v7496_v19, %v3716_v58 }
 0xafc   : > { %v3718_v17 = vpop.f32.mrf.mxu1 }
 0xafd   : > { %v3719_v34 = vadd.f32 %v3718_v17, %v829_v26  ;;  %v3748_v40 = vsel %vm1241_vm2, %v7184_v48, -inf }
 0xafe   : > { %v4916_v9 = vpop.f32.mrf.mxu1  ;;  %3749 = vmax.xlane.f32.xlu0 %v3748_v40  ;;  %3746 = vmax.xlane.f32.xlu1 %v3745_v18 }
 0xaff   : > { %v7189_v20 = vadd.f32 %v5384_v15, %v3719_v34 }
 0xb01   : > { %v3751_v8 = vsel %vm1241_vm2, %v7189_v20, -inf }
 0xb02   : > { %3752 = vmax.xlane.f32.xlu1 %v3751_v8 }
 0xb14   : > { %3300 = vrot.lane.b32.xlu0 %v3298_v38, %s5606_s23  ;;  %v7500_v38 = vld [vmem:[#allocation27_spill] sm:$0xff] }
 0xb23   : > { %v3732_v43 = vpop.xlane.xlu1 %3731 }
 0xb24   : > { %v3754_v1 = vsub.f32 %v7154_v44, %v3732_v43 }
 0xb26   : > { %v3762_v24 = vmul.f32 1.442695, %v3754_v1  ;;  %v4590_v1 = vpack.c.bf16 %v7147_v7, %v7147_v7 }
 0xb27   : > { %v3735_v37 = vpop.xlane.xlu0 %3734 }
 0xb28   : > { %v3755_v60 = vsub.f32 %v7159_v55, %v3735_v37  ;;  %v4587_v37 = vpack.c.bf16 %v7500_v38, %v7500_v38 }
 0xb2a   : > { %v3764_v35 = vmul.f32 1.442695, %v3755_v60 }
 0xb7f   : > { %v3738_v41 = vpop.xlane.xlu0 %3737 }
 0xb80   : > { %v3756_v59 = vsub.f32 %v7168_v22, %v3738_v41 }
 0xb82   : > { %v3766_v58 = vmul.f32 1.442695, %v3756_v59 }
 0xb83   : > { %v3744_v4 = vpop.xlane.xlu0 %3743  ;;  %v3741_v63 = vpop.xlane.xlu1 %3740 }
 0xb84   : > { %v3758_v32 = vsub.f32 %v7171_v50, %v3744_v4  ;;  %v3757_v19 = vsub.f32 %v7176_v0, %v3741_v63  ;;  %v4589_v50 = vpack.c.bf16 %v7143_v14, %v7143_v14  ;;  %v4593_v4 = vpack.c.bf16 %v7149_v53, %v7149_v53 }
 0xb86   : > { %v3770_v44 = vmul.f32 1.442695, %v3758_v32  ;;  %v3768_v22 = vmul.f32 1.442695, %v3757_v19 }
 0xb87   : > { %v3750_v26 = vpop.xlane.xlu0 %3749  ;;  %v3747_v33 = vpop.xlane.xlu1 %3746 }
 0xb88   : > { %v3759_v13 = vsub.f32 %v3727_v27, %v3747_v33  ;;  %v3294_v27 = vunpack.c.h.bf16 %v3285_v61  ;;  %v3760_v17 = vsub.f32 %v7184_v48, %v3750_v26  ;;  %v4591_v48 = vpack.c.bf16 %v7151_v62, %v7151_v62 }
 0xb89   : > { %v4595_v33 = vpack.c.bf16 %v7165_v36, %v7165_v36 }
 0xb8a   : > { %v3772_v29 = vmul.f32 1.442695, %v3759_v13  ;;  %v3774_v18 = vmul.f32 1.442695, %v3760_v17 }
 0xb8b   : > { %v7199_v46 = vpop.permute.xlu0 %3300  ;;  %v3753_v40 = vpop.xlane.xlu1 %3752 }
 0xb8c   : > { %v3303_v25 = vadd.f32 %v7199_v46, %v3287_v2  ;;  %v3304_v21 = vadd.f32 %v7199_v46, %v3288_v47  ;;  %5341 = vpow2.f32 %v3772_v29  ;;  %v3305_v51 = vadd.f32 %v7199_v46, %v3289_v3 }
 0xb8d   : > { %v3306_v54 = vadd.f32 %v7199_v46, %v3290_v12  ;;  %5343 = vpow2.f32 %v3762_v24  ;;  %v3309_v56 = vadd.f32 %v7199_v46, %v3293_v52  ;;  %v3310_v16 = vadd.f32 %v7199_v46, %v3294_v27  ;;  %v7502_v12 = vld [vmem:[#allocation19_spill] sm:$0xff] }
 0xb8e   : > { %v3311_v11 = vpack.c.bf16 %v3304_v21, %v3303_v25  ;;  %5345 = vpow2.f32 %v3764_v35  ;;  %v3761_v9 = vsub.f32 %v7189_v20, %v3753_v40  ;;  %v4585_v20 = vpack.c.bf16 %v7499_v39, %v7499_v39  ;;  %v7501_v21 = vld [vmem:[#allocation20_spill] sm:$0xff]  ;;  %v7505_v24 = vld [vmem:[#allocation23_spill] sm:$0xff]  ;;  %v7506_v35 = vld [vmem:[#allocation26_spill] sm:$0xff] }
 0xb8f   : > { %v3312_v31 = vpack.c.bf16 %v3306_v54, %v3305_v51  ;;  %5347 = vpow2.f32 %v3766_v58  ;;  %v3314_v55 = vpack.c.bf16 %v3310_v16, %v3309_v56  ;;  %v3291_v29 = vunpack.c.l.bf16 %v3283_v10  ;;  %v7503_v51 = vld [vmem:[#allocation22_spill] sm:$0xff] }
 0xb90   : > { %3823 = vrot.lane.b32.xlu1 %v3311_v11, %s5607_s26  ;;  %5349 = vpow2.f32 %v3770_v44  ;;  %v3776_v14 = vmul.f32 1.442695, %v3761_v9  ;;  %v3292_v2 = vunpack.c.h.bf16 %v3283_v10  ;;  %v4580_v3 = vpack.c.bf16 %v7501_v21, %v7501_v21  ;;  %v5105_v21 = vld [vmem:[#allocation12 + $0x38] sm:$0xff]  }
 0xb91   : > { %5351 = vpow2.f32 %v3768_v22  ;;  %v3307_v47 = vadd.f32 %v7199_v46, %v3291_v29  ;;  %v4581_v11 = vpack.c.bf16 %v7502_v12, %v7502_v12  ;;  %v4582_v54 = vpack.c.bf16 %v7503_v51, %v7503_v51  ;;  %v5107_v12 = vld [vmem:[#allocation12 + $0x28] sm:$0xff]   ;;  %v5109_v51 = vld [vmem:[#allocation12 + $0x18] sm:$0xff]  }
 0xb92   : > { %5353 = vpow2.f32 %v3774_v18  ;;  %v3308_v36 = vadd.f32 %v7199_v46, %v3292_v2  ;;  %v4584_v60 = vpack.c.bf16 %v7505_v24, %v7505_v24  ;;  %v4586_v59 = vpack.c.bf16 %v7506_v35, %v7506_v35  ;;  %v5112_v35 = vld [vmem:[#allocation12 + $0x8] sm:$0xff]  }
 0xb93   : > { %5355 = vpow2.f32 %v3776_v14  ;;  %v4594_v52 = vpack.c.bf16 %v7163_v42, %v7163_v42 }
 0xb94   : > { %3871 = vrot.lane.b32.xlu1 %v3312_v31, %s5607_s26  ;;  %v3313_v25 = vpack.c.bf16 %v3308_v36, %v3307_v47  ;;  %v7504_v31 = vld [vmem:[#allocation21_spill] sm:$0xff] }
 0xb95   : > { %v4583_v46 = vpack.c.bf16 %v7504_v31, %v7504_v31 }
 0xb99   : > { %v7207_v5 = vpop.eup %5341 }
 0xb9a   : > { %v3793_v28 = vsel %vm1241_vm2, %v7207_v5, 0.0  ;;  %v7220_v34 = vpop.eup %5343 }
 0xb9b   : > { %3794 = vadd.xlane.f32.xlu0 %v3793_v28  ;;  %v3778_v0 = vsel %vm1241_vm2, %v7220_v34, 0.0  ;;  %v7228_v15 = vpop.eup %5345  ;;  %v4588_v28 = vpack.c.bf16 %v7141_v30, %v7141_v30  ;;  %v4592_v30 = vpack.c.bf16 %v7145_v57, %v7145_v57 }
 0xb9c   : > { %v3781_v8 = vsel %vm1241_vm2, %v7228_v15, 0.0  ;;  %v7235_v49 = vpop.eup %5347 }
 0xb9d   : > { %v3784_v62 = vsel %vm1241_vm2, %v7235_v49, 0.0  ;;  %v7242_v45 = vpop.eup %5349 }
 0xb9e   : > { %v3790_v43 = vsel %vm1241_vm2, %v7242_v45, 0.0  ;;  %v7249_v41 = vpop.eup %5351 }
 0xb9f   : > { %v3787_v63 = vsel %vm1241_vm2, %v7249_v41, 0.0  ;;  %v7256_v26 = vpop.eup %5353 }
 0xba0   : > { %v3796_v23 = vsel %vm1241_vm2, %v7256_v26, 0.0  ;;  %v7263_v13 = vpop.eup %5355 }
 0xba1   : > { %v3799_v53 = vsel %vm1241_vm2, %v7263_v13, 0.0 }
 0xbb1   : > { %3967 = vrot.lane.b32.xlu0 %v3314_v55, %s5607_s26 }
 0xbb5   : > { %3200 = vrot.lane.b32.xlu0 %v4589_v50, %s5608_s14 }
 0xbb8   : > { %3779 = vadd.xlane.f32.xlu1 %v3778_v0 }
 0xbb9   : > { %3204 = vrot.lane.b32.xlu0 %v4591_v48, %s5608_s14 }
 0xbbc   : > { %3782 = vadd.xlane.f32.xlu1 %v3781_v8 }
 0xbbd   : > { %2368 = vrot.lane.b32.xlu0 %v4585_v20, %s5607_s26 }
 0xbc0   : > { %3785 = vadd.xlane.f32.xlu1 %v3784_v62 }
 0xbc1   : > { %2372 = vrot.lane.b32.xlu0 %v4587_v37, %s5607_s26 }
 0xbc4   : > { %3791 = vadd.xlane.f32.xlu1 %v3790_v43 }
 0xbc5   : > { %3208 = vrot.lane.b32.xlu0 %v4593_v4, %s5608_s14 }
 0xbc8   : > { %3788 = vadd.xlane.f32.xlu1 %v3787_v63 }
 0xbc9   : > { %3212 = vrot.lane.b32.xlu0 %v4595_v33, %s5608_s14 }
 0xbcc   : > { %3797 = vadd.xlane.f32.xlu1 %v3796_v23 }
 0xbd0   : > { %3800 = vadd.xlane.f32.xlu1 %v3799_v53 }
 0xbe1   : > { %3919 = vrot.lane.b32.xlu1 %v3313_v25, %s5607_s26 }
 0xbe5   : > { %2358 = vrot.lane.b32.xlu1 %v4580_v3, %s5607_s26  ;;  %v5106_v3 = vld [vmem:[#allocation12 + $0x30] sm:$0xff]  }
 0xbe9   : > { %2360 = vrot.lane.b32.xlu1 %v4581_v11, %s5607_s26  ;;  %v5108_v11 = vld [vmem:[#allocation12 + $0x20] sm:$0xff]  }
 0xbed   : > { %2362 = vrot.lane.b32.xlu1 %v4582_v54, %s5607_s26 }
 0xbf1   : > { %2364 = vrot.lane.b32.xlu1 %v4583_v46, %s5607_s26 }
 0xbf5   : > { %3198 = vrot.lane.b32.xlu1 %v4588_v28, %s5608_s14  ;;  %v5110_v28 = vld [vmem:[#allocation12 + $0x10] sm:$0xff]  }
 0xbf9   : > { %3202 = vrot.lane.b32.xlu1 %v4590_v1, %s5608_s14 }
 0xbfd   : > { %2366 = vrot.lane.b32.xlu1 %v4584_v60, %s5607_s26 }
 0xc01   : > { %2370 = vrot.lane.b32.xlu1 %v4586_v59, %s5607_s26 }
 0xc02   : > { %v3824_v61 = vpop.permute.xlu1 %3823 }
 0xc03   : > { %4918 = vmatpush3.bf16.msra.mxu0 %v3824_v61  ;;  %v5113_v61 = vld [vmem:[#allocation12] sm:$0xff]  }
 0xc04   : > { %4929 = vmatprep.subr.bf16.mxu0 %v7470_v6 }
 0xc05   : > { %3206 = vrot.lane.b32.xlu1 %v4592_v30, %s5608_s14 }
 0xc06   : > { %v3872_v7 = vpop.permute.xlu1 %3871 }
 0xc07   : > { %4924 = vmatpush3.bf16.msra.mxu1 %v3872_v7 }
 0xc08   : > { %4935 = vmatprep.subr.bf16.mxu1 %v7470_v6 }
 0xc09   : > { %3210 = vrot.lane.b32.xlu1 %v4594_v52, %s5608_s14 }
 0xc24   : > { %v3795_v27 = vpop.xlane.xlu0 %3794 }
 0xc28   : > { %v3968_v58 = vpop.permute.xlu0 %3967 }
 0xc2c   : > { %v3201_v32 = vpop.permute.xlu0 %3200 }
 0xc30   : > { %v7302_v56 = vpop.permute.xlu0 %3204 }
 0xc34   : > { %v2369_v57 = vpop.permute.xlu0 %2368 }
 0xc35   : > { %2388 = vst.msk [vmem:[#allocation3 + $0x14] sm:$0xf] %vm2382_vm4, %v2369_v57 }
 0xc38   : > { %v2373_v16 = vpop.permute.xlu0 %2372 }
 0xc39   : > { %2390 = vst.msk [vmem:[#allocation3 + $0x1c] sm:$0xf] %vm2382_vm4, %v2373_v16 }
 0xc3c   : > { %v3209_v44 = vpop.permute.xlu0 %3208 }
 0xc3d   : > { %3228 = vst.msk [vmem:[#allocation3 + $0x14] sm:$0xf] %vm3222_vm5, %v3209_v44 }
 0xc40   : > { %v3213_v42 = vpop.permute.xlu0 %3212 }
 0xc41   : > { %v3780_v19 = vpop.xlane.xlu1 %3779  ;;  %3230 = vst.msk [vmem:[#allocation3 + $0x1c] sm:$0xf] %vm3222_vm5, %v3213_v42 }
 0xc42   : > { %5357 = vrcp.f32 %v3780_v19 }
 0xc45   : > { %v3783_v55 = vpop.xlane.xlu1 %3782 }
 0xc46   : > { %5359 = vrcp.f32 %v3783_v55 }
 0xc47   : > { %5361 = vrcp.f32 %v3795_v27 }
 0xc49   : > { %v3786_v22 = vpop.xlane.xlu1 %3785 }
 0xc4d   : > { %v3792_v17 = vpop.xlane.xlu1 %3791 }
 0xc4e   : > { %5363 = vrcp.f32 %v3792_v17 }
 0xc4f   : > { %5365 = vrcp.f32 %v3786_v22  ;;  %v5358_v50 = vpop.eup %5357 }
 0xc50   : > { %v3810_v9 = vmul.f32 %v5358_v50, %v7220_v34 }
 0xc51   : > { %v3789_v40 = vpop.xlane.xlu1 %3788 }
 0xc52   : > { %5367 = vrcp.f32 %v3789_v40 }
 0xc53   : > { %v5360_v18 = vpop.eup %5359 }
 0xc54   : > { %v3811_v0 = vmul.f32 %v5360_v18, %v7228_v15  ;;  %v5362_v8 = vpop.eup %5361 }
 0xc55   : > { %v3798_v48 = vpop.xlane.xlu1 %3797  ;;  %v3815_v38 = vmul.f32 %v5362_v8, %v7207_v5 }
 0xc56   : > { %v3818_v14 = vpack.c.bf16 %v3811_v0, %v3810_v9  ;;  %5369 = vrcp.f32 %v3798_v48 }
 0xc58   : > { %4920 = vmatmul.mubr.msk.bf16.vlgmr.msra.gmra.mxu0 %vm1241_vm2, %v3818_v14 }
 0xc59   : > { %v3801_v39 = vpop.xlane.xlu1 %3800  ;;  %4931 = vmatprep.mubr.msk.bf16.mxu0 %vm5605_vm1, %v7470_v6 }
 0xc5a   : > { %5371 = vrcp.f32 %v3801_v39 }
 0xc5b   : > { %v5364_v20 = vpop.eup %5363 }
 0xc5c   : > { %v3814_v62 = vmul.f32 %v5364_v20, %v7242_v45  ;;  %v5366_v37 = vpop.eup %5365 }
 0xc5d   : > { %v3920_v34 = vpop.permute.xlu1 %3919  ;;  %v3812_v4 = vmul.f32 %v5366_v37, %v7235_v49 }
 0xc5e   : > { %4930 = vmatpush3.bf16.msra.mxu0 %v3920_v34  ;;  %v3820_v15 = vpack.c.bf16 %v3815_v38, %v3814_v62 }
 0xc5f   : > { %v5368_v43 = vpop.eup %5367  ;;  %4941 = vmatprep.subr.bf16.mxu0 %v5105_v21 }
 0xc60   : > { %v3813_v63 = vmul.f32 %v5368_v43, %v7249_v41  ;;  %v4527_v43 = vld [vmem:[%s7416_s8] ss:$0 sm:$0xff] }
 0xc61   : > { %4932 = vmatmul.mubr.msk.bf16.vlgmr.msra.gmra.mxu0 %vm1241_vm2, %v3820_v15  ;;  %v2359_v33 = vpop.permute.xlu1 %2358 }
 0xc62   : > { %2383 = vst.msk [vmem:[#allocation3] sm:$0xf] %vm2382_vm4, %v2359_v33  ;;  %v3819_v23 = vpack.c.bf16 %v3813_v63, %v3812_v4  ;;  %4942 = vmatpush3.bf16.msra.mxu0 %v5105_v21 }
 0xc63   : > { %v5370_v45 = vpop.eup %5369  ;;  %4943 = vmatprep.subr.bf16.mxu0 %v5106_v3 }
 0xc64   : > { %4926 = vmatmul.mubr.msk.bf16.vlgmr.msra.gmra.mxu1 %vm1241_vm2, %v3819_v23  ;;  %v3816_v49 = vmul.f32 %v5370_v45, %v7256_v26 }
 0xc65   : > { %4936 = vmatpush3.bf16.msra.mxu1 %v3968_v58  ;;  %v2361_v5 = vpop.permute.xlu1 %2360  ;;  %4937 = vmatprep.mubr.msk.bf16.mxu1 %vm5605_vm1, %v7470_v6 }
 0xc66   : > { %2384 = vst.msk [vmem:[#allocation3 + $0x4] sm:$0xf] %vm2382_vm4, %v2361_v5  ;;  %4944 = vmatpush3.bf16.msra.mxu0 %v5106_v3 }
 0xc67   : > { %v5372_v53 = vpop.eup %5371  ;;  %3224 = vst.msk [vmem:[#allocation3 + $0x4] sm:$0xf] %vm3222_vm5, %v3201_v32  ;;  %4945 = vmatprep.subr.bf16.mxu0 %v5107_v12 }
 0xc68   : > { %v3817_v41 = vmul.f32 %v5372_v53, %v7263_v13 }
 0xc69   : > { %v2363_v10 = vpop.permute.xlu1 %2362 }
 0xc6a   : > { %2385 = vst.msk [vmem:[#allocation3 + $0x8] sm:$0xf] %vm2382_vm4, %v2363_v10  ;;  %v3821_v29 = vpack.c.bf16 %v3817_v41, %v3816_v49  ;;  %4946 = vmatpush3.bf16.msra.mxu0 %v5107_v12 }
 0xc6b   : > { %4947 = vmatprep.subr.bf16.mxu0 %v5108_v11 }
 0xc6c   : > { %4938 = vmatmul.mubr.msk.bf16.vlgmr.msra.gmra.mxu1 %vm1241_vm2, %v3821_v29 }
 0xc6d   : > { %v2365_v2 = vpop.permute.xlu1 %2364 }
 0xc6e   : > { %2386 = vst.msk [vmem:[#allocation3 + $0xc] sm:$0xf] %vm2382_vm4, %v2365_v2  ;;  %4948 = vmatpush3.bf16.msra.mxu0 %v5108_v11 }
 0xc6f   : > { %3226 = vst.msk [vmem:[#allocation3 + $0xc] sm:$0xf] %vm3222_vm5, %v7302_v56  ;;  %4949 = vmatprep.subr.bf16.mxu0 %v5109_v51 }
 0xc71   : > { %v3199_v6 = vpop.permute.xlu1 %3198 }
 0xc72   : > { %3223 = vst.msk [vmem:[#allocation3] sm:$0xf] %vm3222_vm5, %v3199_v6  ;;  %4950 = vmatpush3.bf16.msra.mxu0 %v5109_v51 }
 0xc73   : > { %4951 = vmatprep.subr.bf16.mxu0 %v5110_v28 }
 0xc75   : > { %v3203_v47 = vpop.permute.xlu1 %3202 }
 0xc76   : > { %3225 = vst.msk [vmem:[#allocation3 + $0x8] sm:$0xf] %vm3222_vm5, %v3203_v47  ;;  %4952 = vmatpush3.bf16.msra.mxu0 %v5110_v28 }
 0xc77   : > { %4953 = vmatprep.subr.bf16.mxu0 %v5112_v35 }
 0xc79   : > { %v2367_v26 = vpop.permute.xlu1 %2366 }
 0xc7a   : > { %2387 = vst.msk [vmem:[#allocation3 + $0x10] sm:$0xf] %vm2382_vm4, %v2367_v26  ;;  %4954 = vmatpush3.bf16.msra.mxu0 %v5112_v35 }
 0xc7b   : > { %4955 = vmatprep.subr.bf16.mxu0 %v5113_v61 }
 0xc7d   : > { %v2371_v13 = vpop.permute.xlu1 %2370 }
 0xc7e   : > { %2389 = vst.msk [vmem:[#allocation3 + $0x18] sm:$0xf] %vm2382_vm4, %v2371_v13  ;;  %4956 = vmatpush3.bf16.msra.mxu0 %v5113_v61 }
 0xc81   : > { %v3207_v36 = vpop.permute.xlu1 %3206 }
 0xc82   : > { %3227 = vst.msk [vmem:[#allocation3 + $0x10] sm:$0xf] %vm3222_vm5, %v3207_v36 }
 0xc85   : > { %v3211_v25 = vpop.permute.xlu1 %3210 }
 0xc86   : > { %3229 = vst.msk [vmem:[#allocation3 + $0x18] sm:$0xf] %vm3222_vm5, %v3211_v25 }
 0xd18   : > { %v3863_v54 = vpop.f32.mrf.mxu0 }
 0xd19   : > { %v4596_v31 = vpack.c.bf16 %v3863_v54, %v3863_v54 }
 0xd1a   : > { %v4921_v46 = vpop.f32.mrf.mxu0 }
 0xd1b   : > { %4038 = vrot.lane.b32.xlu1 %v4596_v31, %s5606_s23 }
 0xd1c   : > { %v3866_v1 = vpop.f32.mrf.mxu0 }
 0xd1d   : > { %v4597_v24 = vpack.c.bf16 %v3866_v1, %v3866_v1 }
 0xd1e   : > { %v4922_v60 = vpop.f32.mrf.mxu0 }
 0xd1f   : > { %4040 = vrot.lane.b32.xlu0 %v4597_v24, %s5606_s23 }
 0xd21   : > { %v3959_v59 = vpop.f32.mrf.mxu0 }
 0xd22   : > { %v4600_v57 = vpack.c.bf16 %v3959_v59, %v3959_v59 }
 0xd23   : > { %v4933_v30 = vpop.f32.mrf.mxu0 }
 0xd24   : > { %v3911_v7 = vpop.f32.mrf.mxu1 }
 0xd25   : > { %v4598_v52 = vpack.c.bf16 %v3911_v7, %v3911_v7  ;;  %v3962_v27 = vpop.f32.mrf.mxu0 }
 0xd26   : > { %v4927_v58 = vpop.f32.mrf.mxu1  ;;  %v4601_v19 = vpack.c.bf16 %v3962_v27, %v3962_v27 }
 0xd27   : > { %4042 = vrot.lane.b32.xlu1 %v4598_v52, %s5606_s23  ;;  %v4934_v32 = vpop.f32.mrf.mxu0 }
 0xd28   : > { %v3914_v56 = vpop.f32.mrf.mxu1 }
 0xd29   : > { %v4599_v16 = vpack.c.bf16 %v3914_v56, %v3914_v56 }
 0xd2a   : > { %v4928_v44 = vpop.f32.mrf.mxu1 }
 0xd2b   : > { %4044 = vrot.lane.b32.xlu0 %v4599_v16, %s5606_s23  ;;  %4046 = vrot.lane.b32.xlu1 %v4600_v57, %s5606_s23 }
 0xd2c   : > { %v4007_v42 = vpop.f32.mrf.mxu1 }
 0xd2d   : > { %v4602_v55 = vpack.c.bf16 %v4007_v42, %v4007_v42 }
 0xd2e   : > { %v4939_v22 = vpop.f32.mrf.mxu1 }
 0xd2f   : > { %4050 = vrot.lane.b32.xlu1 %v4602_v55, %s5606_s23  ;;  %4048 = vrot.lane.b32.xlu0 %v4601_v19, %s5606_s23 }
 0xd30   : > { %v4010_v17 = vpop.f32.mrf.mxu1 }
 0xd31   : > { %v4603_v50 = vpack.c.bf16 %v4010_v17, %v4010_v17 }
 0xd32   : > { %v4940_v40 = vpop.f32.mrf.mxu1 }
 0xd33   : > { %4052 = vrot.lane.b32.xlu0 %v4603_v50, %s5606_s23 }
 0xd8d   : > { %v4039_v18 = vpop.permute.xlu1 %4038 }
 0xd8e   : > { %4063 = vst.msk [vmem:[#allocation3] sm:$0xf] %vm4062_vm6, %v4039_v18 }
 0xd91   : > { %v4041_v9 = vpop.permute.xlu0 %4040 }
 0xd92   : > { %4064 = vst.msk [vmem:[#allocation3 + $0x4] sm:$0xf] %vm4062_vm6, %v4041_v9 }
 0xd99   : > { %v4043_v0 = vpop.permute.xlu1 %4042  ;;  %v5111_v48 = vld [vmem:[#allocation3] sm:$0xff]  }
 0xd9a   : > { %4065 = vst.msk [vmem:[#allocation3 + $0x8] sm:$0xf] %vm4062_vm6, %v4043_v0  ;;  %4957 = vmatprep.mubr.bf16.mxu0 %v5111_v48 }
 0xd9d   : > { %v4045_v14 = vpop.permute.xlu0 %4044  ;;  %v4047_v8 = vpop.permute.xlu1 %4046 }
 0xd9e   : > { %4066 = vst.msk [vmem:[#allocation3 + $0xc] sm:$0xf] %vm4062_vm6, %v4045_v14  ;;  %4067 = vst.msk [vmem:[#allocation3 + $0x10] sm:$0xf] %vm4062_vm6, %v4047_v8 }
 0xda1   : > { %v4049_v39 = vpop.permute.xlu0 %4048  ;;  %v4051_v20 = vpop.permute.xlu1 %4050 }
 0xda2   : > { %4068 = vst.msk [vmem:[#allocation3 + $0x14] sm:$0xf] %vm4062_vm6, %v4049_v39  ;;  %4069 = vst.msk [vmem:[#allocation3 + $0x18] sm:$0xf] %vm4062_vm6, %v4051_v20 }
 0xda5   : > { %v4053_v62 = vpop.permute.xlu0 %4052  ;;  %v5114_v38 = vld [vmem:[#allocation3 + $0x8] sm:$0xff]  }
 0xda6   : > { %4070 = vst.msk [vmem:[#allocation3 + $0x1c] sm:$0xf] %vm4062_vm6, %v4053_v62  ;;  %4958 = vmatmul.mubr.bf16.vlgmr.msra.gmra.mxu0 %v5114_v38 }
 0xda9   : > { %v5115_v37 = vld [vmem:[#allocation3 + $0x10] sm:$0xff]  }
 0xdaa   : > { %4961 = vmatprep.mubr.bf16.mxu0 %v5115_v37 }
 0xdad   : > { %v5116_v34 = vld [vmem:[#allocation3 + $0x18] sm:$0xff]  }
 0xdae   : > { %4962 = vmatmul.mubr.bf16.gmra.mxu0 %v5116_v34 }
 0xe66   : > { %v4959_v15 = vpop.f32.mrf.mxu0 }
 0xe67   : > { %v4217_v33 = vadd.f32 %v4959_v15, %v4527_v43 }
 0xe68   : > { %v4208_v4 = vpop.f32.mrf.mxu0 }
 0xe69   : > { %v4209_v5 = vadd.f32 %v4527_v43, %v4208_v4 }
 0xe6a   : > { %v4960_v63 = vpop.f32.mrf.mxu0 }
 0xe6b   : > { %v4220_v23 = vadd.f32 %v4960_v63, %v4527_v43 }
 0xe6c   : > { %v4211_v45 = vpop.f32.mrf.mxu0 }
 0xe6d   : > { %v4622_v53 = vpack.c.bf16 %v4220_v23, %v4217_v33  ;;  %v4212_v49 = vadd.f32 %v4527_v43, %v4211_v45 }
 0xe6e   : > { %v4963_v41 = vpop.f32.mrf.mxu0 }
 0xe6f   : > { %4634 = vst [vmem:[%s409_s6 + $0x8] sm:$0xff] %v4622_v53   ;;  %v4617_v10 = vpack.c.bf16 %v4212_v49, %v4209_v5  ;;  %v4233_v6 = vadd.f32 %v4963_v41, %v4527_v43 }
 0xe70   : > { %v4224_v29 = vpop.f32.mrf.mxu0 }
 0xe71   : > { %4618 = vst [vmem:[%s409_s6] sm:$0xff] %v4617_v10   ;;  %v4225_v13 = vadd.f32 %v4527_v43, %v4224_v29 }
 0xe72   : > { %v4964_v2 = vpop.f32.mrf.mxu0 }
 0xe73   : > { %v4236_v47 = vadd.f32 %v4964_v2, %v4527_v43 }
 0xe74   : > { %v4227_v26 = vpop.f32.mrf.mxu0 }
 0xe75   : > { %v4632_v36 = vpack.c.bf16 %v4236_v47, %v4233_v6  ;;  %v4228_v25 = vadd.f32 %v4527_v43, %v4227_v26 }
 0xe77   : > { %4636 = vst [vmem:[%s409_s6 + $0x18] sm:$0xff] %v4632_v36   ;;  %v4627_v21 = vpack.c.bf16 %v4228_v25, %v4225_v13 }
 0xe79   : > { %4635 = vst [vmem:[%s409_s6 + $0x10] sm:$0xff] %v4627_v21  }
 0xe7a   : > { %5531 = shalt.err (!%p5528_p12)
}
 0xe7b   : > { %s5532_s23 = scalar_lea.hbm %s7363_s18, 512  ;;  %s5536_s6 = scalar_lea.hbm %s7417_s9, 1024 }
 0xe7c   : > { %p5533_p1 = scmp.ne.s32.totalorder %s7363_s18, %s5532_s23  ;;  %p5537_p8 = scmp.lt.s32.totalorder %s7363_s18, %s7417_s9 }
 0xe7d   : > { %p5538_p13 = scmp.lt.s32.totalorder %s5536_s6, %s5532_s23 }
 0xe7e   : > { %p5534_p4 = pnand %p5533_p1, %p7507_p3 }
 0xe7f   : > { %p5539_p11 = por %p5538_p13, %p5537_p8 }
 0xe80   : > { %p5535_p6 = pneg %p5534_p4 }
 0xe82   : > { %p5540_p2 = pnand %p5539_p11, %p5535_p6 }
 0xe84   : > { %5543 = shalt.err (!%p5540_p2)
}
 0xe85   : > { %s5610_s17 = smov 4  }
 0xe86   : > { %4991 = dma.vmem_to_hbm [thread:$0]  (%p7507_p3), %s7358_s19, 512, %s7363_s18, %s4280_s21, %s5608_s14, %s5608_s14, %s5610_s17  }
 0xe87 PF: > { %s4309_s25 = sand.u32 1, %s5578_s30   ;;  %p7508_p5 = scmp.ne.s32.totalorder %s7445_s16, 0 }
 0xe88   : > { %p7509_p7 = scmp.ge.s32.totalorder %s5590_s12, 2  ;;  %s4310_s13 = scalar_lea.sflag [#allocation6], %s4309_s25 }
 0xe8a   : > { %p5011_p9 = pnand %p7509_p7, %p7508_p5 }
 0xe8c   : > { %p5012_p0 = pneg %p5011_p9 }
 0xe8e   : > { %5573 = dma.done.wait (%p5012_p0), %s4310_s13, 512  }
 0xe8f   : > { %5575 = vsyncadd (%p5012_p0), %s4310_s13, 4294966784  ;;  %p24_p10 = scmp.ge.s32.totalorder %s5755_s24, 4   ;;  %s7510_s30 = smov %s5582_s10 }
 0xe90   : > { %s7511_s10 = smov %s5586_s11  ;;  %s7512_s11 = smov %s5764_s22 }
 0xe91   : > { %s7513_s12 = smov %s5755_s24  ;;  %26 = sbr.rel (!%p24_p10) target bundleno = 11 (0xb), region = 117 }
 0xe96   :  { %4315 = vsyncpa [#allocation5], 1 }
 0xe97   :  { %4317 = vsyncpa [#allocation5 + $0x1], 1 }
 0xe98   :  { %4318 = vsyncpa [#allocation8], 1 }
 0xe99   :  { %4319 = vsyncpa [#allocation11], 1 }
 0xe9a   :  { %4320 = vsyncpa [#allocation6], 1 }
 0xe9b   :  { %4322 = vsyncpa [#allocation6 + $0x1], 1 }

// kernel: tpu_custom_call.1
= control target key start
LH: loop header
LB: loop body
LE: loop exit
PB: predicated region body
PF: predicated region fallthrough
CT: control target
= control target key end

     0   :  { %s7408_s0 = inlined_call_operand.hbm [shape: f32[8,16,128], index: 0, kind: input, shape index: {}]   ;;  %s7409_s1 = inlined_call_operand.hbm [shape: bf16[128,384], index: 1, kind: input, shape index: {}]   ;;  %s7410_s2 = inlined_call_operand.vmem [shape: f32[4,32], index: 2, kind: input, shape index: {}]   ;;  %s7411_s3 = inlined_call_operand.vmem [shape: f32[4,32], index: 3, kind: input, shape index: {}]   ;;  %s7412_s4 = inlined_call_operand.vmem [shape: f32[4,1], index: 4, kind: input, shape index: {}]   ;;  %s7413_s5 = inlined_call_operand.hbm [shape: f32[4,16,16], index: 5, kind: input, shape index: {}]   ;;  %s7414_s6 = inlined_call_operand.hbm [shape: f32[4,16,16], index: 6, kind: input, shape index: {}]   ;;  %s7415_s7 = inlined_call_operand.hbm [shape: bf16[128,128], index: 7, kind: input, shape index: {}]   ;;  %s7416_s8 = inlined_call_operand.vmem [shape: f32[1,128], index: 8, kind: input, shape index: {}]   ;;  %s7417_s9 = inlined_call_operand.hbm [shape: bf16[8,16,128], index: 9, kind: output, shape index: {}]  }
   0x1   :  { %7441 = sst [smem:[#allocation33_spill]] %s7409_s1 }
   0x2   :  { %7442 = sst [smem:[#allocation34_spill]] %s7413_s5 }
   0x3   :  { %7443 = sst [smem:[#allocation35_spill]] %s7414_s6 }
   0x4   :  { %14 = vsyncpa [#allocation5], 0 }
   0x5   :  { %16 = vsyncpa [#allocation5 + $0x1], 0 }
   0x6   :  { %17 = vsyncpa [#allocation8], 0 }
   0x7   :  { %18 = vsyncpa [#allocation11], 0 }
   0x8   :  { %19 = vsyncpa [#allocation6], 0 }
   0x9   :  { %21 = vsyncpa [#allocation6 + $0x1], 0  ;;  %s5661_s30 = smov 0   ;;  %s5663_s10 = smov 0  }
   0xa   :  { %s5665_s11 = smov 0   ;;  %s5667_s12 = smov 0  }
   0xb LB: > { %s5682_s13 = sadd.s32 4294967295, %s5590_s12   ;;  %s4405_s14 = sadd.s32 4294967294, %s5590_s12   ;;  %s5590_s12 = sphi %s5667_s12, %s7513_s12   ;;  %s5586_s11 = sphi %s5665_s11, %s7512_s11   ;;  %s5582_s10 = sphi %s5663_s10, %s7511_s10   ;;  %s5578_s30 = sphi %s5661_s30, %s7510_s30  }
   0xc   : > { %p47_p0 = scmp.ne.s32.totalorder %s5582_s10, %s5578_s30  ;;  %p7420_p1 = scmp.eq.s32.totalorder %s5682_s13, 0 }
   0xd   : > { %p245_p3 = scmp.eq.s32.totalorder %s4405_s14, 1  ;;  %p4406_p5 = scmp.ge.s32.totalorder %s5590_s12, 1 }
   0xe   : > { %p5691_p4 = por %p7420_p1, %p47_p0  ;;  %p252_p7 = scmp.lt.s32.totalorder %s5590_s12, 3 }
   0xf   : > { %p5696_p6 = por %p245_p3, %p47_p0  ;;  %s5592_s18 = smov [#allocation7]  }
  0x10   : > { %s7444_s15 = scalar_select %p5691_p4, 1, 0 }
  0x11   : > { %s7445_s16 = scalar_select %p5696_p6, 1, 0 }
  0x12   : > { %p5701_p8 = pnand %p4406_p5, %p252_p7  ;;  %s264_s19 = sshll.u32 %s5592_s18, 4  ;;  %s265_s19 = int_to_ptr.vmem [resolvable:$true] %s264_s19 }
  0x13   : > { %s5593_s21 = smov [#allocation10]   ;;  %s5397_s23 = scalar_lea.vmem %s265_s19, 3072 }
  0x14   : > { %s7446_s17 = scalar_select %p5701_p8, 1, 0 }
  0x15   : > { %p4993_p9 = pneg %p5701_p8  ;;  %s299_s22 = sshll.u32 %s5593_s21, 4  ;;  %s300_s22 = int_to_ptr.vmem [resolvable:$true] %s299_s22 }
  0x16   : > { %p5398_p13 = scmp.ne.s32.totalorder %s265_s19, %s5397_s23  ;;  %p5405_p5 = scmp.lt.s32.totalorder %s265_s19, %s265_s19 }
  0x17   : > { %p5710_p11 = pnand %p4993_p9, %p7420_p1  ;;  %p5406_p7 = scmp.lt.s32.totalorder %s5397_s23, %s5397_s23 }
  0x19   : > { %p5388_p12 = pneg %p5710_p11  ;;  %p5407_p10 = por %p5406_p7, %p5405_p5 }
  0x1b   : > { %p5400_p0 = pnand %p5398_p13, %p5388_p12 }
  0x1d   : > { %p5401_p3 = pneg %p5400_p0 }
  0x1f   : > { %p5408_p2 = pnand %p5407_p10, %p5401_p3 }
  0x21   : > { %5411 = shalt.err (!%p5408_p2)
}
  0x22   : > { %s5594_s24 = smov 192   ;;  %s5595_s25 = smov 12  }
  0x23   : > { %s7448_s1 = sld [smem:[#allocation33_spill]]  ;;  %s5596_s28 = smov [#allocation9]  }
  0x24   : > { %s286_s29 = sshll.u32 %s5596_s28, 4  ;;  %s5423_s14 = scalar_lea.vmem %s300_s22, 1024  ;;  %s287_s29 = int_to_ptr.vmem [resolvable:$true] %s286_s29 }
  0x25   : > { %p5424_p9 = scmp.ne.s32.totalorder %s300_s22, %s5423_s14  ;;  %p5431_p10 = scmp.lt.s32.totalorder %s300_s22, %s300_s22 }
  0x26   : > { %p5432_p2 = scmp.lt.s32.totalorder %s5423_s14, %s5423_s14 }
  0x27   : > { %p5426_p13 = pnand %p5424_p9, %p5388_p12 }
  0x28   : > { %p5433_p3 = por %p5432_p2, %p5431_p10 }
  0x29   : > { %4996 = dma.hbm_to_vmem [thread:$0]  (!%p5710_p11), %s7448_s1, 3072, %s265_s19, [#allocation8], %s5594_s24, %s5594_s24, %s5595_s25  }
  0x2a   : > { %p5427_p0 = pneg %p5426_p13 }
  0x2c   : > { %p5434_p5 = pnand %p5433_p3, %p5427_p0 }
  0x2e   : > { %5437 = shalt.err (!%p5434_p5)
}
  0x2f   : > { %s7418_s18 = smov 128   ;;  %s7419_s21 = smov 8  }
  0x30   : > { %s7449_s6 = sld [smem:[#allocation35_spill]]  ;;  %s5449_s24 = scalar_lea.vmem %s287_s29, 1024 }
  0x31   : > { %p5450_p7 = scmp.ne.s32.totalorder %s287_s29, %s5449_s24  ;;  %p5457_p0 = scmp.lt.s32.totalorder %s287_s29, %s287_s29 }
  0x32   : > { %p5458_p10 = scmp.lt.s32.totalorder %s5449_s24, %s5449_s24 }
  0x33   : > { %p5452_p9 = pnand %p5450_p7, %p5388_p12 }
  0x34   : > { %p5459_p2 = por %p5458_p10, %p5457_p0 }
  0x35   : > { %p5453_p13 = pneg %p5452_p9 }
  0x36   : > { %5002 = dma.hbm_to_vmem [thread:$0]  (!%p5710_p11), %s7449_s6, 1024, %s300_s22, [#allocation11], %s7418_s18, %s7418_s18, %s7419_s21  }
  0x37   : > { %p5460_p3 = pnand %p5459_p2, %p5453_p13 }
  0x39   : > { %5463 = shalt.err (!%p5460_p3)
}
  0x3a   : > { %s7450_s5 = sld [smem:[#allocation34_spill]]  ;;  %s5599_s22 = smov [#allocation12]  }
  0x3b   : > { %s312_s27 = sshll.u32 %s5599_s22, 4  ;;  %s313_s27 = int_to_ptr.vmem [resolvable:$true] %s312_s27 }
  0x3c   : > { %s5475_s28 = scalar_lea.vmem %s313_s27, 1024  ;;  %p5483_p13 = scmp.lt.s32.totalorder %s313_s27, %s313_s27 }
  0x3d   : > { %p5476_p5 = scmp.ne.s32.totalorder %s313_s27, %s5475_s28  ;;  %p5484_p0 = scmp.lt.s32.totalorder %s5475_s28, %s5475_s28 }
  0x3f   : > { %p5478_p7 = pnand %p5476_p5, %p5388_p12  ;;  %p5485_p10 = por %p5484_p0, %p5483_p13 }
  0x40   : > { %4999 = dma.hbm_to_vmem [thread:$0]  (!%p5710_p11), %s7450_s5, 1024, %s287_s29, [#allocation8], %s7418_s18, %s7418_s18, %s7419_s21  }
  0x41   : > { %p5479_p9 = pneg %p5478_p7 }
  0x43   : > { %p5486_p2 = pnand %p5485_p10, %p5479_p9 }
  0x45   : > { %5489 = shalt.err (!%p5486_p2)
}
  0x46   : > { %s5600_s14 = smov 64   ;;  %s5601_s29 = smov 4  }
  0x47   : > { %5005 = dma.hbm_to_vmem [thread:$0]  (!%p5710_p11), %s7415_s7, 1024, %s313_s27, [#allocation11], %s5600_s14, %s5600_s14, %s5601_s29  }
  0x48   : > { %s5755_s24 = sadd.s32 1, %s5590_s12   ;;  %s34_s26 = sadd.s32 1, %s5586_s11 }
  0x49   : > { %s31_s25 = ssub.s32 %s5590_s12, %s5755_s24  ;;  %p41_p3 = scmp.ne.s32.totalorder %s5586_s11, %s5582_s10 }
  0x4a   : > { %p32_p12 = scmp.eq.s32.totalorder %s31_s25, 0  ;;  %p42_p5 = scmp.eq.s32.totalorder %s5590_s12, 0 }
  0x4b   : > { %p7451_p9 = scmp.eq.s32.totalorder %s5682_s13, 1  ;;  %p5018_p0 = scmp.lt.s32.totalorder %s5590_s12, 2 }
  0x4c   : > { %s5764_s22 = scalar_select %p32_p12, %s5586_s11, %s34_s26  }
  0x4d   : > { %p43_p7 = por %p42_p5, %p41_p3  ;;  %p5768_p13 = por %p7451_p9, %p41_p3 }
  0x4e   : > { %s329_s20 = sand.u32 1, %s5586_s11   ;;  %s4555_s27 = sshll.u32 %s5590_s12, 10 }
  0x4f   : > { %s7452_s28 = scalar_select %p5768_p13, 1, 0 }
  0x50   : > { %s4412_s19 = sshll.u32 %s329_s20, 6  ;;  %s5778_s23 = scalar_lea.hbm %s7408_s0, %s4555_s27 }
  0x51   : > { %s333_s25 = scalar_lea.vmem [#allocation4], %s4412_s19  ;;  %p5782_p11 = pnand %p5018_p0, %p43_p7 }
  0x52   : > { %s341_s26 = sshll.u32 %s333_s25, 4  ;;  %s5786_s21 = scalar_lea.sflag [#allocation5], %s329_s20  ;;  %s5780_s26 = int_to_ptr.vmem [resolvable:$true] %s341_s26 }
  0x53   : > { %s5490_s1 = scalar_lea.hbm %s5778_s23, 1024  ;;  %p5492_p2 = pneg %p5782_p11 }
  0x54   : > { %p5491_p10 = scmp.ne.s32.totalorder %s5778_s23, %s5490_s1  ;;  %s5495_s19 = scalar_lea.hbm %s7408_s0, 2048 }
  0x55   : > { %p5496_p5 = scmp.lt.s32.totalorder %s5778_s23, %s7408_s0  ;;  %p5497_p7 = scmp.lt.s32.totalorder %s5495_s19, %s5490_s1 }
  0x56   : > { %p5493_p12 = pnand %p5492_p2, %p5491_p10 }
  0x57   : > { %p5498_p9 = por %p5497_p7, %p5496_p5 }
  0x58   : > { %p5494_p3 = pneg %p5493_p12 }
  0x5a   : > { %p5499_p0 = pnand %p5498_p9, %p5494_p3 }
  0x5c   : > { %5502 = shalt.err (!%p5499_p0)
}
  0x5d   : > { %s5503_s20 = scalar_lea.vmem %s5780_s26, 1024  ;;  %s5602_s5 = smov [#allocation4]  }
  0x5e   : > { %p5504_p1 = scmp.ne.s32.totalorder %s5780_s26, %s5503_s20  ;;  %s5508_s6 = sshll.u32 %s5602_s5, 4  ;;  %s5509_s6 = int_to_ptr.vmem [resolvable:$false] %s5508_s6 }
  0x5f   : > { %s5510_s27 = scalar_lea.vmem %s5509_s6, 2048  ;;  %p5511_p12 = scmp.lt.s32.totalorder %s5780_s26, %s5509_s6 }
  0x60   : > { %p5506_p6 = pnand %p5504_p1, %p5492_p2  ;;  %p5512_p13 = scmp.lt.s32.totalorder %s5510_s27, %s5503_s20 }
  0x62   : > { %p5507_p10 = pneg %p5506_p6  ;;  %p5513_p4 = por %p5512_p13, %p5511_p12 }
  0x64   : > { %p5514_p8 = pnand %p5513_p4, %p5507_p10 }
  0x66   : > { %5517 = shalt.err (!%p5514_p8)
}
  0x67   : > { %s7454_s1 = smov 8   ;;  %s7455_s14 = smov 128  }
  0x68   : > { %5009 = dma.hbm_to_vmem [thread:$0]  (!%p5782_p11), %s5778_s23, 1024, %s5780_s26, %s5786_s21, %s7455_s14, %s7455_s14, %s7454_s1  }
  0x69   : > { %p7456_p1 = scmp.ne.s32.totalorder %s7446_s17, 0 }
  0x6b   : > { %353 = sbr.rel (%p7456_p1) target bundleno = 3719 (0xe87), region = 56 }
  0x70   : > { %s5813_s5 = sand.u32 1, %s5582_s10   ;;  %p7457_p4 = scmp.ne.s32.totalorder %s7444_s15, 0 }
  0x71   : > { %s4417_s6 = sshll.u32 %s5813_s5, 6  ;;  %s356_s19 = scalar_lea.sflag [#allocation5], %s5813_s5 }
  0x72   : > { %s5817_s29 = scalar_lea.vmem [#allocation4], %s4417_s6 }
  0x73   : > { %5561 = dma.done.wait (%p7457_p4), %s356_s19, 1024  }
  0x74   : > { %5563 = vsyncadd (%p7457_p4), %s356_s19, 4294966272  ;;  %p7458_p6 = scmp.eq.s32.totalorder %s5682_s13, 0 }
  0x76   : > { %5565 = dma.done.wait (%p7458_p6), [#allocation8], 4096   ;;  %p7459_p8 = pmov %p7458_p6 }
  0x77   : > { %p7460_p13 = pmov %p7458_p6 }
  0x78   : > { %5567 = vsyncadd (%p7459_p8), [#allocation8], 4294963200 }
  0x79   : > { %5569 = dma.done.wait (%p7460_p13), [#allocation11], 2048   ;;  %p7461_p11 = pmov %p7458_p6 }
  0x7a   : > { %v5603_v0 = vmov 0   ;;  %v5073_v1 = vld [vmem:[#allocation7 + $0xac] ss:$12 sps:$4 sm:$0xff]   ;;  %v5075_v2 = vld [vmem:[#allocation7 + $0xa8] ss:$12 sps:$4 sm:$0xff]   ;;  %v413_v8 = vld [vmem:[%s5817_s29] sm:$0xff]  ;;  %v854_v38 = vlaneseq }
  0x7b   : > { %5571 = vsyncadd (%p7461_p11), [#allocation11], 4294965248  ;;  %617 = vmatprep.mubr.bf16.mxu1 %v5603_v0  ;;  %585 = vmatprep.subr.bf16.mxu1 %v5073_v1  ;;  %v5076_v3 = vld [vmem:[#allocation7 + $0x94] ss:$12 sps:$4 sm:$0xff]   ;;  %v5078_v4 = vld [vmem:[#allocation7 + $0x90] ss:$12 sps:$4 sm:$0xff]  }
  0x7c   : > { %586 = vmatpush1.bf16.msra.mxu1 %v5075_v2  ;;  %v5079_v5 = vld [vmem:[#allocation7 + $0x7c] ss:$12 sps:$4 sm:$0xff]   ;;  %v5081_v6 = vld [vmem:[#allocation7 + $0x78] ss:$12 sps:$4 sm:$0xff]   ;;  %v5084_v9 = vld [vmem:[#allocation7 + $0x60] ss:$12 sps:$4 sm:$0xff]  }
  0x7d   : > { %587 = vmatprep.subr.bf16.mxu1 %v5076_v3  ;;  %v5082_v7 = vld [vmem:[#allocation7 + $0x64] ss:$12 sps:$4 sm:$0xff]   ;;  %v414_v10 = vld [vmem:[%s5817_s29 + $0x8] sm:$0xff]  ;;  %v5088_v16 = vld [vmem:[#allocation7 + $0x34] ss:$12 sps:$4 sm:$0xff]   ;;  %v5849_v42 = vshrl.u32 %v854_v38, 7 }
  0x7e   : > { %v5085_v11 = vld [vmem:[#allocation7 + $0x4c] ss:$12 sps:$4 sm:$0xff]   ;;  %v421_v12 = vpack.c.bf16 %v414_v10, %v413_v8  ;;  %v5087_v13 = vld [vmem:[#allocation7 + $0x48] ss:$12 sps:$4 sm:$0xff]   ;;  %v5097_v14 = vld [vmem:[#allocation7 + $0xb0] ss:$12 sps:$4 sm:$0xff]  }
  0x7f   : > { %v5098_v15 = vld [vmem:[#allocation7 + $0x98] ss:$12 sps:$4 sm:$0xff]   ;;  %4725 = vmatprep.subr.bf16.mxu0 %v5097_v14  ;;  %v5099_v17 = vld [vmem:[#allocation7 + $0x80] ss:$12 sps:$4 sm:$0xff]   ;;  %v5090_v18 = vld [vmem:[#allocation7 + $0x30] ss:$12 sps:$4 sm:$0xff]  }
  0x80   : > { %588 = vmatpush1.bf16.msra.mxu1 %v5078_v4  ;;  %4741 = vmatprep.mubr.bf16.mxu0 %v421_v12  ;;  %v5091_v19 = vld [vmem:[#allocation7 + $0x1c] ss:$12 sps:$4 sm:$0xff]   ;;  %v5093_v20 = vld [vmem:[#allocation7 + $0x18] ss:$12 sps:$4 sm:$0xff]   ;;  %v5096_v24 = vld [vmem:[#allocation7] ss:$12 sps:$4 sm:$0xff]  }
  0x81   : > { %589 = vmatprep.subr.bf16.mxu1 %v5079_v5  ;;  %4726 = vmatpush3.bf16.msra.mxu0 %v5097_v14  ;;  %v5100_v21 = vld [vmem:[#allocation7 + $0x68] ss:$12 sps:$4 sm:$0xff]   ;;  %v5094_v22 = vld [vmem:[#allocation7 + $0x4] ss:$12 sps:$4 sm:$0xff]   ;;  %v5103_v26 = vld [vmem:[#allocation7 + $0x20] ss:$12 sps:$4 sm:$0xff]  }
  0x82   : > { %4727 = vmatprep.subr.bf16.mxu0 %v5098_v15  ;;  %v5101_v23 = vld [vmem:[#allocation7 + $0x50] ss:$12 sps:$4 sm:$0xff]   ;;  %v5102_v25 = vld [vmem:[#allocation7 + $0x38] ss:$12 sps:$4 sm:$0xff]   ;;  %v5104_v29 = vld [vmem:[#allocation7 + $0x8] ss:$12 sps:$4 sm:$0xff]  }
  0x83   : > { %v415_v27 = vld [vmem:[%s5817_s29 + $0x10] sm:$0xff]  ;;  %v416_v28 = vld [vmem:[%s5817_s29 + $0x18] sm:$0xff]  ;;  %v417_v31 = vld [vmem:[%s5817_s29 + $0x20] sm:$0xff]  ;;  %7462 = vst [vmem:[#allocation18_spill] sm:$0xff] %v5849_v42  ;;  %v856_v46 = vsub.s32 0, %v5849_v42  ;;  %vm923_vm0 = vcmask 261120  }
  0x84   : > { %590 = vmatpush1.bf16.msra.mxu1 %v5081_v6  ;;  %v422_v30 = vpack.c.bf16 %v416_v28, %v415_v27  ;;  %v418_v32 = vld [vmem:[%s5817_s29 + $0x28] sm:$0xff]  ;;  %v419_v34 = vld [vmem:[%s5817_s29 + $0x30] sm:$0xff]  ;;  %v420_v35 = vld [vmem:[%s5817_s29 + $0x38] sm:$0xff]  ;;  %vm5605_vm1 = vmmov 0   ;;  %s5606_s23 = smov 96   ;;  %s5607_s26 = smov 32  }
  0x85   : > { %591 = vmatprep.subr.bf16.mxu1 %v5082_v7  ;;  %4728 = vmatpush3.bf16.msra.mxu0 %v5098_v15  ;;  %v423_v33 = vpack.c.bf16 %v418_v32, %v417_v31  ;;  %v424_v36 = vpack.c.bf16 %v420_v35, %v419_v34  ;;  %v5846_v37 = vld [vmem:[%s7412_s4] sm:$0xf]  ;;  %vm1241_vm2 = vcmask 130048   ;;  %s5608_s14 = smov 64   ;;  %vm1542_vm3 = vcmask 257024   ;;  %s4613_s29 = sshll.u32 %s5682_s13, 9 }
  0x86   : > { %4729 = vmatprep.subr.bf16.mxu0 %v5099_v17  ;;  %4965 = vpush %v5846_v37  ;;  %v5855_v48 = vld [vmem:[%s7410_s2] sm:$0xf]  ;;  %vm2382_vm4 = vcmask 519424   ;;  %vm3222_vm5 = vcmask 781824   ;;  %vm4062_vm6 = vcmask 1044224   ;;  %s7363_s18 = scalar_lea.hbm %s7417_s9, %s4613_s29  ;;  %p7507_p3 = scmp.ne.s32.totalorder %s7452_s28, 0 }
  0x87   : > { %v5860_v51 = vrot.slane %v5855_v48, %v856_v46  ;;  %s5609_s13 = smov [#allocation13]  }
  0x88   : > { %592 = vmatpush1.bf16.msra.mxu1 %v5084_v9  ;;  %s5522_s20 = sshll.u32 %s5609_s13, 4  ;;  %s5523_s20 = int_to_ptr.vmem [resolvable:$false] %s5522_s20 }
  0x89   : > { %593 = vmatprep.subr.bf16.mxu1 %v5085_v11  ;;  %4730 = vmatpush3.bf16.msra.mxu0 %v5099_v17  ;;  %s5524_s27 = scalar_lea.vmem %s5523_s20, 1024 }
  0x8a   : > { %4731 = vmatprep.subr.bf16.mxu0 %v5100_v21 }
  0x8c   : > { %594 = vmatpush1.bf16.msra.mxu1 %v5087_v13 }
  0x8d   : > { %595 = vmatprep.subr.bf16.mxu1 %v5088_v16  ;;  %4732 = vmatpush3.bf16.msra.mxu0 %v5100_v21 }
  0x8e   : > { %4733 = vmatprep.subr.bf16.mxu0 %v5101_v23 }
  0x90   : > { %596 = vmatpush1.bf16.msra.mxu1 %v5090_v18 }
  0x91   : > { %597 = vmatprep.subr.bf16.mxu1 %v5091_v19  ;;  %4734 = vmatpush3.bf16.msra.mxu0 %v5101_v23 }
  0x92   : > { %4735 = vmatprep.subr.bf16.mxu0 %v5102_v25 }
  0x94   : > { %598 = vmatpush1.bf16.msra.mxu1 %v5093_v20 }
  0x95   : > { %599 = vmatprep.subr.bf16.mxu1 %v5094_v22  ;;  %4736 = vmatpush3.bf16.msra.mxu0 %v5102_v25 }
  0x96   : > { %4737 = vmatprep.subr.bf16.mxu0 %v5103_v26 }
  0x98   : > { %600 = vmatpush1.bf16.msra.mxu1 %v5096_v24 }
  0x99   : > { %4738 = vmatpush3.bf16.msra.mxu0 %v5103_v26 }
  0x9a   : > { %4739 = vmatprep.subr.bf16.mxu0 %v5104_v29 }
  0x9b   : > { %618 = vmatmul.mubr.bf16.vlgmr.msra.gmra.mxu1 %v421_v12 }
  0x9c   : > { %627 = vmatprep.mubr.bf16.mxu1 %v5603_v0 }
  0x9d   : > { %4740 = vmatpush3.bf16.msra.mxu0 %v5104_v29 }
  0xa0   : > { %4742 = vmatmul.mubr.bf16.vlgmr.msra.gmra.mxu0 %v422_v30 }
  0xa1   : > { %4745 = vmatprep.mubr.bf16.mxu0 %v423_v33 }
  0xa3   : > { %628 = vmatmul.mubr.bf16.gmra.mxu1 %v422_v30 }
  0xa4   : > { %637 = vmatprep.mubr.bf16.mxu1 %v5603_v0 }
  0xa8   : > { %4746 = vmatmul.mubr.bf16.gmra.mxu0 %v424_v36 }
  0xab   : > { %638 = vmatmul.mubr.bf16.gmra.mxu1 %v423_v33 }
  0xac   : > { %647 = vmatprep.mubr.bf16.mxu1 %v5603_v0 }
  0xb3   : > { %648 = vmatmul.mubr.bf16.gmra.mxu1 %v424_v36 }
  0xb7   : > { %s4966_s25 = spop %4965 }
 0x15b   : > { %v619_v39 = vpop.f32.mrf.mxu1 }
 0x15d   : > { %v621_v40 = vpop.f32.mrf.mxu1 }
 0x15e   : > { %v4556_v41 = vpack.c.bf16 %v621_v40, %v619_v39 }
 0x15f   : > { %v623_v43 = vpop.f32.mrf.mxu1 }
 0x160   : > { %803 = vst [vmem:[#allocation2] sm:$0xff] %v4556_v41  ;;  %v4743_v57 = vpop.f32.mrf.mxu0 }
 0x161   : > { %v625_v44 = vpop.f32.mrf.mxu1  ;;  %v4561_v61 = vpack.c.bf16 %v4743_v57, %v4743_v57 }
 0x162   : > { %v4558_v45 = vpack.c.bf16 %v625_v44, %v623_v43  ;;  %v692_v0 = vpop.f32.mrf.mxu0 }
 0x163   : > { %v629_v47 = vpop.f32.mrf.mxu1  ;;  %808 = vst [vmem:[#allocation2 + $0x20] sm:$0xf] %v4561_v61  ;;  %v4557_v13 = vpack.c.bf16 %v692_v0, %v692_v0 }
 0x164   : > { %805 = vst [vmem:[#allocation2 + $0xc] sm:$0xff] %v4558_v45  ;;  %v4744_v6 = vpop.f32.mrf.mxu0 }
 0x165   : > { %v631_v49 = vpop.f32.mrf.mxu1  ;;  %v4563_v14 = vpack.c.bf16 %v4744_v6, %v4744_v6  ;;  %804 = vst [vmem:[#allocation2 + $0x8] sm:$0xf] %v4557_v13 }
 0x166   : > { %v4560_v50 = vpack.c.bf16 %v631_v49, %v629_v47  ;;  %v695_v15 = vpop.f32.mrf.mxu0 }
 0x167   : > { %v633_v52 = vpop.f32.mrf.mxu1  ;;  %v866_v53 = vld [vmem:[#allocation2] sm:$0xff]   ;;  %810 = vst [vmem:[#allocation2 + $0x2c] sm:$0xf] %v4563_v14  ;;  %v4559_v21 = vpack.c.bf16 %v695_v15, %v695_v15 }
 0x168   : > { %807 = vst [vmem:[#allocation2 + $0x18] sm:$0xff] %v4560_v50  ;;  %v5862_v54 = vunpack.c.h.bf16 %v866_v53  ;;  %v846_v55 = vunpack.c.l.bf16 %v866_v53  ;;  %v4747_v22 = vpop.f32.mrf.mxu0 }
 0x169   : > { %v635_v56 = vpop.f32.mrf.mxu1  ;;  %806 = vst [vmem:[#allocation2 + $0x14] sm:$0xf] %v4559_v21  ;;  %v4569_v29 = vpack.c.bf16 %v4747_v22, %v4747_v22 }
 0x16a   : > { %v4562_v58 = vpack.c.bf16 %v635_v56, %v633_v52  ;;  %v973_v59 = vmul.f32 %v5862_v54, %v5862_v54  ;;  %v5867_v60 = vadd.f32 %v5860_v51, %v846_v55  ;;  %v708_v30 = vpop.f32.mrf.mxu0 }
 0x16b   : > { %v639_v62 = vpop.f32.mrf.mxu1  ;;  %v867_v63 = vld [vmem:[#allocation2 + $0xc] sm:$0xff]   ;;  %816 = vst [vmem:[#allocation2 + $0x50] sm:$0xf] %v4569_v29  ;;  %v4565_v44 = vpack.c.bf16 %v708_v30, %v708_v30  ;;  %v7425_v30 = vmov 0.0  }
 0x16c   : > { %809 = vst [vmem:[#allocation2 + $0x24] sm:$0xff] %v4562_v58  ;;  %v981_v1 = vsel %vm923_vm0, %v973_v59, 0.0  ;;  %v915_v2 = vmul.f32 %v5867_v60, %v5867_v60  ;;  %v5872_v3 = vunpack.c.h.bf16 %v867_v63  ;;  %v847_v4 = vunpack.c.l.bf16 %v867_v63  ;;  %v4748_v36 = vpop.f32.mrf.mxu0  ;;  %4749 = vmatprep.subr.bf16.mxu1 %v7425_v30  ;;  %4761 = vmatprep.subr.bf16.mxu0 %v7425_v30 }
 0x16d   : > { %982 = vadd.xlane.f32.xlu0 %v981_v1  ;;  %v641_v5 = vpop.f32.mrf.mxu1  ;;  %v4571_v45 = vpack.c.bf16 %v4748_v36, %v4748_v36  ;;  %812 = vst [vmem:[#allocation2 + $0x38] sm:$0xf] %v4565_v44  ;;  %4751 = vmatprep.mubr.msk.bf16.mxu1 %vm5605_vm1, %v7425_v30 }
 0x16e   : > { %v4564_v7 = vpack.c.bf16 %v641_v5, %v639_v62  ;;  %v924_v8 = vsel %vm923_vm0, %v915_v2, 0.0  ;;  %v974_v9 = vmul.f32 %v5872_v3, %v5872_v3  ;;  %v5878_v10 = vadd.f32 %v5860_v51, %v847_v4  ;;  %v711_v47 = vpop.f32.mrf.mxu0  ;;  %4763 = vmatprep.mubr.msk.bf16.mxu0 %vm5605_vm1, %v7425_v30 }
 0x16f   : > { %925 = vadd.xlane.f32.xlu1 %v924_v8  ;;  %v643_v11 = vpop.f32.mrf.mxu1  ;;  %v868_v12 = vld [vmem:[#allocation2 + $0x18] sm:$0xff]   ;;  %818 = vst [vmem:[#allocation2 + $0x5c] sm:$0xf] %v4571_v45  ;;  %v4567_v56 = vpack.c.bf16 %v711_v47, %v711_v47 }
 0x170   : > { %811 = vst [vmem:[#allocation2 + $0x30] sm:$0xff] %v4564_v7  ;;  %v984_v16 = vsel %vm923_vm0, %v974_v9, 0.0  ;;  %v916_v17 = vmul.f32 %v5878_v10, %v5878_v10  ;;  %v5883_v18 = vunpack.c.h.bf16 %v868_v12  ;;  %v848_v19 = vunpack.c.l.bf16 %v868_v12 }
 0x171   : > { %985 = vadd.xlane.f32.xlu0 %v984_v16  ;;  %v645_v20 = vpop.f32.mrf.mxu1  ;;  %814 = vst [vmem:[#allocation2 + $0x44] sm:$0xf] %v4567_v56 }
 0x172   : > { %v4566_v23 = vpack.c.bf16 %v645_v20, %v643_v11  ;;  %v927_v24 = vsel %vm923_vm0, %v916_v17, 0.0  ;;  %v975_v25 = vmul.f32 %v5883_v18, %v5883_v18  ;;  %v5889_v26 = vadd.f32 %v5860_v51, %v848_v19 }
 0x173   : > { %928 = vadd.xlane.f32.xlu1 %v927_v24  ;;  %v649_v27 = vpop.f32.mrf.mxu1  ;;  %v869_v28 = vld [vmem:[#allocation2 + $0x24] sm:$0xff]  }
 0x174   : > { %813 = vst [vmem:[#allocation2 + $0x3c] sm:$0xff] %v4566_v23  ;;  %v987_v31 = vsel %vm923_vm0, %v975_v25, 0.0  ;;  %v917_v32 = vmul.f32 %v5889_v26, %v5889_v26  ;;  %v5894_v33 = vunpack.c.h.bf16 %v869_v28  ;;  %v849_v34 = vunpack.c.l.bf16 %v869_v28 }
 0x175   : > { %988 = vadd.xlane.f32.xlu0 %v987_v31  ;;  %v651_v35 = vpop.f32.mrf.mxu1  ;;  %v1569_v31 = vsub.s32 1, %v5849_v42 }
 0x176   : > { %v4568_v38 = vpack.c.bf16 %v651_v35, %v649_v27  ;;  %v976_v39 = vmul.f32 %v5894_v33, %v5894_v33  ;;  %v5899_v40 = vadd.f32 %v5860_v51, %v849_v34  ;;  %v930_v49 = vsel %vm923_vm0, %v917_v32, 0.0  ;;  %v1586_v34 = vld [vmem:[#allocation2 + $0x1c] ss:$12 sps:$4 sm:$0xff]  }
 0x177   : > { %v653_v41 = vpop.f32.mrf.mxu1  ;;  %v870_v43 = vld [vmem:[#allocation2 + $0x30] sm:$0xff]   ;;  %v1570_v35 = vrot.slane %v5855_v48, %v1569_v31 }
 0x178   : > { %815 = vst [vmem:[#allocation2 + $0x48] sm:$0xff] %v4568_v38  ;;  %v990_v50 = vsel %vm923_vm0, %v976_v39, 0.0  ;;  %v918_v52 = vmul.f32 %v5899_v40, %v5899_v40  ;;  %v5905_v53 = vunpack.c.h.bf16 %v870_v43  ;;  %v850_v61 = vunpack.c.l.bf16 %v870_v43 }
 0x179   : > { %931 = vadd.xlane.f32.xlu0 %v930_v49  ;;  %991 = vadd.xlane.f32.xlu1 %v990_v50  ;;  %v655_v55 = vpop.f32.mrf.mxu1  ;;  %v5966_v39 = vunpack.c.h.bf16 %v1586_v34 }
 0x17a   : > { %v4570_v57 = vpack.c.bf16 %v655_v55, %v653_v41  ;;  %v977_v58 = vmul.f32 %v5905_v53, %v5905_v53  ;;  %v933_v62 = vsel %vm923_vm0, %v918_v52, 0.0  ;;  %v5916_v4 = vadd.f32 %v5860_v51, %v850_v61 }
 0x17b   : > { %v871_v59 = vld [vmem:[#allocation2 + $0x3c] sm:$0xff]   ;;  %v5972_v41 = vunpack.c.l.bf16 %v1586_v34  ;;  %v1729_v43 = vmul.f32 %v5966_v39, %v5966_v39 }
 0x17c   : > { %817 = vst [vmem:[#allocation2 + $0x54] sm:$0xff] %v4570_v57  ;;  %v993_v63 = vsel %vm923_vm0, %v977_v58, 0.0  ;;  %v5911_v0 = vunpack.c.h.bf16 %v871_v59  ;;  %v851_v5 = vunpack.c.l.bf16 %v871_v59  ;;  %v919_v11 = vmul.f32 %v5916_v4, %v5916_v4 }
 0x17d   : > { %934 = vadd.xlane.f32.xlu1 %v933_v62  ;;  %994 = vadd.xlane.f32.xlu0 %v993_v63  ;;  %v1728_v44 = vmul.f32 %v5972_v41, %v5972_v41 }
 0x17e   : > { %v978_v1 = vmul.f32 %v5911_v0, %v5911_v0  ;;  %v5926_v13 = vadd.f32 %v5860_v51, %v851_v5  ;;  %v936_v20 = vsel %vm923_vm0, %v919_v11, 0.0 }
 0x17f   : > { %v872_v2 = vld [vmem:[#allocation2 + $0x48] sm:$0xff]  }
 0x180   : > { %v996_v6 = vsel %vm923_vm0, %v978_v1, 0.0  ;;  %v5919_v7 = vunpack.c.h.bf16 %v872_v2  ;;  %v852_v8 = vunpack.c.l.bf16 %v872_v2  ;;  %v920_v23 = vmul.f32 %v5926_v13, %v5926_v13 }
 0x181   : > { %997 = vadd.xlane.f32.xlu1 %v996_v6 }
 0x182   : > { %v979_v9 = vmul.f32 %v5919_v7, %v5919_v7  ;;  %v5932_v16 = vadd.f32 %v5860_v51, %v852_v8  ;;  %v939_v27 = vsel %vm923_vm0, %v920_v23, 0.0 }
 0x183   : > { %v873_v12 = vld [vmem:[#allocation2 + $0x54] sm:$0xff]  }
 0x184   : > { %v999_v14 = vsel %vm923_vm0, %v979_v9, 0.0  ;;  %v5929_v15 = vunpack.c.h.bf16 %v873_v12  ;;  %v853_v17 = vunpack.c.l.bf16 %v873_v12  ;;  %v921_v22 = vmul.f32 %v5932_v16, %v5932_v16 }
 0x185   : > { %1000 = vadd.xlane.f32.xlu0 %v999_v14 }
 0x186   : > { %v980_v19 = vmul.f32 %v5929_v15, %v5929_v15  ;;  %v5943_v24 = vadd.f32 %v5860_v51, %v853_v17  ;;  %v942_v25 = vsel %vm923_vm0, %v921_v22, 0.0  ;;  %v1583_v51 = vld [vmem:[#allocation2 + $0x4] ss:$12 sps:$4 sm:$0xff]   ;;  %v5983_v22 = vstv %s4966_s25 }
 0x187   : > { %v5953_v32 = vunpack.c.l.bf16 %v1583_v51  ;;  %v5960_v38 = vunpack.c.h.bf16 %v1583_v51 }
 0x188   : > { %v1002_v21 = vsel %vm923_vm0, %v980_v19, 0.0  ;;  %v922_v28 = vmul.f32 %v5943_v24, %v5943_v24 }
 0x189   : > { %937 = vadd.xlane.f32.xlu0 %v936_v20  ;;  %1003 = vadd.xlane.f32.xlu1 %v1002_v21  ;;  %v1726_v36 = vmul.f32 %v5953_v32, %v5953_v32  ;;  %v1727_v48 = vmul.f32 %v5960_v38, %v5960_v38 }
 0x18a   : > { %v945_v29 = vsel %vm923_vm0, %v922_v28, 0.0 }
 0x18d   : > { %943 = vadd.xlane.f32.xlu0 %v942_v25  ;;  %940 = vadd.xlane.f32.xlu1 %v939_v27 }
 0x191   : > { %946 = vadd.xlane.f32.xlu1 %v945_v29 }
 0x1a2   : > { %1742 = vrot.lane.b32.xlu1 %v1726_v36, %s5606_s23 }
 0x1a3   : > { %1572 = vrot.lane.b32.xlu0 %v1570_v35, %s5607_s26 }
 0x1a6   : > { %1744 = vrot.lane.b32.xlu1 %v1727_v48, %s5606_s23 }
 0x1a7   : > { %1748 = vrot.lane.b32.xlu0 %v1729_v43, %s5606_s23 }
 0x1aa   : > { %1746 = vrot.lane.b32.xlu1 %v1728_v44, %s5606_s23 }
 0x1f6   : > { %v983_v45 = vpop.xlane.xlu0 %982 }
 0x1f7   : > { %v1005_v47 = vmax.f32 %v983_v45, 1e-24 }
 0x1f8   : > { %v926_v49 = vpop.xlane.xlu1 %925 }
 0x1f9   : > { %v948_v50 = vmax.f32 %v926_v49, 1e-24  ;;  %5117 = vrsqrt.f32 %v1005_v47 }
 0x1fa   : > { %v986_v52 = vpop.xlane.xlu0 %985 }
 0x1fb   : > { %v1006_v55 = vmax.f32 %v986_v52, 1e-24 }
 0x1fc   : > { %v929_v56 = vpop.xlane.xlu1 %928 }
 0x1fd   : > { %5119 = vrsqrt.f32 %v1006_v55  ;;  %v949_v57 = vmax.f32 %v929_v56, 1e-24 }
 0x1fe   : > { %5121 = vrsqrt.f32 %v948_v50  ;;  %v989_v58 = vpop.xlane.xlu0 %988 }
 0x1ff   : > { %5123 = vrsqrt.f32 %v949_v57  ;;  %v1007_v59 = vmax.f32 %v989_v58, 1e-24  ;;  %v1552_v57 = vld [vmem:[#allocation2] ss:$12 sps:$4 sm:$0xff]  }
 0x201   : > { %5125 = vrsqrt.f32 %v1007_v59 }
 0x202   : > { %v932_v61 = vpop.xlane.xlu0 %931  ;;  %v992_v62 = vpop.xlane.xlu1 %991 }
 0x203   : > { %v1008_v63 = vmax.f32 %v992_v62, 1e-24  ;;  %v950_v1 = vmax.f32 %v932_v61, 1e-24  ;;  %v1554_v61 = vld [vmem:[#allocation2 + $0x18] ss:$12 sps:$4 sm:$0xff]  }
 0x205   : > { %5127 = vrsqrt.f32 %v1008_v63  ;;  %v1560_v63 = vunpack.c.h.bf16 %v1552_v57 }
 0x206   : > { %v935_v2 = vpop.xlane.xlu1 %934  ;;  %v995_v5 = vpop.xlane.xlu0 %994  ;;  %5129 = vrsqrt.f32 %v950_v1  ;;  %v1559_v1 = vunpack.c.l.bf16 %v1552_v57 }
 0x207   : > { %v951_v6 = vmax.f32 %v935_v2, 1e-24  ;;  %v5118_v8 = vpop.eup %5117  ;;  %v1009_v9 = vmax.f32 %v995_v5, 1e-24 }
 0x208   : > { %v1033_v19 = vmul.f32 %v5118_v8, %v5862_v54 }
 0x209   : > { %5131 = vrsqrt.f32 %v951_v6 }
 0x20a   : > { %v5120_v11 = vpop.eup %5119  ;;  %v998_v12 = vpop.xlane.xlu1 %997  ;;  %5133 = vrsqrt.f32 %v1009_v9  ;;  %v1562_v9 = vunpack.c.h.bf16 %v1554_v61 }
 0x20b   : > { %v5122_v14 = vpop.eup %5121  ;;  %v1010_v17 = vmax.f32 %v998_v12, 1e-24  ;;  %v1034_v20 = vmul.f32 %v5120_v11, %v5872_v3 }
 0x20c   : > { %v5124_v21 = vpop.eup %5123  ;;  %v965_v28 = vmul.f32 %v5122_v14, %v5983_v22 }
 0x20d   : > { %v966_v23 = vmul.f32 %v5124_v21, %v5983_v22  ;;  %5135 = vrsqrt.f32 %v1010_v17  ;;  %v1041_v25 = vpack.c.bf16 %v1034_v20, %v1033_v19  ;;  %v1561_v17 = vunpack.c.l.bf16 %v1554_v61 }
 0x20e   : > { %v1001_v27 = vpop.xlane.xlu0 %1000  ;;  %v5126_v34 = vpop.eup %5125  ;;  %v1021_v48 = vmul.f32 %v965_v28, %v5867_v60 }
 0x20f   : > { %v1049_v29 = vsel %vm923_vm0, %v1041_v25, 0  ;;  %v1011_v51 = vmax.f32 %v1001_v27, 1e-24  ;;  %v1022_v54 = vmul.f32 %v966_v23, %v5878_v10  ;;  %v1035_v45 = vmul.f32 %v5126_v34, %v5883_v18 }
 0x210   : > { %4750 = vmatpush3.bf16.xpose.msra.mxu1 %v1049_v29 }
 0x211   : > { %4755 = vmatprep.subr.bf16.mxu1 %v7425_v30  ;;  %5137 = vrsqrt.f32 %v1011_v51  ;;  %v1029_v50 = vpack.c.bf16 %v1022_v54, %v1021_v48  ;;  %v1587_v51 = vld [vmem:[#allocation2 + $0x30] sm:$0xff]  }
 0x212   : > { %v938_v3 = vpop.xlane.xlu0 %937  ;;  %v1004_v35 = vpop.xlane.xlu1 %1003  ;;  %v1590_v48 = vld [vmem:[#allocation2 + $0x54] sm:$0xff]  }
 0x213   : > { %v5128_v36 = vpop.eup %5127  ;;  %v952_v43 = vmax.f32 %v938_v3, 1e-24  ;;  %v1012_v44 = vmax.f32 %v1004_v35, 1e-24  ;;  %v6032_v35 = vunpack.c.h.bf16 %v1587_v51 }
 0x214   : > { %v1036_v47 = vmul.f32 %v5128_v36, %v5894_v33  ;;  %v5130_v49 = vpop.eup %5129 }
 0x215   : > { %5139 = vrsqrt.f32 %v952_v43  ;;  %v967_v33 = vmul.f32 %v5130_v49, %v5983_v22  ;;  %v1589_v43 = vld [vmem:[#allocation2 + $0x48] sm:$0xff]  }
 0x216   : > { %v5132_v52 = vpop.eup %5131  ;;  %5141 = vrsqrt.f32 %v1012_v44  ;;  %v944_v10 = vpop.xlane.xlu0 %943  ;;  %v1042_v56 = vpack.c.bf16 %v1036_v47, %v1035_v45 }
 0x217   : > { %v941_v55 = vpop.xlane.xlu1 %940  ;;  %v954_v58 = vmax.f32 %v944_v10, 1e-24  ;;  %4752 = vmatmul.mubr.msk.bf16.vlgmr.msra.gmra.mxu1 %vm923_vm0, %v1029_v50  ;;  %v968_v60 = vmul.f32 %v5132_v52, %v5983_v22  ;;  %v5134_v62 = vpop.eup %5133  ;;  %v1023_v19 = vmul.f32 %v967_v33, %v5889_v26  ;;  %v1588_v26 = vld [vmem:[#allocation2 + $0x3c] sm:$0xff]   ;;  %v1730_v50 = vmul.f32 %v6032_v35, %v6032_v35 }
 0x218   : > { %v953_v59 = vmax.f32 %v941_v55, 1e-24  ;;  %v1096_v18 = vsel %vm923_vm0, %v1042_v56, 0  ;;  %4757 = vmatprep.mubr.msk.bf16.mxu1 %vm5605_vm1, %v7425_v30  ;;  %v1037_v20 = vmul.f32 %v5134_v62, %v5905_v53  ;;  %v6030_v3 = vunpack.c.h.bf16 %v1588_v26 }
 0x219   : > { %5143 = vrsqrt.f32 %v954_v58  ;;  %4756 = vmatpush3.bf16.xpose.msra.mxu1 %v1096_v18  ;;  %v1024_v8 = vmul.f32 %v968_v60, %v5899_v40  ;;  %v6045_v52 = vunpack.c.h.bf16 %v1590_v48  ;;  %v6047_v10 = vunpack.c.h.bf16 %v1589_v43 }
 0x21a   : > { %v5136_v2 = vpop.eup %5135  ;;  %5145 = vrsqrt.f32 %v953_v59  ;;  %v5999_v5 = vpop.permute.xlu0 %1572  ;;  %4767 = vmatprep.subr.bf16.mxu1 %v7425_v30  ;;  %v1731_v49 = vmul.f32 %v6030_v3, %v6030_v3  ;;  %v1564_v58 = vunpack.c.l.bf16 %v1588_v26  ;;  %v1563_v59 = vunpack.c.l.bf16 %v1587_v51 }
 0x21b   : > { %v947_v6 = vpop.xlane.xlu1 %946  ;;  %v6004_v12 = vadd.f32 %v5999_v5, %v1560_v63  ;;  %v6007_v14 = vadd.f32 %v5999_v5, %v1559_v1  ;;  %v1038_v21 = vmul.f32 %v5136_v2, %v5911_v0  ;;  %v6013_v23 = vadd.f32 %v5999_v5, %v1562_v9 }
 0x21c   : > { %v955_v11 = vmax.f32 %v947_v6, 1e-24  ;;  %v6020_v27 = vadd.f32 %v5999_v5, %v1561_v17  ;;  %v1030_v28 = vpack.c.bf16 %v1024_v8, %v1023_v19  ;;  %v6055_v61 = vadd.f32 %v5999_v5, %v1564_v58  ;;  %v6115_v58 = vld [vmem:[#allocation10 + $0x8] sm:$0xff] }
 0x21d   : > { %v1638_v40 = vmul.f32 %v6004_v12, %v6004_v12  ;;  %v1637_v25 = vmul.f32 %v6007_v14, %v6007_v14  ;;  %v1043_v29 = vpack.c.bf16 %v1038_v21, %v1037_v20  ;;  %v1640_v34 = vmul.f32 %v6013_v23, %v6013_v23 }
 0x21e   : > { %5147 = vrsqrt.f32 %v955_v11  ;;  %v5138_v0 = vpop.eup %5137  ;;  %v1639_v54 = vmul.f32 %v6020_v27, %v6020_v27  ;;  %v6058_v18 = vadd.f32 %v5999_v5, %v1563_v59  ;;  %v1733_v33 = vmul.f32 %v6045_v52, %v6045_v52 }
 0x21f   : > { %1655 = vrot.lane.b32.xlu0 %v1638_v40, %s5606_s23  ;;  %1653 = vrot.lane.b32.xlu1 %v1637_v25, %s5606_s23  ;;  %v1143_v53 = vsel %vm923_vm0, %v1043_v29, 0  ;;  %v1039_v45 = vmul.f32 %v5138_v0, %v5919_v7  ;;  %v1732_v62 = vmul.f32 %v6047_v10, %v6047_v10  ;;  %v1566_v9 = vunpack.c.l.bf16 %v1590_v48  ;;  %v884_v29 = vld [vmem:[#allocation2 + $0x20] ss:$12 sps:$4 sm:$0xff]  }
 0x220   : > { %4758 = vmatmul.mubr.msk.bf16.vlgmr.msra.gmra.mxu1 %vm923_vm0, %v1030_v28  ;;  %4762 = vmatpush3.bf16.xpose.msra.mxu0 %v1143_v53  ;;  %v1565_v11 = vunpack.c.l.bf16 %v1589_v43  ;;  %v1642_v19 = vmul.f32 %v6055_v61, %v6055_v61  ;;  %v1641_v20 = vmul.f32 %v6058_v18, %v6058_v18  ;;  %v882_v28 = vld [vmem:[#allocation2 + $0x8] ss:$12 sps:$4 sm:$0xff]   ;;  %v892_v53 = vunpack.c.l.bf16 %v884_v29 }
 0x221   : > { %4769 = vmatprep.mubr.msk.bf16.mxu1 %vm5605_vm1, %v7425_v30  ;;  %4773 = vmatprep.subr.bf16.mxu0 %v7425_v30  ;;  %v6078_v21 = vadd.f32 %v5999_v5, %v1566_v9  ;;  %v890_v26 = vunpack.c.l.bf16 %v882_v28  ;;  %v891_v51 = vunpack.c.h.bf16 %v882_v28  ;;  %v893_v0 = vunpack.c.h.bf16 %v884_v29  ;;  %v6129_v9 = vld [vmem:[#allocation10 + $0x18] sm:$0xff] }
 0x222   : > { %v5140_v36 = vpop.eup %5139  ;;  %v6081_v40 = vadd.f32 %v5999_v5, %v1565_v11  ;;  %v820_v5 = vld [vmem:[%s7411_s3] sm:$0xf] }
 0x223   : > { %v5142_v44 = vpop.eup %5141  ;;  %1659 = vrot.lane.b32.xlu0 %v1640_v34, %s5606_s23  ;;  %1657 = vrot.lane.b32.xlu1 %v1639_v54, %s5606_s23  ;;  %v969_v56 = vmul.f32 %v5140_v36, %v5983_v22  ;;  %v6102_v25 = vrot.slane %v820_v5, %v856_v46  ;;  %v822_v46 = vld [vmem:[#allocation9] sm:$0xff] }
 0x224   : > { %v1040_v47 = vmul.f32 %v5142_v44, %v5929_v15  ;;  %v6139_v5 = vld [vmem:[#allocation10 + $0x20] sm:$0xff] }
 0x225   : > { %v1025_v2 = vmul.f32 %v969_v56, %v5916_v4  ;;  %v902_v34 = vadd.f32 %v6102_v25, %v890_v26  ;;  %v903_v54 = vadd.f32 %v6102_v25, %v891_v51  ;;  %v904_v36 = vadd.f32 %v6102_v25, %v892_v53  ;;  %v6144_v53 = vld [vmem:[#allocation10 + $0x30] sm:$0xff] }
 0x226   : > { %v5144_v55 = vpop.eup %5143  ;;  %v1044_v57 = vpack.c.bf16 %v1040_v47, %v1039_v45  ;;  %v905_v48 = vadd.f32 %v6102_v25, %v893_v0  ;;  %v6110_v47 = vld [vmem:[#allocation10] sm:$0xff] }
 0x227   : > { %v5146_v60 = vpop.eup %5145  ;;  %1752 = vrot.lane.b32.xlu0 %v1731_v49, %s5606_s23  ;;  %1750 = vrot.lane.b32.xlu1 %v1730_v50, %s5606_s23  ;;  %v971_v63 = vmul.f32 %v5144_v55, %v5983_v22  ;;  %v910_v43 = vpack.c.bf16 %v903_v54, %v902_v34  ;;  %v823_v55 = vld [vmem:[#allocation9 + $0x8] sm:$0xff] }
 0x228   : > { %v970_v7 = vmul.f32 %v5146_v60, %v5983_v22  ;;  %v1190_v15 = vsel %vm923_vm0, %v1044_v57, 0  ;;  %v911_v44 = vpack.c.bf16 %v905_v48, %v904_v36  ;;  %v6146_v36 = vld [vmem:[#allocation10 + $0x28] sm:$0xff] }
 0x229   : > { %4768 = vmatpush3.bf16.xpose.msra.mxu1 %v1190_v15  ;;  %v1027_v4 = vmul.f32 %v971_v63, %v5932_v16  ;;  %v1644_v16 = vmul.f32 %v6078_v21, %v6078_v21  ;;  %v6124_v63 = vld [vmem:[#allocation10 + $0x10] sm:$0xff] }
 0x22a   : > { %v1026_v6 = vmul.f32 %v970_v7, %v5926_v13  ;;  %4779 = vmatprep.subr.bf16.mxu1 %v7425_v30 }
 0x22b   : > { %v5148_v1 = vpop.eup %5147  ;;  %1756 = vrot.lane.b32.xlu0 %v1733_v33, %s5606_s23  ;;  %1754 = vrot.lane.b32.xlu1 %v1732_v62, %s5606_s23 }
 0x22c   : > { %v972_v8 = vmul.f32 %v5148_v1, %v5983_v22  ;;  %v1031_v17 = vpack.c.bf16 %v1026_v6, %v1025_v2 }
 0x22e   : > { %v1028_v13 = vmul.f32 %v972_v8, %v5943_v24  ;;  %4764 = vmatmul.mubr.msk.bf16.vlgmr.msra.gmra.mxu0 %vm923_vm0, %v1031_v17  ;;  %v1643_v24 = vmul.f32 %v6081_v40, %v6081_v40 }
 0x22f   : > { %1663 = vrot.lane.b32.xlu0 %v1642_v19, %s5606_s23  ;;  %1661 = vrot.lane.b32.xlu1 %v1641_v20, %s5606_s23  ;;  %v1743_v19 = vpop.permute.xlu1 %1742 }
 0x230   : > { %v1032_v22 = vpack.c.bf16 %v1028_v13, %v1027_v4  ;;  %4775 = vmatprep.mubr.msk.bf16.mxu0 %vm5605_vm1, %v7425_v30  ;;  %4774 = vmatpush3.bf16.msra.mxu0 %v910_v43 }
 0x231   : > { %4785 = vmatprep.subr.bf16.mxu0 %v7425_v30 }
 0x232   : > { %4770 = vmatmul.mubr.msk.bf16.vlgmr.msra.gmra.mxu1 %vm923_vm0, %v1032_v22  ;;  %v1635_v22 = vrot.slane %v5846_v37, 1 }
 0x233   : > { %4781 = vmatprep.mubr.msk.bf16.mxu1 %vm5605_vm1, %v7425_v30  ;;  %1667 = vrot.lane.b32.xlu0 %v1644_v16, %s5606_s23  ;;  %v1745_v16 = vpop.permute.xlu1 %1744 }
 0x234   : > { %1665 = vrot.lane.b32.xlu1 %v1643_v24, %s5606_s23  ;;  %4780 = vmatpush3.bf16.msra.mxu1 %v911_v44  ;;  %4967 = vpush %v1635_v22 }
 0x235   : > { %4791 = vmatprep.subr.bf16.mxu1 %v7425_v30 }
 0x237   : > { %v1747_v0 = vpop.permute.xlu1 %1746 }
 0x265   : > { %s4968_s1 = spop %4967 }
 0x2d7   : > { %v1085_v45 = vpop.f32.mrf.mxu1 }
 0x2d8   : > { %v1086_v49 = vadd.f32 %v1085_v45, %v822_v46 }
 0x2d9   : > { %v4753_v50 = vpop.f32.mrf.mxu1 }
 0x2da   : > { %v6113_v56 = vadd.f32 %v1086_v49, %v6110_v47 }
 0x2db   : > { %v1088_v57 = vpop.f32.mrf.mxu1 }
 0x2dc   : > { %v1089_v59 = vadd.f32 %v1088_v57, %v823_v55  ;;  %v1242_v60 = vsel %vm1241_vm2, %v6113_v56, -inf  ;;  %v837_v57 = vld [vmem:[#allocation10 + $0x38] sm:$0xff] }
 0x2dd   : > { %v4754_v7 = vpop.f32.mrf.mxu1  ;;  %1243 = vmax.xlane.f32.xlu1 %v1242_v60  ;;  %v1654_v60 = vpop.permute.xlu1 %1653 }
 0x2de   : > { %v6120_v15 = vadd.f32 %v1089_v59, %v6115_v58  ;;  %v1749_v59 = vpop.permute.xlu0 %1748 }
 0x2e0   : > { %v1132_v33 = vpop.f32.mrf.mxu1  ;;  %v1245_v62 = vsel %vm1241_vm2, %v6120_v15, -inf }
 0x2e1   : > { %v1133_v1 = vadd.f32 %v1132_v33, %v822_v46  ;;  %1246 = vmax.xlane.f32.xlu0 %v1245_v62 }
 0x2e2   : > { %v4759_v2 = vpop.f32.mrf.mxu1 }
 0x2e3   : > { %v6127_v6 = vadd.f32 %v1133_v1, %v6124_v63  ;;  %v1656_v2 = vpop.permute.xlu0 %1655 }
 0x2e4   : > { %v1135_v8 = vpop.f32.mrf.mxu1 }
 0x2e5   : > { %v1136_v11 = vadd.f32 %v1135_v8, %v823_v55  ;;  %v1248_v17 = vsel %vm1241_vm2, %v6127_v6, -inf }
 0x2e6   : > { %v4760_v20 = vpop.f32.mrf.mxu1  ;;  %1249 = vmax.xlane.f32.xlu0 %v1248_v17  ;;  %v1658_v17 = vpop.permute.xlu1 %1657 }
 0x2e7   : > { %v6134_v4 = vadd.f32 %v1136_v11, %v6129_v9  ;;  %v1766_v11 = vsel %vm923_vm0, %v1743_v19, 0.0  ;;  %v1772_v20 = vsel %vm923_vm0, %v1747_v0, 0.0  ;;  %v1680_v19 = vsel %vm923_vm0, %v1656_v2, 0.0 }
 0x2e9   : > { %v1251_v13 = vsel %vm1241_vm2, %v6134_v4, -inf }
 0x2ea   : > { %1252 = vmax.xlane.f32.xlu0 %v1251_v13  ;;  %v1660_v13 = vpop.permute.xlu0 %1659  ;;  %v1751_v22 = vpop.permute.xlu1 %1750 }
 0x2eb   : > { %v1778_v0 = vsel %vm923_vm0, %v1751_v22, 0.0 }
 0x2ee   : > { %v1179_v24 = vpop.f32.mrf.mxu0 }
 0x2ef   : > { %v1180_v28 = vadd.f32 %v1179_v24, %v822_v46  ;;  %v1775_v24 = vsel %vm923_vm0, %v1749_v59, 0.0 }
 0x2f0   : > { %v4765_v29 = vpop.f32.mrf.mxu0 }
 0x2f1   : > { %v6142_v51 = vadd.f32 %v1180_v28, %v6139_v5  ;;  %v1677_v28 = vsel %vm923_vm0, %v1654_v60, 0.0  ;;  %v1753_v29 = vpop.permute.xlu0 %1752 }
 0x2f2   : > { %v1226_v26 = vpop.f32.mrf.mxu1  ;;  %v1182_v34 = vpop.f32.mrf.mxu0 }
 0x2f3   : > { %v1227_v54 = vadd.f32 %v1226_v26, %v822_v46  ;;  %v1183_v48 = vadd.f32 %v1182_v34, %v823_v55  ;;  %v1254_v37 = vsel %vm1241_vm2, %v6142_v51, -inf  ;;  %v1683_v26 = vsel %vm923_vm0, %v1658_v17, 0.0  ;;  %v1755_v34 = vpop.permute.xlu1 %1754 }
 0x2f4   : > { %v4771_v43 = vpop.f32.mrf.mxu1  ;;  %v4766_v44 = vpop.f32.mrf.mxu0  ;;  %1255 = vmax.xlane.f32.xlu1 %v1254_v37  ;;  %v1781_v37 = vsel %vm923_vm0, %v1753_v29, 0.0 }
 0x2f5   : > { %v6151_v45 = vadd.f32 %v1227_v54, %v6144_v53  ;;  %v6154_v50 = vadd.f32 %v1183_v48, %v6146_v36  ;;  %v1757_v54 = vpop.permute.xlu0 %1756  ;;  %v1784_v43 = vsel %vm923_vm0, %v1755_v34, 0.0 }
 0x2f6   : > { %v1229_v49 = vpop.f32.mrf.mxu1 }
 0x2f7   : > { %v1230_v46 = vadd.f32 %v1229_v49, %v823_v55  ;;  %v1260_v7 = vsel %vm1241_vm2, %v6151_v45, -inf  ;;  %v1257_v33 = vsel %vm1241_vm2, %v6154_v50, -inf  ;;  %v1769_v55 = vsel %vm923_vm0, %v1745_v16, 0.0  ;;  %v1662_v48 = vpop.permute.xlu1 %1661 }
 0x2f8   : > { %v4772_v62 = vpop.f32.mrf.mxu1  ;;  %1258 = vmax.xlane.f32.xlu0 %v1257_v33  ;;  %1261 = vmax.xlane.f32.xlu1 %v1260_v7  ;;  %v1686_v16 = vsel %vm923_vm0, %v1660_v13, 0.0  ;;  %v1787_v49 = vsel %vm923_vm0, %v1757_v54, 0.0 }
 0x2f9   : > { %v6160_v1 = vadd.f32 %v1230_v46, %v837_v57  ;;  %v1664_v44 = vpop.permute.xlu0 %1663  ;;  %v1689_v57 = vsel %vm923_vm0, %v1662_v48, 0.0 }
 0x2fa   : > { %v1692_v60 = vsel %vm923_vm0, %v1664_v44, 0.0 }
 0x2fb   : > { %v1263_v8 = vsel %vm1241_vm2, %v6160_v1, -inf  ;;  %v1666_v59 = vpop.permute.xlu1 %1665 }
 0x2fc   : > { %1264 = vmax.xlane.f32.xlu0 %v1263_v8  ;;  %1767 = vadd.xlane.f32.xlu1 %v1766_v11  ;;  %v1695_v46 = vsel %vm923_vm0, %v1666_v59, 0.0 }
 0x2fd   : > { %v1668_v7 = vpop.permute.xlu0 %1667 }
 0x2fe   : > { %v1698_v33 = vsel %vm923_vm0, %v1668_v7, 0.0 }
 0x300   : > { %1770 = vadd.xlane.f32.xlu0 %v1769_v55  ;;  %1773 = vadd.xlane.f32.xlu1 %v1772_v20 }
 0x304   : > { %1776 = vadd.xlane.f32.xlu0 %v1775_v24  ;;  %1678 = vadd.xlane.f32.xlu1 %v1677_v28 }
 0x308   : > { %1681 = vadd.xlane.f32.xlu0 %v1680_v19  ;;  %1684 = vadd.xlane.f32.xlu1 %v1683_v26 }
 0x30c   : > { %1687 = vadd.xlane.f32.xlu0 %v1686_v16  ;;  %1779 = vadd.xlane.f32.xlu1 %v1778_v0 }
 0x310   : > { %1782 = vadd.xlane.f32.xlu0 %v1781_v37  ;;  %1785 = vadd.xlane.f32.xlu1 %v1784_v43 }
 0x314   : > { %1788 = vadd.xlane.f32.xlu0 %v1787_v49  ;;  %1690 = vadd.xlane.f32.xlu1 %v1689_v57 }
 0x318   : > { %1693 = vadd.xlane.f32.xlu0 %v1692_v60  ;;  %1696 = vadd.xlane.f32.xlu1 %v1695_v46 }
 0x31c   : > { %1699 = vadd.xlane.f32.xlu0 %v1698_v33 }
 0x366   : > { %v6184_v13 = vpop.xlane.xlu1 %1243 }
 0x36a   : > { %v1247_v62 = vpop.xlane.xlu0 %1246 }
 0x36b   : > { %v1267_v2 = vsub.f32 %v6120_v15, %v1247_v62 }
 0x36d   : > { %v1276_v8 = vmul.f32 1.442695, %v1267_v2 }
 0x36f   : > { %5149 = vpow2.f32 %v1276_v8  ;;  %v6181_v11 = vpop.xlane.xlu0 %1249 }
 0x373   : > { %v1253_v17 = vpop.xlane.xlu0 %1252 }
 0x374   : > { %v1269_v55 = vsub.f32 %v6134_v4, %v1253_v17 }
 0x376   : > { %v1280_v20 = vmul.f32 1.442695, %v1269_v55 }
 0x378   : > { %5151 = vpow2.f32 %v1280_v20 }
 0x37c   : > { %v6186_v22 = vpop.eup %5149 }
 0x37d   : > { %v6188_v24 = vpop.xlane.xlu1 %1255  ;;  %v1293_v28 = vsel %vm1241_vm2, %v6186_v22, 0.0 }
 0x37e   : > { %1294 = vadd.xlane.f32.xlu0 %v1293_v28 }
 0x381   : > { %v1259_v15 = vpop.xlane.xlu0 %1258  ;;  %v6192_v29 = vpop.xlane.xlu1 %1261 }
 0x382   : > { %v1271_v19 = vsub.f32 %v6154_v50, %v1259_v15 }
 0x384   : > { %v1284_v26 = vmul.f32 1.442695, %v1271_v19 }
 0x385   : > { %v6195_v34 = vpop.eup %5151  ;;  %v1265_v4 = vpop.xlane.xlu0 %1264 }
 0x386   : > { %v1768_v16 = vpop.xlane.xlu1 %1767  ;;  %5153 = vpow2.f32 %v1284_v26  ;;  %v1273_v0 = vsub.f32 %v6160_v1, %v1265_v4  ;;  %v1299_v48 = vsel %vm1241_vm2, %v6195_v34, 0.0 }
 0x387   : > { %v1790_v54 = vmax.f32 %v1768_v16, 1e-24  ;;  %1300 = vadd.xlane.f32.xlu0 %v1299_v48 }
 0x388   : > { %v1288_v37 = vmul.f32 1.442695, %v1273_v0 }
 0x389   : > { %5155 = vrsqrt.f32 %v1790_v54  ;;  %v1771_v43 = vpop.xlane.xlu0 %1770 }
 0x38a   : > { %v1774_v44 = vpop.xlane.xlu1 %1773  ;;  %5157 = vpow2.f32 %v1288_v37  ;;  %v1791_v49 = vmax.f32 %v1771_v43, 1e-24 }
 0x38b   : > { %v1792_v17 = vmax.f32 %v1774_v44, 1e-24 }
 0x38c   : > { %5159 = vrsqrt.f32 %v1791_v49 }
 0x38d   : > { %v1777_v50 = vpop.xlane.xlu0 %1776 }
 0x38e   : > { %v6200_v57 = vpop.xlane.xlu1 %1678  ;;  %v1793_v7 = vmax.f32 %v1777_v50, 1e-24 }
 0x390   : > { %5161 = vrsqrt.f32 %v1793_v7 }
 0x391   : > { %v6202_v59 = vpop.xlane.xlu0 %1681  ;;  %5163 = vrsqrt.f32 %v1792_v17 }
 0x392   : > { %v6204_v60 = vpop.xlane.xlu1 %1684 }
 0x393   : > { %v6206_v1 = vpop.eup %5153 }
 0x394   : > { %v1305_v46 = vsel %vm1241_vm2, %v6206_v1, 0.0 }
 0x395   : > { %1306 = vadd.xlane.f32.xlu0 %v1305_v46  ;;  %v6210_v33 = vpop.xlane.xlu0 %1687 }
 0x396   : > { %v6212_v62 = vpop.xlane.xlu1 %1779  ;;  %v5156_v2 = vpop.eup %5155 }
 0x397   : > { %v6214_v8 = vpop.eup %5157  ;;  %v1818_v26 = vmul.f32 %v5156_v2, %v5953_v32 }
 0x398   : > { %v1311_v55 = vsel %vm1241_vm2, %v6214_v8, 0.0 }
 0x399   : > { %v5160_v20 = vpop.eup %5159  ;;  %1312 = vadd.xlane.f32.xlu0 %v1311_v55  ;;  %v6218_v28 = vpop.xlane.xlu0 %1782 }
 0x39a   : > { %v1786_v15 = vpop.xlane.xlu1 %1785  ;;  %v1819_v4 = vmul.f32 %v5160_v20, %v5960_v38  ;;  %v1266_v38 = vsub.f32 %v6113_v56, %v6184_v13  ;;  %v6238_v13 = vstv %s4968_s1  ;;  %s4422_s1 = sshll.u32 %s5813_s5, 5 }
 0x39b   : > { %v1796_v19 = vmax.f32 %v1786_v15, 1e-24  ;;  %v1268_v15 = vsub.f32 %v6127_v6, %v6181_v11  ;;  %s409_s6 = scalar_lea.vmem [#allocation13], %s4422_s1 }
 0x39c   : > { %v1826_v16 = vpack.c.bf16 %v1819_v4, %v1818_v26  ;;  %v1274_v20 = vmul.f32 1.442695, %v1266_v38  ;;  %s4294_s19 = sshll.u32 %s409_s6, 4  ;;  %s7358_s19 = int_to_ptr.vmem [resolvable:$true] %s4294_s19 }
 0x39d   : > { %v1789_v0 = vpop.xlane.xlu0 %1788  ;;  %5165 = vrsqrt.f32 %v1796_v19  ;;  %v5162_v50 = vpop.eup %5161  ;;  %v1278_v56 = vmul.f32 1.442695, %v1268_v15  ;;  %p5525_p9 = scmp.lt.s32.totalorder %s7358_s19, %s5523_s20 }
 0x39e   : > { %v6222_v54 = vpop.xlane.xlu1 %1690  ;;  %v1797_v48 = vmax.f32 %v1789_v0, 1e-24  ;;  %1834 = vrot.lane.b32.xlu1 %v1826_v16, %s5606_s23  ;;  %v5164_v46 = vpop.eup %5163  ;;  %v1821_v7 = vmul.f32 %v5162_v50, %v5966_v39  ;;  %v1270_v39 = vsub.f32 %v6142_v51, %v6188_v24  ;;  %v6252_v50 = vld [vmem:[#allocation2 + $0x18] sm:$0xff]  }
 0x39f   : > { %v1820_v17 = vmul.f32 %v5164_v46, %v5972_v41 }
 0x3a0   : > { %5167 = vrsqrt.f32 %v1797_v48  ;;  %v6245_v48 = vld [vmem:[#allocation2] sm:$0xff]  }
 0x3a1   : > { %v6225_v37 = vpop.xlane.xlu0 %1693  ;;  %v1827_v19 = vpack.c.bf16 %v1821_v7, %v1820_v17  ;;  %v1701_v7 = vmax.f32 %v6200_v57, 1e-24  ;;  %v1703_v57 = vmax.f32 %v6204_v60, 1e-24 }
 0x3a2   : > { %v1697_v43 = vpop.xlane.xlu1 %1696 }
 0x3a3   : > { %v1707_v44 = vmax.f32 %v1697_v43, 1e-24 }
 0x3a5   : > { %5169 = vrsqrt.f32 %v1707_v44  ;;  %v1700_v49 = vpop.xlane.xlu0 %1699 }
 0x3a6   : > { %v1708_v32 = vmax.f32 %v1700_v49, 1e-24  ;;  %v6250_v49 = vunpack.c.h.bf16 %v6245_v48 }
 0x3a8   : > { %5171 = vrsqrt.f32 %v1708_v32 }
 0x3a9   : > { %5173 = vpow2.f32 %v1274_v20 }
 0x3aa   : > { %v5166_v2 = vpop.eup %5165  ;;  %5175 = vpow2.f32 %v1278_v56 }
 0x3ab   : > { %v1824_v26 = vmul.f32 %v5166_v2, %v6047_v10  ;;  %v1282_v10 = vmul.f32 1.442695, %v1270_v39 }
 0x3ad   : > { %v5168_v55 = vpop.eup %5167  ;;  %5177 = vpow2.f32 %v1282_v10 }
 0x3ae   : > { %v1825_v4 = vmul.f32 %v5168_v55, %v6045_v52  ;;  %v1272_v52 = vsub.f32 %v6151_v45, %v6192_v29  ;;  %v2566_v29 = vmul.f32 %v6250_v49, %v6250_v49  ;;  %v1795_v55 = vmax.f32 %v6218_v28, 1e-24 }
 0x3af   : > { %1887 = vrot.lane.b32.xlu0 %v1827_v19, %s5606_s23  ;;  %v1794_v19 = vmax.f32 %v6212_v62, 1e-24 }
 0x3b0   : > { %v1829_v16 = vpack.c.bf16 %v1825_v4, %v1824_v26  ;;  %v1286_v24 = vmul.f32 1.442695, %v1272_v52  ;;  %v1706_v26 = vmax.f32 %v6225_v37, 1e-24 }
 0x3b2   : > { %v5170_v41 = vpop.eup %5169  ;;  %5179 = vpow2.f32 %v1286_v24 }
 0x3b3   : > { %1993 = vrot.lane.b32.xlu0 %v1829_v16, %s5606_s23  ;;  %v1724_v6 = vmul.f32 %v5170_v41, %v6238_v13 }
 0x3b5   : > { %v5172_v11 = vpop.eup %5171  ;;  %v1812_v43 = vmul.f32 %v1724_v6, %v6081_v40  ;;  %v6260_v40 = vunpack.c.h.bf16 %v6252_v50 }
 0x3b6   : > { %v1725_v0 = vmul.f32 %v5172_v11, %v6238_v13  ;;  %v6255_v45 = vpop.eup %5173 }
 0x3b7   : > { %v1290_v32 = vsel %vm1241_vm2, %v6255_v45, 0.0  ;;  %v6266_v46 = vpop.eup %5175  ;;  %v2568_v38 = vmul.f32 %v6260_v40, %v6260_v40 }
 0x3b8   : > { %v1813_v51 = vmul.f32 %v1725_v0, %v6078_v21  ;;  %v1702_v21 = vmax.f32 %v6202_v59, 1e-24  ;;  %v1296_v2 = vsel %vm1241_vm2, %v6266_v46, 0.0  ;;  %v1704_v59 = vmax.f32 %v6210_v33, 1e-24 }
 0x3b9   : > { %v1705_v33 = vmax.f32 %v6222_v54, 1e-24 }
 0x3ba   : > { %v1817_v44 = vpack.c.bf16 %v1813_v51, %v1812_v43  ;;  %5181 = vrsqrt.f32 %v1702_v21  ;;  %v6274_v17 = vpop.eup %5177 }
 0x3bb   : > { %5183 = vrsqrt.f32 %v1701_v7  ;;  %v1302_v20 = vsel %vm1241_vm2, %v6274_v17, 0.0 }
 0x3bc   : > { %1990 = vrot.lane.b32.xlu0 %v1817_v44, %s5606_s23  ;;  %5185 = vrsqrt.f32 %v1704_v59 }
 0x3bd   : > { %5187 = vrsqrt.f32 %v1795_v55 }
 0x3be   : > { %5189 = vrsqrt.f32 %v1703_v57 }
 0x3bf   : > { %v6280_v15 = vpop.eup %5179  ;;  %5191 = vrsqrt.f32 %v1794_v19 }
 0x3c0   : > { %2582 = vrot.lane.b32.xlu0 %v2566_v29, %s5608_s14  ;;  %v1308_v4 = vsel %vm1241_vm2, %v6280_v15, 0.0  ;;  %5193 = vrsqrt.f32 %v1706_v26 }
 0x3c1   : > { %5195 = vrsqrt.f32 %v1705_v33 }
 0x3c2   : > { %1291 = vadd.xlane.f32.xlu1 %v1290_v32 }
 0x3c4   : > { %2586 = vrot.lane.b32.xlu0 %v2568_v38, %s5608_s14  ;;  %v7424_v38 = vsub.s32 2, %v5849_v42 }
 0x3c6   : > { %1297 = vadd.xlane.f32.xlu1 %v1296_v2  ;;  %v6306_v2 = vld [vmem:[#allocation2 + $0xc] sm:$0xff]  }
 0x3c7   : > { %v5182_v28 = vpop.eup %5181 }
 0x3c8   : > { %v5184_v16 = vpop.eup %5183  ;;  %v1719_v60 = vmul.f32 %v5182_v28, %v6238_v13  ;;  %v6332_v28 = vld [vmem:[#allocation2 + $0x44] sm:$0xff]  }
 0x3c9   : > { %v1718_v62 = vmul.f32 %v5184_v16, %v6238_v13  ;;  %v5186_v56 = vpop.eup %5185 }
 0x3ca   : > { %1303 = vadd.xlane.f32.xlu1 %v1302_v20  ;;  %v1807_v39 = vmul.f32 %v1719_v60, %v6004_v12  ;;  %v5188_v37 = vpop.eup %5187  ;;  %v1721_v54 = vmul.f32 %v5186_v56, %v6238_v13  ;;  %v895_v56 = vunpack.c.l.bf16 %v6332_v28 }
 0x3cb   : > { %v5190_v41 = vpop.eup %5189  ;;  %v1806_v6 = vmul.f32 %v1718_v62, %v6007_v14  ;;  %v1823_v52 = vmul.f32 %v5188_v37, %v6030_v3  ;;  %v6334_v62 = vld [vmem:[#allocation2 + $0x38] sm:$0xff]  }
 0x3cc   : > { %v5192_v11 = vpop.eup %5191  ;;  %v1720_v51 = vmul.f32 %v5190_v41, %v6238_v13  ;;  %v1809_v12 = vmul.f32 %v1721_v54, %v6013_v23  ;;  %v6312_v23 = vld [vmem:[%s7410_s2] sm:$0xf]  ;;  %v6339_v37 = vld [vmem:[#allocation2 + $0x58] sm:$0xff]  }
 0x3cd   : > { %v1814_v10 = vpack.c.bf16 %v1807_v39, %v1806_v6  ;;  %v5194_v0 = vpop.eup %5193  ;;  %v1822_v43 = vmul.f32 %v5192_v11, %v6032_v35  ;;  %v6337_v39 = vld [vmem:[#allocation2 + $0x50] sm:$0xff]   ;;  %v894_v11 = vunpack.c.l.bf16 %v6334_v62 }
 0x3ce   : > { %1309 = vadd.xlane.f32.xlu1 %v1308_v4  ;;  %v5196_v24 = vpop.eup %5195  ;;  %v1723_v29 = vmul.f32 %v5194_v0, %v6238_v13  ;;  %v1808_v14 = vmul.f32 %v1720_v51, %v6020_v27  ;;  %v2410_v27 = vrot.slane %v6312_v23, %v7424_v38  ;;  %v896_v54 = vunpack.c.l.bf16 %v6337_v39  ;;  %v6587_v38 = vld [vmem:[#allocation2 + $0x44] sm:$0xff]  }
 0x3cf   : > { %v1828_v44 = vpack.c.bf16 %v1823_v52, %v1822_v43  ;;  %v1722_v3 = vmul.f32 %v5196_v24, %v6238_v13  ;;  %v907_v52 = vadd.f32 %v6102_v25, %v895_v56  ;;  %v897_v0 = vunpack.c.h.bf16 %v6339_v37 }
 0x3d0   : > { %v1815_v21 = vpack.c.bf16 %v1809_v12, %v1808_v14  ;;  %v1811_v32 = vmul.f32 %v1723_v29, %v6055_v61  ;;  %v6318_v61 = vunpack.c.h.bf16 %v6306_v2  ;;  %v906_v12 = vadd.f32 %v6102_v25, %v894_v11 }
 0x3d1   : > { %v1810_v35 = vmul.f32 %v1722_v3, %v6058_v18  ;;  %v6320_v18 = vld [vmem:[#allocation2 + $0x24] sm:$0xff]  }
 0x3d2   : > { %v2567_v13 = vmul.f32 %v6318_v61, %v6318_v61  ;;  %v6326_v59 = vunpack.c.h.bf16 %v6320_v18  ;;  %v912_v3 = vpack.c.bf16 %v907_v52, %v906_v12  ;;  %v2402_v11 = vunpack.c.l.bf16 %v6320_v18 }
 0x3d3   : > { %v1816_v7 = vpack.c.bf16 %v1811_v32, %v1810_v35  ;;  %v909_v32 = vadd.f32 %v6102_v25, %v897_v0 }
 0x3d4   : > { %v2569_v55 = vmul.f32 %v6326_v59, %v6326_v59 }
 0x3df   : > { %1831 = vrot.lane.b32.xlu1 %v1814_v10, %s5606_s23 }
 0x3e3   : > { %1940 = vrot.lane.b32.xlu1 %v1828_v44, %s5606_s23 }
 0x3e7   : > { %1884 = vrot.lane.b32.xlu1 %v1815_v21, %s5606_s23  ;;  %v908_v21 = vadd.f32 %v6102_v25, %v896_v54 }
 0x3eb   : > { %1937 = vrot.lane.b32.xlu1 %v1816_v7, %s5606_s23 }
 0x3ef   : > { %2412 = vrot.lane.b32.xlu1 %v2410_v27, %s5608_s14 }
 0x3f3   : > { %2584 = vrot.lane.b32.xlu1 %v2567_v13, %s5608_s14 }
 0x3f7   : > { %2588 = vrot.lane.b32.xlu1 %v2569_v55, %s5608_s14  ;;  %v913_v55 = vpack.c.bf16 %v909_v32, %v908_v21  ;;  %v6418_v21 = vunpack.c.l.bf16 %v6339_v37 }
 0x3f9   : > { %7463 = vst [vmem:[#allocation19_spill] sm:$0xff] %v6418_v21 }
 0x407   : > { %v1295_v20 = vpop.xlane.xlu0 %1294 }
 0x408   : > { %5197 = vrcp.f32 %v1295_v20 }
 0x410   : > { %v1835_v57 = vpop.permute.xlu1 %1834  ;;  %v1301_v19 = vpop.xlane.xlu0 %1300 }
 0x415   : > { %v5198_v41 = vpop.eup %5197 }
 0x416   : > { %v1323_v51 = vmul.f32 %v5198_v41, %v6186_v22  ;;  %v2399_v41 = vunpack.c.l.bf16 %v6245_v48 }
 0x41e   : > { %v1307_v4 = vpop.xlane.xlu0 %1306 }
 0x422   : > { %v1313_v16 = vpop.xlane.xlu0 %1312 }
 0x44b   : > { %v1292_v26 = vpop.xlane.xlu1 %1291 }
 0x44c   : > { %5199 = vrcp.f32 %v1292_v26 }
 0x44d   : > { %5201 = vrcp.f32 %v1301_v19 }
 0x44f   : > { %v1298_v33 = vpop.xlane.xlu1 %1297 }
 0x450   : > { %5203 = vrcp.f32 %v1298_v33 }
 0x451   : > { %5205 = vrcp.f32 %v1307_v4  ;;  %v1840_v4 = vsel %vm923_vm0, %v1835_v57, 0  ;;  %v2400_v57 = vunpack.c.l.bf16 %v6306_v2 }
 0x453   : > { %v1304_v60 = vpop.xlane.xlu1 %1303 }
 0x454   : > { %5207 = vrcp.f32 %v1304_v60 }
 0x455   : > { %5209 = vrcp.f32 %v1313_v16  ;;  %v1888_v16 = vpop.permute.xlu0 %1887 }
 0x456   : > { %v1893_v56 = vsel %vm923_vm0, %v1888_v16, 0 }
 0x457   : > { %v1310_v6 = vpop.xlane.xlu1 %1309 }
 0x458   : > { %5211 = vrcp.f32 %v1310_v6 }
 0x459   : > { %v5200_v10 = vpop.eup %5199 }
 0x45a   : > { %v1322_v43 = vmul.f32 %v5200_v10, %v6255_v45  ;;  %v5202_v24 = vpop.eup %5201  ;;  %v2401_v10 = vunpack.c.l.bf16 %v6252_v50  ;;  %v2428_v50 = vld [vmem:[#allocation2 + $0x40] ss:$12 sps:$4 sm:$0xff]  }
 0x45b   : > { %v1832_v44 = vpop.permute.xlu1 %1831  ;;  %v1325_v7 = vmul.f32 %v5202_v24, %v6195_v34  ;;  %v6420_v32 = vunpack.c.h.bf16 %v2428_v50 }
 0x45c   : > { %v1330_v29 = vpack.c.bf16 %v1323_v51, %v1322_v43  ;;  %v2427_v43 = vld [vmem:[#allocation2 + $0x30] sm:$0xff]   ;;  %v1994_v51 = vpop.permute.xlu0 %1993 }
 0x45d   : > { %v5204_v14 = vpop.eup %5203  ;;  %v6396_v18 = vunpack.c.h.bf16 %v2427_v43  ;;  %v1999_v24 = vsel %vm923_vm0, %v1994_v51, 0  ;;  %7464 = vst [vmem:[#allocation20_spill] sm:$0xff] %v6420_v32  ;;  %v2572_v37 = vmul.f32 %v6420_v32, %v6420_v32  ;;  %v3264_v32 = vld [vmem:[#allocation2 + $0x10] ss:$24 sps:$4 sm:$0xff]  }
 0x45e   : > { %4776 = vmatmul.mubr.msk.bf16.vlgmr.msra.gmra.mxu0 %vm1241_vm2, %v1330_v29  ;;  %v1324_v35 = vmul.f32 %v5204_v14, %v6266_v46  ;;  %v5206_v45 = vpop.eup %5205  ;;  %v6405_v29 = vunpack.c.l.bf16 %v2428_v50 }
 0x45f   : > { %4786 = vmatpush3.bf16.msra.mxu0 %v912_v3  ;;  %v1941_v22 = vpop.permute.xlu1 %1940  ;;  %4787 = vmatprep.mubr.msk.bf16.mxu0 %vm5605_vm1, %v7425_v30  ;;  %v1327_v20 = vmul.f32 %v5206_v45, %v6206_v1  ;;  %v2570_v3 = vmul.f32 %v6396_v18, %v6396_v18 }
 0x460   : > { %v1331_v27 = vpack.c.bf16 %v1325_v7, %v1324_v35  ;;  %4797 = vmatprep.subr.bf16.mxu0 %v7425_v30  ;;  %v1946_v52 = vsel %vm923_vm0, %v1941_v22, 0  ;;  %v2571_v14 = vmul.f32 %v6405_v29, %v6405_v29  ;;  %v2404_v35 = vunpack.c.h.bf16 %v6334_v62  ;;  %v1991_v45 = vpop.permute.xlu0 %1990 }
 0x461   : > { %v5208_v13 = vpop.eup %5207  ;;  %v2403_v7 = vunpack.c.l.bf16 %v2427_v43  ;;  %v2573_v22 = vmul.f32 %v6418_v21, %v6418_v21  ;;  %v2406_v62 = vunpack.c.h.bf16 %v6337_v39 }
 0x462   : > { %4782 = vmatmul.mubr.msk.bf16.vlgmr.msra.gmra.mxu1 %vm1241_vm2, %v1331_v27  ;;  %v1326_v25 = vmul.f32 %v5208_v13, %v6274_v17  ;;  %v5210_v46 = vpop.eup %5209 }
 0x463   : > { %4792 = vmatpush3.bf16.msra.mxu1 %v913_v55  ;;  %v1885_v34 = vpop.permute.xlu1 %1884  ;;  %4793 = vmatprep.mubr.msk.bf16.mxu1 %vm5605_vm1, %v7425_v30  ;;  %v1329_v17 = vmul.f32 %v5210_v46, %v6214_v8  ;;  %v2405_v55 = vunpack.c.h.bf16 %v6332_v28 }
 0x464   : > { %v1332_v19 = vpack.c.bf16 %v1327_v20, %v1326_v25  ;;  %4803 = vmatprep.subr.bf16.mxu1 %v7425_v30  ;;  %v2583_v39 = vpop.permute.xlu0 %2582 }
 0x465   : > { %v5212_v26 = vpop.eup %5211 }
 0x466   : > { %4788 = vmatmul.mubr.msk.bf16.vlgmr.msra.gmra.mxu0 %vm1241_vm2, %v1332_v19  ;;  %v1328_v33 = vmul.f32 %v5212_v26, %v6280_v15 }
 0x467   : > { %4798 = vmatpush3.bf16.xpose.msra.mxu0 %v1840_v4  ;;  %v1938_v1 = vpop.permute.xlu1 %1937  ;;  %4799 = vmatprep.mubr.msk.bf16.mxu0 %vm5605_vm1, %v7425_v30  ;;  %v2606_v4 = vsel %vm923_vm0, %v2583_v39, 0.0 }
 0x468   : > { %v1333_v60 = vpack.c.bf16 %v1329_v17, %v1328_v33  ;;  %4809 = vmatprep.subr.bf16.mxu0 %v7425_v30  ;;  %v2587_v33 = vpop.permute.xlu0 %2586 }
 0x469   : > { %v2612_v17 = vsel %vm923_vm0, %v2587_v33, 0.0 }
 0x46a   : > { %4794 = vmatmul.mubr.msk.bf16.vlgmr.msra.gmra.mxu1 %vm1241_vm2, %v1333_v60 }
 0x46b   : > { %4804 = vmatpush3.bf16.xpose.msra.mxu1 %v1893_v56  ;;  %v2413_v15 = vpop.permute.xlu1 %2412  ;;  %4805 = vmatprep.mubr.msk.bf16.mxu1 %vm5605_vm1, %v7425_v30  ;;  %v6465_v56 = vld [vmem:[%s7412_s4] sm:$0xf] }
 0x46c   : > { %v6375_v8 = vadd.f32 %v2413_v15, %v2400_v57  ;;  %v6377_v6 = vadd.f32 %v2413_v15, %v2399_v41  ;;  %4815 = vmatprep.subr.bf16.mxu1 %v7425_v30  ;;  %v6388_v54 = vadd.f32 %v2413_v15, %v2402_v11  ;;  %v6390_v0 = vadd.f32 %v2413_v15, %v2401_v10 }
 0x46d   : > { %v6432_v27 = vadd.f32 %v2413_v15, %v2404_v35  ;;  %v6434_v13 = vadd.f32 %v2413_v15, %v2403_v7  ;;  %v6446_v46 = vadd.f32 %v2413_v15, %v2406_v62  ;;  %7467 = vst [vmem:[#allocation23_spill] sm:$0xff] %v6465_v56  ;;  %v2475_v57 = vrot.slane %v6465_v56, 2 }
 0x46e   : > { %4800 = vmatmul.mubr.msk.bf16.vlgmr.msra.gmra.mxu0 %vm923_vm0, %v1832_v44  ;;  %v2478_v48 = vmul.f32 %v6375_v8, %v6375_v8  ;;  %v2477_v2 = vmul.f32 %v6377_v6, %v6377_v6  ;;  %v2480_v44 = vmul.f32 %v6388_v54, %v6388_v54  ;;  %v2479_v12 = vmul.f32 %v6390_v0, %v6390_v0 }
 0x46f   : > { %4810 = vmatpush3.bf16.xpose.msra.mxu0 %v1946_v52  ;;  %4811 = vmatprep.mubr.msk.bf16.mxu0 %vm5605_vm1, %v7425_v30  ;;  %v2482_v25 = vmul.f32 %v6432_v27, %v6432_v27  ;;  %v2481_v20 = vmul.f32 %v6434_v13, %v6434_v13  ;;  %7465 = vst [vmem:[#allocation21_spill] sm:$0xff] %v6446_v46  ;;  %v2585_v26 = vpop.permute.xlu1 %2584  ;;  %4969 = vpush %v2475_v57 }
 0x470   : > { %2495 = vrot.lane.b32.xlu1 %v2478_v48, %s5608_s14  ;;  %2493 = vrot.lane.b32.xlu0 %v2477_v2, %s5608_s14  ;;  %v2484_v19 = vmul.f32 %v6446_v46, %v6446_v46  ;;  %v2609_v16 = vsel %vm923_vm0, %v2585_v26, 0.0 }
 0x471   : > { %4821 = vmatprep.subr.bf16.mxu0 %v7425_v30 }
 0x472   : > { %4806 = vmatmul.mubr.msk.bf16.vlgmr.msra.gmra.mxu1 %vm923_vm0, %v1885_v34  ;;  %v6448_v34 = vadd.f32 %v2413_v15, %v2405_v55 }
 0x473   : > { %4816 = vmatpush3.bf16.xpose.msra.mxu1 %v1999_v24  ;;  %4817 = vmatprep.mubr.msk.bf16.mxu1 %vm5605_vm1, %v7425_v30 }
 0x474   : > { %2499 = vrot.lane.b32.xlu1 %v2480_v44, %s5608_s14  ;;  %2497 = vrot.lane.b32.xlu0 %v2479_v12, %s5608_s14  ;;  %7466 = vst [vmem:[#allocation22_spill] sm:$0xff] %v6448_v34  ;;  %v2483_v28 = vmul.f32 %v6448_v34, %v6448_v34  ;;  %v6595_v34 = vld [vmem:[#allocation2 + $0x58] sm:$0xff]  }
 0x475   : > { %4827 = vmatprep.subr.bf16.mxu1 %v7425_v30 }
 0x476   : > { %4812 = vmatmul.mubr.msk.bf16.vlgmr.msra.gmra.mxu0 %vm923_vm0, %v1938_v1  ;;  %v2589_v1 = vpop.permute.xlu1 %2588 }
 0x477   : > { %4823 = vmatprep.mubr.msk.bf16.mxu0 %vm5605_vm1, %v7425_v30  ;;  %v2615_v60 = vsel %vm923_vm0, %v2589_v1, 0.0  ;;  %v825_v1 = vld [vmem:[#allocation9 + $0x18] sm:$0xff] }
 0x478   : > { %2592 = vrot.lane.b32.xlu1 %v2571_v14, %s5608_s14  ;;  %2590 = vrot.lane.b32.xlu0 %v2570_v3, %s5608_s14 }
 0x47a   : > { %4818 = vmatmul.mubr.msk.bf16.vlgmr.msra.gmra.mxu1 %vm923_vm0, %v1991_v45 }
 0x47b   : > { %4829 = vmatprep.mubr.msk.bf16.mxu1 %vm5605_vm1, %v7425_v30 }
 0x47c   : > { %2596 = vrot.lane.b32.xlu1 %v2573_v22, %s5608_s14  ;;  %2594 = vrot.lane.b32.xlu0 %v2572_v37, %s5608_s14 }
 0x480   : > { %2503 = vrot.lane.b32.xlu1 %v2482_v25, %s5608_s14  ;;  %2501 = vrot.lane.b32.xlu0 %v2481_v20, %s5608_s14 }
 0x484   : > { %2507 = vrot.lane.b32.xlu1 %v2484_v19, %s5608_s14  ;;  %2505 = vrot.lane.b32.xlu0 %v2483_v28, %s5608_s14  ;;  %v824_v28 = vld [vmem:[#allocation9 + $0x10] sm:$0xff] }
 0x4a0   : > { %s4970_s21 = spop %4969 }
 0x4a3   : > { %2607 = vadd.xlane.f32.xlu0 %v2606_v4 }
 0x4a7   : > { %2613 = vadd.xlane.f32.xlu0 %v2612_v17 }
 0x4a8   : > { %2610 = vadd.xlane.f32.xlu1 %v2609_v16 }
 0x4ac   : > { %2616 = vadd.xlane.f32.xlu1 %v2615_v60 }
 0x4e2   : > { %v2494_v41 = vpop.permute.xlu0 %2493  ;;  %v2496_v15 = vpop.permute.xlu1 %2495 }
 0x4e3   : > { %v2517_v11 = vsel %vm923_vm0, %v2494_v41, 0.0  ;;  %v2520_v10 = vsel %vm923_vm0, %v2496_v15, 0.0 }
 0x4e4   : > { %2518 = vadd.xlane.f32.xlu0 %v2517_v11  ;;  %2521 = vadd.xlane.f32.xlu1 %v2520_v10 }
 0x4e6   : > { %v2500_v15 = vpop.permute.xlu1 %2499 }
 0x51e   : > { %v1371_v52 = vpop.f32.mrf.mxu0 }
 0x51f   : > { %v4572_v48 = vpack.c.bf16 %v1371_v52, %v1371_v52 }
 0x520   : > { %v4777_v2 = vpop.f32.mrf.mxu0 }
 0x521   : > { %1543 = vst.msk [vmem:[#allocation3] sm:$0xf] %vm1542_vm3, %v4572_v48 }
 0x522   : > { %v1374_v43 = vpop.f32.mrf.mxu0  ;;  %v1415_v51 = vpop.f32.mrf.mxu1 }
 0x523   : > { %v4573_v50 = vpack.c.bf16 %v1374_v43, %v1374_v43  ;;  %v4574_v24 = vpack.c.bf16 %v1415_v51, %v1415_v51 }
 0x524   : > { %v4778_v44 = vpop.f32.mrf.mxu0  ;;  %v4783_v12 = vpop.f32.mrf.mxu1 }
 0x525   : > { %1544 = vst.msk [vmem:[#allocation3 + $0x4] sm:$0xf] %vm1542_vm3, %v4573_v50  ;;  %1545 = vst.msk [vmem:[#allocation3 + $0x8] sm:$0xf] %vm1542_vm3, %v4574_v24 }
 0x526   : > { %v1418_v14 = vpop.f32.mrf.mxu1  ;;  %v1459_v3 = vpop.f32.mrf.mxu0 }
 0x527   : > { %v4575_v35 = vpack.c.bf16 %v1418_v14, %v1418_v14  ;;  %v4576_v7 = vpack.c.bf16 %v1459_v3, %v1459_v3 }
 0x528   : > { %v4784_v45 = vpop.f32.mrf.mxu1  ;;  %v4789_v22 = vpop.f32.mrf.mxu0 }
 0x529   : > { %1546 = vst.msk [vmem:[#allocation3 + $0xc] sm:$0xf] %vm1542_vm3, %v4575_v35  ;;  %1547 = vst.msk [vmem:[#allocation3 + $0x10] sm:$0xf] %vm1542_vm3, %v4576_v7  ;;  %v2593_v7 = vpop.permute.xlu1 %2592  ;;  %v2498_v22 = vpop.permute.xlu0 %2497 }
 0x52a   : > { %v1462_v37 = vpop.f32.mrf.mxu0  ;;  %v1503_v62 = vpop.f32.mrf.mxu1 }
 0x52b   : > { %v4577_v55 = vpack.c.bf16 %v1462_v37, %v1462_v37  ;;  %v4578_v25 = vpack.c.bf16 %v1503_v62, %v1503_v62 }
 0x52c   : > { %v4790_v20 = vpop.f32.mrf.mxu0  ;;  %v4795_v19 = vpop.f32.mrf.mxu1 }
 0x52d   : > { %1548 = vst.msk [vmem:[#allocation3 + $0x14] sm:$0xf] %vm1542_vm3, %v4577_v55  ;;  %1549 = vst.msk [vmem:[#allocation3 + $0x18] sm:$0xf] %vm1542_vm3, %v4578_v25  ;;  %v2526_v25 = vsel %vm923_vm0, %v2500_v15, 0.0  ;;  %v2621_v15 = vsel %vm923_vm0, %v2593_v7, 0.0 }
 0x52e   : > { %v1506_v39 = vpop.f32.mrf.mxu1  ;;  %v1876_v26 = vpop.f32.mrf.mxu0 }
 0x52f   : > { %v4579_v4 = vpack.c.bf16 %v1506_v39, %v1506_v39  ;;  %v1877_v33 = vadd.f32 %v1876_v26, %v824_v28 }
 0x530   : > { %v4796_v17 = vpop.f32.mrf.mxu1  ;;  %v4801_v16 = vpop.f32.mrf.mxu0 }
 0x531   : > { %1550 = vst.msk [vmem:[#allocation3 + $0x1c] sm:$0xf] %vm1542_vm3, %v4579_v4  ;;  %v6479_v60 = vadd.f32 %v1877_v33, %v6110_v47  ;;  %v2597_v17 = vpop.permute.xlu1 %2596 }
 0x532   : > { %v1879_v57 = vpop.f32.mrf.mxu0  ;;  %v1929_v41 = vpop.f32.mrf.mxu1 }
 0x533   : > { %v1880_v11 = vadd.f32 %v1879_v57, %v825_v1  ;;  %v1930_v10 = vadd.f32 %v1929_v41, %v824_v28  ;;  %v2050_v52 = vsel %vm1241_vm2, %v6479_v60, -inf  ;;  %v2591_v57 = vpop.permute.xlu0 %2590 }
 0x534   : > { %v4802_v48 = vpop.f32.mrf.mxu0  ;;  %v4807_v2 = vpop.f32.mrf.mxu1  ;;  %2051 = vmax.xlane.f32.xlu0 %v2050_v52  ;;  %v2618_v52 = vsel %vm923_vm0, %v2591_v57, 0.0 }
 0x535   : > { %v6484_v43 = vadd.f32 %v1880_v11, %v6115_v58  ;;  %v6487_v51 = vadd.f32 %v1930_v10, %v6124_v63  ;;  %v2627_v11 = vsel %vm923_vm0, %v2597_v17, 0.0 }
 0x536   : > { %v1932_v50 = vpop.f32.mrf.mxu1  ;;  %v1982_v47 = vpop.f32.mrf.mxu0 }
 0x537   : > { %v1933_v24 = vadd.f32 %v1932_v50, %v825_v1  ;;  %v1983_v44 = vadd.f32 %v1982_v47, %v824_v28  ;;  %v2056_v12 = vsel %vm1241_vm2, %v6487_v51, -inf  ;;  %v2053_v14 = vsel %vm1241_vm2, %v6484_v43, -inf  ;;  %v2595_v10 = vpop.permute.xlu0 %2594 }
 0x538   : > { %v4808_v3 = vpop.f32.mrf.mxu1  ;;  %v4813_v35 = vpop.f32.mrf.mxu0  ;;  %2057 = vmax.xlane.f32.xlu0 %v2056_v12  ;;  %2054 = vmax.xlane.f32.xlu1 %v2053_v14  ;;  %v2624_v50 = vsel %vm923_vm0, %v2595_v10, 0.0  ;;  %v6525_v14 = vld [vmem:[%s7411_s3] sm:$0xf] }
 0x539   : > { %v6494_v58 = vadd.f32 %v1983_v44, %v6139_v5  ;;  %v6497_v37 = vadd.f32 %v1933_v24, %v6129_v9  ;;  %7468 = vst [vmem:[#allocation24_spill] sm:$0xff] %v6525_v14  ;;  %v1618_v3 = vrot.slane %v6525_v14, %v1569_v31 }
 0x53a   : > { %v1985_v63 = vpop.f32.mrf.mxu0  ;;  %v2035_v45 = vpop.f32.mrf.mxu1 }
 0x53b   : > { %v1986_v62 = vadd.f32 %v1985_v63, %v825_v1  ;;  %v2062_v55 = vsel %vm1241_vm2, %v6494_v58, -inf  ;;  %v2036_v26 = vadd.f32 %v2035_v45, %v824_v28  ;;  %v2059_v9 = vsel %vm1241_vm2, %v6497_v37, -inf  ;;  %v2504_v28 = vpop.permute.xlu1 %2503 }
 0x53c   : > { %v4814_v20 = vpop.f32.mrf.mxu0  ;;  %v4819_v19 = vpop.f32.mrf.mxu1  ;;  %2063 = vmax.xlane.f32.xlu0 %v2062_v55  ;;  %2527 = vadd.xlane.f32.xlu1 %v2526_v25  ;;  %v2532_v48 = vsel %vm923_vm0, %v2504_v28, 0.0 }
 0x53d   : > { %v6503_v39 = vadd.f32 %v1986_v62, %v6146_v36  ;;  %v2048_v41 = vadd.f32 %v2036_v26, %v6144_v53  ;;  %v2523_v36 = vsel %vm923_vm0, %v2498_v22, 0.0  ;;  %v2502_v53 = vpop.permute.xlu0 %2501 }
 0x53e   : > { %v2038_v5 = vpop.f32.mrf.mxu1  ;;  %v2529_v24 = vsel %vm923_vm0, %v2502_v53, 0.0 }
 0x53f   : > { %v6505_v4 = vadd.f32 %v2038_v5, %v825_v1  ;;  %v2065_v33 = vsel %vm1241_vm2, %v6503_v39, -inf  ;;  %v2068_v1 = vsel %vm1241_vm2, %v2048_v41, -inf  ;;  %v2508_v2 = vpop.permute.xlu1 %2507 }
 0x540   : > { %v4820_v16 = vpop.f32.mrf.mxu1  ;;  %2060 = vmax.xlane.f32.xlu0 %v2059_v9  ;;  %2066 = vmax.xlane.f32.xlu1 %v2065_v33  ;;  %v2538_v47 = vsel %vm923_vm0, %v2508_v2, 0.0  ;;  %v6571_v2 = vld [vmem:[#allocation2 + $0x14] sm:$0xff]  }
 0x541   : > { %v2506_v44 = vpop.permute.xlu0 %2505 }
 0x542   : > { %v2535_v12 = vsel %vm923_vm0, %v2506_v44, 0.0 }
 0x543   : > { %v6533_v7 = vpop.xlane.xlu1 %2610 }
 0x544   : > { %2524 = vadd.xlane.f32.xlu0 %v2523_v36  ;;  %2622 = vadd.xlane.f32.xlu1 %v2621_v15 }
 0x545   : > { %v6531_v35 = vpop.xlane.xlu0 %2607 }
 0x547   : > { %v6539_v22 = vpop.xlane.xlu1 %2616 }
 0x548   : > { %2069 = vmax.xlane.f32.xlu0 %v2068_v1  ;;  %2628 = vadd.xlane.f32.xlu1 %v2627_v11 }
 0x549   : > { %v6535_v63 = vpop.xlane.xlu0 %2613 }
 0x54c   : > { %2619 = vadd.xlane.f32.xlu0 %v2618_v52  ;;  %2533 = vadd.xlane.f32.xlu1 %v2532_v48  ;;  %v6569_v48 = vld [vmem:[#allocation2 + $0x8] sm:$0xff]  }
 0x54d   : > { %v1607_v44 = vunpack.c.l.bf16 %v6569_v48 }
 0x550   : > { %2625 = vadd.xlane.f32.xlu0 %v2624_v50  ;;  %2539 = vadd.xlane.f32.xlu1 %v2538_v47  ;;  %v6575_v50 = vld [vmem:[#allocation2 + $0x20] sm:$0xff]   ;;  %v6577_v47 = vld [vmem:[#allocation2 + $0x2c] sm:$0xff]  }
 0x554   : > { %2530 = vadd.xlane.f32.xlu0 %v2529_v24 }
 0x558   : > { %2536 = vadd.xlane.f32.xlu0 %v2535_v12  ;;  %v1608_v12 = vunpack.c.l.bf16 %v6571_v2 }
 0x56d   : > { %v6537_v45 = vpop.xlane.xlu0 %2518  ;;  %v6543_v55 = vpop.xlane.xlu1 %2521 }
 0x56e   : > { %1620 = vrot.lane.b32.xlu0 %v1618_v3, %s5607_s26 }
 0x5bd   : > { %v6541_v62 = vpop.xlane.xlu0 %2051 }
 0x5c1   : > { %v6545_v25 = vpop.xlane.xlu0 %2057  ;;  %v6547_v20 = vpop.xlane.xlu1 %2054 }
 0x5c5   : > { %v6549_v31 = vpop.xlane.xlu0 %2063  ;;  %v6551_v19 = vpop.xlane.xlu1 %2527 }
 0x5c9   : > { %v6553_v5 = vpop.xlane.xlu0 %2060  ;;  %v6557_v9 = vpop.xlane.xlu1 %2066 }
 0x5cd   : > { %v6555_v26 = vpop.xlane.xlu0 %2524  ;;  %v6559_v16 = vpop.xlane.xlu1 %2622 }
 0x5d1   : > { %v2070_v33 = vpop.xlane.xlu0 %2069  ;;  %v6565_v28 = vpop.xlane.xlu1 %2628 }
 0x5d2   : > { %v2080_v17 = vsub.f32 %v2048_v41, %v2070_v33 }
 0x5d4   : > { %v2094_v57 = vmul.f32 1.442695, %v2080_v17 }
 0x5d5   : > { %v6561_v36 = vpop.xlane.xlu0 %2619  ;;  %v2534_v11 = vpop.xlane.xlu1 %2533 }
 0x5d6   : > { %5213 = vpow2.f32 %v2094_v57  ;;  %v2546_v53 = vmax.f32 %v2534_v11, 1e-24  ;;  %v1609_v57 = vunpack.c.l.bf16 %v6575_v50  ;;  %v6585_v11 = vld [vmem:[#allocation2 + $0x38] sm:$0xff]  }
 0x5d9   : > { %v6563_v15 = vpop.xlane.xlu0 %2625 }
 0x5dd   : > { %v2531_v1 = vpop.xlane.xlu0 %2530 }
 0x5de   : > { %v2545_v10 = vmax.f32 %v2531_v1, 1e-24  ;;  %v1610_v1 = vunpack.c.l.bf16 %v6577_v47 }
 0x5e0   : > { %5215 = vrsqrt.f32 %v2545_v10  ;;  %v1611_v10 = vunpack.c.l.bf16 %v6585_v11 }
 0x5e1   : > { %v6567_v52 = vpop.xlane.xlu0 %2536  ;;  %5217 = vrsqrt.f32 %v2546_v53  ;;  %v6593_v53 = vld [vmem:[#allocation2 + $0x50] sm:$0xff]  }
 0x5e3   : > { %v6573_v41 = vpop.eup %5213 }
 0x5e4   : > { %7469 = vst [vmem:[#allocation25_spill] sm:$0xff] %v6573_v41  ;;  %v2116_v24 = vsel %vm1241_vm2, %v6573_v41, 0.0 }
 0x5e5   : > { %2117 = vadd.xlane.f32.xlu0 %v2116_v24  ;;  %v1621_v3 = vpop.permute.xlu0 %1620  ;;  %v1612_v24 = vunpack.c.l.bf16 %v6587_v38 }
 0x5e6   : > { %v1623_v33 = vadd.f32 %v1621_v3, %v1607_v44  ;;  %v1624_v17 = vadd.f32 %v1621_v3, %v1608_v12  ;;  %v1625_v14 = vadd.f32 %v1621_v3, %v1609_v57  ;;  %v1626_v41 = vadd.f32 %v1621_v3, %v1610_v1 }
 0x5e7   : > { %v1627_v12 = vadd.f32 %v1621_v3, %v1611_v10  ;;  %v1628_v56 = vadd.f32 %v1621_v3, %v1612_v24  ;;  %v6600_v1 = vstv %s4970_s21  ;;  %s4280_s21 = scalar_lea.sflag [#allocation6], %s5813_s5 }
 0x5e8   : > { %v1631_v30 = vpack.c.bf16 %v1624_v17, %v1623_v33  ;;  %v1632_v44 = vpack.c.bf16 %v1626_v41, %v1625_v14  ;;  %v1614_v17 = vunpack.c.h.bf16 %v6595_v34 }
 0x5e9   : > { %v1633_v46 = vpack.c.bf16 %v1628_v56, %v1627_v12  ;;  %v7434_v12 = vsub.s32 3, %v5849_v42 }
 0x5ea   : > { %2143 = vrot.lane.b32.xlu1 %v1631_v30, %s5606_s23  ;;  %v1613_v30 = vunpack.c.l.bf16 %v6593_v53  ;;  %v1630_v41 = vadd.f32 %v1621_v3, %v1614_v17 }
 0x5ec   : > { %v1629_v14 = vadd.f32 %v1621_v3, %v1613_v30  ;;  %v3250_v3 = vrot.slane %v6312_v23, %v7434_v12  ;;  %v6614_v30 = vunpack.c.l.bf16 %v3264_v32  ;;  %v2076_v23 = vsub.f32 %v6487_v51, %v6545_v25 }
 0x5ed   : > { %v5216_v33 = vpop.eup %5215  ;;  %v2077_v51 = vsub.f32 %v6497_v37, %v6553_v5 }
 0x5ee   : > { %2191 = vrot.lane.b32.xlu1 %v1632_v44, %s5606_s23  ;;  %v5218_v57 = vpop.eup %5217  ;;  %v2562_v10 = vmul.f32 %v5216_v33, %v6600_v1  ;;  %v1634_v24 = vpack.c.bf16 %v1630_v41, %v1629_v14  ;;  %v2074_v33 = vsub.f32 %v6479_v60, %v6541_v62  ;;  %v3407_v17 = vmul.f32 %v6614_v30, %v6614_v30 }
 0x5ef   : > { %v2563_v56 = vmul.f32 %v5218_v57, %v6600_v1  ;;  %v6621_v57 = vunpack.c.h.bf16 %v3264_v32  ;;  %v2086_v62 = vmul.f32 1.442695, %v2076_v23  ;;  %v2088_v25 = vmul.f32 1.442695, %v2077_v51 }
 0x5f0   : > { %v2650_v44 = vmul.f32 %v2562_v10, %v6434_v13  ;;  %v2082_v13 = vmul.f32 1.442695, %v2074_v33  ;;  %v2079_v41 = vsub.f32 %v6503_v39, %v6557_v9  ;;  %v2633_v33 = vmax.f32 %v6539_v22, 1e-24 }
 0x5f1   : > { %v3409_v60 = vmul.f32 %v6621_v57, %v6621_v57  ;;  %v2635_v22 = vmax.f32 %v6559_v16, 1e-24 }
 0x5f2   : > { %2239 = vrot.lane.b32.xlu1 %v1633_v46, %s5606_s23  ;;  %v2651_v46 = vmul.f32 %v2563_v56, %v6432_v27  ;;  %v2075_v27 = vsub.f32 %v6484_v43, %v6547_v20  ;;  %5219 = vpow2.f32 %v2082_v13  ;;  %v2078_v43 = vsub.f32 %v6494_v58, %v6549_v31  ;;  %v6631_v20 = vld [vmem:[#allocation10 + $0x38] sm:$0xff] }
 0x5f3   : > { %v6635_v32 = vadd.f32 %v6631_v20, %v6505_v4  ;;  %v2092_v31 = vmul.f32 1.442695, %v2079_v41  ;;  %v2541_v13 = vmax.f32 %v6537_v45, 1e-24  ;;  %v2634_v45 = vmax.f32 %v6561_v36, 1e-24 }
 0x5f4   : > { %v2656_v21 = vpack.c.bf16 %v2651_v46, %v2650_v44  ;;  %v2090_v14 = vmul.f32 1.442695, %v2078_v43 }
 0x5f5   : > { %v2071_v10 = vsel %vm1241_vm2, %v6635_v32, -inf }
 0x5fb   : > { %2287 = vrot.lane.b32.xlu0 %v1634_v24, %s5606_s23  ;;  %v2631_v24 = vmax.f32 %v6533_v7, 1e-24  ;;  %v2632_v7 = vmax.f32 %v6535_v63, 1e-24 }
 0x5ff   : > { %2777 = vrot.lane.b32.xlu0 %v2656_v21, %s5608_s14  ;;  %v2084_v21 = vmul.f32 1.442695, %v2075_v27  ;;  %v6643_v58 = vpop.eup %5219  ;;  %v2542_v27 = vmax.f32 %v6543_v55, 1e-24 }
 0x600   : > { %v2098_v4 = vsel %vm1241_vm2, %v6643_v58, 0.0 }
 0x601   : > { %5221 = vpow2.f32 %v2084_v21 }
 0x602   : > { %5223 = vpow2.f32 %v2086_v62 }
 0x603   : > { %3252 = vrot.lane.b32.xlu0 %v3250_v3, %s5606_s23  ;;  %5225 = vpow2.f32 %v2090_v14  ;;  %v2630_v3 = vmax.f32 %v6531_v35, 1e-24 }
 0x604   : > { %5227 = vpow2.f32 %v2088_v25 }
 0x605   : > { %5229 = vpow2.f32 %v2092_v31 }
 0x606   : > { %5231 = vrsqrt.f32 %v2631_v24 }
 0x607   : > { %3424 = vrot.lane.b32.xlu0 %v3407_v17, %s5607_s26  ;;  %5233 = vrsqrt.f32 %v2630_v3 }
 0x608   : > { %5235 = vrsqrt.f32 %v2633_v33 }
 0x609   : > { %5237 = vrsqrt.f32 %v2541_v13 }
 0x60a   : > { %5239 = vrsqrt.f32 %v2542_v27 }
 0x60b   : > { %3428 = vrot.lane.b32.xlu0 %v3409_v60, %s5607_s26  ;;  %5241 = vrsqrt.f32 %v2632_v7  ;;  %v3243_v7 = vunpack.c.h.bf16 %v6577_v47 }
 0x60c   : > { %5243 = vrsqrt.f32 %v2634_v45 }
 0x60d   : > { %5245 = vrsqrt.f32 %v2635_v22  ;;  %v3242_v22 = vunpack.c.h.bf16 %v6575_v50 }
 0x60e   : > { %v6647_v56 = vpop.eup %5221 }
 0x60f   : > { %v2101_v37 = vsel %vm1241_vm2, %v6647_v56, 0.0  ;;  %v6651_v5 = vpop.eup %5223 }
 0x610   : > { %v2104_v39 = vsel %vm1241_vm2, %v6651_v5, 0.0  ;;  %v6655_v9 = vpop.eup %5225 }
 0x611   : > { %v2110_v44 = vsel %vm1241_vm2, %v6655_v9, 0.0  ;;  %v6660_v46 = vpop.eup %5227 }
 0x612   : > { %v2107_v17 = vsel %vm1241_vm2, %v6660_v46, 0.0  ;;  %v6668_v23 = vpop.eup %5229 }
 0x613   : > { %v2113_v35 = vsel %vm1241_vm2, %v6668_v23, 0.0  ;;  %v5232_v55 = vpop.eup %5231 }
 0x614   : > { %v5234_v21 = vpop.eup %5233  ;;  %v2659_v63 = vmul.f32 %v5232_v55, %v6318_v61 }
 0x615   : > { %v5236_v60 = vpop.eup %5235  ;;  %v2658_v14 = vmul.f32 %v5234_v21, %v6250_v49 }
 0x616   : > { %2072 = vmax.xlane.f32.xlu1 %v2071_v10  ;;  %v5238_v62 = vpop.eup %5237  ;;  %v2661_v41 = vmul.f32 %v5236_v60, %v6326_v59 }
 0x617   : > { %v5240_v43 = vpop.eup %5239  ;;  %v2666_v25 = vpack.c.bf16 %v2659_v63, %v2658_v14  ;;  %v2558_v10 = vmul.f32 %v5238_v62, %v6600_v1  ;;  %v6735_v63 = vunpack.c.l.bf16 %v6595_v34 }
 0x618   : > { %v5242_v51 = vpop.eup %5241  ;;  %v2559_v36 = vmul.f32 %v5240_v43, %v6600_v1  ;;  %v3244_v43 = vunpack.c.h.bf16 %v6585_v11 }
 0x619   : > { %v2660_v16 = vmul.f32 %v5242_v51, %v6260_v40  ;;  %v6689_v40 = vpop.xlane.xlu1 %2539  ;;  %v3413_v14 = vmul.f32 %v6735_v63, %v6735_v63 }
 0x61a   : > { %2099 = vadd.xlane.f32.xlu1 %v2098_v4  ;;  %v2646_v4 = vmul.f32 %v2558_v10, %v6377_v6  ;;  %v2647_v61 = vmul.f32 %v2559_v36, %v6375_v8  ;;  %v7470_v6 = vmov 0.0  }
 0x61b   : > { %v2667_v31 = vpack.c.bf16 %v2661_v41, %v2660_v16 }
 0x61e   : > { %2102 = vadd.xlane.f32.xlu1 %v2101_v37  ;;  %v5244_v37 = vpop.eup %5243 }
 0x61f   : > { %v5246_v49 = vpop.eup %5245  ;;  %v2662_v59 = vmul.f32 %v5244_v37, %v6396_v18 }
 0x620   : > { %v2663_v24 = vmul.f32 %v5246_v49, %v6405_v29  ;;  %v3240_v29 = vunpack.c.h.bf16 %v6569_v48  ;;  %v2637_v49 = vmax.f32 %v6565_v28, 1e-24 }
 0x622   : > { %2105 = vadd.xlane.f32.xlu1 %v2104_v39  ;;  %v2654_v39 = vpack.c.bf16 %v2647_v61, %v2646_v4  ;;  %v2544_v61 = vmax.f32 %v6551_v19, 1e-24 }
 0x626   : > { %2111 = vadd.xlane.f32.xlu1 %v2110_v44  ;;  %v2668_v44 = vpack.c.bf16 %v2663_v24, %v2662_v59  ;;  %v2636_v59 = vmax.f32 %v6563_v15, 1e-24  ;;  %v2547_v24 = vmax.f32 %v6567_v52, 1e-24 }
 0x62a   : > { %2108 = vadd.xlane.f32.xlu1 %v2107_v17  ;;  %v3241_v17 = vunpack.c.h.bf16 %v6571_v2 }
 0x62e   : > { %2114 = vadd.xlane.f32.xlu1 %v2113_v35  ;;  %v3245_v35 = vunpack.c.h.bf16 %v6587_v38  ;;  %v6723_v38 = vld [vmem:[#allocation2 + $0x1c] ss:$36 sps:$4 sm:$0xff]  }
 0x62f   : > { %v6729_v60 = vunpack.c.h.bf16 %v6723_v38 }
 0x631   : > { %v3411_v62 = vmul.f32 %v6729_v60, %v6729_v60 }
 0x63f   : > { %2674 = vrot.lane.b32.xlu1 %v2666_v25, %s5608_s14  ;;  %v3246_v25 = vunpack.c.h.bf16 %v6593_v53  ;;  %v2543_v53 = vmax.f32 %v6555_v26, 1e-24 }
 0x643   : > { %2727 = vrot.lane.b32.xlu1 %v2667_v31, %s5608_s14 }
 0x647   : > { %2671 = vrot.lane.b32.xlu1 %v2654_v39, %s5608_s14 }
 0x64b   : > { %2780 = vrot.lane.b32.xlu1 %v2668_v44, %s5608_s14 }
 0x65c   : > { %v2144_v3 = vpop.permute.xlu1 %2143 }
 0x65d   : > { %4822 = vmatpush3.bf16.msra.mxu0 %v2144_v3 }
 0x65e   : > { %4833 = vmatprep.subr.bf16.mxu0 %v7470_v6 }
 0x660   : > { %v2192_v8 = vpop.permute.xlu1 %2191 }
 0x661   : > { %4828 = vmatpush3.bf16.msra.mxu1 %v2192_v8 }
 0x662   : > { %4839 = vmatprep.subr.bf16.mxu1 %v7470_v6 }
 0x664   : > { %v2240_v10 = vpop.permute.xlu1 %2239 }
 0x66e   : > { %v6693_v33 = vpop.xlane.xlu0 %2117 }
 0x672   : > { %v6695_v18 = vpop.permute.xlu0 %2287 }
 0x676   : > { %v6697_v13 = vpop.permute.xlu0 %2777 }
 0x67a   : > { %v6700_v27 = vpop.permute.xlu0 %3252 }
 0x67b   : > { %v6706_v45 = vadd.f32 %v6700_v27, %v3240_v29  ;;  %v6710_v55 = vadd.f32 %v6700_v27, %v3241_v17  ;;  %v6713_v21 = vadd.f32 %v6700_v27, %v3243_v7  ;;  %v6716_v48 = vadd.f32 %v6700_v27, %v3245_v35 }
 0x67c   : > { %v6721_v47 = vadd.f32 %v6700_v27, %v3242_v22  ;;  %v6742_v51 = vadd.f32 %v6700_v27, %v3244_v43  ;;  %v6749_v34 = vadd.f32 %v6700_v27, %v3246_v25 }
 0x67d   : > { %v3318_v2 = vmul.f32 %v6706_v45, %v6706_v45 }
 0x67e   : > { %v3320_v50 = vmul.f32 %v6721_v47, %v6721_v47  ;;  %v3322_v41 = vmul.f32 %v6742_v51, %v6742_v51  ;;  %v3324_v11 = vmul.f32 %v6749_v34, %v6749_v34 }
 0x67f   : > { %3335 = vrot.lane.b32.xlu0 %v3318_v2, %s5607_s26 }
 0x683   : > { %3339 = vrot.lane.b32.xlu0 %v3320_v50, %s5607_s26 }
 0x687   : > { %3432 = vrot.lane.b32.xlu0 %v3411_v62, %s5607_s26 }
 0x68b   : > { %3436 = vrot.lane.b32.xlu0 %v3413_v14, %s5607_s26 }
 0x68f   : > { %3343 = vrot.lane.b32.xlu0 %v3322_v41, %s5607_s26 }
 0x693   : > { %3347 = vrot.lane.b32.xlu0 %v3324_v11, %s5607_s26 }
 0x69f   : > { %v2073_v36 = vpop.xlane.xlu1 %2072 }
 0x6a0   : > { %v2081_v16 = vsub.f32 %v6635_v32, %v2073_v36  ;;  %v2548_v32 = vmax.f32 %v6689_v40, 1e-24 }
 0x6a2   : > { %v2096_v31 = vmul.f32 1.442695, %v2081_v16  ;;  %v7471_v16 = vld [vmem:[#allocation20_spill] sm:$0xff] }
 0x6a3   : > { %v2100_v4 = vpop.xlane.xlu1 %2099 }
 0x6a4   : > { %5247 = vpow2.f32 %v2096_v31 }
 0x6a5   : > { %5249 = vrcp.f32 %v2100_v4 }
 0x6a7   : > { %v2103_v37 = vpop.xlane.xlu1 %2102 }
 0x6a8   : > { %5251 = vrcp.f32 %v2103_v37  ;;  %v7472_v37 = vld [vmem:[#allocation19_spill] sm:$0xff] }
 0x6a9   : > { %5253 = vrsqrt.f32 %v2543_v53 }
 0x6aa   : > { %5255 = vrsqrt.f32 %v2544_v61 }
 0x6ab   : > { %v2106_v39 = vpop.xlane.xlu1 %2105  ;;  %5257 = vrsqrt.f32 %v2637_v49 }
 0x6ac   : > { %5259 = vrsqrt.f32 %v2636_v59 }
 0x6ad   : > { %5261 = vrsqrt.f32 %v2547_v24  ;;  %v7473_v24 = vld [vmem:[#allocation22_spill] sm:$0xff] }
 0x6ae   : > { %5263 = vrcp.f32 %v2106_v39 }
 0x6af   : > { %v2112_v44 = vpop.xlane.xlu1 %2111  ;;  %5265 = vrsqrt.f32 %v2548_v32 }
 0x6b1   : > { %v6762_v26 = vpop.eup %5247 }
 0x6b2   : > { %v2119_v19 = vsel %vm1241_vm2, %v6762_v26, 0.0  ;;  %v5250_v3 = vpop.eup %5249 }
 0x6b3   : > { %2120 = vadd.xlane.f32.xlu1 %v2119_v19  ;;  %v2109_v28 = vpop.xlane.xlu1 %2108  ;;  %v2130_v52 = vmul.f32 %v5250_v3, %v6643_v58 }
 0x6b4   : > { %5267 = vrcp.f32 %v2109_v28 }
 0x6b5   : > { %v5252_v15 = vpop.eup %5251  ;;  %5269 = vrcp.f32 %v2112_v44  ;;  %v3263_v44 = vld [vmem:[#allocation2] sm:$0xff]  }
 0x6b6   : > { %v5254_v8 = vpop.eup %5253  ;;  %v2131_v40 = vmul.f32 %v5252_v15, %v6647_v56  ;;  %v6797_v15 = vunpack.c.h.bf16 %v3263_v44 }
 0x6b7   : > { %v2115_v29 = vpop.xlane.xlu1 %2114  ;;  %v5256_v17 = vpop.eup %5255  ;;  %v2560_v35 = vmul.f32 %v5254_v8, %v6600_v1  ;;  %v6806_v8 = vunpack.c.l.bf16 %v6723_v38 }
 0x6b8   : > { %5271 = vrcp.f32 %v2115_v29  ;;  %v2138_v7 = vpack.c.bf16 %v2131_v40, %v2130_v52  ;;  %v2561_v22 = vmul.f32 %v5256_v17, %v6600_v1  ;;  %v5258_v2 = vpop.eup %5257  ;;  %v3239_v40 = vunpack.c.l.bf16 %v3263_v44 }
 0x6b9   : > { %v5260_v58 = vpop.eup %5259  ;;  %v2648_v56 = vmul.f32 %v2560_v35, %v6390_v0  ;;  %v2665_v49 = vmul.f32 %v5258_v2, %v7472_v37  ;;  %v3408_v17 = vmul.f32 %v6806_v8, %v6806_v8  ;;  %v3267_v35 = vld [vmem:[#allocation2 + $0x34] ss:$24 sps:$4 sm:$0xff]   ;;  %5273 = vrcp.f32 %v6693_v33 }
 0x6ba   : > { %4824 = vmatmul.mubr.msk.bf16.vlgmr.msra.gmra.mxu0 %vm1241_vm2, %v2138_v7  ;;  %v5262_v62 = vpop.eup %5261  ;;  %v2649_v14 = vmul.f32 %v2561_v22, %v6388_v54  ;;  %v2664_v31 = vmul.f32 %v5260_v58, %v7471_v16  ;;  %v6814_v7 = vadd.f32 %v6700_v27, %v3239_v40  ;;  %v3319_v27 = vmul.f32 %v6710_v55, %v6710_v55 }
 0x6bb   : > { %4834 = vmatpush3.bf16.msra.mxu0 %v2240_v10  ;;  %4835 = vmatprep.mubr.msk.bf16.mxu0 %vm5605_vm1, %v7470_v6  ;;  %v2675_v50 = vpop.permute.xlu1 %2674  ;;  %v5264_v43 = vpop.eup %5263  ;;  %v2564_v4 = vmul.f32 %v5262_v62, %v6600_v1  ;;  %v6827_v22 = vunpack.c.l.bf16 %v3267_v35  ;;  %v6834_v58 = vunpack.c.h.bf16 %v3267_v35  ;;  %v7475_v62 = vld [vmem:[#allocation23_spill] sm:$0xff] }
 0x6bc   : > { %4845 = vmatprep.subr.bf16.mxu0 %v7470_v6  ;;  %v5266_v25 = vpop.eup %5265  ;;  %v2655_v11 = vpack.c.bf16 %v2649_v14, %v2648_v56  ;;  %v2132_v10 = vmul.f32 %v5264_v43, %v6651_v5  ;;  %v2669_v5 = vpack.c.bf16 %v2665_v49, %v2664_v31  ;;  %v3317_v38 = vmul.f32 %v6814_v7, %v6814_v7  ;;  %v3425_v14 = vpop.permute.xlu0 %3424 }
 0x6bd   : > { %v2565_v54 = vmul.f32 %v5266_v25, %v6600_v1  ;;  %v2652_v32 = vmul.f32 %v2564_v4, %v7473_v24  ;;  %v7474_v1 = vld [vmem:[#allocation21_spill] sm:$0xff]  ;;  %v3410_v2 = vmul.f32 %v6827_v22, %v6827_v22  ;;  %v3323_v56 = vmul.f32 %v6716_v48, %v6716_v48 }
 0x6be   : > { %v3315_v43 = vrot.slane %v7475_v62, 3 }
 0x6bf   : > { %v6780_v61 = vpop.permute.xlu1 %2727  ;;  %v2653_v3 = vmul.f32 %v2565_v54, %v7474_v1 }
 0x6c0   : > { %4971 = vpush %v3315_v43  ;;  %v3429_v25 = vpop.permute.xlu0 %3428  ;;  %v2733_v44 = vsel %vm923_vm0, %v6780_v61, 0 }
 0x6c1   : > { %v5268_v41 = vpop.eup %5267 }
 0x6c2   : > { %v2133_v36 = vmul.f32 %v5268_v41, %v6660_v46  ;;  %v5270_v53 = vpop.eup %5269  ;;  %v3449_v41 = vsel %vm923_vm0, %v3425_v14, 0.0  ;;  %v6884_v14 = vld [vmem:[#allocation9 + $0x28] sm:$0xff] }
 0x6c3   : > { %v2134_v46 = vmul.f32 %v5270_v53, %v6655_v9  ;;  %v2672_v28 = vpop.permute.xlu1 %2671  ;;  %v2680_v9 = vsel %vm923_vm0, %v2675_v50, 0  ;;  %v3321_v50 = vmul.f32 %v6713_v21, %v6713_v21 }
 0x6c4   : > { %2724 = vrot.lane.b32.xlu1 %v2655_v11, %s5608_s14  ;;  %v2139_v0 = vpack.c.bf16 %v2133_v36, %v2132_v10  ;;  %v3455_v10 = vsel %vm923_vm0, %v3429_v25, 0.0  ;;  %v6886_v25 = vld [vmem:[#allocation10] sm:$0xff] }
 0x6c5   : > { %v5272_v39 = vpop.eup %5271 }
 0x6c6   : > { %4830 = vmatmul.mubr.msk.bf16.vlgmr.msra.gmra.mxu1 %vm1241_vm2, %v2139_v0  ;;  %v2135_v59 = vmul.f32 %v5272_v39, %v6668_v23  ;;  %v2657_v23 = vpack.c.bf16 %v2653_v3, %v2652_v32  ;;  %v5274_v37 = vpop.eup %5273  ;;  %v7476_v39 = vld [vmem:[#allocation25_spill] sm:$0xff] }
 0x6c7   : > { %4840 = vmatpush3.bf16.msra.mxu1 %v6695_v18  ;;  %4841 = vmatprep.mubr.msk.bf16.mxu1 %vm5605_vm1, %v7470_v6  ;;  %v3406_v18 = vmul.f32 %v6797_v15, %v6797_v15  ;;  %v2781_v52 = vpop.permute.xlu1 %2780 }
 0x6c8   : > { %2833 = vrot.lane.b32.xlu1 %v2669_v5, %s5608_s14  ;;  %v2140_v19 = vpack.c.bf16 %v2135_v59, %v2134_v46  ;;  %4851 = vmatprep.subr.bf16.mxu1 %v7470_v6  ;;  %v2786_v29 = vsel %vm923_vm0, %v2781_v52, 0  ;;  %v2136_v5 = vmul.f32 %v5274_v37, %v7476_v39 }
 0x6ca   : > { %4836 = vmatmul.mubr.msk.bf16.vlgmr.msra.gmra.mxu0 %vm1241_vm2, %v2140_v19 }
 0x6cb   : > { %4846 = vmatpush3.bf16.xpose.msra.mxu0 %v2680_v9  ;;  %4847 = vmatprep.mubr.msk.bf16.mxu0 %vm5605_vm1, %v7470_v6 }
 0x6cc   : > { %2830 = vrot.lane.b32.xlu1 %v2657_v23, %s5608_s14  ;;  %4857 = vmatprep.subr.bf16.mxu0 %v7470_v6 }
 0x6d0   : > { %3422 = vrot.lane.b32.xlu1 %v3406_v18, %s5607_s26 }
 0x6d2   : > { %4848 = vmatmul.mubr.msk.bf16.vlgmr.msra.gmra.mxu0 %vm923_vm0, %v2672_v28 }
 0x6d3   : > { %4858 = vmatpush3.bf16.xpose.msra.mxu0 %v2786_v29  ;;  %4859 = vmatprep.mubr.msk.bf16.mxu0 %vm5605_vm1, %v7470_v6 }
 0x6d4   : > { %3426 = vrot.lane.b32.xlu1 %v3408_v17, %s5607_s26  ;;  %4869 = vmatprep.subr.bf16.mxu0 %v7470_v6 }
 0x6d8   : > { %3333 = vrot.lane.b32.xlu1 %v3317_v38, %s5607_s26 }
 0x6da   : > { %4860 = vmatmul.mubr.msk.bf16.vlgmr.msra.gmra.mxu0 %vm923_vm0, %v6697_v13  ;;  %v3412_v13 = vmul.f32 %v6834_v58, %v6834_v58 }
 0x6db   : > { %4871 = vmatprep.mubr.msk.bf16.mxu0 %vm5605_vm1, %v7470_v6 }
 0x6dc   : > { %3337 = vrot.lane.b32.xlu1 %v3319_v27, %s5607_s26 }
 0x6e0   : > { %3430 = vrot.lane.b32.xlu1 %v3410_v2, %s5607_s26 }
 0x6e4   : > { %3434 = vrot.lane.b32.xlu1 %v3412_v13, %s5607_s26 }
 0x6e8   : > { %3341 = vrot.lane.b32.xlu1 %v3321_v50, %s5607_s26  ;;  %v826_v50 = vld [vmem:[#allocation9 + $0x20] sm:$0xff] }
 0x6ec   : > { %3345 = vrot.lane.b32.xlu1 %v3323_v56, %s5607_s26 }
 0x6f1   : > { %v3336_v11 = vpop.permute.xlu0 %3335  ;;  %s4972_s25 = spop %4971 }
 0x6f2   : > { %v3360_v36 = vsel %vm923_vm0, %v3336_v11, 0.0 }
 0x6f5   : > { %v3340_v16 = vpop.permute.xlu0 %3339 }
 0x6f6   : > { %v3366_v31 = vsel %vm923_vm0, %v3340_v16, 0.0 }
 0x710   : > { %3450 = vadd.xlane.f32.xlu1 %v3449_v41 }
 0x714   : > { %3456 = vadd.xlane.f32.xlu1 %v3455_v10 }
 0x718   : > { %3361 = vadd.xlane.f32.xlu1 %v3360_v36 }
 0x71c   : > { %3367 = vadd.xlane.f32.xlu1 %v3366_v31  ;;  %v6894_v31 = vld [vmem:[#allocation10 + $0x8] sm:$0xff] }
 0x73c   : > { %v2121_v4 = vpop.xlane.xlu1 %2120 }
 0x73d   : > { %5275 = vrcp.f32 %v2121_v4 }
 0x740   : > { %v2725_v53 = vpop.permute.xlu1 %2724 }
 0x744   : > { %v2834_v0 = vpop.permute.xlu1 %2833 }
 0x745   : > { %v2839_v3 = vsel %vm923_vm0, %v2834_v0, 0 }
 0x748   : > { %v2831_v49 = vpop.permute.xlu1 %2830 }
 0x74a   : > { %v5276_v54 = vpop.eup %5275 }
 0x74b   : > { %v2137_v46 = vmul.f32 %v5276_v54, %v6762_v26 }
 0x74c   : > { %v3423_v59 = vpop.permute.xlu1 %3422 }
 0x74d   : > { %v3446_v24 = vsel %vm923_vm0, %v3423_v59, 0.0  ;;  %v2141_v32 = vpack.c.bf16 %v2137_v46, %v2136_v5 }
 0x74e   : > { %3447 = vadd.xlane.f32.xlu0 %v3446_v24 }
 0x74f   : > { %4842 = vmatmul.mubr.msk.bf16.vlgmr.msra.gmra.mxu1 %vm1241_vm2, %v2141_v32 }
 0x750   : > { %4852 = vmatpush3.bf16.xpose.msra.mxu1 %v2733_v44  ;;  %v3427_v33 = vpop.permute.xlu1 %3426  ;;  %4853 = vmatprep.mubr.msk.bf16.mxu1 %vm5605_vm1, %v7470_v6 }
 0x751   : > { %v3452_v19 = vsel %vm923_vm0, %v3427_v33, 0.0  ;;  %4863 = vmatprep.subr.bf16.mxu1 %v7470_v6 }
 0x752   : > { %3453 = vadd.xlane.f32.xlu0 %v3452_v19  ;;  %v6905_v19 = vld [vmem:[#allocation10 + $0x10] sm:$0xff] }
 0x753   : > { %7485 = vst [vmem:[#allocation28_spill] sm:$0xff] %v6905_v19 }
 0x754   : > { %v3334_v26 = vpop.permute.xlu1 %3333 }
 0x755   : > { %v3357_v1 = vsel %vm923_vm0, %v3334_v26, 0.0 }
 0x756   : > { %3358 = vadd.xlane.f32.xlu0 %v3357_v1 }
 0x757   : > { %4854 = vmatmul.mubr.msk.bf16.vlgmr.msra.gmra.mxu1 %vm923_vm0, %v2725_v53 }
 0x758   : > { %4864 = vmatpush3.bf16.xpose.msra.mxu1 %v2839_v3  ;;  %v3338_v61 = vpop.permute.xlu1 %3337  ;;  %4865 = vmatprep.mubr.msk.bf16.mxu1 %vm5605_vm1, %v7470_v6  ;;  %v6910_v3 = vld [vmem:[#allocation10 + $0x20] sm:$0xff] }
 0x759   : > { %v3363_v28 = vsel %vm923_vm0, %v3338_v61, 0.0  ;;  %4875 = vmatprep.subr.bf16.mxu1 %v7470_v6  ;;  %7486 = vst [vmem:[#allocation29_spill] sm:$0xff] %v6910_v3 }
 0x75a   : > { %3364 = vadd.xlane.f32.xlu0 %v3363_v28 }
 0x75f   : > { %4866 = vmatmul.mubr.msk.bf16.vlgmr.msra.gmra.mxu1 %vm923_vm0, %v2831_v49 }
 0x760   : > { %4877 = vmatprep.mubr.msk.bf16.mxu1 %vm5605_vm1, %v7470_v6 }
 0x77a   : > { %v6872_v9 = vpop.f32.mrf.mxu0 }
 0x77b   : > { %7477 = vst [vmem:[#allocation20_spill] sm:$0xff] %v6872_v9 }
 0x77c   : > { %v4825_v23 = vpop.f32.mrf.mxu0 }
 0x77e   : > { %v6874_v18 = vpop.f32.mrf.mxu0 }
 0x77f   : > { %7478 = vst [vmem:[#allocation19_spill] sm:$0xff] %v6874_v18 }
 0x780   : > { %v4826_v52 = vpop.f32.mrf.mxu0 }
 0x786   : > { %v6876_v40 = vpop.f32.mrf.mxu1 }
 0x787   : > { %7479 = vst [vmem:[#allocation22_spill] sm:$0xff] %v6876_v40 }
 0x788   : > { %v4831_v29 = vpop.f32.mrf.mxu1 }
 0x78a   : > { %v6878_v17 = vpop.f32.mrf.mxu1  ;;  %v6880_v38 = vpop.f32.mrf.mxu0 }
 0x78b   : > { %7480 = vst [vmem:[#allocation21_spill] sm:$0xff] %v6878_v17  ;;  %7481 = vst [vmem:[#allocation23_spill] sm:$0xff] %v6880_v38 }
 0x78c   : > { %v4832_v35 = vpop.f32.mrf.mxu1  ;;  %v4837_v27 = vpop.f32.mrf.mxu0 }
 0x78d   : > { %v3433_v35 = vpop.permute.xlu0 %3432  ;;  %v6919_v27 = vld [vmem:[#allocation10 + $0x18] sm:$0xff] }
 0x78e   : > { %v6882_v2 = vpop.f32.mrf.mxu0  ;;  %7487 = vst [vmem:[#allocation30_spill] sm:$0xff] %v6919_v27 }
 0x78f   : > { %7482 = vst [vmem:[#allocation25_spill] sm:$0xff] %v6882_v2  ;;  %v2439_v2 = vld [vmem:[#allocation2 + $0x8] ss:$12 sps:$4 sm:$0xff]  }
 0x790   : > { %v4838_v13 = vpop.f32.mrf.mxu0 }
 0x792   : > { %v2716_v56 = vpop.f32.mrf.mxu0 }
 0x793   : > { %v2717_v62 = vadd.f32 %v2716_v56, %v826_v50  ;;  %v3431_v56 = vpop.permute.xlu1 %3430 }
 0x794   : > { %v4849_v43 = vpop.f32.mrf.mxu0 }
 0x795   : > { %v6889_v41 = vadd.f32 %v6886_v25, %v2717_v62  ;;  %v6924_v43 = vld [vmem:[#allocation10 + $0x28] sm:$0xff] }
 0x796   : > { %v2719_v11 = vpop.f32.mrf.mxu0  ;;  %7488 = vst [vmem:[#allocation31_spill] sm:$0xff] %v6924_v43 }
 0x797   : > { %v2720_v10 = vadd.f32 %v2719_v11, %v6884_v14  ;;  %v2890_v36 = vsel %vm1241_vm2, %v6889_v41, -inf }
 0x798   : > { %2891 = vmax.xlane.f32.xlu1 %v2890_v36  ;;  %v4850_v16 = vpop.f32.mrf.mxu0 }
 0x799   : > { %v6897_v4 = vadd.f32 %v6894_v31, %v2720_v10 }
 0x79a   : > { %v2822_v53 = vpop.f32.mrf.mxu0 }
 0x79b   : > { %v2893_v0 = vsel %vm1241_vm2, %v6897_v4, -inf  ;;  %v2823_v32 = vadd.f32 %v2822_v53, %v826_v50 }
 0x79c   : > { %v4861_v37 = vpop.f32.mrf.mxu0  ;;  %2894 = vmax.xlane.f32.xlu0 %v2893_v0  ;;  %v6931_v0 = vld [vmem:[#allocation10 + $0x30] sm:$0xff] }
 0x79d   : > { %v6913_v61 = vadd.f32 %v6910_v3, %v2823_v32  ;;  %7489 = vst [vmem:[#allocation32_spill] sm:$0xff] %v6931_v0  ;;  %v3461_v32 = vsel %vm923_vm0, %v3433_v35, 0.0 }
 0x79e   : > { %v2825_v49 = vpop.f32.mrf.mxu0 }
 0x79f   : > { %v2826_v28 = vadd.f32 %v2825_v49, %v6884_v14  ;;  %v2902_v16 = vsel %vm1241_vm2, %v6913_v61, -inf }
 0x7a0   : > { %v4862_v54 = vpop.f32.mrf.mxu0 }
 0x7a1   : > { %v2887_v11 = vadd.f32 %v6924_v43, %v2826_v28  ;;  %v3437_v54 = vpop.permute.xlu0 %3436 }
 0x7a2   : > { %v3467_v28 = vsel %vm923_vm0, %v3437_v54, 0.0 }
 0x80f   : > { %v6901_v39 = vpop.f32.mrf.mxu1 }
 0x810   : > { %7483 = vst [vmem:[#allocation26_spill] sm:$0xff] %v6901_v39 }
 0x811   : > { %v4843_v5 = vpop.f32.mrf.mxu1 }
 0x812   : > { %v2905_v5 = vsel %vm1241_vm2, %v2887_v11, -inf }
 0x813   : > { %v6903_v46 = vpop.f32.mrf.mxu1 }
 0x814   : > { %7484 = vst [vmem:[#allocation27_spill] sm:$0xff] %v6903_v46 }
 0x815   : > { %v4844_v59 = vpop.f32.mrf.mxu1 }
 0x816   : > { %v3435_v59 = vpop.permute.xlu1 %3434 }
 0x817   : > { %v2769_v24 = vpop.f32.mrf.mxu1 }
 0x818   : > { %v2770_v44 = vadd.f32 %v2769_v24, %v826_v50 }
 0x819   : > { %v4855_v33 = vpop.f32.mrf.mxu1 }
 0x81a   : > { %v6908_v26 = vadd.f32 %v6905_v19, %v2770_v44  ;;  %v3458_v44 = vsel %vm923_vm0, %v3431_v56, 0.0  ;;  %v3344_v33 = vpop.permute.xlu0 %3343 }
 0x81b   : > { %v2772_v1 = vpop.f32.mrf.mxu1 }
 0x81c   : > { %v2773_v23 = vadd.f32 %v2772_v1, %v6884_v14  ;;  %v2896_v52 = vsel %vm1241_vm2, %v6908_v26, -inf  ;;  %v3342_v1 = vpop.permute.xlu1 %3341 }
 0x81d   : > { %v4856_v29 = vpop.f32.mrf.mxu1  ;;  %2897 = vmax.xlane.f32.xlu0 %v2896_v52  ;;  %v3372_v52 = vsel %vm923_vm0, %v3344_v33, 0.0 }
 0x81e   : > { %v6922_v13 = vadd.f32 %v6919_v27, %v2773_v23  ;;  %v3464_v23 = vsel %vm923_vm0, %v3435_v59, 0.0  ;;  %v3369_v29 = vsel %vm923_vm0, %v3342_v1, 0.0 }
 0x81f   : > { %v2875_v62 = vpop.f32.mrf.mxu1 }
 0x820   : > { %v2876_v10 = vadd.f32 %v2875_v62, %v826_v50  ;;  %v2899_v36 = vsel %vm1241_vm2, %v6922_v13, -inf  ;;  %v3348_v62 = vpop.permute.xlu0 %3347 }
 0x821   : > { %2900 = vmax.xlane.f32.xlu1 %v2899_v36  ;;  %v4867_v53 = vpop.f32.mrf.mxu1  ;;  %2903 = vmax.xlane.f32.xlu0 %v2902_v16  ;;  %v3378_v35 = vsel %vm923_vm0, %v3348_v62, 0.0  ;;  %v7490_v36 = vsub.s32 2, %v5849_v42  ;;  %v7491_v16 = vld [vmem:[#allocation24_spill] sm:$0xff] }
 0x822   : > { %v6934_v37 = vadd.f32 %v6931_v0, %v2876_v10  ;;  %v3346_v10 = vpop.permute.xlu1 %3345 }
 0x823   : > { %v6936_v49 = vpop.f32.mrf.mxu1  ;;  %v3375_v56 = vsel %vm923_vm0, %v3346_v10, 0.0  ;;  %v2458_v53 = vrot.slane %v7491_v16, %v7490_v36 }
 0x824   : > { %v2908_v50 = vsel %vm1241_vm2, %v6934_v37, -inf  ;;  %v6953_v54 = vpop.xlane.xlu0 %3447 }
 0x825   : > { %2906 = vmax.xlane.f32.xlu1 %v2905_v5  ;;  %v4868_v24 = vpop.f32.mrf.mxu1  ;;  %2909 = vmax.xlane.f32.xlu0 %v2908_v50 }
 0x826   : > { %v6955_v5 = vpop.xlane.xlu1 %3450 }
 0x828   : > { %v6957_v50 = vpop.xlane.xlu0 %3453 }
 0x829   : > { %3462 = vadd.xlane.f32.xlu1 %v3461_v32  ;;  %3459 = vadd.xlane.f32.xlu0 %v3458_v44 }
 0x82a   : > { %v6959_v59 = vpop.xlane.xlu1 %3456 }
 0x82c   : > { %v6961_v24 = vpop.xlane.xlu0 %3358 }
 0x82d   : > { %3468 = vadd.xlane.f32.xlu1 %v3467_v28  ;;  %3465 = vadd.xlane.f32.xlu0 %v3464_v23 }
 0x82e   : > { %v6963_v32 = vpop.xlane.xlu1 %3361 }
 0x830   : > { %v6965_v44 = vpop.xlane.xlu0 %3364 }
 0x831   : > { %3373 = vadd.xlane.f32.xlu1 %v3372_v52  ;;  %3370 = vadd.xlane.f32.xlu0 %v3369_v29 }
 0x832   : > { %v6967_v33 = vpop.xlane.xlu1 %3367 }
 0x834   : > { %v6969_v1 = vpop.xlane.xlu0 %2894 }
 0x835   : > { %3379 = vadd.xlane.f32.xlu1 %v3378_v35  ;;  %3376 = vadd.xlane.f32.xlu0 %v3375_v56 }
 0x836   : > { %v6971_v28 = vpop.xlane.xlu1 %2891 }
 0x84b   : > { %2460 = vrot.lane.b32.xlu0 %v2458_v53, %s5608_s14 }
 0x8a6   : > { %v6973_v23 = vpop.xlane.xlu0 %2897 }
 0x8aa   : > { %v6975_v52 = vpop.xlane.xlu0 %2903  ;;  %v6977_v29 = vpop.xlane.xlu1 %2900 }
 0x8ae   : > { %v6979_v62 = vpop.xlane.xlu0 %2909  ;;  %v2907_v10 = vpop.xlane.xlu1 %2906 }
 0x8af   : > { %v2919_v35 = vsub.f32 %v2887_v11, %v2907_v10  ;;  %v2441_v11 = vld [vmem:[#allocation2 + $0x20] ss:$12 sps:$4 sm:$0xff]  }
 0x8b1   : > { %v2932_v56 = vmul.f32 1.442695, %v2919_v35 }
 0x8b2   : > { %v3460_v36 = vpop.xlane.xlu0 %3459  ;;  %v3463_v16 = vpop.xlane.xlu1 %3462 }
 0x8b3   : > { %v3474_v53 = vmax.f32 %v3460_v36, 1e-24  ;;  %v3475_v12 = vmax.f32 %v3463_v16, 1e-24  ;;  %5277 = vpow2.f32 %v2932_v56  ;;  %v2447_v36 = vunpack.c.l.bf16 %v2439_v2 }
 0x8b4   : > { %v2448_v56 = vunpack.c.h.bf16 %v2439_v2 }
 0x8b5   : > { %5279 = vrsqrt.f32 %v3474_v53 }
 0x8b6   : > { %5281 = vrsqrt.f32 %v3475_v12  ;;  %v3466_v39 = vpop.xlane.xlu0 %3465  ;;  %v3469_v38 = vpop.xlane.xlu1 %3468 }
 0x8b7   : > { %v3476_v42 = vmax.f32 %v3466_v39, 1e-24  ;;  %v3477_v10 = vmax.f32 %v3469_v38, 1e-24 }
 0x8ba   : > { %v3371_v17 = vpop.xlane.xlu0 %3370  ;;  %v3374_v40 = vpop.xlane.xlu1 %3373 }
 0x8bb   : > { %v3385_v18 = vmax.f32 %v3371_v17, 1e-24  ;;  %v3386_v9 = vmax.f32 %v3374_v40, 1e-24  ;;  %v2449_v17 = vunpack.c.l.bf16 %v2441_v11  ;;  %v2450_v40 = vunpack.c.h.bf16 %v2441_v11 }
 0x8bd   : > { %5283 = vrsqrt.f32 %v3385_v18 }
 0x8be   : > { %5285 = vrsqrt.f32 %v3386_v9  ;;  %v3377_v46 = vpop.xlane.xlu0 %3376  ;;  %v3380_v35 = vpop.xlane.xlu1 %3379 }
 0x8bf   : > { %v3387_v12 = vmax.f32 %v3377_v46, 1e-24  ;;  %5287 = vrsqrt.f32 %v3476_v42  ;;  %v3388_v9 = vmax.f32 %v3380_v35, 1e-24  ;;  %v2445_v35 = vld [vmem:[#allocation2 + $0x50] ss:$12 sps:$4 sm:$0xff]  }
 0x8c0   : > { %v6981_v0 = vpop.eup %5277  ;;  %5289 = vrsqrt.f32 %v3477_v10  ;;  %v6994_v10 = vstv %s4972_s25  ;;  %s5518_s25 = scalar_lea.vmem %s7358_s19, 512 }
 0x8c1   : > { %v2953_v43 = vsel %vm1241_vm2, %v6981_v0, 0.0  ;;  %5291 = vrsqrt.f32 %v3387_v12  ;;  %p5519_p2 = scmp.ne.s32.totalorder %s7358_s19, %s5518_s25  ;;  %p5526_p0 = scmp.lt.s32.totalorder %s5524_s27, %s5518_s25 }
 0x8c2   : > { %v5280_v16 = vpop.eup %5279  ;;  %v2461_v53 = vpop.permute.xlu0 %2460  ;;  %2954 = vadd.xlane.f32.xlu0 %v2953_v43  ;;  %5293 = vrsqrt.f32 %v3388_v9 }
 0x8c3   : > { %v5282_v18 = vpop.eup %5281  ;;  %v2463_v39 = vadd.f32 %v2461_v53, %v2447_v36  ;;  %v2464_v27 = vadd.f32 %v2461_v53, %v2448_v56  ;;  %v2465_v38 = vadd.f32 %v2461_v53, %v2449_v17  ;;  %v2466_v19 = vadd.f32 %v2461_v53, %v2450_v40  ;;  %p5520_p5 = pnand %p5519_p2, %p7507_p3  ;;  %p5527_p10 = por %p5526_p0, %p5525_p9 }
 0x8c4   : > { %v6986_v2 = vmul.f32 %v5280_v16, %v6827_v22  ;;  %v6989_v46 = vmul.f32 %v5282_v18, %v6729_v60  ;;  %v2453_v16 = vunpack.c.l.bf16 %v2445_v35 }
 0x8c5   : > { %v2471_v3 = vpack.c.bf16 %v2464_v27, %v2463_v39  ;;  %v2472_v43 = vpack.c.bf16 %v2466_v19, %v2465_v38  ;;  %v2454_v19 = vunpack.c.h.bf16 %v2445_v35  ;;  %p5521_p7 = pneg %p5520_p5 }
 0x8c6   : > { %v3508_v42 = vpack.c.bf16 %v6989_v46, %v6986_v2  ;;  %v2469_v40 = vadd.f32 %v2461_v53, %v2453_v16  ;;  %v2443_v16 = vld [vmem:[#allocation2 + $0x38] ss:$12 sps:$4 sm:$0xff]  }
 0x8c7   : > { %2983 = vrot.lane.b32.xlu1 %v2471_v3, %s5608_s14  ;;  %v2470_v18 = vadd.f32 %v2461_v53, %v2454_v19  ;;  %v2451_v19 = vunpack.c.l.bf16 %v2443_v16  ;;  %p5528_p12 = pnand %p5527_p10, %p5521_p7 }
 0x8c9   : > { %v2474_v38 = vpack.c.bf16 %v2470_v18, %v2469_v40  ;;  %v2914_v18 = vsub.f32 %v6889_v41, %v6971_v28 }
 0x8ca   : > { %v5284_v11 = vpop.eup %5283 }
 0x8cb   : > { %v5286_v27 = vpop.eup %5285  ;;  %3031 = vrot.lane.b32.xlu1 %v2472_v43, %s5608_s14  ;;  %v3402_v22 = vmul.f32 %v5284_v11, %v6994_v10 }
 0x8cc   : > { %v3403_v60 = vmul.f32 %v5286_v27, %v6994_v10  ;;  %v5288_v56 = vpop.eup %5287 }
 0x8cd   : > { %v7000_v36 = vmul.f32 %v3402_v22, %v6713_v21  ;;  %v5290_v17 = vpop.eup %5289  ;;  %v3504_v43 = vmul.f32 %v5288_v56, %v6834_v58  ;;  %v2879_v58 = vadd.f32 %v6936_v49, %v6884_v14  ;;  %v2916_v49 = vsub.f32 %v6908_v26, %v6973_v23 }
 0x8ce   : > { %v7003_v3 = vmul.f32 %v3403_v60, %v6742_v51  ;;  %v5292_v9 = vpop.eup %5291  ;;  %v3505_v21 = vmul.f32 %v5290_v17, %v6735_v63  ;;  %v2467_v17 = vadd.f32 %v2461_v53, %v2451_v19  ;;  %v3470_v23 = vmax.f32 %v6953_v54, 1e-24 }
 0x8cf   : > { %v5294_v39 = vpop.eup %5293  ;;  %v3404_v11 = vmul.f32 %v5292_v9, %v6994_v10  ;;  %v7019_v63 = vadd.f32 %v6631_v20, %v2879_v58  ;;  %v2922_v9 = vmul.f32 1.442695, %v2914_v18  ;;  %v2915_v20 = vsub.f32 %v6897_v4, %v6969_v1 }
 0x8d0   : > { %v3496_v12 = vpack.c.bf16 %v7003_v3, %v7000_v36  ;;  %v3405_v51 = vmul.f32 %v5294_v39, %v6994_v10  ;;  %v3509_v27 = vpack.c.bf16 %v3505_v21, %v3504_v43  ;;  %v2926_v39 = vmul.f32 1.442695, %v2916_v49 }
 0x8d1   : > { %v3492_v22 = vmul.f32 %v3404_v11, %v6716_v48  ;;  %v2911_v56 = vsel %vm1241_vm2, %v7019_v63, -inf  ;;  %v2452_v48 = vunpack.c.h.bf16 %v2443_v16  ;;  %5295 = vpow2.f32 %v2922_v9 }
 0x8d2   : > { %v3493_v60 = vmul.f32 %v3405_v51, %v6749_v34  ;;  %v2924_v14 = vmul.f32 1.442695, %v2915_v20  ;;  %v2917_v43 = vsub.f32 %v6922_v13, %v6977_v29  ;;  %v3471_v29 = vmax.f32 %v6955_v5, 1e-24 }
 0x8d3   : > { %v2468_v34 = vadd.f32 %v2461_v53, %v2452_v48  ;;  %v2918_v53 = vsub.f32 %v6913_v61, %v6975_v52  ;;  %v3472_v21 = vmax.f32 %v6957_v50, 1e-24  ;;  %v3381_v11 = vmax.f32 %v6961_v24, 1e-24 }
 0x8d4   : > { %v3497_v35 = vpack.c.bf16 %v3493_v60, %v3492_v22  ;;  %5297 = vpow2.f32 %v2924_v14  ;;  %v2928_v41 = vmul.f32 1.442695, %v2917_v43  ;;  %v3473_v54 = vmax.f32 %v6959_v59, 1e-24 }
 0x8d5   : > { %v2473_v40 = vpack.c.bf16 %v2468_v34, %v2467_v17  ;;  %5299 = vpow2.f32 %v2926_v39  ;;  %v3382_v22 = vmax.f32 %v6963_v32, 1e-24 }
 0x8d8   : > { %3127 = vrot.lane.b32.xlu0 %v2474_v38, %s5608_s14  ;;  %v2930_v38 = vmul.f32 1.442695, %v2918_v53 }
 0x8da   : > { %5301 = vpow2.f32 %v2930_v38  ;;  %v3384_v38 = vmax.f32 %v6967_v33, 1e-24 }
 0x8db   : > { %5303 = vpow2.f32 %v2928_v41 }
 0x8dc   : > { %3673 = vrot.lane.b32.xlu0 %v3509_v27, %s5607_s26  ;;  %5305 = vrsqrt.f32 %v3470_v23 }
 0x8dd   : > { %5307 = vrsqrt.f32 %v3471_v29 }
 0x8de   : > { %v7034_v28 = vpop.eup %5295  ;;  %5309 = vrsqrt.f32 %v3472_v21 }
 0x8df   : > { %v2938_v4 = vsel %vm1241_vm2, %v7034_v28, 0.0  ;;  %5311 = vrsqrt.f32 %v3381_v11 }
 0x8e0   : > { %3670 = vrot.lane.b32.xlu0 %v3497_v35, %s5607_s26  ;;  %5313 = vrsqrt.f32 %v3473_v54 }
 0x8e1   : > { %v7038_v1 = vpop.eup %5297  ;;  %5315 = vrsqrt.f32 %v3382_v22 }
 0x8e2   : > { %v2941_v26 = vsel %vm1241_vm2, %v7038_v1, 0.0  ;;  %v7042_v61 = vpop.eup %5299 }
 0x8e3   : > { %v2944_v13 = vsel %vm1241_vm2, %v7042_v61, 0.0 }
 0x8e7   : > { %v7047_v52 = vpop.eup %5301 }
 0x8e8   : > { %v2950_v51 = vsel %vm1241_vm2, %v7047_v52, 0.0  ;;  %v7054_v27 = vpop.eup %5303 }
 0x8e9   : > { %v2947_v5 = vsel %vm1241_vm2, %v7054_v27, 0.0  ;;  %v5306_v24 = vpop.eup %5305 }
 0x8ea   : > { %v5308_v35 = vpop.eup %5307  ;;  %v3498_v58 = vmul.f32 %v5306_v24, %v6797_v15 }
 0x8eb   : > { %v5310_v59 = vpop.eup %5309  ;;  %v3499_v16 = vmul.f32 %v5308_v35, %v6614_v30 }
 0x8ec   : > { %v5312_v32 = vpop.eup %5311  ;;  %v3500_v17 = vmul.f32 %v5310_v59, %v6806_v8  ;;  %v2920_v8 = vsub.f32 %v6934_v37, %v6979_v62 }
 0x8ed   : > { %v3506_v48 = vpack.c.bf16 %v3499_v16, %v3498_v58  ;;  %v3398_v34 = vmul.f32 %v5312_v32, %v6994_v10 }
 0x8ee   : > { %v2934_v14 = vmul.f32 1.442695, %v2920_v8 }
 0x8ef   : > { %2912 = vmax.xlane.f32.xlu1 %v2911_v56  ;;  %v5314_v56 = vpop.eup %5313  ;;  %v3486_v15 = vmul.f32 %v3398_v34, %v6814_v7 }
 0x8f0   : > { %v5316_v19 = vpop.eup %5315  ;;  %5317 = vpow2.f32 %v2934_v14 }
 0x8f1   : > { %v3399_v18 = vmul.f32 %v5316_v19, %v6994_v10 }
 0x8f3   : > { %v3487_v20 = vmul.f32 %v3399_v18, %v6706_v45  ;;  %v3383_v45 = vmax.f32 %v6965_v44, 1e-24 }
 0x8f5   : > { %v3494_v30 = vpack.c.bf16 %v3487_v20, %v3486_v15 }
 0x8fd   : > { %v7075_v49 = vpop.eup %5317 }
 0x900   : > { %3079 = vrot.lane.b32.xlu1 %v2473_v40, %s5608_s14  ;;  %v3501_v40 = vmul.f32 %v5314_v56, %v6621_v57  ;;  %v2956_v57 = vsel %vm1241_vm2, %v7075_v49, 0.0 }
 0x902   : > { %v3507_v9 = vpack.c.bf16 %v3501_v40, %v3500_v17 }
 0x924   : > { %2939 = vadd.xlane.f32.xlu1 %v2938_v4 }
 0x928   : > { %2942 = vadd.xlane.f32.xlu1 %v2941_v26 }
 0x92c   : > { %2945 = vadd.xlane.f32.xlu1 %v2944_v13 }
 0x930   : > { %2951 = vadd.xlane.f32.xlu1 %v2950_v51 }
 0x934   : > { %2948 = vadd.xlane.f32.xlu1 %v2947_v5 }
 0x939   : > { %v2984_v50 = vpop.permute.xlu1 %2983 }
 0x93a   : > { %4870 = vmatpush3.bf16.msra.mxu0 %v2984_v50 }
 0x93b   : > { %4881 = vmatprep.subr.bf16.mxu0 %v7470_v6 }
 0x93d   : > { %v3032_v60 = vpop.permute.xlu1 %3031 }
 0x93e   : > { %4876 = vmatpush3.bf16.msra.mxu1 %v3032_v60 }
 0x93f   : > { %4887 = vmatprep.subr.bf16.mxu1 %v7470_v6 }
 0x945   : > { %3514 = vrot.lane.b32.xlu1 %v3506_v48, %s5607_s26 }
 0x949   : > { %3567 = vrot.lane.b32.xlu1 %v3507_v9, %s5607_s26 }
 0x94d   : > { %3511 = vrot.lane.b32.xlu1 %v3494_v30, %s5607_s26 }
 0x971   : > { %2957 = vadd.xlane.f32.xlu1 %v2956_v57 }
 0x978   : > { %v2913_v39 = vpop.xlane.xlu1 %2912 }
 0x979   : > { %v2921_v7 = vsub.f32 %v7019_v63, %v2913_v39 }
 0x97b   : > { %v2936_v53 = vmul.f32 1.442695, %v2921_v7 }
 0x97c   : > { %v3080_v23 = vpop.permute.xlu1 %3079 }
 0x97d   : > { %5319 = vpow2.f32 %v2936_v53 }
 0x97e   : > { %5321 = vrsqrt.f32 %v3383_v45 }
 0x97f   : > { %5323 = vrsqrt.f32 %v3384_v38 }
 0x98a   : > { %v7082_v37 = vpop.eup %5319 }
 0x98b   : > { %v2959_v62 = vsel %vm1241_vm2, %v7082_v37, 0.0  ;;  %v5322_v43 = vpop.eup %5321 }
 0x98c   : > { %2960 = vadd.xlane.f32.xlu1 %v2959_v62  ;;  %v5324_v41 = vpop.eup %5323  ;;  %v3400_v4 = vmul.f32 %v5322_v43, %v6994_v10 }
 0x98d   : > { %v3401_v63 = vmul.f32 %v5324_v41, %v6994_v10 }
 0x98e   : > { %v3488_v26 = vmul.f32 %v3400_v4, %v6710_v55  ;;  %v2955_v55 = vpop.xlane.xlu0 %2954 }
 0x98f   : > { %v3489_v44 = vmul.f32 %v3401_v63, %v6721_v47 }
 0x991   : > { %v3495_v33 = vpack.c.bf16 %v3489_v44, %v3488_v26  ;;  %v829_v26 = vld [vmem:[#allocation9 + $0x38] sm:$0xff] }
 0x99d   : > { %3620 = vrot.lane.b32.xlu1 %v3508_v42, %s5607_s26 }
 0x9a1   : > { %3564 = vrot.lane.b32.xlu1 %v3495_v33, %s5607_s26 }
 0x9a5   : > { %3617 = vrot.lane.b32.xlu1 %v3496_v12, %s5607_s26 }
 0x9ad   : > { %v2940_v13 = vpop.xlane.xlu1 %2939 }
 0x9ae   : > { %5325 = vrcp.f32 %v2940_v13 }
 0x9b1   : > { %v2943_v10 = vpop.xlane.xlu1 %2942 }
 0x9b2   : > { %5327 = vrcp.f32 %v2943_v10 }
 0x9b3   : > { %5329 = vrcp.f32 %v2955_v55 }
 0x9b5   : > { %v2946_v29 = vpop.xlane.xlu1 %2945 }
 0x9b9   : > { %v2952_v2 = vpop.xlane.xlu1 %2951 }
 0x9ba   : > { %5331 = vrcp.f32 %v2952_v2 }
 0x9bb   : > { %5333 = vrcp.f32 %v2946_v29  ;;  %v5326_v47 = vpop.eup %5325 }
 0x9bc   : > { %v2970_v21 = vmul.f32 %v5326_v47, %v7034_v28 }
 0x9bd   : > { %v2949_v46 = vpop.xlane.xlu1 %2948 }
 0x9be   : > { %5335 = vrcp.f32 %v2949_v46 }
 0x9bf   : > { %v5328_v42 = vpop.eup %5327 }
 0x9c0   : > { %v2971_v36 = vmul.f32 %v5328_v42, %v7038_v1  ;;  %v5330_v12 = vpop.eup %5329 }
 0x9c1   : > { %v3515_v51 = vpop.permute.xlu1 %3514  ;;  %v2975_v22 = vmul.f32 %v5330_v12, %v6981_v0  ;;  %v3128_v0 = vpop.permute.xlu0 %3127 }
 0x9c2   : > { %v2978_v3 = vpack.c.bf16 %v2971_v36, %v2970_v21  ;;  %v3520_v1 = vsel %vm923_vm0, %v3515_v51, 0 }
 0x9c4   : > { %4872 = vmatmul.mubr.msk.bf16.vlgmr.msra.gmra.mxu0 %vm1241_vm2, %v2978_v3 }
 0x9c5   : > { %4882 = vmatpush3.bf16.msra.mxu0 %v3080_v23  ;;  %4883 = vmatprep.mubr.msk.bf16.mxu0 %vm5605_vm1, %v7470_v6  ;;  %v3568_v35 = vpop.permute.xlu1 %3567  ;;  %v3674_v9 = vpop.permute.xlu0 %3673 }
 0x9c6   : > { %4893 = vmatprep.subr.bf16.mxu0 %v7470_v6  ;;  %v3573_v18 = vsel %vm923_vm0, %v3568_v35, 0  ;;  %v3679_v15 = vsel %vm923_vm0, %v3674_v9, 0 }
 0x9c7   : > { %v5332_v11 = vpop.eup %5331 }
 0x9c8   : > { %v2974_v54 = vmul.f32 %v5332_v11, %v7047_v52  ;;  %v5334_v5 = vpop.eup %5333 }
 0x9c9   : > { %v2972_v24 = vmul.f32 %v5334_v5, %v7042_v61  ;;  %v3512_v61 = vpop.permute.xlu1 %3511  ;;  %v3671_v20 = vpop.permute.xlu0 %3670 }
 0x9ca   : > { %v2980_v28 = vpack.c.bf16 %v2975_v22, %v2974_v54 }
 0x9cb   : > { %v5336_v50 = vpop.eup %5335 }
 0x9cc   : > { %4884 = vmatmul.mubr.msk.bf16.vlgmr.msra.gmra.mxu0 %vm1241_vm2, %v2980_v28  ;;  %v2973_v60 = vmul.f32 %v5336_v50, %v7054_v27  ;;  %v7493_v28 = vld [vmem:[#allocation29_spill] sm:$0xff] }
 0x9cd   : > { %4894 = vmatpush3.bf16.xpose.msra.mxu0 %v3520_v1  ;;  %4895 = vmatprep.mubr.msk.bf16.mxu0 %vm5605_vm1, %v7470_v6 }
 0x9ce   : > { %v2979_v59 = vpack.c.bf16 %v2973_v60, %v2972_v24  ;;  %4905 = vmatprep.subr.bf16.mxu0 %v7470_v6 }
 0x9d0   : > { %4878 = vmatmul.mubr.msk.bf16.vlgmr.msra.gmra.mxu1 %vm1241_vm2, %v2979_v59  ;;  %v7494_v59 = vld [vmem:[#allocation30_spill] sm:$0xff] }
 0x9d1   : > { %4888 = vmatpush3.bf16.msra.mxu1 %v3128_v0  ;;  %4889 = vmatprep.mubr.msk.bf16.mxu1 %vm5605_vm1, %v7470_v6 }
 0x9d2   : > { %4899 = vmatprep.subr.bf16.mxu1 %v7470_v6 }
 0x9d4   : > { %4896 = vmatmul.mubr.msk.bf16.vlgmr.msra.gmra.mxu0 %vm923_vm0, %v3512_v61 }
 0x9d5   : > { %4907 = vmatprep.mubr.msk.bf16.mxu0 %vm5605_vm1, %v7470_v6 }
 0x9fa   : > { %v2958_v52 = vpop.xlane.xlu1 %2957 }
 0x9fb   : > { %5337 = vrcp.f32 %v2958_v52  ;;  %v7495_v52 = vld [vmem:[#allocation31_spill] sm:$0xff] }
 0xa08   : > { %v5338_v16 = vpop.eup %5337 }
 0xa09   : > { %v2976_v17 = vmul.f32 %v5338_v16, %v7075_v49 }
 0xa15   : > { %v2961_v27 = vpop.xlane.xlu1 %2960 }
 0xa16   : > { %5339 = vrcp.f32 %v2961_v27 }
 0xa19   : > { %v3621_v58 = vpop.permute.xlu1 %3620 }
 0xa1a   : > { %v3626_v32 = vsel %vm923_vm0, %v3621_v58, 0 }
 0xa1b   : > { %4906 = vmatpush3.bf16.xpose.msra.mxu0 %v3626_v32 }
 0xa1c   : > { %4917 = vmatprep.subr.bf16.mxu0 %v7470_v6 }
 0xa1d   : > { %v3565_v56 = vpop.permute.xlu1 %3564 }
 0xa21   : > { %v3618_v19 = vpop.permute.xlu1 %3617 }
 0xa22   : > { %4908 = vmatmul.mubr.msk.bf16.vlgmr.msra.gmra.mxu0 %vm923_vm0, %v3618_v19  ;;  %v7496_v19 = vld [vmem:[#allocation32_spill] sm:$0xff] }
 0xa23   : > { %v5340_v48 = vpop.eup %5339  ;;  %4919 = vmatprep.mubr.msk.bf16.mxu0 %vm5605_vm1, %v7470_v6 }
 0xa24   : > { %v2977_v34 = vmul.f32 %v5340_v48, %v7082_v37  ;;  %v828_v37 = vld [vmem:[#allocation9 + $0x30] sm:$0xff] }
 0xa26   : > { %v2981_v40 = vpack.c.bf16 %v2977_v34, %v2976_v17 }
 0xa28   : > { %4890 = vmatmul.mubr.msk.bf16.vlgmr.msra.gmra.mxu1 %vm1241_vm2, %v2981_v40 }
 0xa29   : > { %4900 = vmatpush3.bf16.xpose.msra.mxu1 %v3573_v18  ;;  %4901 = vmatprep.mubr.msk.bf16.mxu1 %vm5605_vm1, %v7470_v6 }
 0xa2a   : > { %4911 = vmatprep.subr.bf16.mxu1 %v7470_v6 }
 0xa30   : > { %4902 = vmatmul.mubr.msk.bf16.vlgmr.msra.gmra.mxu1 %vm923_vm0, %v3565_v56 }
 0xa31   : > { %4912 = vmatpush3.bf16.xpose.msra.mxu1 %v3679_v15  ;;  %4913 = vmatprep.mubr.msk.bf16.mxu1 %vm5605_vm1, %v7470_v6  ;;  %v5384_v15 = vld [vmem:[#allocation10 + $0x38] sm:$0xff] }
 0xa32   : > { %4923 = vmatprep.subr.bf16.mxu1 %v7470_v6 }
 0xa38   : > { %4914 = vmatmul.mubr.msk.bf16.vlgmr.msra.gmra.mxu1 %vm923_vm0, %v3671_v20 }
 0xa39   : > { %4925 = vmatprep.mubr.msk.bf16.mxu1 %vm5605_vm1, %v7470_v6 }
 0xa84   : > { %v7141_v30 = vpop.f32.mrf.mxu0 }
 0xa86   : > { %v4873_v8 = vpop.f32.mrf.mxu0 }
 0xa88   : > { %v7143_v14 = vpop.f32.mrf.mxu0 }
 0xa8a   : > { %v4874_v49 = vpop.f32.mrf.mxu0 }
 0xa8b   : > { %v5385_v49 = vld [vmem:[%s7411_s3] sm:$0xf] }
 0xa8c   : > { %v7145_v57 = vpop.f32.mrf.mxu0 }
 0xa8e   : > { %v4885_v39 = vpop.f32.mrf.mxu0 }
 0xa8f   : > { %v7497_v39 = vld [vmem:[#allocation18_spill] sm:$0xff] }
 0xa90   : > { %v7147_v7 = vpop.f32.mrf.mxu1  ;;  %v7149_v53 = vpop.f32.mrf.mxu0 }
 0xa92   : > { %v4879_v45 = vpop.f32.mrf.mxu1  ;;  %v4886_v38 = vpop.f32.mrf.mxu0 }
 0xa93   : > { %v7498_v45 = vsub.s32 3, %v7497_v39  ;;  %v7499_v39 = vld [vmem:[#allocation25_spill] sm:$0xff] }
 0xa94   : > { %v7151_v62 = vpop.f32.mrf.mxu1  ;;  %v3556_v43 = vpop.f32.mrf.mxu0 }
 0xa95   : > { %v3557_v41 = vadd.f32 %v3556_v43, %v828_v37  ;;  %v3298_v38 = vrot.slane %v5385_v49, %v7498_v45 }
 0xa96   : > { %v4880_v4 = vpop.f32.mrf.mxu1  ;;  %v4897_v63 = vpop.f32.mrf.mxu0 }
 0xa97   : > { %v7154_v44 = vadd.f32 %v6886_v25, %v3557_v41 }
 0xa98   : > { %v3559_v33 = vpop.f32.mrf.mxu0 }
 0xa99   : > { %v3560_v23 = vadd.f32 %v3559_v33, %v829_v26  ;;  %v3730_v13 = vsel %vm1241_vm2, %v7154_v44, -inf }
 0xa9a   : > { %3731 = vmax.xlane.f32.xlu1 %v3730_v13  ;;  %v4898_v10 = vpop.f32.mrf.mxu0 }
 0xa9b   : > { %v7159_v55 = vadd.f32 %v6894_v31, %v3560_v23  ;;  %v7492_v31 = vld [vmem:[#allocation28_spill] sm:$0xff]  ;;  %v3281_v10 = vld [vmem:[#allocation2 + $0x20] ss:$12 sps:$4 sm:$0xff]  }
 0xa9c   : > { %v3279_v23 = vld [vmem:[#allocation2 + $0x8] ss:$12 sps:$4 sm:$0xff]  }
 0xa9d   : > { %v3733_v29 = vsel %vm1241_vm2, %v7159_v55, -inf }
 0xa9e   : > { %3734 = vmax.xlane.f32.xlu0 %v3733_v29 }
 0xae2   : > { %v3662_v2 = vpop.f32.mrf.mxu0 }
 0xae3   : > { %v3663_v11 = vadd.f32 %v3662_v2, %v828_v37  ;;  %v3287_v2 = vunpack.c.l.bf16 %v3279_v23 }
 0xae4   : > { %v4909_v47 = vpop.f32.mrf.mxu0 }
 0xae5   : > { %v7171_v50 = vadd.f32 %v7493_v28, %v3663_v11  ;;  %v3288_v47 = vunpack.c.h.bf16 %v3279_v23 }
 0xae6   : > { %v3665_v46 = vpop.f32.mrf.mxu0 }
 0xae7   : > { %v3666_v1 = vadd.f32 %v3665_v46, %v829_v26  ;;  %v3742_v56 = vsel %vm1241_vm2, %v7171_v50, -inf }
 0xae8   : > { %v7163_v42 = vpop.f32.mrf.mxu1  ;;  %v4910_v25 = vpop.f32.mrf.mxu0 }
 0xae9   : > { %v3727_v27 = vadd.f32 %v7495_v52, %v3666_v1 }
 0xaea   : > { %v4891_v21 = vpop.f32.mrf.mxu1 }
 0xaeb   : > { %v3745_v18 = vsel %vm1241_vm2, %v3727_v27, -inf }
 0xaec   : > { %v7165_v36 = vpop.f32.mrf.mxu1 }
 0xaee   : > { %v4892_v3 = vpop.f32.mrf.mxu1 }
 0xaef   : > { %v3289_v3 = vunpack.c.l.bf16 %v3281_v10 }
 0xaf0   : > { %v3609_v12 = vpop.f32.mrf.mxu1 }
 0xaf1   : > { %v3610_v51 = vadd.f32 %v3609_v12, %v828_v37  ;;  %v3290_v12 = vunpack.c.h.bf16 %v3281_v10  ;;  %v3283_v10 = vld [vmem:[#allocation2 + $0x38] ss:$12 sps:$4 sm:$0xff]  }
 0xaf2   : > { %v4903_v54 = vpop.f32.mrf.mxu1 }
 0xaf3   : > { %v7168_v22 = vadd.f32 %v7492_v31, %v3610_v51 }
 0xaf4   : > { %v3612_v5 = vpop.f32.mrf.mxu1 }
 0xaf5   : > { %v3613_v24 = vadd.f32 %v3612_v5, %v829_v26  ;;  %v3736_v60 = vsel %vm1241_vm2, %v7168_v22, -inf }
 0xaf6   : > { %3737 = vmax.xlane.f32.xlu0 %v3736_v60  ;;  %v4904_v35 = vpop.f32.mrf.mxu1 }
 0xaf7   : > { %v7176_v0 = vadd.f32 %v7494_v59, %v3613_v24 }
 0xaf8   : > { %v3715_v61 = vpop.f32.mrf.mxu1 }
 0xaf9   : > { %v3716_v58 = vadd.f32 %v3715_v61, %v828_v37  ;;  %v3739_v32 = vsel %vm1241_vm2, %v7176_v0, -inf  ;;  %v3285_v61 = vld [vmem:[#allocation2 + $0x50] ss:$12 sps:$4 sm:$0xff]  }
 0xafa   : > { %3740 = vmax.xlane.f32.xlu1 %v3739_v32  ;;  %v4915_v16 = vpop.f32.mrf.mxu1  ;;  %3743 = vmax.xlane.f32.xlu0 %v3742_v56  ;;  %v3293_v52 = vunpack.c.l.bf16 %v3285_v61 }
 0xafb   : > { %v7184_v48 = vadd.f32 %v7496_v19, %v3716_v58 }
 0xafc   : > { %v3718_v17 = vpop.f32.mrf.mxu1 }
 0xafd   : > { %v3719_v34 = vadd.f32 %v3718_v17, %v829_v26  ;;  %v3748_v40 = vsel %vm1241_vm2, %v7184_v48, -inf }
 0xafe   : > { %v4916_v9 = vpop.f32.mrf.mxu1  ;;  %3749 = vmax.xlane.f32.xlu0 %v3748_v40  ;;  %3746 = vmax.xlane.f32.xlu1 %v3745_v18 }
 0xaff   : > { %v7189_v20 = vadd.f32 %v5384_v15, %v3719_v34 }
 0xb01   : > { %v3751_v8 = vsel %vm1241_vm2, %v7189_v20, -inf }
 0xb02   : > { %3752 = vmax.xlane.f32.xlu1 %v3751_v8 }
 0xb14   : > { %3300 = vrot.lane.b32.xlu0 %v3298_v38, %s5606_s23  ;;  %v7500_v38 = vld [vmem:[#allocation27_spill] sm:$0xff] }
 0xb23   : > { %v3732_v43 = vpop.xlane.xlu1 %3731 }
 0xb24   : > { %v3754_v1 = vsub.f32 %v7154_v44, %v3732_v43 }
 0xb26   : > { %v3762_v24 = vmul.f32 1.442695, %v3754_v1  ;;  %v4590_v1 = vpack.c.bf16 %v7147_v7, %v7147_v7 }
 0xb27   : > { %v3735_v37 = vpop.xlane.xlu0 %3734 }
 0xb28   : > { %v3755_v60 = vsub.f32 %v7159_v55, %v3735_v37  ;;  %v4587_v37 = vpack.c.bf16 %v7500_v38, %v7500_v38 }
 0xb2a   : > { %v3764_v35 = vmul.f32 1.442695, %v3755_v60 }
 0xb7f   : > { %v3738_v41 = vpop.xlane.xlu0 %3737 }
 0xb80   : > { %v3756_v59 = vsub.f32 %v7168_v22, %v3738_v41 }
 0xb82   : > { %v3766_v58 = vmul.f32 1.442695, %v3756_v59 }
 0xb83   : > { %v3744_v4 = vpop.xlane.xlu0 %3743  ;;  %v3741_v63 = vpop.xlane.xlu1 %3740 }
 0xb84   : > { %v3758_v32 = vsub.f32 %v7171_v50, %v3744_v4  ;;  %v3757_v19 = vsub.f32 %v7176_v0, %v3741_v63  ;;  %v4589_v50 = vpack.c.bf16 %v7143_v14, %v7143_v14  ;;  %v4593_v4 = vpack.c.bf16 %v7149_v53, %v7149_v53 }
 0xb86   : > { %v3770_v44 = vmul.f32 1.442695, %v3758_v32  ;;  %v3768_v22 = vmul.f32 1.442695, %v3757_v19 }
 0xb87   : > { %v3750_v26 = vpop.xlane.xlu0 %3749  ;;  %v3747_v33 = vpop.xlane.xlu1 %3746 }
 0xb88   : > { %v3759_v13 = vsub.f32 %v3727_v27, %v3747_v33  ;;  %v3294_v27 = vunpack.c.h.bf16 %v3285_v61  ;;  %v3760_v17 = vsub.f32 %v7184_v48, %v3750_v26  ;;  %v4591_v48 = vpack.c.bf16 %v7151_v62, %v7151_v62 }
 0xb89   : > { %v4595_v33 = vpack.c.bf16 %v7165_v36, %v7165_v36 }
 0xb8a   : > { %v3772_v29 = vmul.f32 1.442695, %v3759_v13  ;;  %v3774_v18 = vmul.f32 1.442695, %v3760_v17 }
 0xb8b   : > { %v7199_v46 = vpop.permute.xlu0 %3300  ;;  %v3753_v40 = vpop.xlane.xlu1 %3752 }
 0xb8c   : > { %v3303_v25 = vadd.f32 %v7199_v46, %v3287_v2  ;;  %v3304_v21 = vadd.f32 %v7199_v46, %v3288_v47  ;;  %5341 = vpow2.f32 %v3772_v29  ;;  %v3305_v51 = vadd.f32 %v7199_v46, %v3289_v3 }
 0xb8d   : > { %v3306_v54 = vadd.f32 %v7199_v46, %v3290_v12  ;;  %5343 = vpow2.f32 %v3762_v24  ;;  %v3309_v56 = vadd.f32 %v7199_v46, %v3293_v52  ;;  %v3310_v16 = vadd.f32 %v7199_v46, %v3294_v27  ;;  %v7502_v12 = vld [vmem:[#allocation19_spill] sm:$0xff] }
 0xb8e   : > { %v3311_v11 = vpack.c.bf16 %v3304_v21, %v3303_v25  ;;  %5345 = vpow2.f32 %v3764_v35  ;;  %v3761_v9 = vsub.f32 %v7189_v20, %v3753_v40  ;;  %v4585_v20 = vpack.c.bf16 %v7499_v39, %v7499_v39  ;;  %v7501_v21 = vld [vmem:[#allocation20_spill] sm:$0xff]  ;;  %v7505_v24 = vld [vmem:[#allocation23_spill] sm:$0xff]  ;;  %v7506_v35 = vld [vmem:[#allocation26_spill] sm:$0xff] }
 0xb8f   : > { %v3312_v31 = vpack.c.bf16 %v3306_v54, %v3305_v51  ;;  %5347 = vpow2.f32 %v3766_v58  ;;  %v3314_v55 = vpack.c.bf16 %v3310_v16, %v3309_v56  ;;  %v3291_v29 = vunpack.c.l.bf16 %v3283_v10  ;;  %v7503_v51 = vld [vmem:[#allocation22_spill] sm:$0xff] }
 0xb90   : > { %3823 = vrot.lane.b32.xlu1 %v3311_v11, %s5607_s26  ;;  %5349 = vpow2.f32 %v3770_v44  ;;  %v3776_v14 = vmul.f32 1.442695, %v3761_v9  ;;  %v3292_v2 = vunpack.c.h.bf16 %v3283_v10  ;;  %v4580_v3 = vpack.c.bf16 %v7501_v21, %v7501_v21  ;;  %v5105_v21 = vld [vmem:[#allocation12 + $0x38] sm:$0xff]  }
 0xb91   : > { %5351 = vpow2.f32 %v3768_v22  ;;  %v3307_v47 = vadd.f32 %v7199_v46, %v3291_v29  ;;  %v4581_v11 = vpack.c.bf16 %v7502_v12, %v7502_v12  ;;  %v4582_v54 = vpack.c.bf16 %v7503_v51, %v7503_v51  ;;  %v5107_v12 = vld [vmem:[#allocation12 + $0x28] sm:$0xff]   ;;  %v5109_v51 = vld [vmem:[#allocation12 + $0x18] sm:$0xff]  }
 0xb92   : > { %5353 = vpow2.f32 %v3774_v18  ;;  %v3308_v36 = vadd.f32 %v7199_v46, %v3292_v2  ;;  %v4584_v60 = vpack.c.bf16 %v7505_v24, %v7505_v24  ;;  %v4586_v59 = vpack.c.bf16 %v7506_v35, %v7506_v35  ;;  %v5112_v35 = vld [vmem:[#allocation12 + $0x8] sm:$0xff]  }
 0xb93   : > { %5355 = vpow2.f32 %v3776_v14  ;;  %v4594_v52 = vpack.c.bf16 %v7163_v42, %v7163_v42 }
 0xb94   : > { %3871 = vrot.lane.b32.xlu1 %v3312_v31, %s5607_s26  ;;  %v3313_v25 = vpack.c.bf16 %v3308_v36, %v3307_v47  ;;  %v7504_v31 = vld [vmem:[#allocation21_spill] sm:$0xff] }
 0xb95   : > { %v4583_v46 = vpack.c.bf16 %v7504_v31, %v7504_v31 }
 0xb99   : > { %v7207_v5 = vpop.eup %5341 }
 0xb9a   : > { %v3793_v28 = vsel %vm1241_vm2, %v7207_v5, 0.0  ;;  %v7220_v34 = vpop.eup %5343 }
 0xb9b   : > { %3794 = vadd.xlane.f32.xlu0 %v3793_v28  ;;  %v3778_v0 = vsel %vm1241_vm2, %v7220_v34, 0.0  ;;  %v7228_v15 = vpop.eup %5345  ;;  %v4588_v28 = vpack.c.bf16 %v7141_v30, %v7141_v30  ;;  %v4592_v30 = vpack.c.bf16 %v7145_v57, %v7145_v57 }
 0xb9c   : > { %v3781_v8 = vsel %vm1241_vm2, %v7228_v15, 0.0  ;;  %v7235_v49 = vpop.eup %5347 }
 0xb9d   : > { %v3784_v62 = vsel %vm1241_vm2, %v7235_v49, 0.0  ;;  %v7242_v45 = vpop.eup %5349 }
 0xb9e   : > { %v3790_v43 = vsel %vm1241_vm2, %v7242_v45, 0.0  ;;  %v7249_v41 = vpop.eup %5351 }
 0xb9f   : > { %v3787_v63 = vsel %vm1241_vm2, %v7249_v41, 0.0  ;;  %v7256_v26 = vpop.eup %5353 }
 0xba0   : > { %v3796_v23 = vsel %vm1241_vm2, %v7256_v26, 0.0  ;;  %v7263_v13 = vpop.eup %5355 }
 0xba1   : > { %v3799_v53 = vsel %vm1241_vm2, %v7263_v13, 0.0 }
 0xbb1   : > { %3967 = vrot.lane.b32.xlu0 %v3314_v55, %s5607_s26 }
 0xbb5   : > { %3200 = vrot.lane.b32.xlu0 %v4589_v50, %s5608_s14 }
 0xbb8   : > { %3779 = vadd.xlane.f32.xlu1 %v3778_v0 }
 0xbb9   : > { %3204 = vrot.lane.b32.xlu0 %v4591_v48, %s5608_s14 }
 0xbbc   : > { %3782 = vadd.xlane.f32.xlu1 %v3781_v8 }
 0xbbd   : > { %2368 = vrot.lane.b32.xlu0 %v4585_v20, %s5607_s26 }
 0xbc0   : > { %3785 = vadd.xlane.f32.xlu1 %v3784_v62 }
 0xbc1   : > { %2372 = vrot.lane.b32.xlu0 %v4587_v37, %s5607_s26 }
 0xbc4   : > { %3791 = vadd.xlane.f32.xlu1 %v3790_v43 }
 0xbc5   : > { %3208 = vrot.lane.b32.xlu0 %v4593_v4, %s5608_s14 }
 0xbc8   : > { %3788 = vadd.xlane.f32.xlu1 %v3787_v63 }
 0xbc9   : > { %3212 = vrot.lane.b32.xlu0 %v4595_v33, %s5608_s14 }
 0xbcc   : > { %3797 = vadd.xlane.f32.xlu1 %v3796_v23 }
 0xbd0   : > { %3800 = vadd.xlane.f32.xlu1 %v3799_v53 }
 0xbe1   : > { %3919 = vrot.lane.b32.xlu1 %v3313_v25, %s5607_s26 }
 0xbe5   : > { %2358 = vrot.lane.b32.xlu1 %v4580_v3, %s5607_s26  ;;  %v5106_v3 = vld [vmem:[#allocation12 + $0x30] sm:$0xff]  }
 0xbe9   : > { %2360 = vrot.lane.b32.xlu1 %v4581_v11, %s5607_s26  ;;  %v5108_v11 = vld [vmem:[#allocation12 + $0x20] sm:$0xff]  }
 0xbed   : > { %2362 = vrot.lane.b32.xlu1 %v4582_v54, %s5607_s26 }
 0xbf1   : > { %2364 = vrot.lane.b32.xlu1 %v4583_v46, %s5607_s26 }
 0xbf5   : > { %3198 = vrot.lane.b32.xlu1 %v4588_v28, %s5608_s14  ;;  %v5110_v28 = vld [vmem:[#allocation12 + $0x10] sm:$0xff]  }
 0xbf9   : > { %3202 = vrot.lane.b32.xlu1 %v4590_v1, %s5608_s14 }
 0xbfd   : > { %2366 = vrot.lane.b32.xlu1 %v4584_v60, %s5607_s26 }
 0xc01   : > { %2370 = vrot.lane.b32.xlu1 %v4586_v59, %s5607_s26 }
 0xc02   : > { %v3824_v61 = vpop.permute.xlu1 %3823 }
 0xc03   : > { %4918 = vmatpush3.bf16.msra.mxu0 %v3824_v61  ;;  %v5113_v61 = vld [vmem:[#allocation12] sm:$0xff]  }
 0xc04   : > { %4929 = vmatprep.subr.bf16.mxu0 %v7470_v6 }
 0xc05   : > { %3206 = vrot.lane.b32.xlu1 %v4592_v30, %s5608_s14 }
 0xc06   : > { %v3872_v7 = vpop.permute.xlu1 %3871 }
 0xc07   : > { %4924 = vmatpush3.bf16.msra.mxu1 %v3872_v7 }
 0xc08   : > { %4935 = vmatprep.subr.bf16.mxu1 %v7470_v6 }
 0xc09   : > { %3210 = vrot.lane.b32.xlu1 %v4594_v52, %s5608_s14 }
 0xc24   : > { %v3795_v27 = vpop.xlane.xlu0 %3794 }
 0xc28   : > { %v3968_v58 = vpop.permute.xlu0 %3967 }
 0xc2c   : > { %v3201_v32 = vpop.permute.xlu0 %3200 }
 0xc30   : > { %v7302_v56 = vpop.permute.xlu0 %3204 }
 0xc34   : > { %v2369_v57 = vpop.permute.xlu0 %2368 }
 0xc35   : > { %2388 = vst.msk [vmem:[#allocation3 + $0x14] sm:$0xf] %vm2382_vm4, %v2369_v57 }
 0xc38   : > { %v2373_v16 = vpop.permute.xlu0 %2372 }
 0xc39   : > { %2390 = vst.msk [vmem:[#allocation3 + $0x1c] sm:$0xf] %vm2382_vm4, %v2373_v16 }
 0xc3c   : > { %v3209_v44 = vpop.permute.xlu0 %3208 }
 0xc3d   : > { %3228 = vst.msk [vmem:[#allocation3 + $0x14] sm:$0xf] %vm3222_vm5, %v3209_v44 }
 0xc40   : > { %v3213_v42 = vpop.permute.xlu0 %3212 }
 0xc41   : > { %v3780_v19 = vpop.xlane.xlu1 %3779  ;;  %3230 = vst.msk [vmem:[#allocation3 + $0x1c] sm:$0xf] %vm3222_vm5, %v3213_v42 }
 0xc42   : > { %5357 = vrcp.f32 %v3780_v19 }
 0xc45   : > { %v3783_v55 = vpop.xlane.xlu1 %3782 }
 0xc46   : > { %5359 = vrcp.f32 %v3783_v55 }
 0xc47   : > { %5361 = vrcp.f32 %v3795_v27 }
 0xc49   : > { %v3786_v22 = vpop.xlane.xlu1 %3785 }
 0xc4d   : > { %v3792_v17 = vpop.xlane.xlu1 %3791 }
 0xc4e   : > { %5363 = vrcp.f32 %v3792_v17 }
 0xc4f   : > { %5365 = vrcp.f32 %v3786_v22  ;;  %v5358_v50 = vpop.eup %5357 }
 0xc50   : > { %v3810_v9 = vmul.f32 %v5358_v50, %v7220_v34 }
 0xc51   : > { %v3789_v40 = vpop.xlane.xlu1 %3788 }
 0xc52   : > { %5367 = vrcp.f32 %v3789_v40 }
 0xc53   : > { %v5360_v18 = vpop.eup %5359 }
 0xc54   : > { %v3811_v0 = vmul.f32 %v5360_v18, %v7228_v15  ;;  %v5362_v8 = vpop.eup %5361 }
 0xc55   : > { %v3798_v48 = vpop.xlane.xlu1 %3797  ;;  %v3815_v38 = vmul.f32 %v5362_v8, %v7207_v5 }
 0xc56   : > { %v3818_v14 = vpack.c.bf16 %v3811_v0, %v3810_v9  ;;  %5369 = vrcp.f32 %v3798_v48 }
 0xc58   : > { %4920 = vmatmul.mubr.msk.bf16.vlgmr.msra.gmra.mxu0 %vm1241_vm2, %v3818_v14 }
 0xc59   : > { %v3801_v39 = vpop.xlane.xlu1 %3800  ;;  %4931 = vmatprep.mubr.msk.bf16.mxu0 %vm5605_vm1, %v7470_v6 }
 0xc5a   : > { %5371 = vrcp.f32 %v3801_v39 }
 0xc5b   : > { %v5364_v20 = vpop.eup %5363 }
 0xc5c   : > { %v3814_v62 = vmul.f32 %v5364_v20, %v7242_v45  ;;  %v5366_v37 = vpop.eup %5365 }
 0xc5d   : > { %v3920_v34 = vpop.permute.xlu1 %3919  ;;  %v3812_v4 = vmul.f32 %v5366_v37, %v7235_v49 }
 0xc5e   : > { %4930 = vmatpush3.bf16.msra.mxu0 %v3920_v34  ;;  %v3820_v15 = vpack.c.bf16 %v3815_v38, %v3814_v62 }
 0xc5f   : > { %v5368_v43 = vpop.eup %5367  ;;  %4941 = vmatprep.subr.bf16.mxu0 %v5105_v21 }
 0xc60   : > { %v3813_v63 = vmul.f32 %v5368_v43, %v7249_v41  ;;  %v4527_v43 = vld [vmem:[%s7416_s8] ss:$0 sm:$0xff] }
 0xc61   : > { %4932 = vmatmul.mubr.msk.bf16.vlgmr.msra.gmra.mxu0 %vm1241_vm2, %v3820_v15  ;;  %v2359_v33 = vpop.permute.xlu1 %2358 }
 0xc62   : > { %2383 = vst.msk [vmem:[#allocation3] sm:$0xf] %vm2382_vm4, %v2359_v33  ;;  %v3819_v23 = vpack.c.bf16 %v3813_v63, %v3812_v4  ;;  %4942 = vmatpush3.bf16.msra.mxu0 %v5105_v21 }
 0xc63   : > { %v5370_v45 = vpop.eup %5369  ;;  %4943 = vmatprep.subr.bf16.mxu0 %v5106_v3 }
 0xc64   : > { %4926 = vmatmul.mubr.msk.bf16.vlgmr.msra.gmra.mxu1 %vm1241_vm2, %v3819_v23  ;;  %v3816_v49 = vmul.f32 %v5370_v45, %v7256_v26 }
 0xc65   : > { %4936 = vmatpush3.bf16.msra.mxu1 %v3968_v58  ;;  %v2361_v5 = vpop.permute.xlu1 %2360  ;;  %4937 = vmatprep.mubr.msk.bf16.mxu1 %vm5605_vm1, %v7470_v6 }
 0xc66   : > { %2384 = vst.msk [vmem:[#allocation3 + $0x4] sm:$0xf] %vm2382_vm4, %v2361_v5  ;;  %4944 = vmatpush3.bf16.msra.mxu0 %v5106_v3 }
 0xc67   : > { %v5372_v53 = vpop.eup %5371  ;;  %3224 = vst.msk [vmem:[#allocation3 + $0x4] sm:$0xf] %vm3222_vm5, %v3201_v32  ;;  %4945 = vmatprep.subr.bf16.mxu0 %v5107_v12 }
 0xc68   : > { %v3817_v41 = vmul.f32 %v5372_v53, %v7263_v13 }
 0xc69   : > { %v2363_v10 = vpop.permute.xlu1 %2362 }
 0xc6a   : > { %2385 = vst.msk [vmem:[#allocation3 + $0x8] sm:$0xf] %vm2382_vm4, %v2363_v10  ;;  %v3821_v29 = vpack.c.bf16 %v3817_v41, %v3816_v49  ;;  %4946 = vmatpush3.bf16.msra.mxu0 %v5107_v12 }
 0xc6b   : > { %4947 = vmatprep.subr.bf16.mxu0 %v5108_v11 }
 0xc6c   : > { %4938 = vmatmul.mubr.msk.bf16.vlgmr.msra.gmra.mxu1 %vm1241_vm2, %v3821_v29 }
 0xc6d   : > { %v2365_v2 = vpop.permute.xlu1 %2364 }
 0xc6e   : > { %2386 = vst.msk [vmem:[#allocation3 + $0xc] sm:$0xf] %vm2382_vm4, %v2365_v2  ;;  %4948 = vmatpush3.bf16.msra.mxu0 %v5108_v11 }
 0xc6f   : > { %3226 = vst.msk [vmem:[#allocation3 + $0xc] sm:$0xf] %vm3222_vm5, %v7302_v56  ;;  %4949 = vmatprep.subr.bf16.mxu0 %v5109_v51 }
 0xc71   : > { %v3199_v6 = vpop.permute.xlu1 %3198 }
 0xc72   : > { %3223 = vst.msk [vmem:[#allocation3] sm:$0xf] %vm3222_vm5, %v3199_v6  ;;  %4950 = vmatpush3.bf16.msra.mxu0 %v5109_v51 }
 0xc73   : > { %4951 = vmatprep.subr.bf16.mxu0 %v5110_v28 }
 0xc75   : > { %v3203_v47 = vpop.permute.xlu1 %3202 }
 0xc76   : > { %3225 = vst.msk [vmem:[#allocation3 + $0x8] sm:$0xf] %vm3222_vm5, %v3203_v47  ;;  %4952 = vmatpush3.bf16.msra.mxu0 %v5110_v28 }
 0xc77   : > { %4953 = vmatprep.subr.bf16.mxu0 %v5112_v35 }
 0xc79   : > { %v2367_v26 = vpop.permute.xlu1 %2366 }
 0xc7a   : > { %2387 = vst.msk [vmem:[#allocation3 + $0x10] sm:$0xf] %vm2382_vm4, %v2367_v26  ;;  %4954 = vmatpush3.bf16.msra.mxu0 %v5112_v35 }
 0xc7b   : > { %4955 = vmatprep.subr.bf16.mxu0 %v5113_v61 }
 0xc7d   : > { %v2371_v13 = vpop.permute.xlu1 %2370 }
 0xc7e   : > { %2389 = vst.msk [vmem:[#allocation3 + $0x18] sm:$0xf] %vm2382_vm4, %v2371_v13  ;;  %4956 = vmatpush3.bf16.msra.mxu0 %v5113_v61 }
 0xc81   : > { %v3207_v36 = vpop.permute.xlu1 %3206 }
 0xc82   : > { %3227 = vst.msk [vmem:[#allocation3 + $0x10] sm:$0xf] %vm3222_vm5, %v3207_v36 }
 0xc85   : > { %v3211_v25 = vpop.permute.xlu1 %3210 }
 0xc86   : > { %3229 = vst.msk [vmem:[#allocation3 + $0x18] sm:$0xf] %vm3222_vm5, %v3211_v25 }
 0xd18   : > { %v3863_v54 = vpop.f32.mrf.mxu0 }
 0xd19   : > { %v4596_v31 = vpack.c.bf16 %v3863_v54, %v3863_v54 }
 0xd1a   : > { %v4921_v46 = vpop.f32.mrf.mxu0 }
 0xd1b   : > { %4038 = vrot.lane.b32.xlu1 %v4596_v31, %s5606_s23 }
 0xd1c   : > { %v3866_v1 = vpop.f32.mrf.mxu0 }
 0xd1d   : > { %v4597_v24 = vpack.c.bf16 %v3866_v1, %v3866_v1 }
 0xd1e   : > { %v4922_v60 = vpop.f32.mrf.mxu0 }
 0xd1f   : > { %4040 = vrot.lane.b32.xlu0 %v4597_v24, %s5606_s23 }
 0xd21   : > { %v3959_v59 = vpop.f32.mrf.mxu0 }
 0xd22   : > { %v4600_v57 = vpack.c.bf16 %v3959_v59, %v3959_v59 }
 0xd23   : > { %v4933_v30 = vpop.f32.mrf.mxu0 }
 0xd24   : > { %v3911_v7 = vpop.f32.mrf.mxu1 }
 0xd25   : > { %v4598_v52 = vpack.c.bf16 %v3911_v7, %v3911_v7  ;;  %v3962_v27 = vpop.f32.mrf.mxu0 }
 0xd26   : > { %v4927_v58 = vpop.f32.mrf.mxu1  ;;  %v4601_v19 = vpack.c.bf16 %v3962_v27, %v3962_v27 }
 0xd27   : > { %4042 = vrot.lane.b32.xlu1 %v4598_v52, %s5606_s23  ;;  %v4934_v32 = vpop.f32.mrf.mxu0 }
 0xd28   : > { %v3914_v56 = vpop.f32.mrf.mxu1 }
 0xd29   : > { %v4599_v16 = vpack.c.bf16 %v3914_v56, %v3914_v56 }
 0xd2a   : > { %v4928_v44 = vpop.f32.mrf.mxu1 }
 0xd2b   : > { %4044 = vrot.lane.b32.xlu0 %v4599_v16, %s5606_s23  ;;  %4046 = vrot.lane.b32.xlu1 %v4600_v57, %s5606_s23 }
 0xd2c   : > { %v4007_v42 = vpop.f32.mrf.mxu1 }
 0xd2d   : > { %v4602_v55 = vpack.c.bf16 %v4007_v42, %v4007_v42 }
 0xd2e   : > { %v4939_v22 = vpop.f32.mrf.mxu1 }
 0xd2f   : > { %4050 = vrot.lane.b32.xlu1 %v4602_v55, %s5606_s23  ;;  %4048 = vrot.lane.b32.xlu0 %v4601_v19, %s5606_s23 }
 0xd30   : > { %v4010_v17 = vpop.f32.mrf.mxu1 }
 0xd31   : > { %v4603_v50 = vpack.c.bf16 %v4010_v17, %v4010_v17 }
 0xd32   : > { %v4940_v40 = vpop.f32.mrf.mxu1 }
 0xd33   : > { %4052 = vrot.lane.b32.xlu0 %v4603_v50, %s5606_s23 }
 0xd8d   : > { %v4039_v18 = vpop.permute.xlu1 %4038 }
 0xd8e   : > { %4063 = vst.msk [vmem:[#allocation3] sm:$0xf] %vm4062_vm6, %v4039_v18 }
 0xd91   : > { %v4041_v9 = vpop.permute.xlu0 %4040 }
 0xd92   : > { %4064 = vst.msk [vmem:[#allocation3 + $0x4] sm:$0xf] %vm4062_vm6, %v4041_v9 }
 0xd99   : > { %v4043_v0 = vpop.permute.xlu1 %4042  ;;  %v5111_v48 = vld [vmem:[#allocation3] sm:$0xff]  }
 0xd9a   : > { %4065 = vst.msk [vmem:[#allocation3 + $0x8] sm:$0xf] %vm4062_vm6, %v4043_v0  ;;  %4957 = vmatprep.mubr.bf16.mxu0 %v5111_v48 }
 0xd9d   : > { %v4045_v14 = vpop.permute.xlu0 %4044  ;;  %v4047_v8 = vpop.permute.xlu1 %4046 }
 0xd9e   : > { %4066 = vst.msk [vmem:[#allocation3 + $0xc] sm:$0xf] %vm4062_vm6, %v4045_v14  ;;  %4067 = vst.msk [vmem:[#allocation3 + $0x10] sm:$0xf] %vm4062_vm6, %v4047_v8 }
 0xda1   : > { %v4049_v39 = vpop.permute.xlu0 %4048  ;;  %v4051_v20 = vpop.permute.xlu1 %4050 }
 0xda2   : > { %4068 = vst.msk [vmem:[#allocation3 + $0x14] sm:$0xf] %vm4062_vm6, %v4049_v39  ;;  %4069 = vst.msk [vmem:[#allocation3 + $0x18] sm:$0xf] %vm4062_vm6, %v4051_v20 }
 0xda5   : > { %v4053_v62 = vpop.permute.xlu0 %4052  ;;  %v5114_v38 = vld [vmem:[#allocation3 + $0x8] sm:$0xff]  }
 0xda6   : > { %4070 = vst.msk [vmem:[#allocation3 + $0x1c] sm:$0xf] %vm4062_vm6, %v4053_v62  ;;  %4958 = vmatmul.mubr.bf16.vlgmr.msra.gmra.mxu0 %v5114_v38 }
 0xda9   : > { %v5115_v37 = vld [vmem:[#allocation3 + $0x10] sm:$0xff]  }
 0xdaa   : > { %4961 = vmatprep.mubr.bf16.mxu0 %v5115_v37 }
 0xdad   : > { %v5116_v34 = vld [vmem:[#allocation3 + $0x18] sm:$0xff]  }
 0xdae   : > { %4962 = vmatmul.mubr.bf16.gmra.mxu0 %v5116_v34 }
 0xe66   : > { %v4959_v15 = vpop.f32.mrf.mxu0 }
 0xe67   : > { %v4217_v33 = vadd.f32 %v4959_v15, %v4527_v43 }
 0xe68   : > { %v4208_v4 = vpop.f32.mrf.mxu0 }
 0xe69   : > { %v4209_v5 = vadd.f32 %v4527_v43, %v4208_v4 }
 0xe6a   : > { %v4960_v63 = vpop.f32.mrf.mxu0 }
 0xe6b   : > { %v4220_v23 = vadd.f32 %v4960_v63, %v4527_v43 }
 0xe6c   : > { %v4211_v45 = vpop.f32.mrf.mxu0 }
 0xe6d   : > { %v4622_v53 = vpack.c.bf16 %v4220_v23, %v4217_v33  ;;  %v4212_v49 = vadd.f32 %v4527_v43, %v4211_v45 }
 0xe6e   : > { %v4963_v41 = vpop.f32.mrf.mxu0 }
 0xe6f   : > { %4634 = vst [vmem:[%s409_s6 + $0x8] sm:$0xff] %v4622_v53   ;;  %v4617_v10 = vpack.c.bf16 %v4212_v49, %v4209_v5  ;;  %v4233_v6 = vadd.f32 %v4963_v41, %v4527_v43 }
 0xe70   : > { %v4224_v29 = vpop.f32.mrf.mxu0 }
 0xe71   : > { %4618 = vst [vmem:[%s409_s6] sm:$0xff] %v4617_v10   ;;  %v4225_v13 = vadd.f32 %v4527_v43, %v4224_v29 }
 0xe72   : > { %v4964_v2 = vpop.f32.mrf.mxu0 }
 0xe73   : > { %v4236_v47 = vadd.f32 %v4964_v2, %v4527_v43 }
 0xe74   : > { %v4227_v26 = vpop.f32.mrf.mxu0 }
 0xe75   : > { %v4632_v36 = vpack.c.bf16 %v4236_v47, %v4233_v6  ;;  %v4228_v25 = vadd.f32 %v4527_v43, %v4227_v26 }
 0xe77   : > { %4636 = vst [vmem:[%s409_s6 + $0x18] sm:$0xff] %v4632_v36   ;;  %v4627_v21 = vpack.c.bf16 %v4228_v25, %v4225_v13 }
 0xe79   : > { %4635 = vst [vmem:[%s409_s6 + $0x10] sm:$0xff] %v4627_v21  }
 0xe7a   : > { %5531 = shalt.err (!%p5528_p12)
}
 0xe7b   : > { %s5532_s23 = scalar_lea.hbm %s7363_s18, 512  ;;  %s5536_s6 = scalar_lea.hbm %s7417_s9, 1024 }
 0xe7c   : > { %p5533_p1 = scmp.ne.s32.totalorder %s7363_s18, %s5532_s23  ;;  %p5537_p8 = scmp.lt.s32.totalorder %s7363_s18, %s7417_s9 }
 0xe7d   : > { %p5538_p13 = scmp.lt.s32.totalorder %s5536_s6, %s5532_s23 }
 0xe7e   : > { %p5534_p4 = pnand %p5533_p1, %p7507_p3 }
 0xe7f   : > { %p5539_p11 = por %p5538_p13, %p5537_p8 }
 0xe80   : > { %p5535_p6 = pneg %p5534_p4 }
 0xe82   : > { %p5540_p2 = pnand %p5539_p11, %p5535_p6 }
 0xe84   : > { %5543 = shalt.err (!%p5540_p2)
}
 0xe85   : > { %s5610_s17 = smov 4  }
 0xe86   : > { %4991 = dma.vmem_to_hbm [thread:$0]  (%p7507_p3), %s7358_s19, 512, %s7363_s18, %s4280_s21, %s5608_s14, %s5608_s14, %s5610_s17  }
 0xe87 PF: > { %s4309_s25 = sand.u32 1, %s5578_s30   ;;  %p7508_p5 = scmp.ne.s32.totalorder %s7445_s16, 0 }
 0xe88   : > { %p7509_p7 = scmp.ge.s32.totalorder %s5590_s12, 2  ;;  %s4310_s13 = scalar_lea.sflag [#allocation6], %s4309_s25 }
 0xe8a   : > { %p5011_p9 = pnand %p7509_p7, %p7508_p5 }
 0xe8c   : > { %p5012_p0 = pneg %p5011_p9 }
 0xe8e   : > { %5573 = dma.done.wait (%p5012_p0), %s4310_s13, 512  }
 0xe8f   : > { %5575 = vsyncadd (%p5012_p0), %s4310_s13, 4294966784  ;;  %p24_p10 = scmp.ge.s32.totalorder %s5755_s24, 4   ;;  %s7510_s30 = smov %s5582_s10 }
 0xe90   : > { %s7511_s10 = smov %s5586_s11  ;;  %s7512_s11 = smov %s5764_s22 }
 0xe91   : > { %s7513_s12 = smov %s5755_s24  ;;  %26 = sbr.rel (!%p24_p10) target bundleno = 11 (0xb), region = 117 }
 0xe96   :  { %4315 = vsyncpa [#allocation5], 1 }
 0xe97   :  { %4317 = vsyncpa [#allocation5 + $0x1], 1 }
 0xe98   :  { %4318 = vsyncpa [#allocation8], 1 }
 0xe99   :  { %4319 = vsyncpa [#allocation11], 1 }
 0xe9a   :  { %4320 = vsyncpa [#allocation6], 1 }
 0xe9b   :  { %4322 = vsyncpa [#allocation6 + $0x1], 1 }

</bundles_post_ra>
